<compile_context>
chip_gen: v6e
topology: v6e:2x2x1
jax: 0.10.0
libtpu: 0.0.40
codegen_flags: <defaults>
</compile_context>

<pallas_src>
import jax
import jax.numpy as jnp
from jax.experimental import pallas as pl
from jax.experimental.pallas import tpu as pltpu

_K = 7                    # SpatialGate kernel_size
_PAD = (_K - 1) // 2      # = 3
_EPS = 1e-5               # BatchNorm eps
_WSTRIDE = 2 * _K * _K + 1   # 99 scalars per gate (98 folded weights + bias)


# ----------------------------------------------------------------------------
# In-kernel helpers
# ----------------------------------------------------------------------------
def _pad_same(m):
    """Zero-pad a 2D map by _PAD on all sides, kept in vregs (no VMEM scratch)."""
    A, B = m.shape
    zr = jnp.zeros((_PAD, B), m.dtype)
    m2 = jnp.concatenate([zr, m, zr], axis=0)            # (A+6, B)
    zc = jnp.zeros((A + 2 * _PAD, _PAD), m.dtype)
    return jnp.concatenate([zc, m2, zc], axis=1)         # (A+6, B+6)


def _conv7x7_same(m0, m1, w_ref, base):
    """SAME 7x7 conv of the 2-channel pooled map (m0, m1), BN already folded.

    w_ref[base + (c*7+dy)*7 + dx] are the folded scalar weights, w_ref[base+98]
    the folded bias.  Lane shifts are hoisted (14 column slabs total) and the
    accumulation is split over 4 independent accumulators to break the serial
    dependency chain.
    """
    A, B = m0.shape
    pads = (_pad_same(m0), _pad_same(m1))
    accs = [None, None, None, None]
    t = 0
    for c in range(2):
        for dx in range(_K):
            col = pads[c][:, dx:dx + B]                  # one lane shift per (c, dx)
            for dy in range(_K):
                wv = w_ref[base + (c * _K + dy) * _K + dx]
                term = wv * col[dy:dy + A, :]
                k = t % 4
                accs[k] = term if accs[k] is None else accs[k] + term
                t += 1
    return accs[0] + accs[1] + accs[2] + accs[3] + w_ref[base + 2 * _K * _K]


# ----------------------------------------------------------------------------
# Fused TripletAttention kernel (depth = -1, in_compress = None)
# ----------------------------------------------------------------------------
def _triplet_kernel(w_ref, x_ref, out_ref, comp_ref):
    """One batch element.

    w_ref   : SMEM (297,)  folded weights+bias: [S-gate | H-gate | W-gate(T)]
    x_ref   : VMEM (1, C, H, W)
    out_ref : VMEM (1, C, H, W)  = x * (sig_s + sig_h + sig_w) / 3
    comp_ref: VMEM (1, 2, H, W)  = ChannelPool over C (the returned compress)
    """
    x = x_ref[0]                                   # (C, H, W), f32

    # ChannelPool along each axis — all in the natural NCHW layout.
    mxc = jnp.max(x, axis=0)                       # (H, W)  SpatialGate
    mnc = jnp.mean(x, axis=0)
    mxh = jnp.max(x, axis=1)                       # (C, W)  ChannelGateH
    mnh = jnp.mean(x, axis=1)
    mxw = jnp.max(x, axis=2)                       # (C, H)  ChannelGateW
    mnw = jnp.mean(x, axis=2)

    # Only the C-pool compress is actually returned by the module.
    comp_ref[0, 0] = mxc
    comp_ref[0, 1] = mnc

    # 7x7 conv (BN folded) + sigmoid; sigmoid's exp/rcp run on the EUP.
    sig_s = jax.nn.sigmoid(_conv7x7_same(mxc, mnc, w_ref, 0 * _WSTRIDE))   # (H, W)
    sig_h = jax.nn.sigmoid(_conv7x7_same(mxh, mnh, w_ref, 1 * _WSTRIDE))   # (C, W)
    sig_w = jax.nn.sigmoid(_conv7x7_same(mxw, mnw, w_ref, 2 * _WSTRIDE))   # (C, H)

    # Fused 1/3*(x*s + x*h + x*w): sum the broadcast gates, multiply x once.
    gate = (sig_s[None, :, :] + sig_h[:, None, :] + sig_w[:, :, None]) * (1.0 / 3.0)
    out_ref[0] = x * gate


# ----------------------------------------------------------------------------
# Wrapper
# ----------------------------------------------------------------------------
def _pack_weights(params):
    def flat(w, b):
        return jnp.concatenate([w.reshape(-1), jnp.reshape(b, (1,))])
    ws = flat(params["s_w"], params["s_b"])
    wh = flat(params["h_w"], params["h_b"])
    # The W-gate conv is evaluated on the (C, H) pooled map instead of the
    # permuted (H, C) layout; that is equivalent to convolving with spatially
    # transposed weights.
    ww = flat(jnp.transpose(params["w_w"], (0, 2, 1)), params["w_b"])
    return jnp.concatenate([ws, wh, ww]).astype(jnp.float32)       # (297,)


def triplet_attention(x, params):
    """x: (N, C, H, W) f32. Returns (x_out, out_compress). depth=-1 variant."""
    N, C, H, W = x.shape
    wvec = _pack_weights(params)

    # One grid step == one batch element held fully in VMEM (tiny for the test
    # shapes; very large C*H*W slabs would need an additional C-tiled pass).
    out, comp = pl.pallas_call(
        _triplet_kernel,
        grid=(N,),
        in_specs=[
            pl.BlockSpec(memory_space=pltpu.MemorySpace.SMEM),      # weights
            pl.BlockSpec((1, C, H, W), lambda n: (n, 0, 0, 0)),     # x
        ],
        out_specs=[
            pl.BlockSpec((1, C, H, W), lambda n: (n, 0, 0, 0)),
            pl.BlockSpec((1, 2, H, W), lambda n: (n, 0, 0, 0)),
        ],
        out_shape=[
            jax.ShapeDtypeStruct((N, C, H, W), jnp.float32),
            jax.ShapeDtypeStruct((N, 2, H, W), jnp.float32),
        ],
        compiler_params=pltpu.CompilerParams(
            # Grid steps over N are fully independent -> megacore on v7x.
            dimension_semantics=("parallel",),
            vmem_limit_bytes=32 * 1024 * 1024,
        ),
    )(wvec, x)
    return out, comp


# ----------------------------------------------------------------------------
# Parameters (deterministic synthetic init) + BN folding
# ----------------------------------------------------------------------------
def _fold_bn(w, gamma, beta, mean, var, eps=_EPS):
    s = gamma / jnp.sqrt(var + eps)          # scalar
    return w[0] * s, beta - mean * s         # folded (2,7,7) weight, scalar bias


def init_params(key):
    params = {}
    for name, k in zip(("h", "w", "s"), jax.random.split(key, 3)):
        kw, kg, kb, km = jax.random.split(k, 4)
        w = jax.random.normal(kw, (1, 2, _K, _K), jnp.float32) * 0.1  # Conv2d(2,1,7)
        gamma = jnp.abs(jax.random.normal(kg, (), jnp.float32)) + 0.5
        beta = jax.random.normal(kb, (), jnp.float32) * 0.1
        mean = jax.random.normal(km, (), jnp.float32) * 0.1
        var = jnp.float32(1.0)
        wf, bf = _fold_bn(w, gamma, beta, mean, var)
        params[name + "_w"] = wf
        params[name + "_b"] = bf
        params[name + "_raw"] = (w, gamma, beta, mean, var)
    return params


# ----------------------------------------------------------------------------
# Pure-JAX reference (matches the PyTorch forward) for numerical verification
# ----------------------------------------------------------------------------
def _ref_gate(xp, raw):
    w, gamma, beta, mean, var = raw
    mx = jnp.max(xp, axis=1, keepdims=True)
    mn = jnp.mean(xp, axis=1, keepdims=True)
    comp = jnp.concatenate([mx, mn], axis=1)
    y = jax.lax.conv_general_dilated(
        comp, w, window_strides=(1, 1), padding=[(_PAD, _PAD)] * 2,
        dimension_numbers=("NCHW", "OIHW", "NCHW"))
    y = (y - mean) * gamma / jnp.sqrt(var + _EPS) + beta
    return xp * jax.nn.sigmoid(y), comp


def _ref_triplet(x, params):
    o1, _ = _ref_gate(jnp.transpose(x, (0, 2, 1, 3)), params["h_raw"])
    o11 = jnp.transpose(o1, (0, 2, 1, 3))
    o2, _ = _ref_gate(jnp.transpose(x, (0, 3, 2, 1)), params["w_raw"])
    o21 = jnp.transpose(o2, (0, 3, 2, 1))
    o31, comp = _ref_gate(x, params["s_raw"])
    return (o31 + o11 + o21) / 3.0, comp


# ----------------------------------------------------------------------------
if __name__ == "__main__":
    key = jax.random.PRNGKey(0)
    kx, kp = jax.random.split(key)
    N, C, H, W = 2, 4, 16, 16
    x = jax.random.normal(kx, (N, C, H, W), dtype=jnp.float32)
    params = init_params(kp)

    x_out, out_compress = triplet_attention(x, params)
    jax.block_until_ready((x_out, out_compress))

    ref_out, ref_comp = _ref_triplet(x, params)
    assert x_out.shape == (N, C, H, W) and out_compress.shape == (N, 2, H, W)
    assert jnp.allclose(x_out, ref_out, atol=1e-4, rtol=1e-4)
    assert jnp.allclose(out_compress, ref_comp, atol=1e-4, rtol=1e-4)

    print("KERNEL_OK")
</pallas_src>

<mosaic_0001>
module attributes {stable_mosaic.version = 11 : i64} {
  func.func @_triplet_kernel(%arg0: i32, %arg1: memref<297xf32, #tpu.memory_space<smem>>, %arg2: memref<1x4x16x16xf32, #tpu.memory_space<vmem>>, %arg3: memref<1x4x16x16xf32, #tpu.memory_space<vmem>>, %arg4: memref<1x2x16x16xf32, #tpu.memory_space<vmem>>) attributes {dimension_semantics = [#tpu.dimension_semantics<parallel>], iteration_bounds = array<i64: 2>, scalar_prefetch = 0 : i64, scratch_operands = 0 : i64, tpu.core_type = #tpu.core_type<tc>, window_params = [{transform_indices = @transform_0, window_bounds = array<i64: 297>}, {transform_indices = @transform_1, window_bounds = array<i64: 1, 4, 16, 16>}, {transform_indices = @transform_2, window_bounds = array<i64: 1, 4, 16, 16>}, {transform_indices = @transform_3, window_bounds = array<i64: 1, 2, 16, 16>}]} {
    %c0 = arith.constant 0 : index
    %c0_0 = arith.constant 0 : index
    %c0_1 = arith.constant 0 : index
    %c0_2 = arith.constant 0 : index
    %0 = vector.load %arg2[%c0, %c0_0, %c0_1, %c0_2] : memref<1x4x16x16xf32, #tpu.memory_space<vmem>>, vector<1x4x16x16xf32>
    %1 = vector.shape_cast %0 : vector<1x4x16x16xf32> to vector<4x16x16xf32>
    %cst = arith.constant dense<0xFF800000> : vector<16x16xf32>
    %2 = vector.multi_reduction <maximumf>, %1, %cst [0] : vector<4x16x16xf32> to vector<16x16xf32>
    %cst_3 = arith.constant dense<0.000000e+00> : vector<16x16xf32>
    %3 = vector.multi_reduction <add>, %1, %cst_3 [0] : vector<4x16x16xf32> to vector<16x16xf32>
    %cst_4 = arith.constant 4.000000e+00 : f32
    %4 = vector.broadcast %cst_4 : f32 to vector<16x16xf32>
    %5 = arith.divf %3, %4 : vector<16x16xf32>
    %cst_5 = arith.constant dense<0xFF800000> : vector<4x16xf32>
    %6 = vector.multi_reduction <maximumf>, %1, %cst_5 [1] : vector<4x16x16xf32> to vector<4x16xf32>
    %cst_6 = arith.constant dense<0.000000e+00> : vector<4x16xf32>
    %7 = vector.multi_reduction <add>, %1, %cst_6 [1] : vector<4x16x16xf32> to vector<4x16xf32>
    %cst_7 = arith.constant 1.600000e+01 : f32
    %8 = vector.broadcast %cst_7 : f32 to vector<4x16xf32>
    %9 = arith.divf %7, %8 : vector<4x16xf32>
    %cst_8 = arith.constant dense<0xFF800000> : vector<4x16xf32>
    %10 = vector.multi_reduction <maximumf>, %1, %cst_8 [2] : vector<4x16x16xf32> to vector<4x16xf32>
    %cst_9 = arith.constant dense<0.000000e+00> : vector<4x16xf32>
    %11 = vector.multi_reduction <add>, %1, %cst_9 [2] : vector<4x16x16xf32> to vector<4x16xf32>
    %cst_10 = arith.constant 1.600000e+01 : f32
    %12 = vector.broadcast %cst_10 : f32 to vector<4x16xf32>
    %13 = arith.divf %11, %12 : vector<4x16xf32>
    %c0_11 = arith.constant 0 : index
    %c0_12 = arith.constant 0 : index
    %c0_13 = arith.constant 0 : index
    %c0_14 = arith.constant 0 : index
    %14 = vector.load %arg4[%c0_11, %c0_12, %c0_13, %c0_14] : memref<1x2x16x16xf32, #tpu.memory_space<vmem>>, vector<1x1x16x16xf32>
    %15 = vector.shape_cast %14 : vector<1x1x16x16xf32> to vector<16x16xf32>
    %16 = vector.shape_cast %2 : vector<16x16xf32> to vector<1x1x16x16xf32>
    tpu.vector_store %arg4[%c0_11, %c0_12, %c0_13, %c0_14], %16 {strides = array<i32>} : memref<1x2x16x16xf32, #tpu.memory_space<vmem>>, vector<1x1x16x16xf32>,
    %c0_15 = arith.constant 0 : index
    %c1 = arith.constant 1 : index
    %c0_16 = arith.constant 0 : index
    %c0_17 = arith.constant 0 : index
    %17 = vector.load %arg4[%c0_15, %c1, %c0_16, %c0_17] : memref<1x2x16x16xf32, #tpu.memory_space<vmem>>, vector<1x1x16x16xf32>
    %18 = vector.shape_cast %17 : vector<1x1x16x16xf32> to vector<16x16xf32>
    %19 = vector.shape_cast %5 : vector<16x16xf32> to vector<1x1x16x16xf32>
    tpu.vector_store %arg4[%c0_15, %c1, %c0_16, %c0_17], %19 {strides = array<i32>} : memref<1x2x16x16xf32, #tpu.memory_space<vmem>>, vector<1x1x16x16xf32>,
    %cst_18 = arith.constant 0.000000e+00 : f32
    %20 = vector.broadcast %cst_18 : f32 to vector<3x16xf32>
    %21 = tpu.concatenate %20, %2, %20 in 0 : vector<3x16xf32>, vector<16x16xf32>, vector<3x16xf32> -> vector<22x16xf32>
    %cst_19 = arith.constant 0.000000e+00 : f32
    %22 = vector.broadcast %cst_19 : f32 to vector<22x3xf32>
    %23 = tpu.concatenate %22, %21, %22 in 1 : vector<22x3xf32>, vector<22x16xf32>, vector<22x3xf32> -> vector<22x22xf32>
    %cst_20 = arith.constant 0.000000e+00 : f32
    %24 = vector.broadcast %cst_20 : f32 to vector<3x16xf32>
    %25 = tpu.concatenate %24, %5, %24 in 0 : vector<3x16xf32>, vector<16x16xf32>, vector<3x16xf32> -> vector<22x16xf32>
    %cst_21 = arith.constant 0.000000e+00 : f32
    %26 = vector.broadcast %cst_21 : f32 to vector<22x3xf32>
    %27 = tpu.concatenate %26, %25, %26 in 1 : vector<22x3xf32>, vector<22x16xf32>, vector<22x3xf32> -> vector<22x22xf32>
    %28 = vector.extract_strided_slice %23 {offsets = [0, 0], sizes = [22, 16], strides = [1, 1]} : vector<22x22xf32> to vector<22x16xf32>
    %c0_22 = arith.constant 0 : index
    %29 = memref.load %arg1[%c0_22] : memref<297xf32, #tpu.memory_space<smem>>
    %30 = vector.extract_strided_slice %28 {offsets = [0, 0], sizes = [16, 16], strides = [1, 1]} : vector<22x16xf32> to vector<16x16xf32>
    %31 = vector.broadcast %29 : f32 to vector<16x16xf32>
    %32 = arith.mulf %31, %30 : vector<16x16xf32>
    %c7 = arith.constant 7 : index
    %33 = memref.load %arg1[%c7] : memref<297xf32, #tpu.memory_space<smem>>
    %34 = vector.extract_strided_slice %28 {offsets = [1, 0], sizes = [16, 16], strides = [1, 1]} : vector<22x16xf32> to vector<16x16xf32>
    %35 = vector.broadcast %33 : f32 to vector<16x16xf32>
    %36 = arith.mulf %35, %34 : vector<16x16xf32>
    %c14 = arith.constant 14 : index
    %37 = memref.load %arg1[%c14] : memref<297xf32, #tpu.memory_space<smem>>
    %38 = vector.extract_strided_slice %28 {offsets = [2, 0], sizes = [16, 16], strides = [1, 1]} : vector<22x16xf32> to vector<16x16xf32>
    %39 = vector.broadcast %37 : f32 to vector<16x16xf32>
    %40 = arith.mulf %39, %38 : vector<16x16xf32>
    %c21 = arith.constant 21 : index
    %41 = memref.load %arg1[%c21] : memref<297xf32, #tpu.memory_space<smem>>
    %42 = vector.extract_strided_slice %28 {offsets = [3, 0], sizes = [16, 16], strides = [1, 1]} : vector<22x16xf32> to vector<16x16xf32>
    %43 = vector.broadcast %41 : f32 to vector<16x16xf32>
    %44 = arith.mulf %43, %42 : vector<16x16xf32>
    %c28 = arith.constant 28 : index
    %45 = memref.load %arg1[%c28] : memref<297xf32, #tpu.memory_space<smem>>
    %46 = vector.extract_strided_slice %28 {offsets = [4, 0], sizes = [16, 16], strides = [1, 1]} : vector<22x16xf32> to vector<16x16xf32>
    %47 = vector.broadcast %45 : f32 to vector<16x16xf32>
    %48 = arith.mulf %47, %46 : vector<16x16xf32>
    %49 = arith.addf %32, %48 : vector<16x16xf32>
    %c35 = arith.constant 35 : index
    %50 = memref.load %arg1[%c35] : memref<297xf32, #tpu.memory_space<smem>>
    %51 = vector.extract_strided_slice %28 {offsets = [5, 0], sizes = [16, 16], strides = [1, 1]} : vector<22x16xf32> to vector<16x16xf32>
    %52 = vector.broadcast %50 : f32 to vector<16x16xf32>
    %53 = arith.mulf %52, %51 : vector<16x16xf32>
    %54 = arith.addf %36, %53 : vector<16x16xf32>
    %c42 = arith.constant 42 : index
    %55 = memref.load %arg1[%c42] : memref<297xf32, #tpu.memory_space<smem>>
    %56 = vector.extract_strided_slice %28 {offsets = [6, 0], sizes = [16, 16], strides = [1, 1]} : vector<22x16xf32> to vector<16x16xf32>
    %57 = vector.broadcast %55 : f32 to vector<16x16xf32>
    %58 = arith.mulf %57, %56 : vector<16x16xf32>
    %59 = arith.addf %40, %58 : vector<16x16xf32>
    %60 = vector.extract_strided_slice %23 {offsets = [0, 1], sizes = [22, 16], strides = [1, 1]} : vector<22x22xf32> to vector<22x16xf32>
    %c1_23 = arith.constant 1 : index
    %61 = memref.load %arg1[%c1_23] : memref<297xf32, #tpu.memory_space<smem>>
    %62 = vector.extract_strided_slice %60 {offsets = [0, 0], sizes = [16, 16], strides = [1, 1]} : vector<22x16xf32> to vector<16x16xf32>
    %63 = vector.broadcast %61 : f32 to vector<16x16xf32>
    %64 = arith.mulf %63, %62 : vector<16x16xf32>
    %65 = arith.addf %44, %64 : vector<16x16xf32>
    %c8 = arith.constant 8 : index
    %66 = memref.load %arg1[%c8] : memref<297xf32, #tpu.memory_space<smem>>
    %67 = vector.extract_strided_slice %60 {offsets = [1, 0], sizes = [16, 16], strides = [1, 1]} : vector<22x16xf32> to vector<16x16xf32>
    %68 = vector.broadcast %66 : f32 to vector<16x16xf32>
    %69 = arith.mulf %68, %67 : vector<16x16xf32>
    %70 = arith.addf %49, %69 : vector<16x16xf32>
    %c15 = arith.constant 15 : index
    %71 = memref.load %arg1[%c15] : memref<297xf32, #tpu.memory_space<smem>>
    %72 = vector.extract_strided_slice %60 {offsets = [2, 0], sizes = [16, 16], strides = [1, 1]} : vector<22x16xf32> to vector<16x16xf32>
    %73 = vector.broadcast %71 : f32 to vector<16x16xf32>
    %74 = arith.mulf %73, %72 : vector<16x16xf32>
    %75 = arith.addf %54, %74 : vector<16x16xf32>
    %c22 = arith.constant 22 : index
    %76 = memref.load %arg1[%c22] : memref<297xf32, #tpu.memory_space<smem>>
    %77 = vector.extract_strided_slice %60 {offsets = [3, 0], sizes = [16, 16], strides = [1, 1]} : vector<22x16xf32> to vector<16x16xf32>
    %78 = vector.broadcast %76 : f32 to vector<16x16xf32>
    %79 = arith.mulf %78, %77 : vector<16x16xf32>
    %80 = arith.addf %59, %79 : vector<16x16xf32>
    %c29 = arith.constant 29 : index
    %81 = memref.load %arg1[%c29] : memref<297xf32, #tpu.memory_space<smem>>
    %82 = vector.extract_strided_slice %60 {offsets = [4, 0], sizes = [16, 16], strides = [1, 1]} : vector<22x16xf32> to vector<16x16xf32>
    %83 = vector.broadcast %81 : f32 to vector<16x16xf32>
    %84 = arith.mulf %83, %82 : vector<16x16xf32>
    %85 = arith.addf %65, %84 : vector<16x16xf32>
    %c36 = arith.constant 36 : index
    %86 = memref.load %arg1[%c36] : memref<297xf32, #tpu.memory_space<smem>>
    %87 = vector.extract_strided_slice %60 {offsets = [5, 0], sizes = [16, 16], strides = [1, 1]} : vector<22x16xf32> to vector<16x16xf32>
    %88 = vector.broadcast %86 : f32 to vector<16x16xf32>
    %89 = arith.mulf %88, %87 : vector<16x16xf32>
    %90 = arith.addf %70, %89 : vector<16x16xf32>
    %c43 = arith.constant 43 : index
    %91 = memref.load %arg1[%c43] : memref<297xf32, #tpu.memory_space<smem>>
    %92 = vector.extract_strided_slice %60 {offsets = [6, 0], sizes = [16, 16], strides = [1, 1]} : vector<22x16xf32> to vector<16x16xf32>
    %93 = vector.broadcast %91 : f32 to vector<16x16xf32>
    %94 = arith.mulf %93, %92 : vector<16x16xf32>
    %95 = arith.addf %75, %94 : vector<16x16xf32>
    %96 = vector.extract_strided_slice %23 {offsets = [0, 2], sizes = [22, 16], strides = [1, 1]} : vector<22x22xf32> to vector<22x16xf32>
    %c2 = arith.constant 2 : index
    %97 = memref.load %arg1[%c2] : memref<297xf32, #tpu.memory_space<smem>>
    %98 = vector.extract_strided_slice %96 {offsets = [0, 0], sizes = [16, 16], strides = [1, 1]} : vector<22x16xf32> to vector<16x16xf32>
    %99 = vector.broadcast %97 : f32 to vector<16x16xf32>
    %100 = arith.mulf %99, %98 : vector<16x16xf32>
    %101 = arith.addf %80, %100 : vector<16x16xf32>
    %c9 = arith.constant 9 : index
    %102 = memref.load %arg1[%c9] : memref<297xf32, #tpu.memory_space<smem>>
    %103 = vector.extract_strided_slice %96 {offsets = [1, 0], sizes = [16, 16], strides = [1, 1]} : vector<22x16xf32> to vector<16x16xf32>
    %104 = vector.broadcast %102 : f32 to vector<16x16xf32>
    %105 = arith.mulf %104, %103 : vector<16x16xf32>
    %106 = arith.addf %85, %105 : vector<16x16xf32>
    %c16 = arith.constant 16 : index
    %107 = memref.load %arg1[%c16] : memref<297xf32, #tpu.memory_space<smem>>
    %108 = vector.extract_strided_slice %96 {offsets = [2, 0], sizes = [16, 16], strides = [1, 1]} : vector<22x16xf32> to vector<16x16xf32>
    %109 = vector.broadcast %107 : f32 to vector<16x16xf32>
    %110 = arith.mulf %109, %108 : vector<16x16xf32>
    %111 = arith.addf %90, %110 : vector<16x16xf32>
    %c23 = arith.constant 23 : index
    %112 = memref.load %arg1[%c23] : memref<297xf32, #tpu.memory_space<smem>>
    %113 = vector.extract_strided_slice %96 {offsets = [3, 0], sizes = [16, 16], strides = [1, 1]} : vector<22x16xf32> to vector<16x16xf32>
    %114 = vector.broadcast %112 : f32 to vector<16x16xf32>
    %115 = arith.mulf %114, %113 : vector<16x16xf32>
    %116 = arith.addf %95, %115 : vector<16x16xf32>
    %c30 = arith.constant 30 : index
    %117 = memref.load %arg1[%c30] : memref<297xf32, #tpu.memory_space<smem>>
    %118 = vector.extract_strided_slice %96 {offsets = [4, 0], sizes = [16, 16], strides = [1, 1]} : vector<22x16xf32> to vector<16x16xf32>
    %119 = vector.broadcast %117 : f32 to vector<16x16xf32>
    %120 = arith.mulf %119, %118 : vector<16x16xf32>
    %121 = arith.addf %101, %120 : vector<16x16xf32>
    %c37 = arith.constant 37 : index
    %122 = memref.load %arg1[%c37] : memref<297xf32, #tpu.memory_space<smem>>
    %123 = vector.extract_strided_slice %96 {offsets = [5, 0], sizes = [16, 16], strides = [1, 1]} : vector<22x16xf32> to vector<16x16xf32>
    %124 = vector.broadcast %122 : f32 to vector<16x16xf32>
    %125 = arith.mulf %124, %123 : vector<16x16xf32>
    %126 = arith.addf %106, %125 : vector<16x16xf32>
    %c44 = arith.constant 44 : index
    %127 = memref.load %arg1[%c44] : memref<297xf32, #tpu.memory_space<smem>>
    %128 = vector.extract_strided_slice %96 {offsets = [6, 0], sizes = [16, 16], strides = [1, 1]} : vector<22x16xf32> to vector<16x16xf32>
    %129 = vector.broadcast %127 : f32 to vector<16x16xf32>
    %130 = arith.mulf %129, %128 : vector<16x16xf32>
    %131 = arith.addf %111, %130 : vector<16x16xf32>
    %132 = vector.extract_strided_slice %23 {offsets = [0, 3], sizes = [22, 16], strides = [1, 1]} : vector<22x22xf32> to vector<22x16xf32>
    %c3 = arith.constant 3 : index
    %133 = memref.load %arg1[%c3] : memref<297xf32, #tpu.memory_space<smem>>
    %134 = vector.extract_strided_slice %132 {offsets = [0, 0], sizes = [16, 16], strides = [1, 1]} : vector<22x16xf32> to vector<16x16xf32>
    %135 = vector.broadcast %133 : f32 to vector<16x16xf32>
    %136 = arith.mulf %135, %134 : vector<16x16xf32>
    %137 = arith.addf %116, %136 : vector<16x16xf32>
    %c10 = arith.constant 10 : index
    %138 = memref.load %arg1[%c10] : memref<297xf32, #tpu.memory_space<smem>>
    %139 = vector.extract_strided_slice %132 {offsets = [1, 0], sizes = [16, 16], strides = [1, 1]} : vector<22x16xf32> to vector<16x16xf32>
    %140 = vector.broadcast %138 : f32 to vector<16x16xf32>
    %141 = arith.mulf %140, %139 : vector<16x16xf32>
    %142 = arith.addf %121, %141 : vector<16x16xf32>
    %c17 = arith.constant 17 : index
    %143 = memref.load %arg1[%c17] : memref<297xf32, #tpu.memory_space<smem>>
    %144 = vector.extract_strided_slice %132 {offsets = [2, 0], sizes = [16, 16], strides = [1, 1]} : vector<22x16xf32> to vector<16x16xf32>
    %145 = vector.broadcast %143 : f32 to vector<16x16xf32>
    %146 = arith.mulf %145, %144 : vector<16x16xf32>
    %147 = arith.addf %126, %146 : vector<16x16xf32>
    %c24 = arith.constant 24 : index
    %148 = memref.load %arg1[%c24] : memref<297xf32, #tpu.memory_space<smem>>
    %149 = vector.extract_strided_slice %132 {offsets = [3, 0], sizes = [16, 16], strides = [1, 1]} : vector<22x16xf32> to vector<16x16xf32>
    %150 = vector.broadcast %148 : f32 to vector<16x16xf32>
    %151 = arith.mulf %150, %149 : vector<16x16xf32>
    %152 = arith.addf %131, %151 : vector<16x16xf32>
    %c31 = arith.constant 31 : index
    %153 = memref.load %arg1[%c31] : memref<297xf32, #tpu.memory_space<smem>>
    %154 = vector.extract_strided_slice %132 {offsets = [4, 0], sizes = [16, 16], strides = [1, 1]} : vector<22x16xf32> to vector<16x16xf32>
    %155 = vector.broadcast %153 : f32 to vector<16x16xf32>
    %156 = arith.mulf %155, %154 : vector<16x16xf32>
    %157 = arith.addf %137, %156 : vector<16x16xf32>
    %c38 = arith.constant 38 : index
    %158 = memref.load %arg1[%c38] : memref<297xf32, #tpu.memory_space<smem>>
    %159 = vector.extract_strided_slice %132 {offsets = [5, 0], sizes = [16, 16], strides = [1, 1]} : vector<22x16xf32> to vector<16x16xf32>
    %160 = vector.broadcast %158 : f32 to vector<16x16xf32>
    %161 = arith.mulf %160, %159 : vector<16x16xf32>
    %162 = arith.addf %142, %161 : vector<16x16xf32>
    %c45 = arith.constant 45 : index
    %163 = memref.load %arg1[%c45] : memref<297xf32, #tpu.memory_space<smem>>
    %164 = vector.extract_strided_slice %132 {offsets = [6, 0], sizes = [16, 16], strides = [1, 1]} : vector<22x16xf32> to vector<16x16xf32>
    %165 = vector.broadcast %163 : f32 to vector<16x16xf32>
    %166 = arith.mulf %165, %164 : vector<16x16xf32>
    %167 = arith.addf %147, %166 : vector<16x16xf32>
    %168 = vector.extract_strided_slice %23 {offsets = [0, 4], sizes = [22, 16], strides = [1, 1]} : vector<22x22xf32> to vector<22x16xf32>
    %c4 = arith.constant 4 : index
    %169 = memref.load %arg1[%c4] : memref<297xf32, #tpu.memory_space<smem>>
    %170 = vector.extract_strided_slice %168 {offsets = [0, 0], sizes = [16, 16], strides = [1, 1]} : vector<22x16xf32> to vector<16x16xf32>
    %171 = vector.broadcast %169 : f32 to vector<16x16xf32>
    %172 = arith.mulf %171, %170 : vector<16x16xf32>
    %173 = arith.addf %152, %172 : vector<16x16xf32>
    %c11 = arith.constant 11 : index
    %174 = memref.load %arg1[%c11] : memref<297xf32, #tpu.memory_space<smem>>
    %175 = vector.extract_strided_slice %168 {offsets = [1, 0], sizes = [16, 16], strides = [1, 1]} : vector<22x16xf32> to vector<16x16xf32>
    %176 = vector.broadcast %174 : f32 to vector<16x16xf32>
    %177 = arith.mulf %176, %175 : vector<16x16xf32>
    %178 = arith.addf %157, %177 : vector<16x16xf32>
    %c18 = arith.constant 18 : index
    %179 = memref.load %arg1[%c18] : memref<297xf32, #tpu.memory_space<smem>>
    %180 = vector.extract_strided_slice %168 {offsets = [2, 0], sizes = [16, 16], strides = [1, 1]} : vector<22x16xf32> to vector<16x16xf32>
    %181 = vector.broadcast %179 : f32 to vector<16x16xf32>
    %182 = arith.mulf %181, %180 : vector<16x16xf32>
    %183 = arith.addf %162, %182 : vector<16x16xf32>
    %c25 = arith.constant 25 : index
    %184 = memref.load %arg1[%c25] : memref<297xf32, #tpu.memory_space<smem>>
    %185 = vector.extract_strided_slice %168 {offsets = [3, 0], sizes = [16, 16], strides = [1, 1]} : vector<22x16xf32> to vector<16x16xf32>
    %186 = vector.broadcast %184 : f32 to vector<16x16xf32>
    %187 = arith.mulf %186, %185 : vector<16x16xf32>
    %188 = arith.addf %167, %187 : vector<16x16xf32>
    %c32 = arith.constant 32 : index
    %189 = memref.load %arg1[%c32] : memref<297xf32, #tpu.memory_space<smem>>
    %190 = vector.extract_strided_slice %168 {offsets = [4, 0], sizes = [16, 16], strides = [1, 1]} : vector<22x16xf32> to vector<16x16xf32>
    %191 = vector.broadcast %189 : f32 to vector<16x16xf32>
    %192 = arith.mulf %191, %190 : vector<16x16xf32>
    %193 = arith.addf %173, %192 : vector<16x16xf32>
    %c39 = arith.constant 39 : index
    %194 = memref.load %arg1[%c39] : memref<297xf32, #tpu.memory_space<smem>>
    %195 = vector.extract_strided_slice %168 {offsets = [5, 0], sizes = [16, 16], strides = [1, 1]} : vector<22x16xf32> to vector<16x16xf32>
    %196 = vector.broadcast %194 : f32 to vector<16x16xf32>
    %197 = arith.mulf %196, %195 : vector<16x16xf32>
    %198 = arith.addf %178, %197 : vector<16x16xf32>
    %c46 = arith.constant 46 : index
    %199 = memref.load %arg1[%c46] : memref<297xf32, #tpu.memory_space<smem>>
    %200 = vector.extract_strided_slice %168 {offsets = [6, 0], sizes = [16, 16], strides = [1, 1]} : vector<22x16xf32> to vector<16x16xf32>
    %201 = vector.broadcast %199 : f32 to vector<16x16xf32>
    %202 = arith.mulf %201, %200 : vector<16x16xf32>
    %203 = arith.addf %183, %202 : vector<16x16xf32>
    %204 = vector.extract_strided_slice %23 {offsets = [0, 5], sizes = [22, 16], strides = [1, 1]} : vector<22x22xf32> to vector<22x16xf32>
    %c5 = arith.constant 5 : index
    %205 = memref.load %arg1[%c5] : memref<297xf32, #tpu.memory_space<smem>>
    %206 = vector.extract_strided_slice %204 {offsets = [0, 0], sizes = [16, 16], strides = [1, 1]} : vector<22x16xf32> to vector<16x16xf32>
    %207 = vector.broadcast %205 : f32 to vector<16x16xf32>
    %208 = arith.mulf %207, %206 : vector<16x16xf32>
    %209 = arith.addf %188, %208 : vector<16x16xf32>
    %c12 = arith.constant 12 : index
    %210 = memref.load %arg1[%c12] : memref<297xf32, #tpu.memory_space<smem>>
    %211 = vector.extract_strided_slice %204 {offsets = [1, 0], sizes = [16, 16], strides = [1, 1]} : vector<22x16xf32> to vector<16x16xf32>
    %212 = vector.broadcast %210 : f32 to vector<16x16xf32>
    %213 = arith.mulf %212, %211 : vector<16x16xf32>
    %214 = arith.addf %193, %213 : vector<16x16xf32>
    %c19 = arith.constant 19 : index
    %215 = memref.load %arg1[%c19] : memref<297xf32, #tpu.memory_space<smem>>
    %216 = vector.extract_strided_slice %204 {offsets = [2, 0], sizes = [16, 16], strides = [1, 1]} : vector<22x16xf32> to vector<16x16xf32>
    %217 = vector.broadcast %215 : f32 to vector<16x16xf32>
    %218 = arith.mulf %217, %216 : vector<16x16xf32>
    %219 = arith.addf %198, %218 : vector<16x16xf32>
    %c26 = arith.constant 26 : index
    %220 = memref.load %arg1[%c26] : memref<297xf32, #tpu.memory_space<smem>>
    %221 = vector.extract_strided_slice %204 {offsets = [3, 0], sizes = [16, 16], strides = [1, 1]} : vector<22x16xf32> to vector<16x16xf32>
    %222 = vector.broadcast %220 : f32 to vector<16x16xf32>
    %223 = arith.mulf %222, %221 : vector<16x16xf32>
    %224 = arith.addf %203, %223 : vector<16x16xf32>
    %c33 = arith.constant 33 : index
    %225 = memref.load %arg1[%c33] : memref<297xf32, #tpu.memory_space<smem>>
    %226 = vector.extract_strided_slice %204 {offsets = [4, 0], sizes = [16, 16], strides = [1, 1]} : vector<22x16xf32> to vector<16x16xf32>
    %227 = vector.broadcast %225 : f32 to vector<16x16xf32>
    %228 = arith.mulf %227, %226 : vector<16x16xf32>
    %229 = arith.addf %209, %228 : vector<16x16xf32>
    %c40 = arith.constant 40 : index
    %230 = memref.load %arg1[%c40] : memref<297xf32, #tpu.memory_space<smem>>
    %231 = vector.extract_strided_slice %204 {offsets = [5, 0], sizes = [16, 16], strides = [1, 1]} : vector<22x16xf32> to vector<16x16xf32>
    %232 = vector.broadcast %230 : f32 to vector<16x16xf32>
    %233 = arith.mulf %232, %231 : vector<16x16xf32>
    %234 = arith.addf %214, %233 : vector<16x16xf32>
    %c47 = arith.constant 47 : index
    %235 = memref.load %arg1[%c47] : memref<297xf32, #tpu.memory_space<smem>>
    %236 = vector.extract_strided_slice %204 {offsets = [6, 0], sizes = [16, 16], strides = [1, 1]} : vector<22x16xf32> to vector<16x16xf32>
    %237 = vector.broadcast %235 : f32 to vector<16x16xf32>
    %238 = arith.mulf %237, %236 : vector<16x16xf32>
    %239 = arith.addf %219, %238 : vector<16x16xf32>
    %240 = vector.extract_strided_slice %23 {offsets = [0, 6], sizes = [22, 16], strides = [1, 1]} : vector<22x22xf32> to vector<22x16xf32>
    %c6 = arith.constant 6 : index
    %241 = memref.load %arg1[%c6] : memref<297xf32, #tpu.memory_space<smem>>
    %242 = vector.extract_strided_slice %240 {offsets = [0, 0], sizes = [16, 16], strides = [1, 1]} : vector<22x16xf32> to vector<16x16xf32>
    %243 = vector.broadcast %241 : f32 to vector<16x16xf32>
    %244 = arith.mulf %243, %242 : vector<16x16xf32>
    %245 = arith.addf %224, %244 : vector<16x16xf32>
    %c13 = arith.constant 13 : index
    %246 = memref.load %arg1[%c13] : memref<297xf32, #tpu.memory_space<smem>>
    %247 = vector.extract_strided_slice %240 {offsets = [1, 0], sizes = [16, 16], strides = [1, 1]} : vector<22x16xf32> to vector<16x16xf32>
    %248 = vector.broadcast %246 : f32 to vector<16x16xf32>
    %249 = arith.mulf %248, %247 : vector<16x16xf32>
    %250 = arith.addf %229, %249 : vector<16x16xf32>
    %c20 = arith.constant 20 : index
    %251 = memref.load %arg1[%c20] : memref<297xf32, #tpu.memory_space<smem>>
    %252 = vector.extract_strided_slice %240 {offsets = [2, 0], sizes = [16, 16], strides = [1, 1]} : vector<22x16xf32> to vector<16x16xf32>
    %253 = vector.broadcast %251 : f32 to vector<16x16xf32>
    %254 = arith.mulf %253, %252 : vector<16x16xf32>
    %255 = arith.addf %234, %254 : vector<16x16xf32>
    %c27 = arith.constant 27 : index
    %256 = memref.load %arg1[%c27] : memref<297xf32, #tpu.memory_space<smem>>
    %257 = vector.extract_strided_slice %240 {offsets = [3, 0], sizes = [16, 16], strides = [1, 1]} : vector<22x16xf32> to vector<16x16xf32>
    %258 = vector.broadcast %256 : f32 to vector<16x16xf32>
    %259 = arith.mulf %258, %257 : vector<16x16xf32>
    %260 = arith.addf %239, %259 : vector<16x16xf32>
    %c34 = arith.constant 34 : index
    %261 = memref.load %arg1[%c34] : memref<297xf32, #tpu.memory_space<smem>>
    %262 = vector.extract_strided_slice %240 {offsets = [4, 0], sizes = [16, 16], strides = [1, 1]} : vector<22x16xf32> to vector<16x16xf32>
    %263 = vector.broadcast %261 : f32 to vector<16x16xf32>
    %264 = arith.mulf %263, %262 : vector<16x16xf32>
    %265 = arith.addf %245, %264 : vector<16x16xf32>
    %c41 = arith.constant 41 : index
    %266 = memref.load %arg1[%c41] : memref<297xf32, #tpu.memory_space<smem>>
    %267 = vector.extract_strided_slice %240 {offsets = [5, 0], sizes = [16, 16], strides = [1, 1]} : vector<22x16xf32> to vector<16x16xf32>
    %268 = vector.broadcast %266 : f32 to vector<16x16xf32>
    %269 = arith.mulf %268, %267 : vector<16x16xf32>
    %270 = arith.addf %250, %269 : vector<16x16xf32>
    %c48 = arith.constant 48 : index
    %271 = memref.load %arg1[%c48] : memref<297xf32, #tpu.memory_space<smem>>
    %272 = vector.extract_strided_slice %240 {offsets = [6, 0], sizes = [16, 16], strides = [1, 1]} : vector<22x16xf32> to vector<16x16xf32>
    %273 = vector.broadcast %271 : f32 to vector<16x16xf32>
    %274 = arith.mulf %273, %272 : vector<16x16xf32>
    %275 = arith.addf %255, %274 : vector<16x16xf32>
    %276 = vector.extract_strided_slice %27 {offsets = [0, 0], sizes = [22, 16], strides = [1, 1]} : vector<22x22xf32> to vector<22x16xf32>
    %c49 = arith.constant 49 : index
    %277 = memref.load %arg1[%c49] : memref<297xf32, #tpu.memory_space<smem>>
    %278 = vector.extract_strided_slice %276 {offsets = [0, 0], sizes = [16, 16], strides = [1, 1]} : vector<22x16xf32> to vector<16x16xf32>
    %279 = vector.broadcast %277 : f32 to vector<16x16xf32>
    %280 = arith.mulf %279, %278 : vector<16x16xf32>
    %281 = arith.addf %260, %280 : vector<16x16xf32>
    %c56 = arith.constant 56 : index
    %282 = memref.load %arg1[%c56] : memref<297xf32, #tpu.memory_space<smem>>
    %283 = vector.extract_strided_slice %276 {offsets = [1, 0], sizes = [16, 16], strides = [1, 1]} : vector<22x16xf32> to vector<16x16xf32>
    %284 = vector.broadcast %282 : f32 to vector<16x16xf32>
    %285 = arith.mulf %284, %283 : vector<16x16xf32>
    %286 = arith.addf %265, %285 : vector<16x16xf32>
    %c63 = arith.constant 63 : index
    %287 = memref.load %arg1[%c63] : memref<297xf32, #tpu.memory_space<smem>>
    %288 = vector.extract_strided_slice %276 {offsets = [2, 0], sizes = [16, 16], strides = [1, 1]} : vector<22x16xf32> to vector<16x16xf32>
    %289 = vector.broadcast %287 : f32 to vector<16x16xf32>
    %290 = arith.mulf %289, %288 : vector<16x16xf32>
    %291 = arith.addf %270, %290 : vector<16x16xf32>
    %c70 = arith.constant 70 : index
    %292 = memref.load %arg1[%c70] : memref<297xf32, #tpu.memory_space<smem>>
    %293 = vector.extract_strided_slice %276 {offsets = [3, 0], sizes = [16, 16], strides = [1, 1]} : vector<22x16xf32> to vector<16x16xf32>
    %294 = vector.broadcast %292 : f32 to vector<16x16xf32>
    %295 = arith.mulf %294, %293 : vector<16x16xf32>
    %296 = arith.addf %275, %295 : vector<16x16xf32>
    %c77 = arith.constant 77 : index
    %297 = memref.load %arg1[%c77] : memref<297xf32, #tpu.memory_space<smem>>
    %298 = vector.extract_strided_slice %276 {offsets = [4, 0], sizes = [16, 16], strides = [1, 1]} : vector<22x16xf32> to vector<16x16xf32>
    %299 = vector.broadcast %297 : f32 to vector<16x16xf32>
    %300 = arith.mulf %299, %298 : vector<16x16xf32>
    %301 = arith.addf %281, %300 : vector<16x16xf32>
    %c84 = arith.constant 84 : index
    %302 = memref.load %arg1[%c84] : memref<297xf32, #tpu.memory_space<smem>>
    %303 = vector.extract_strided_slice %276 {offsets = [5, 0], sizes = [16, 16], strides = [1, 1]} : vector<22x16xf32> to vector<16x16xf32>
    %304 = vector.broadcast %302 : f32 to vector<16x16xf32>
    %305 = arith.mulf %304, %303 : vector<16x16xf32>
    %306 = arith.addf %286, %305 : vector<16x16xf32>
    %c91 = arith.constant 91 : index
    %307 = memref.load %arg1[%c91] : memref<297xf32, #tpu.memory_space<smem>>
    %308 = vector.extract_strided_slice %276 {offsets = [6, 0], sizes = [16, 16], strides = [1, 1]} : vector<22x16xf32> to vector<16x16xf32>
    %309 = vector.broadcast %307 : f32 to vector<16x16xf32>
    %310 = arith.mulf %309, %308 : vector<16x16xf32>
    %311 = arith.addf %291, %310 : vector<16x16xf32>
    %312 = vector.extract_strided_slice %27 {offsets = [0, 1], sizes = [22, 16], strides = [1, 1]} : vector<22x22xf32> to vector<22x16xf32>
    %c50 = arith.constant 50 : index
    %313 = memref.load %arg1[%c50] : memref<297xf32, #tpu.memory_space<smem>>
    %314 = vector.extract_strided_slice %312 {offsets = [0, 0], sizes = [16, 16], strides = [1, 1]} : vector<22x16xf32> to vector<16x16xf32>
    %315 = vector.broadcast %313 : f32 to vector<16x16xf32>
    %316 = arith.mulf %315, %314 : vector<16x16xf32>
    %317 = arith.addf %296, %316 : vector<16x16xf32>
    %c57 = arith.constant 57 : index
    %318 = memref.load %arg1[%c57] : memref<297xf32, #tpu.memory_space<smem>>
    %319 = vector.extract_strided_slice %312 {offsets = [1, 0], sizes = [16, 16], strides = [1, 1]} : vector<22x16xf32> to vector<16x16xf32>
    %320 = vector.broadcast %318 : f32 to vector<16x16xf32>
    %321 = arith.mulf %320, %319 : vector<16x16xf32>
    %322 = arith.addf %301, %321 : vector<16x16xf32>
    %c64 = arith.constant 64 : index
    %323 = memref.load %arg1[%c64] : memref<297xf32, #tpu.memory_space<smem>>
    %324 = vector.extract_strided_slice %312 {offsets = [2, 0], sizes = [16, 16], strides = [1, 1]} : vector<22x16xf32> to vector<16x16xf32>
    %325 = vector.broadcast %323 : f32 to vector<16x16xf32>
    %326 = arith.mulf %325, %324 : vector<16x16xf32>
    %327 = arith.addf %306, %326 : vector<16x16xf32>
    %c71 = arith.constant 71 : index
    %328 = memref.load %arg1[%c71] : memref<297xf32, #tpu.memory_space<smem>>
    %329 = vector.extract_strided_slice %312 {offsets = [3, 0], sizes = [16, 16], strides = [1, 1]} : vector<22x16xf32> to vector<16x16xf32>
    %330 = vector.broadcast %328 : f32 to vector<16x16xf32>
    %331 = arith.mulf %330, %329 : vector<16x16xf32>
    %332 = arith.addf %311, %331 : vector<16x16xf32>
    %c78 = arith.constant 78 : index
    %333 = memref.load %arg1[%c78] : memref<297xf32, #tpu.memory_space<smem>>
    %334 = vector.extract_strided_slice %312 {offsets = [4, 0], sizes = [16, 16], strides = [1, 1]} : vector<22x16xf32> to vector<16x16xf32>
    %335 = vector.broadcast %333 : f32 to vector<16x16xf32>
    %336 = arith.mulf %335, %334 : vector<16x16xf32>
    %337 = arith.addf %317, %336 : vector<16x16xf32>
    %c85 = arith.constant 85 : index
    %338 = memref.load %arg1[%c85] : memref<297xf32, #tpu.memory_space<smem>>
    %339 = vector.extract_strided_slice %312 {offsets = [5, 0], sizes = [16, 16], strides = [1, 1]} : vector<22x16xf32> to vector<16x16xf32>
    %340 = vector.broadcast %338 : f32 to vector<16x16xf32>
    %341 = arith.mulf %340, %339 : vector<16x16xf32>
    %342 = arith.addf %322, %341 : vector<16x16xf32>
    %c92 = arith.constant 92 : index
    %343 = memref.load %arg1[%c92] : memref<297xf32, #tpu.memory_space<smem>>
    %344 = vector.extract_strided_slice %312 {offsets = [6, 0], sizes = [16, 16], strides = [1, 1]} : vector<22x16xf32> to vector<16x16xf32>
    %345 = vector.broadcast %343 : f32 to vector<16x16xf32>
    %346 = arith.mulf %345, %344 : vector<16x16xf32>
    %347 = arith.addf %327, %346 : vector<16x16xf32>
    %348 = vector.extract_strided_slice %27 {offsets = [0, 2], sizes = [22, 16], strides = [1, 1]} : vector<22x22xf32> to vector<22x16xf32>
    %c51 = arith.constant 51 : index
    %349 = memref.load %arg1[%c51] : memref<297xf32, #tpu.memory_space<smem>>
    %350 = vector.extract_strided_slice %348 {offsets = [0, 0], sizes = [16, 16], strides = [1, 1]} : vector<22x16xf32> to vector<16x16xf32>
    %351 = vector.broadcast %349 : f32 to vector<16x16xf32>
    %352 = arith.mulf %351, %350 : vector<16x16xf32>
    %353 = arith.addf %332, %352 : vector<16x16xf32>
    %c58 = arith.constant 58 : index
    %354 = memref.load %arg1[%c58] : memref<297xf32, #tpu.memory_space<smem>>
    %355 = vector.extract_strided_slice %348 {offsets = [1, 0], sizes = [16, 16], strides = [1, 1]} : vector<22x16xf32> to vector<16x16xf32>
    %356 = vector.broadcast %354 : f32 to vector<16x16xf32>
    %357 = arith.mulf %356, %355 : vector<16x16xf32>
    %358 = arith.addf %337, %357 : vector<16x16xf32>
    %c65 = arith.constant 65 : index
    %359 = memref.load %arg1[%c65] : memref<297xf32, #tpu.memory_space<smem>>
    %360 = vector.extract_strided_slice %348 {offsets = [2, 0], sizes = [16, 16], strides = [1, 1]} : vector<22x16xf32> to vector<16x16xf32>
    %361 = vector.broadcast %359 : f32 to vector<16x16xf32>
    %362 = arith.mulf %361, %360 : vector<16x16xf32>
    %363 = arith.addf %342, %362 : vector<16x16xf32>
    %c72 = arith.constant 72 : index
    %364 = memref.load %arg1[%c72] : memref<297xf32, #tpu.memory_space<smem>>
    %365 = vector.extract_strided_slice %348 {offsets = [3, 0], sizes = [16, 16], strides = [1, 1]} : vector<22x16xf32> to vector<16x16xf32>
    %366 = vector.broadcast %364 : f32 to vector<16x16xf32>
    %367 = arith.mulf %366, %365 : vector<16x16xf32>
    %368 = arith.addf %347, %367 : vector<16x16xf32>
    %c79 = arith.constant 79 : index
    %369 = memref.load %arg1[%c79] : memref<297xf32, #tpu.memory_space<smem>>
    %370 = vector.extract_strided_slice %348 {offsets = [4, 0], sizes = [16, 16], strides = [1, 1]} : vector<22x16xf32> to vector<16x16xf32>
    %371 = vector.broadcast %369 : f32 to vector<16x16xf32>
    %372 = arith.mulf %371, %370 : vector<16x16xf32>
    %373 = arith.addf %353, %372 : vector<16x16xf32>
    %c86 = arith.constant 86 : index
    %374 = memref.load %arg1[%c86] : memref<297xf32, #tpu.memory_space<smem>>
    %375 = vector.extract_strided_slice %348 {offsets = [5, 0], sizes = [16, 16], strides = [1, 1]} : vector<22x16xf32> to vector<16x16xf32>
    %376 = vector.broadcast %374 : f32 to vector<16x16xf32>
    %377 = arith.mulf %376, %375 : vector<16x16xf32>
    %378 = arith.addf %358, %377 : vector<16x16xf32>
    %c93 = arith.constant 93 : index
    %379 = memref.load %arg1[%c93] : memref<297xf32, #tpu.memory_space<smem>>
    %380 = vector.extract_strided_slice %348 {offsets = [6, 0], sizes = [16, 16], strides = [1, 1]} : vector<22x16xf32> to vector<16x16xf32>
    %381 = vector.broadcast %379 : f32 to vector<16x16xf32>
    %382 = arith.mulf %381, %380 : vector<16x16xf32>
    %383 = arith.addf %363, %382 : vector<16x16xf32>
    %384 = vector.extract_strided_slice %27 {offsets = [0, 3], sizes = [22, 16], strides = [1, 1]} : vector<22x22xf32> to vector<22x16xf32>
    %c52 = arith.constant 52 : index
    %385 = memref.load %arg1[%c52] : memref<297xf32, #tpu.memory_space<smem>>
    %386 = vector.extract_strided_slice %384 {offsets = [0, 0], sizes = [16, 16], strides = [1, 1]} : vector<22x16xf32> to vector<16x16xf32>
    %387 = vector.broadcast %385 : f32 to vector<16x16xf32>
    %388 = arith.mulf %387, %386 : vector<16x16xf32>
    %389 = arith.addf %368, %388 : vector<16x16xf32>
    %c59 = arith.constant 59 : index
    %390 = memref.load %arg1[%c59] : memref<297xf32, #tpu.memory_space<smem>>
    %391 = vector.extract_strided_slice %384 {offsets = [1, 0], sizes = [16, 16], strides = [1, 1]} : vector<22x16xf32> to vector<16x16xf32>
    %392 = vector.broadcast %390 : f32 to vector<16x16xf32>
    %393 = arith.mulf %392, %391 : vector<16x16xf32>
    %394 = arith.addf %373, %393 : vector<16x16xf32>
    %c66 = arith.constant 66 : index
    %395 = memref.load %arg1[%c66] : memref<297xf32, #tpu.memory_space<smem>>
    %396 = vector.extract_strided_slice %384 {offsets = [2, 0], sizes = [16, 16], strides = [1, 1]} : vector<22x16xf32> to vector<16x16xf32>
    %397 = vector.broadcast %395 : f32 to vector<16x16xf32>
    %398 = arith.mulf %397, %396 : vector<16x16xf32>
    %399 = arith.addf %378, %398 : vector<16x16xf32>
    %c73 = arith.constant 73 : index
    %400 = memref.load %arg1[%c73] : memref<297xf32, #tpu.memory_space<smem>>
    %401 = vector.extract_strided_slice %384 {offsets = [3, 0], sizes = [16, 16], strides = [1, 1]} : vector<22x16xf32> to vector<16x16xf32>
    %402 = vector.broadcast %400 : f32 to vector<16x16xf32>
    %403 = arith.mulf %402, %401 : vector<16x16xf32>
    %404 = arith.addf %383, %403 : vector<16x16xf32>
    %c80 = arith.constant 80 : index
    %405 = memref.load %arg1[%c80] : memref<297xf32, #tpu.memory_space<smem>>
    %406 = vector.extract_strided_slice %384 {offsets = [4, 0], sizes = [16, 16], strides = [1, 1]} : vector<22x16xf32> to vector<16x16xf32>
    %407 = vector.broadcast %405 : f32 to vector<16x16xf32>
    %408 = arith.mulf %407, %406 : vector<16x16xf32>
    %409 = arith.addf %389, %408 : vector<16x16xf32>
    %c87 = arith.constant 87 : index
    %410 = memref.load %arg1[%c87] : memref<297xf32, #tpu.memory_space<smem>>
    %411 = vector.extract_strided_slice %384 {offsets = [5, 0], sizes = [16, 16], strides = [1, 1]} : vector<22x16xf32> to vector<16x16xf32>
    %412 = vector.broadcast %410 : f32 to vector<16x16xf32>
    %413 = arith.mulf %412, %411 : vector<16x16xf32>
    %414 = arith.addf %394, %413 : vector<16x16xf32>
    %c94 = arith.constant 94 : index
    %415 = memref.load %arg1[%c94] : memref<297xf32, #tpu.memory_space<smem>>
    %416 = vector.extract_strided_slice %384 {offsets = [6, 0], sizes = [16, 16], strides = [1, 1]} : vector<22x16xf32> to vector<16x16xf32>
    %417 = vector.broadcast %415 : f32 to vector<16x16xf32>
    %418 = arith.mulf %417, %416 : vector<16x16xf32>
    %419 = arith.addf %399, %418 : vector<16x16xf32>
    %420 = vector.extract_strided_slice %27 {offsets = [0, 4], sizes = [22, 16], strides = [1, 1]} : vector<22x22xf32> to vector<22x16xf32>
    %c53 = arith.constant 53 : index
    %421 = memref.load %arg1[%c53] : memref<297xf32, #tpu.memory_space<smem>>
    %422 = vector.extract_strided_slice %420 {offsets = [0, 0], sizes = [16, 16], strides = [1, 1]} : vector<22x16xf32> to vector<16x16xf32>
    %423 = vector.broadcast %421 : f32 to vector<16x16xf32>
    %424 = arith.mulf %423, %422 : vector<16x16xf32>
    %425 = arith.addf %404, %424 : vector<16x16xf32>
    %c60 = arith.constant 60 : index
    %426 = memref.load %arg1[%c60] : memref<297xf32, #tpu.memory_space<smem>>
    %427 = vector.extract_strided_slice %420 {offsets = [1, 0], sizes = [16, 16], strides = [1, 1]} : vector<22x16xf32> to vector<16x16xf32>
    %428 = vector.broadcast %426 : f32 to vector<16x16xf32>
    %429 = arith.mulf %428, %427 : vector<16x16xf32>
    %430 = arith.addf %409, %429 : vector<16x16xf32>
    %c67 = arith.constant 67 : index
    %431 = memref.load %arg1[%c67] : memref<297xf32, #tpu.memory_space<smem>>
    %432 = vector.extract_strided_slice %420 {offsets = [2, 0], sizes = [16, 16], strides = [1, 1]} : vector<22x16xf32> to vector<16x16xf32>
    %433 = vector.broadcast %431 : f32 to vector<16x16xf32>
    %434 = arith.mulf %433, %432 : vector<16x16xf32>
    %435 = arith.addf %414, %434 : vector<16x16xf32>
    %c74 = arith.constant 74 : index
    %436 = memref.load %arg1[%c74] : memref<297xf32, #tpu.memory_space<smem>>
    %437 = vector.extract_strided_slice %420 {offsets = [3, 0], sizes = [16, 16], strides = [1, 1]} : vector<22x16xf32> to vector<16x16xf32>
    %438 = vector.broadcast %436 : f32 to vector<16x16xf32>
    %439 = arith.mulf %438, %437 : vector<16x16xf32>
    %440 = arith.addf %419, %439 : vector<16x16xf32>
    %c81 = arith.constant 81 : index
    %441 = memref.load %arg1[%c81] : memref<297xf32, #tpu.memory_space<smem>>
    %442 = vector.extract_strided_slice %420 {offsets = [4, 0], sizes = [16, 16], strides = [1, 1]} : vector<22x16xf32> to vector<16x16xf32>
    %443 = vector.broadcast %441 : f32 to vector<16x16xf32>
    %444 = arith.mulf %443, %442 : vector<16x16xf32>
    %445 = arith.addf %425, %444 : vector<16x16xf32>
    %c88 = arith.constant 88 : index
    %446 = memref.load %arg1[%c88] : memref<297xf32, #tpu.memory_space<smem>>
    %447 = vector.extract_strided_slice %420 {offsets = [5, 0], sizes = [16, 16], strides = [1, 1]} : vector<22x16xf32> to vector<16x16xf32>
    %448 = vector.broadcast %446 : f32 to vector<16x16xf32>
    %449 = arith.mulf %448, %447 : vector<16x16xf32>
    %450 = arith.addf %430, %449 : vector<16x16xf32>
    %c95 = arith.constant 95 : index
    %451 = memref.load %arg1[%c95] : memref<297xf32, #tpu.memory_space<smem>>
    %452 = vector.extract_strided_slice %420 {offsets = [6, 0], sizes = [16, 16], strides = [1, 1]} : vector<22x16xf32> to vector<16x16xf32>
    %453 = vector.broadcast %451 : f32 to vector<16x16xf32>
    %454 = arith.mulf %453, %452 : vector<16x16xf32>
    %455 = arith.addf %435, %454 : vector<16x16xf32>
    %456 = vector.extract_strided_slice %27 {offsets = [0, 5], sizes = [22, 16], strides = [1, 1]} : vector<22x22xf32> to vector<22x16xf32>
    %c54 = arith.constant 54 : index
    %457 = memref.load %arg1[%c54] : memref<297xf32, #tpu.memory_space<smem>>
    %458 = vector.extract_strided_slice %456 {offsets = [0, 0], sizes = [16, 16], strides = [1, 1]} : vector<22x16xf32> to vector<16x16xf32>
    %459 = vector.broadcast %457 : f32 to vector<16x16xf32>
    %460 = arith.mulf %459, %458 : vector<16x16xf32>
    %461 = arith.addf %440, %460 : vector<16x16xf32>
    %c61 = arith.constant 61 : index
    %462 = memref.load %arg1[%c61] : memref<297xf32, #tpu.memory_space<smem>>
    %463 = vector.extract_strided_slice %456 {offsets = [1, 0], sizes = [16, 16], strides = [1, 1]} : vector<22x16xf32> to vector<16x16xf32>
    %464 = vector.broadcast %462 : f32 to vector<16x16xf32>
    %465 = arith.mulf %464, %463 : vector<16x16xf32>
    %466 = arith.addf %445, %465 : vector<16x16xf32>
    %c68 = arith.constant 68 : index
    %467 = memref.load %arg1[%c68] : memref<297xf32, #tpu.memory_space<smem>>
    %468 = vector.extract_strided_slice %456 {offsets = [2, 0], sizes = [16, 16], strides = [1, 1]} : vector<22x16xf32> to vector<16x16xf32>
    %469 = vector.broadcast %467 : f32 to vector<16x16xf32>
    %470 = arith.mulf %469, %468 : vector<16x16xf32>
    %471 = arith.addf %450, %470 : vector<16x16xf32>
    %c75 = arith.constant 75 : index
    %472 = memref.load %arg1[%c75] : memref<297xf32, #tpu.memory_space<smem>>
    %473 = vector.extract_strided_slice %456 {offsets = [3, 0], sizes = [16, 16], strides = [1, 1]} : vector<22x16xf32> to vector<16x16xf32>
    %474 = vector.broadcast %472 : f32 to vector<16x16xf32>
    %475 = arith.mulf %474, %473 : vector<16x16xf32>
    %476 = arith.addf %455, %475 : vector<16x16xf32>
    %c82 = arith.constant 82 : index
    %477 = memref.load %arg1[%c82] : memref<297xf32, #tpu.memory_space<smem>>
    %478 = vector.extract_strided_slice %456 {offsets = [4, 0], sizes = [16, 16], strides = [1, 1]} : vector<22x16xf32> to vector<16x16xf32>
    %479 = vector.broadcast %477 : f32 to vector<16x16xf32>
    %480 = arith.mulf %479, %478 : vector<16x16xf32>
    %481 = arith.addf %461, %480 : vector<16x16xf32>
    %c89 = arith.constant 89 : index
    %482 = memref.load %arg1[%c89] : memref<297xf32, #tpu.memory_space<smem>>
    %483 = vector.extract_strided_slice %456 {offsets = [5, 0], sizes = [16, 16], strides = [1, 1]} : vector<22x16xf32> to vector<16x16xf32>
    %484 = vector.broadcast %482 : f32 to vector<16x16xf32>
    %485 = arith.mulf %484, %483 : vector<16x16xf32>
    %486 = arith.addf %466, %485 : vector<16x16xf32>
    %c96 = arith.constant 96 : index
    %487 = memref.load %arg1[%c96] : memref<297xf32, #tpu.memory_space<smem>>
    %488 = vector.extract_strided_slice %456 {offsets = [6, 0], sizes = [16, 16], strides = [1, 1]} : vector<22x16xf32> to vector<16x16xf32>
    %489 = vector.broadcast %487 : f32 to vector<16x16xf32>
    %490 = arith.mulf %489, %488 : vector<16x16xf32>
    %491 = arith.addf %471, %490 : vector<16x16xf32>
    %492 = vector.extract_strided_slice %27 {offsets = [0, 6], sizes = [22, 16], strides = [1, 1]} : vector<22x22xf32> to vector<22x16xf32>
    %c55 = arith.constant 55 : index
    %493 = memref.load %arg1[%c55] : memref<297xf32, #tpu.memory_space<smem>>
    %494 = vector.extract_strided_slice %492 {offsets = [0, 0], sizes = [16, 16], strides = [1, 1]} : vector<22x16xf32> to vector<16x16xf32>
    %495 = vector.broadcast %493 : f32 to vector<16x16xf32>
    %496 = arith.mulf %495, %494 : vector<16x16xf32>
    %497 = arith.addf %476, %496 : vector<16x16xf32>
    %c62 = arith.constant 62 : index
    %498 = memref.load %arg1[%c62] : memref<297xf32, #tpu.memory_space<smem>>
    %499 = vector.extract_strided_slice %492 {offsets = [1, 0], sizes = [16, 16], strides = [1, 1]} : vector<22x16xf32> to vector<16x16xf32>
    %500 = vector.broadcast %498 : f32 to vector<16x16xf32>
    %501 = arith.mulf %500, %499 : vector<16x16xf32>
    %502 = arith.addf %481, %501 : vector<16x16xf32>
    %c69 = arith.constant 69 : index
    %503 = memref.load %arg1[%c69] : memref<297xf32, #tpu.memory_space<smem>>
    %504 = vector.extract_strided_slice %492 {offsets = [2, 0], sizes = [16, 16], strides = [1, 1]} : vector<22x16xf32> to vector<16x16xf32>
    %505 = vector.broadcast %503 : f32 to vector<16x16xf32>
    %506 = arith.mulf %505, %504 : vector<16x16xf32>
    %507 = arith.addf %486, %506 : vector<16x16xf32>
    %c76 = arith.constant 76 : index
    %508 = memref.load %arg1[%c76] : memref<297xf32, #tpu.memory_space<smem>>
    %509 = vector.extract_strided_slice %492 {offsets = [3, 0], sizes = [16, 16], strides = [1, 1]} : vector<22x16xf32> to vector<16x16xf32>
    %510 = vector.broadcast %508 : f32 to vector<16x16xf32>
    %511 = arith.mulf %510, %509 : vector<16x16xf32>
    %512 = arith.addf %491, %511 : vector<16x16xf32>
    %c83 = arith.constant 83 : index
    %513 = memref.load %arg1[%c83] : memref<297xf32, #tpu.memory_space<smem>>
    %514 = vector.extract_strided_slice %492 {offsets = [4, 0], sizes = [16, 16], strides = [1, 1]} : vector<22x16xf32> to vector<16x16xf32>
    %515 = vector.broadcast %513 : f32 to vector<16x16xf32>
    %516 = arith.mulf %515, %514 : vector<16x16xf32>
    %517 = arith.addf %497, %516 : vector<16x16xf32>
    %c90 = arith.constant 90 : index
    %518 = memref.load %arg1[%c90] : memref<297xf32, #tpu.memory_space<smem>>
    %519 = vector.extract_strided_slice %492 {offsets = [5, 0], sizes = [16, 16], strides = [1, 1]} : vector<22x16xf32> to vector<16x16xf32>
    %520 = vector.broadcast %518 : f32 to vector<16x16xf32>
    %521 = arith.mulf %520, %519 : vector<16x16xf32>
    %522 = arith.addf %502, %521 : vector<16x16xf32>
    %c97 = arith.constant 97 : index
    %523 = memref.load %arg1[%c97] : memref<297xf32, #tpu.memory_space<smem>>
    %524 = vector.extract_strided_slice %492 {offsets = [6, 0], sizes = [16, 16], strides = [1, 1]} : vector<22x16xf32> to vector<16x16xf32>
    %525 = vector.broadcast %523 : f32 to vector<16x16xf32>
    %526 = arith.mulf %525, %524 : vector<16x16xf32>
    %527 = arith.addf %507, %526 : vector<16x16xf32>
    %528 = arith.addf %522, %527 : vector<16x16xf32>
    %529 = arith.addf %528, %512 : vector<16x16xf32>
    %530 = arith.addf %529, %517 : vector<16x16xf32>
    %c98 = arith.constant 98 : index
    %531 = memref.load %arg1[%c98] : memref<297xf32, #tpu.memory_space<smem>>
    %532 = vector.broadcast %531 : f32 to vector<16x16xf32>
    %533 = arith.addf %530, %532 : vector<16x16xf32>
    %534 = arith.negf %533 : vector<16x16xf32>
    %535 = math.exp %534 : vector<16x16xf32>
    %cst_24 = arith.constant 1.000000e+00 : f32
    %536 = vector.broadcast %cst_24 : f32 to vector<16x16xf32>
    %537 = arith.addf %536, %535 : vector<16x16xf32>
    %538 = arith.divf %536, %537 : vector<16x16xf32>
    %cst_25 = arith.constant 0.000000e+00 : f32
    %539 = vector.broadcast %cst_25 : f32 to vector<3x16xf32>
    %540 = tpu.concatenate %539, %6, %539 in 0 : vector<3x16xf32>, vector<4x16xf32>, vector<3x16xf32> -> vector<10x16xf32>
    %cst_26 = arith.constant 0.000000e+00 : f32
    %541 = vector.broadcast %cst_26 : f32 to vector<10x3xf32>
    %542 = tpu.concatenate %541, %540, %541 in 1 : vector<10x3xf32>, vector<10x16xf32>, vector<10x3xf32> -> vector<10x22xf32>
    %cst_27 = arith.constant 0.000000e+00 : f32
    %543 = vector.broadcast %cst_27 : f32 to vector<3x16xf32>
    %544 = tpu.concatenate %543, %9, %543 in 0 : vector<3x16xf32>, vector<4x16xf32>, vector<3x16xf32> -> vector<10x16xf32>
    %cst_28 = arith.constant 0.000000e+00 : f32
    %545 = vector.broadcast %cst_28 : f32 to vector<10x3xf32>
    %546 = tpu.concatenate %545, %544, %545 in 1 : vector<10x3xf32>, vector<10x16xf32>, vector<10x3xf32> -> vector<10x22xf32>
    %547 = vector.extract_strided_slice %542 {offsets = [0, 0], sizes = [10, 16], strides = [1, 1]} : vector<10x22xf32> to vector<10x16xf32>
    %c99 = arith.constant 99 : index
    %548 = memref.load %arg1[%c99] : memref<297xf32, #tpu.memory_space<smem>>
    %549 = vector.extract_strided_slice %547 {offsets = [0, 0], sizes = [4, 16], strides = [1, 1]} : vector<10x16xf32> to vector<4x16xf32>
    %550 = vector.broadcast %548 : f32 to vector<4x16xf32>
    %551 = arith.mulf %550, %549 : vector<4x16xf32>
    %c106 = arith.constant 106 : index
    %552 = memref.load %arg1[%c106] : memref<297xf32, #tpu.memory_space<smem>>
    %553 = vector.extract_strided_slice %547 {offsets = [1, 0], sizes = [4, 16], strides = [1, 1]} : vector<10x16xf32> to vector<4x16xf32>
    %554 = vector.broadcast %552 : f32 to vector<4x16xf32>
    %555 = arith.mulf %554, %553 : vector<4x16xf32>
    %c113 = arith.constant 113 : index
    %556 = memref.load %arg1[%c113] : memref<297xf32, #tpu.memory_space<smem>>
    %557 = vector.extract_strided_slice %547 {offsets = [2, 0], sizes = [4, 16], strides = [1, 1]} : vector<10x16xf32> to vector<4x16xf32>
    %558 = vector.broadcast %556 : f32 to vector<4x16xf32>
    %559 = arith.mulf %558, %557 : vector<4x16xf32>
    %c120 = arith.constant 120 : index
    %560 = memref.load %arg1[%c120] : memref<297xf32, #tpu.memory_space<smem>>
    %561 = vector.extract_strided_slice %547 {offsets = [3, 0], sizes = [4, 16], strides = [1, 1]} : vector<10x16xf32> to vector<4x16xf32>
    %562 = vector.broadcast %560 : f32 to vector<4x16xf32>
    %563 = arith.mulf %562, %561 : vector<4x16xf32>
    %c127 = arith.constant 127 : index
    %564 = memref.load %arg1[%c127] : memref<297xf32, #tpu.memory_space<smem>>
    %565 = vector.extract_strided_slice %547 {offsets = [4, 0], sizes = [4, 16], strides = [1, 1]} : vector<10x16xf32> to vector<4x16xf32>
    %566 = vector.broadcast %564 : f32 to vector<4x16xf32>
    %567 = arith.mulf %566, %565 : vector<4x16xf32>
    %568 = arith.addf %551, %567 : vector<4x16xf32>
    %c134 = arith.constant 134 : index
    %569 = memref.load %arg1[%c134] : memref<297xf32, #tpu.memory_space<smem>>
    %570 = vector.extract_strided_slice %547 {offsets = [5, 0], sizes = [4, 16], strides = [1, 1]} : vector<10x16xf32> to vector<4x16xf32>
    %571 = vector.broadcast %569 : f32 to vector<4x16xf32>
    %572 = arith.mulf %571, %570 : vector<4x16xf32>
    %573 = arith.addf %555, %572 : vector<4x16xf32>
    %c141 = arith.constant 141 : index
    %574 = memref.load %arg1[%c141] : memref<297xf32, #tpu.memory_space<smem>>
    %575 = vector.extract_strided_slice %547 {offsets = [6, 0], sizes = [4, 16], strides = [1, 1]} : vector<10x16xf32> to vector<4x16xf32>
    %576 = vector.broadcast %574 : f32 to vector<4x16xf32>
    %577 = arith.mulf %576, %575 : vector<4x16xf32>
    %578 = arith.addf %559, %577 : vector<4x16xf32>
    %579 = vector.extract_strided_slice %542 {offsets = [0, 1], sizes = [10, 16], strides = [1, 1]} : vector<10x22xf32> to vector<10x16xf32>
    %c100 = arith.constant 100 : index
    %580 = memref.load %arg1[%c100] : memref<297xf32, #tpu.memory_space<smem>>
    %581 = vector.extract_strided_slice %579 {offsets = [0, 0], sizes = [4, 16], strides = [1, 1]} : vector<10x16xf32> to vector<4x16xf32>
    %582 = vector.broadcast %580 : f32 to vector<4x16xf32>
    %583 = arith.mulf %582, %581 : vector<4x16xf32>
    %584 = arith.addf %563, %583 : vector<4x16xf32>
    %c107 = arith.constant 107 : index
    %585 = memref.load %arg1[%c107] : memref<297xf32, #tpu.memory_space<smem>>
    %586 = vector.extract_strided_slice %579 {offsets = [1, 0], sizes = [4, 16], strides = [1, 1]} : vector<10x16xf32> to vector<4x16xf32>
    %587 = vector.broadcast %585 : f32 to vector<4x16xf32>
    %588 = arith.mulf %587, %586 : vector<4x16xf32>
    %589 = arith.addf %568, %588 : vector<4x16xf32>
    %c114 = arith.constant 114 : index
    %590 = memref.load %arg1[%c114] : memref<297xf32, #tpu.memory_space<smem>>
    %591 = vector.extract_strided_slice %579 {offsets = [2, 0], sizes = [4, 16], strides = [1, 1]} : vector<10x16xf32> to vector<4x16xf32>
    %592 = vector.broadcast %590 : f32 to vector<4x16xf32>
    %593 = arith.mulf %592, %591 : vector<4x16xf32>
    %594 = arith.addf %573, %593 : vector<4x16xf32>
    %c121 = arith.constant 121 : index
    %595 = memref.load %arg1[%c121] : memref<297xf32, #tpu.memory_space<smem>>
    %596 = vector.extract_strided_slice %579 {offsets = [3, 0], sizes = [4, 16], strides = [1, 1]} : vector<10x16xf32> to vector<4x16xf32>
    %597 = vector.broadcast %595 : f32 to vector<4x16xf32>
    %598 = arith.mulf %597, %596 : vector<4x16xf32>
    %599 = arith.addf %578, %598 : vector<4x16xf32>
    %c128 = arith.constant 128 : index
    %600 = memref.load %arg1[%c128] : memref<297xf32, #tpu.memory_space<smem>>
    %601 = vector.extract_strided_slice %579 {offsets = [4, 0], sizes = [4, 16], strides = [1, 1]} : vector<10x16xf32> to vector<4x16xf32>
    %602 = vector.broadcast %600 : f32 to vector<4x16xf32>
    %603 = arith.mulf %602, %601 : vector<4x16xf32>
    %604 = arith.addf %584, %603 : vector<4x16xf32>
    %c135 = arith.constant 135 : index
    %605 = memref.load %arg1[%c135] : memref<297xf32, #tpu.memory_space<smem>>
    %606 = vector.extract_strided_slice %579 {offsets = [5, 0], sizes = [4, 16], strides = [1, 1]} : vector<10x16xf32> to vector<4x16xf32>
    %607 = vector.broadcast %605 : f32 to vector<4x16xf32>
    %608 = arith.mulf %607, %606 : vector<4x16xf32>
    %609 = arith.addf %589, %608 : vector<4x16xf32>
    %c142 = arith.constant 142 : index
    %610 = memref.load %arg1[%c142] : memref<297xf32, #tpu.memory_space<smem>>
    %611 = vector.extract_strided_slice %579 {offsets = [6, 0], sizes = [4, 16], strides = [1, 1]} : vector<10x16xf32> to vector<4x16xf32>
    %612 = vector.broadcast %610 : f32 to vector<4x16xf32>
    %613 = arith.mulf %612, %611 : vector<4x16xf32>
    %614 = arith.addf %594, %613 : vector<4x16xf32>
    %615 = vector.extract_strided_slice %542 {offsets = [0, 2], sizes = [10, 16], strides = [1, 1]} : vector<10x22xf32> to vector<10x16xf32>
    %c101 = arith.constant 101 : index
    %616 = memref.load %arg1[%c101] : memref<297xf32, #tpu.memory_space<smem>>
    %617 = vector.extract_strided_slice %615 {offsets = [0, 0], sizes = [4, 16], strides = [1, 1]} : vector<10x16xf32> to vector<4x16xf32>
    %618 = vector.broadcast %616 : f32 to vector<4x16xf32>
    %619 = arith.mulf %618, %617 : vector<4x16xf32>
    %620 = arith.addf %599, %619 : vector<4x16xf32>
    %c108 = arith.constant 108 : index
    %621 = memref.load %arg1[%c108] : memref<297xf32, #tpu.memory_space<smem>>
    %622 = vector.extract_strided_slice %615 {offsets = [1, 0], sizes = [4, 16], strides = [1, 1]} : vector<10x16xf32> to vector<4x16xf32>
    %623 = vector.broadcast %621 : f32 to vector<4x16xf32>
    %624 = arith.mulf %623, %622 : vector<4x16xf32>
    %625 = arith.addf %604, %624 : vector<4x16xf32>
    %c115 = arith.constant 115 : index
    %626 = memref.load %arg1[%c115] : memref<297xf32, #tpu.memory_space<smem>>
    %627 = vector.extract_strided_slice %615 {offsets = [2, 0], sizes = [4, 16], strides = [1, 1]} : vector<10x16xf32> to vector<4x16xf32>
    %628 = vector.broadcast %626 : f32 to vector<4x16xf32>
    %629 = arith.mulf %628, %627 : vector<4x16xf32>
    %630 = arith.addf %609, %629 : vector<4x16xf32>
    %c122 = arith.constant 122 : index
    %631 = memref.load %arg1[%c122] : memref<297xf32, #tpu.memory_space<smem>>
    %632 = vector.extract_strided_slice %615 {offsets = [3, 0], sizes = [4, 16], strides = [1, 1]} : vector<10x16xf32> to vector<4x16xf32>
    %633 = vector.broadcast %631 : f32 to vector<4x16xf32>
    %634 = arith.mulf %633, %632 : vector<4x16xf32>
    %635 = arith.addf %614, %634 : vector<4x16xf32>
    %c129 = arith.constant 129 : index
    %636 = memref.load %arg1[%c129] : memref<297xf32, #tpu.memory_space<smem>>
    %637 = vector.extract_strided_slice %615 {offsets = [4, 0], sizes = [4, 16], strides = [1, 1]} : vector<10x16xf32> to vector<4x16xf32>
    %638 = vector.broadcast %636 : f32 to vector<4x16xf32>
    %639 = arith.mulf %638, %637 : vector<4x16xf32>
    %640 = arith.addf %620, %639 : vector<4x16xf32>
    %c136 = arith.constant 136 : index
    %641 = memref.load %arg1[%c136] : memref<297xf32, #tpu.memory_space<smem>>
    %642 = vector.extract_strided_slice %615 {offsets = [5, 0], sizes = [4, 16], strides = [1, 1]} : vector<10x16xf32> to vector<4x16xf32>
    %643 = vector.broadcast %641 : f32 to vector<4x16xf32>
    %644 = arith.mulf %643, %642 : vector<4x16xf32>
    %645 = arith.addf %625, %644 : vector<4x16xf32>
    %c143 = arith.constant 143 : index
    %646 = memref.load %arg1[%c143] : memref<297xf32, #tpu.memory_space<smem>>
    %647 = vector.extract_strided_slice %615 {offsets = [6, 0], sizes = [4, 16], strides = [1, 1]} : vector<10x16xf32> to vector<4x16xf32>
    %648 = vector.broadcast %646 : f32 to vector<4x16xf32>
    %649 = arith.mulf %648, %647 : vector<4x16xf32>
    %650 = arith.addf %630, %649 : vector<4x16xf32>
    %651 = vector.extract_strided_slice %542 {offsets = [0, 3], sizes = [10, 16], strides = [1, 1]} : vector<10x22xf32> to vector<10x16xf32>
    %c102 = arith.constant 102 : index
    %652 = memref.load %arg1[%c102] : memref<297xf32, #tpu.memory_space<smem>>
    %653 = vector.extract_strided_slice %651 {offsets = [0, 0], sizes = [4, 16], strides = [1, 1]} : vector<10x16xf32> to vector<4x16xf32>
    %654 = vector.broadcast %652 : f32 to vector<4x16xf32>
    %655 = arith.mulf %654, %653 : vector<4x16xf32>
    %656 = arith.addf %635, %655 : vector<4x16xf32>
    %c109 = arith.constant 109 : index
    %657 = memref.load %arg1[%c109] : memref<297xf32, #tpu.memory_space<smem>>
    %658 = vector.extract_strided_slice %651 {offsets = [1, 0], sizes = [4, 16], strides = [1, 1]} : vector<10x16xf32> to vector<4x16xf32>
    %659 = vector.broadcast %657 : f32 to vector<4x16xf32>
    %660 = arith.mulf %659, %658 : vector<4x16xf32>
    %661 = arith.addf %640, %660 : vector<4x16xf32>
    %c116 = arith.constant 116 : index
    %662 = memref.load %arg1[%c116] : memref<297xf32, #tpu.memory_space<smem>>
    %663 = vector.extract_strided_slice %651 {offsets = [2, 0], sizes = [4, 16], strides = [1, 1]} : vector<10x16xf32> to vector<4x16xf32>
    %664 = vector.broadcast %662 : f32 to vector<4x16xf32>
    %665 = arith.mulf %664, %663 : vector<4x16xf32>
    %666 = arith.addf %645, %665 : vector<4x16xf32>
    %c123 = arith.constant 123 : index
    %667 = memref.load %arg1[%c123] : memref<297xf32, #tpu.memory_space<smem>>
    %668 = vector.extract_strided_slice %651 {offsets = [3, 0], sizes = [4, 16], strides = [1, 1]} : vector<10x16xf32> to vector<4x16xf32>
    %669 = vector.broadcast %667 : f32 to vector<4x16xf32>
    %670 = arith.mulf %669, %668 : vector<4x16xf32>
    %671 = arith.addf %650, %670 : vector<4x16xf32>
    %c130 = arith.constant 130 : index
    %672 = memref.load %arg1[%c130] : memref<297xf32, #tpu.memory_space<smem>>
    %673 = vector.extract_strided_slice %651 {offsets = [4, 0], sizes = [4, 16], strides = [1, 1]} : vector<10x16xf32> to vector<4x16xf32>
    %674 = vector.broadcast %672 : f32 to vector<4x16xf32>
    %675 = arith.mulf %674, %673 : vector<4x16xf32>
    %676 = arith.addf %656, %675 : vector<4x16xf32>
    %c137 = arith.constant 137 : index
    %677 = memref.load %arg1[%c137] : memref<297xf32, #tpu.memory_space<smem>>
    %678 = vector.extract_strided_slice %651 {offsets = [5, 0], sizes = [4, 16], strides = [1, 1]} : vector<10x16xf32> to vector<4x16xf32>
    %679 = vector.broadcast %677 : f32 to vector<4x16xf32>
    %680 = arith.mulf %679, %678 : vector<4x16xf32>
    %681 = arith.addf %661, %680 : vector<4x16xf32>
    %c144 = arith.constant 144 : index
    %682 = memref.load %arg1[%c144] : memref<297xf32, #tpu.memory_space<smem>>
    %683 = vector.extract_strided_slice %651 {offsets = [6, 0], sizes = [4, 16], strides = [1, 1]} : vector<10x16xf32> to vector<4x16xf32>
    %684 = vector.broadcast %682 : f32 to vector<4x16xf32>
    %685 = arith.mulf %684, %683 : vector<4x16xf32>
    %686 = arith.addf %666, %685 : vector<4x16xf32>
    %687 = vector.extract_strided_slice %542 {offsets = [0, 4], sizes = [10, 16], strides = [1, 1]} : vector<10x22xf32> to vector<10x16xf32>
    %c103 = arith.constant 103 : index
    %688 = memref.load %arg1[%c103] : memref<297xf32, #tpu.memory_space<smem>>
    %689 = vector.extract_strided_slice %687 {offsets = [0, 0], sizes = [4, 16], strides = [1, 1]} : vector<10x16xf32> to vector<4x16xf32>
    %690 = vector.broadcast %688 : f32 to vector<4x16xf32>
    %691 = arith.mulf %690, %689 : vector<4x16xf32>
    %692 = arith.addf %671, %691 : vector<4x16xf32>
    %c110 = arith.constant 110 : index
    %693 = memref.load %arg1[%c110] : memref<297xf32, #tpu.memory_space<smem>>
    %694 = vector.extract_strided_slice %687 {offsets = [1, 0], sizes = [4, 16], strides = [1, 1]} : vector<10x16xf32> to vector<4x16xf32>
    %695 = vector.broadcast %693 : f32 to vector<4x16xf32>
    %696 = arith.mulf %695, %694 : vector<4x16xf32>
    %697 = arith.addf %676, %696 : vector<4x16xf32>
    %c117 = arith.constant 117 : index
    %698 = memref.load %arg1[%c117] : memref<297xf32, #tpu.memory_space<smem>>
    %699 = vector.extract_strided_slice %687 {offsets = [2, 0], sizes = [4, 16], strides = [1, 1]} : vector<10x16xf32> to vector<4x16xf32>
    %700 = vector.broadcast %698 : f32 to vector<4x16xf32>
    %701 = arith.mulf %700, %699 : vector<4x16xf32>
    %702 = arith.addf %681, %701 : vector<4x16xf32>
    %c124 = arith.constant 124 : index
    %703 = memref.load %arg1[%c124] : memref<297xf32, #tpu.memory_space<smem>>
    %704 = vector.extract_strided_slice %687 {offsets = [3, 0], sizes = [4, 16], strides = [1, 1]} : vector<10x16xf32> to vector<4x16xf32>
    %705 = vector.broadcast %703 : f32 to vector<4x16xf32>
    %706 = arith.mulf %705, %704 : vector<4x16xf32>
    %707 = arith.addf %686, %706 : vector<4x16xf32>
    %c131 = arith.constant 131 : index
    %708 = memref.load %arg1[%c131] : memref<297xf32, #tpu.memory_space<smem>>
    %709 = vector.extract_strided_slice %687 {offsets = [4, 0], sizes = [4, 16], strides = [1, 1]} : vector<10x16xf32> to vector<4x16xf32>
    %710 = vector.broadcast %708 : f32 to vector<4x16xf32>
    %711 = arith.mulf %710, %709 : vector<4x16xf32>
    %712 = arith.addf %692, %711 : vector<4x16xf32>
    %c138 = arith.constant 138 : index
    %713 = memref.load %arg1[%c138] : memref<297xf32, #tpu.memory_space<smem>>
    %714 = vector.extract_strided_slice %687 {offsets = [5, 0], sizes = [4, 16], strides = [1, 1]} : vector<10x16xf32> to vector<4x16xf32>
    %715 = vector.broadcast %713 : f32 to vector<4x16xf32>
    %716 = arith.mulf %715, %714 : vector<4x16xf32>
    %717 = arith.addf %697, %716 : vector<4x16xf32>
    %c145 = arith.constant 145 : index
    %718 = memref.load %arg1[%c145] : memref<297xf32, #tpu.memory_space<smem>>
    %719 = vector.extract_strided_slice %687 {offsets = [6, 0], sizes = [4, 16], strides = [1, 1]} : vector<10x16xf32> to vector<4x16xf32>
    %720 = vector.broadcast %718 : f32 to vector<4x16xf32>
    %721 = arith.mulf %720, %719 : vector<4x16xf32>
    %722 = arith.addf %702, %721 : vector<4x16xf32>
    %723 = vector.extract_strided_slice %542 {offsets = [0, 5], sizes = [10, 16], strides = [1, 1]} : vector<10x22xf32> to vector<10x16xf32>
    %c104 = arith.constant 104 : index
    %724 = memref.load %arg1[%c104] : memref<297xf32, #tpu.memory_space<smem>>
    %725 = vector.extract_strided_slice %723 {offsets = [0, 0], sizes = [4, 16], strides = [1, 1]} : vector<10x16xf32> to vector<4x16xf32>
    %726 = vector.broadcast %724 : f32 to vector<4x16xf32>
    %727 = arith.mulf %726, %725 : vector<4x16xf32>
    %728 = arith.addf %707, %727 : vector<4x16xf32>
    %c111 = arith.constant 111 : index
    %729 = memref.load %arg1[%c111] : memref<297xf32, #tpu.memory_space<smem>>
    %730 = vector.extract_strided_slice %723 {offsets = [1, 0], sizes = [4, 16], strides = [1, 1]} : vector<10x16xf32> to vector<4x16xf32>
    %731 = vector.broadcast %729 : f32 to vector<4x16xf32>
    %732 = arith.mulf %731, %730 : vector<4x16xf32>
    %733 = arith.addf %712, %732 : vector<4x16xf32>
    %c118 = arith.constant 118 : index
    %734 = memref.load %arg1[%c118] : memref<297xf32, #tpu.memory_space<smem>>
    %735 = vector.extract_strided_slice %723 {offsets = [2, 0], sizes = [4, 16], strides = [1, 1]} : vector<10x16xf32> to vector<4x16xf32>
    %736 = vector.broadcast %734 : f32 to vector<4x16xf32>
    %737 = arith.mulf %736, %735 : vector<4x16xf32>
    %738 = arith.addf %717, %737 : vector<4x16xf32>
    %c125 = arith.constant 125 : index
    %739 = memref.load %arg1[%c125] : memref<297xf32, #tpu.memory_space<smem>>
    %740 = vector.extract_strided_slice %723 {offsets = [3, 0], sizes = [4, 16], strides = [1, 1]} : vector<10x16xf32> to vector<4x16xf32>
    %741 = vector.broadcast %739 : f32 to vector<4x16xf32>
    %742 = arith.mulf %741, %740 : vector<4x16xf32>
    %743 = arith.addf %722, %742 : vector<4x16xf32>
    %c132 = arith.constant 132 : index
    %744 = memref.load %arg1[%c132] : memref<297xf32, #tpu.memory_space<smem>>
    %745 = vector.extract_strided_slice %723 {offsets = [4, 0], sizes = [4, 16], strides = [1, 1]} : vector<10x16xf32> to vector<4x16xf32>
    %746 = vector.broadcast %744 : f32 to vector<4x16xf32>
    %747 = arith.mulf %746, %745 : vector<4x16xf32>
    %748 = arith.addf %728, %747 : vector<4x16xf32>
    %c139 = arith.constant 139 : index
    %749 = memref.load %arg1[%c139] : memref<297xf32, #tpu.memory_space<smem>>
    %750 = vector.extract_strided_slice %723 {offsets = [5, 0], sizes = [4, 16], strides = [1, 1]} : vector<10x16xf32> to vector<4x16xf32>
    %751 = vector.broadcast %749 : f32 to vector<4x16xf32>
    %752 = arith.mulf %751, %750 : vector<4x16xf32>
    %753 = arith.addf %733, %752 : vector<4x16xf32>
    %c146 = arith.constant 146 : index
    %754 = memref.load %arg1[%c146] : memref<297xf32, #tpu.memory_space<smem>>
    %755 = vector.extract_strided_slice %723 {offsets = [6, 0], sizes = [4, 16], strides = [1, 1]} : vector<10x16xf32> to vector<4x16xf32>
    %756 = vector.broadcast %754 : f32 to vector<4x16xf32>
    %757 = arith.mulf %756, %755 : vector<4x16xf32>
    %758 = arith.addf %738, %757 : vector<4x16xf32>
    %759 = vector.extract_strided_slice %542 {offsets = [0, 6], sizes = [10, 16], strides = [1, 1]} : vector<10x22xf32> to vector<10x16xf32>
    %c105 = arith.constant 105 : index
    %760 = memref.load %arg1[%c105] : memref<297xf32, #tpu.memory_space<smem>>
    %761 = vector.extract_strided_slice %759 {offsets = [0, 0], sizes = [4, 16], strides = [1, 1]} : vector<10x16xf32> to vector<4x16xf32>
    %762 = vector.broadcast %760 : f32 to vector<4x16xf32>
    %763 = arith.mulf %762, %761 : vector<4x16xf32>
    %764 = arith.addf %743, %763 : vector<4x16xf32>
    %c112 = arith.constant 112 : index
    %765 = memref.load %arg1[%c112] : memref<297xf32, #tpu.memory_space<smem>>
    %766 = vector.extract_strided_slice %759 {offsets = [1, 0], sizes = [4, 16], strides = [1, 1]} : vector<10x16xf32> to vector<4x16xf32>
    %767 = vector.broadcast %765 : f32 to vector<4x16xf32>
    %768 = arith.mulf %767, %766 : vector<4x16xf32>
    %769 = arith.addf %748, %768 : vector<4x16xf32>
    %c119 = arith.constant 119 : index
    %770 = memref.load %arg1[%c119] : memref<297xf32, #tpu.memory_space<smem>>
    %771 = vector.extract_strided_slice %759 {offsets = [2, 0], sizes = [4, 16], strides = [1, 1]} : vector<10x16xf32> to vector<4x16xf32>
    %772 = vector.broadcast %770 : f32 to vector<4x16xf32>
    %773 = arith.mulf %772, %771 : vector<4x16xf32>
    %774 = arith.addf %753, %773 : vector<4x16xf32>
    %c126 = arith.constant 126 : index
    %775 = memref.load %arg1[%c126] : memref<297xf32, #tpu.memory_space<smem>>
    %776 = vector.extract_strided_slice %759 {offsets = [3, 0], sizes = [4, 16], strides = [1, 1]} : vector<10x16xf32> to vector<4x16xf32>
    %777 = vector.broadcast %775 : f32 to vector<4x16xf32>
    %778 = arith.mulf %777, %776 : vector<4x16xf32>
    %779 = arith.addf %758, %778 : vector<4x16xf32>
    %c133 = arith.constant 133 : index
    %780 = memref.load %arg1[%c133] : memref<297xf32, #tpu.memory_space<smem>>
    %781 = vector.extract_strided_slice %759 {offsets = [4, 0], sizes = [4, 16], strides = [1, 1]} : vector<10x16xf32> to vector<4x16xf32>
    %782 = vector.broadcast %780 : f32 to vector<4x16xf32>
    %783 = arith.mulf %782, %781 : vector<4x16xf32>
    %784 = arith.addf %764, %783 : vector<4x16xf32>
    %c140 = arith.constant 140 : index
    %785 = memref.load %arg1[%c140] : memref<297xf32, #tpu.memory_space<smem>>
    %786 = vector.extract_strided_slice %759 {offsets = [5, 0], sizes = [4, 16], strides = [1, 1]} : vector<10x16xf32> to vector<4x16xf32>
    %787 = vector.broadcast %785 : f32 to vector<4x16xf32>
    %788 = arith.mulf %787, %786 : vector<4x16xf32>
    %789 = arith.addf %769, %788 : vector<4x16xf32>
    %c147 = arith.constant 147 : index
    %790 = memref.load %arg1[%c147] : memref<297xf32, #tpu.memory_space<smem>>
    %791 = vector.extract_strided_slice %759 {offsets = [6, 0], sizes = [4, 16], strides = [1, 1]} : vector<10x16xf32> to vector<4x16xf32>
    %792 = vector.broadcast %790 : f32 to vector<4x16xf32>
    %793 = arith.mulf %792, %791 : vector<4x16xf32>
    %794 = arith.addf %774, %793 : vector<4x16xf32>
    %795 = vector.extract_strided_slice %546 {offsets = [0, 0], sizes = [10, 16], strides = [1, 1]} : vector<10x22xf32> to vector<10x16xf32>
    %c148 = arith.constant 148 : index
    %796 = memref.load %arg1[%c148] : memref<297xf32, #tpu.memory_space<smem>>
    %797 = vector.extract_strided_slice %795 {offsets = [0, 0], sizes = [4, 16], strides = [1, 1]} : vector<10x16xf32> to vector<4x16xf32>
    %798 = vector.broadcast %796 : f32 to vector<4x16xf32>
    %799 = arith.mulf %798, %797 : vector<4x16xf32>
    %800 = arith.addf %779, %799 : vector<4x16xf32>
    %c155 = arith.constant 155 : index
    %801 = memref.load %arg1[%c155] : memref<297xf32, #tpu.memory_space<smem>>
    %802 = vector.extract_strided_slice %795 {offsets = [1, 0], sizes = [4, 16], strides = [1, 1]} : vector<10x16xf32> to vector<4x16xf32>
    %803 = vector.broadcast %801 : f32 to vector<4x16xf32>
    %804 = arith.mulf %803, %802 : vector<4x16xf32>
    %805 = arith.addf %784, %804 : vector<4x16xf32>
    %c162 = arith.constant 162 : index
    %806 = memref.load %arg1[%c162] : memref<297xf32, #tpu.memory_space<smem>>
    %807 = vector.extract_strided_slice %795 {offsets = [2, 0], sizes = [4, 16], strides = [1, 1]} : vector<10x16xf32> to vector<4x16xf32>
    %808 = vector.broadcast %806 : f32 to vector<4x16xf32>
    %809 = arith.mulf %808, %807 : vector<4x16xf32>
    %810 = arith.addf %789, %809 : vector<4x16xf32>
    %c169 = arith.constant 169 : index
    %811 = memref.load %arg1[%c169] : memref<297xf32, #tpu.memory_space<smem>>
    %812 = vector.extract_strided_slice %795 {offsets = [3, 0], sizes = [4, 16], strides = [1, 1]} : vector<10x16xf32> to vector<4x16xf32>
    %813 = vector.broadcast %811 : f32 to vector<4x16xf32>
    %814 = arith.mulf %813, %812 : vector<4x16xf32>
    %815 = arith.addf %794, %814 : vector<4x16xf32>
    %c176 = arith.constant 176 : index
    %816 = memref.load %arg1[%c176] : memref<297xf32, #tpu.memory_space<smem>>
    %817 = vector.extract_strided_slice %795 {offsets = [4, 0], sizes = [4, 16], strides = [1, 1]} : vector<10x16xf32> to vector<4x16xf32>
    %818 = vector.broadcast %816 : f32 to vector<4x16xf32>
    %819 = arith.mulf %818, %817 : vector<4x16xf32>
    %820 = arith.addf %800, %819 : vector<4x16xf32>
    %c183 = arith.constant 183 : index
    %821 = memref.load %arg1[%c183] : memref<297xf32, #tpu.memory_space<smem>>
    %822 = vector.extract_strided_slice %795 {offsets = [5, 0], sizes = [4, 16], strides = [1, 1]} : vector<10x16xf32> to vector<4x16xf32>
    %823 = vector.broadcast %821 : f32 to vector<4x16xf32>
    %824 = arith.mulf %823, %822 : vector<4x16xf32>
    %825 = arith.addf %805, %824 : vector<4x16xf32>
    %c190 = arith.constant 190 : index
    %826 = memref.load %arg1[%c190] : memref<297xf32, #tpu.memory_space<smem>>
    %827 = vector.extract_strided_slice %795 {offsets = [6, 0], sizes = [4, 16], strides = [1, 1]} : vector<10x16xf32> to vector<4x16xf32>
    %828 = vector.broadcast %826 : f32 to vector<4x16xf32>
    %829 = arith.mulf %828, %827 : vector<4x16xf32>
    %830 = arith.addf %810, %829 : vector<4x16xf32>
    %831 = vector.extract_strided_slice %546 {offsets = [0, 1], sizes = [10, 16], strides = [1, 1]} : vector<10x22xf32> to vector<10x16xf32>
    %c149 = arith.constant 149 : index
    %832 = memref.load %arg1[%c149] : memref<297xf32, #tpu.memory_space<smem>>
    %833 = vector.extract_strided_slice %831 {offsets = [0, 0], sizes = [4, 16], strides = [1, 1]} : vector<10x16xf32> to vector<4x16xf32>
    %834 = vector.broadcast %832 : f32 to vector<4x16xf32>
    %835 = arith.mulf %834, %833 : vector<4x16xf32>
    %836 = arith.addf %815, %835 : vector<4x16xf32>
    %c156 = arith.constant 156 : index
    %837 = memref.load %arg1[%c156] : memref<297xf32, #tpu.memory_space<smem>>
    %838 = vector.extract_strided_slice %831 {offsets = [1, 0], sizes = [4, 16], strides = [1, 1]} : vector<10x16xf32> to vector<4x16xf32>
    %839 = vector.broadcast %837 : f32 to vector<4x16xf32>
    %840 = arith.mulf %839, %838 : vector<4x16xf32>
    %841 = arith.addf %820, %840 : vector<4x16xf32>
    %c163 = arith.constant 163 : index
    %842 = memref.load %arg1[%c163] : memref<297xf32, #tpu.memory_space<smem>>
    %843 = vector.extract_strided_slice %831 {offsets = [2, 0], sizes = [4, 16], strides = [1, 1]} : vector<10x16xf32> to vector<4x16xf32>
    %844 = vector.broadcast %842 : f32 to vector<4x16xf32>
    %845 = arith.mulf %844, %843 : vector<4x16xf32>
    %846 = arith.addf %825, %845 : vector<4x16xf32>
    %c170 = arith.constant 170 : index
    %847 = memref.load %arg1[%c170] : memref<297xf32, #tpu.memory_space<smem>>
    %848 = vector.extract_strided_slice %831 {offsets = [3, 0], sizes = [4, 16], strides = [1, 1]} : vector<10x16xf32> to vector<4x16xf32>
    %849 = vector.broadcast %847 : f32 to vector<4x16xf32>
    %850 = arith.mulf %849, %848 : vector<4x16xf32>
    %851 = arith.addf %830, %850 : vector<4x16xf32>
    %c177 = arith.constant 177 : index
    %852 = memref.load %arg1[%c177] : memref<297xf32, #tpu.memory_space<smem>>
    %853 = vector.extract_strided_slice %831 {offsets = [4, 0], sizes = [4, 16], strides = [1, 1]} : vector<10x16xf32> to vector<4x16xf32>
    %854 = vector.broadcast %852 : f32 to vector<4x16xf32>
    %855 = arith.mulf %854, %853 : vector<4x16xf32>
    %856 = arith.addf %836, %855 : vector<4x16xf32>
    %c184 = arith.constant 184 : index
    %857 = memref.load %arg1[%c184] : memref<297xf32, #tpu.memory_space<smem>>
    %858 = vector.extract_strided_slice %831 {offsets = [5, 0], sizes = [4, 16], strides = [1, 1]} : vector<10x16xf32> to vector<4x16xf32>
    %859 = vector.broadcast %857 : f32 to vector<4x16xf32>
    %860 = arith.mulf %859, %858 : vector<4x16xf32>
    %861 = arith.addf %841, %860 : vector<4x16xf32>
    %c191 = arith.constant 191 : index
    %862 = memref.load %arg1[%c191] : memref<297xf32, #tpu.memory_space<smem>>
    %863 = vector.extract_strided_slice %831 {offsets = [6, 0], sizes = [4, 16], strides = [1, 1]} : vector<10x16xf32> to vector<4x16xf32>
    %864 = vector.broadcast %862 : f32 to vector<4x16xf32>
    %865 = arith.mulf %864, %863 : vector<4x16xf32>
    %866 = arith.addf %846, %865 : vector<4x16xf32>
    %867 = vector.extract_strided_slice %546 {offsets = [0, 2], sizes = [10, 16], strides = [1, 1]} : vector<10x22xf32> to vector<10x16xf32>
    %c150 = arith.constant 150 : index
    %868 = memref.load %arg1[%c150] : memref<297xf32, #tpu.memory_space<smem>>
    %869 = vector.extract_strided_slice %867 {offsets = [0, 0], sizes = [4, 16], strides = [1, 1]} : vector<10x16xf32> to vector<4x16xf32>
    %870 = vector.broadcast %868 : f32 to vector<4x16xf32>
    %871 = arith.mulf %870, %869 : vector<4x16xf32>
    %872 = arith.addf %851, %871 : vector<4x16xf32>
    %c157 = arith.constant 157 : index
    %873 = memref.load %arg1[%c157] : memref<297xf32, #tpu.memory_space<smem>>
    %874 = vector.extract_strided_slice %867 {offsets = [1, 0], sizes = [4, 16], strides = [1, 1]} : vector<10x16xf32> to vector<4x16xf32>
    %875 = vector.broadcast %873 : f32 to vector<4x16xf32>
    %876 = arith.mulf %875, %874 : vector<4x16xf32>
    %877 = arith.addf %856, %876 : vector<4x16xf32>
    %c164 = arith.constant 164 : index
    %878 = memref.load %arg1[%c164] : memref<297xf32, #tpu.memory_space<smem>>
    %879 = vector.extract_strided_slice %867 {offsets = [2, 0], sizes = [4, 16], strides = [1, 1]} : vector<10x16xf32> to vector<4x16xf32>
    %880 = vector.broadcast %878 : f32 to vector<4x16xf32>
    %881 = arith.mulf %880, %879 : vector<4x16xf32>
    %882 = arith.addf %861, %881 : vector<4x16xf32>
    %c171 = arith.constant 171 : index
    %883 = memref.load %arg1[%c171] : memref<297xf32, #tpu.memory_space<smem>>
    %884 = vector.extract_strided_slice %867 {offsets = [3, 0], sizes = [4, 16], strides = [1, 1]} : vector<10x16xf32> to vector<4x16xf32>
    %885 = vector.broadcast %883 : f32 to vector<4x16xf32>
    %886 = arith.mulf %885, %884 : vector<4x16xf32>
    %887 = arith.addf %866, %886 : vector<4x16xf32>
    %c178 = arith.constant 178 : index
    %888 = memref.load %arg1[%c178] : memref<297xf32, #tpu.memory_space<smem>>
    %889 = vector.extract_strided_slice %867 {offsets = [4, 0], sizes = [4, 16], strides = [1, 1]} : vector<10x16xf32> to vector<4x16xf32>
    %890 = vector.broadcast %888 : f32 to vector<4x16xf32>
    %891 = arith.mulf %890, %889 : vector<4x16xf32>
    %892 = arith.addf %872, %891 : vector<4x16xf32>
    %c185 = arith.constant 185 : index
    %893 = memref.load %arg1[%c185] : memref<297xf32, #tpu.memory_space<smem>>
    %894 = vector.extract_strided_slice %867 {offsets = [5, 0], sizes = [4, 16], strides = [1, 1]} : vector<10x16xf32> to vector<4x16xf32>
    %895 = vector.broadcast %893 : f32 to vector<4x16xf32>
    %896 = arith.mulf %895, %894 : vector<4x16xf32>
    %897 = arith.addf %877, %896 : vector<4x16xf32>
    %c192 = arith.constant 192 : index
    %898 = memref.load %arg1[%c192] : memref<297xf32, #tpu.memory_space<smem>>
    %899 = vector.extract_strided_slice %867 {offsets = [6, 0], sizes = [4, 16], strides = [1, 1]} : vector<10x16xf32> to vector<4x16xf32>
    %900 = vector.broadcast %898 : f32 to vector<4x16xf32>
    %901 = arith.mulf %900, %899 : vector<4x16xf32>
    %902 = arith.addf %882, %901 : vector<4x16xf32>
    %903 = vector.extract_strided_slice %546 {offsets = [0, 3], sizes = [10, 16], strides = [1, 1]} : vector<10x22xf32> to vector<10x16xf32>
    %c151 = arith.constant 151 : index
    %904 = memref.load %arg1[%c151] : memref<297xf32, #tpu.memory_space<smem>>
    %905 = vector.extract_strided_slice %903 {offsets = [0, 0], sizes = [4, 16], strides = [1, 1]} : vector<10x16xf32> to vector<4x16xf32>
    %906 = vector.broadcast %904 : f32 to vector<4x16xf32>
    %907 = arith.mulf %906, %905 : vector<4x16xf32>
    %908 = arith.addf %887, %907 : vector<4x16xf32>
    %c158 = arith.constant 158 : index
    %909 = memref.load %arg1[%c158] : memref<297xf32, #tpu.memory_space<smem>>
    %910 = vector.extract_strided_slice %903 {offsets = [1, 0], sizes = [4, 16], strides = [1, 1]} : vector<10x16xf32> to vector<4x16xf32>
    %911 = vector.broadcast %909 : f32 to vector<4x16xf32>
    %912 = arith.mulf %911, %910 : vector<4x16xf32>
    %913 = arith.addf %892, %912 : vector<4x16xf32>
    %c165 = arith.constant 165 : index
    %914 = memref.load %arg1[%c165] : memref<297xf32, #tpu.memory_space<smem>>
    %915 = vector.extract_strided_slice %903 {offsets = [2, 0], sizes = [4, 16], strides = [1, 1]} : vector<10x16xf32> to vector<4x16xf32>
    %916 = vector.broadcast %914 : f32 to vector<4x16xf32>
    %917 = arith.mulf %916, %915 : vector<4x16xf32>
    %918 = arith.addf %897, %917 : vector<4x16xf32>
    %c172 = arith.constant 172 : index
    %919 = memref.load %arg1[%c172] : memref<297xf32, #tpu.memory_space<smem>>
    %920 = vector.extract_strided_slice %903 {offsets = [3, 0], sizes = [4, 16], strides = [1, 1]} : vector<10x16xf32> to vector<4x16xf32>
    %921 = vector.broadcast %919 : f32 to vector<4x16xf32>
    %922 = arith.mulf %921, %920 : vector<4x16xf32>
    %923 = arith.addf %902, %922 : vector<4x16xf32>
    %c179 = arith.constant 179 : index
    %924 = memref.load %arg1[%c179] : memref<297xf32, #tpu.memory_space<smem>>
    %925 = vector.extract_strided_slice %903 {offsets = [4, 0], sizes = [4, 16], strides = [1, 1]} : vector<10x16xf32> to vector<4x16xf32>
    %926 = vector.broadcast %924 : f32 to vector<4x16xf32>
    %927 = arith.mulf %926, %925 : vector<4x16xf32>
    %928 = arith.addf %908, %927 : vector<4x16xf32>
    %c186 = arith.constant 186 : index
    %929 = memref.load %arg1[%c186] : memref<297xf32, #tpu.memory_space<smem>>
    %930 = vector.extract_strided_slice %903 {offsets = [5, 0], sizes = [4, 16], strides = [1, 1]} : vector<10x16xf32> to vector<4x16xf32>
    %931 = vector.broadcast %929 : f32 to vector<4x16xf32>
    %932 = arith.mulf %931, %930 : vector<4x16xf32>
    %933 = arith.addf %913, %932 : vector<4x16xf32>
    %c193 = arith.constant 193 : index
    %934 = memref.load %arg1[%c193] : memref<297xf32, #tpu.memory_space<smem>>
    %935 = vector.extract_strided_slice %903 {offsets = [6, 0], sizes = [4, 16], strides = [1, 1]} : vector<10x16xf32> to vector<4x16xf32>
    %936 = vector.broadcast %934 : f32 to vector<4x16xf32>
    %937 = arith.mulf %936, %935 : vector<4x16xf32>
    %938 = arith.addf %918, %937 : vector<4x16xf32>
    %939 = vector.extract_strided_slice %546 {offsets = [0, 4], sizes = [10, 16], strides = [1, 1]} : vector<10x22xf32> to vector<10x16xf32>
    %c152 = arith.constant 152 : index
    %940 = memref.load %arg1[%c152] : memref<297xf32, #tpu.memory_space<smem>>
    %941 = vector.extract_strided_slice %939 {offsets = [0, 0], sizes = [4, 16], strides = [1, 1]} : vector<10x16xf32> to vector<4x16xf32>
    %942 = vector.broadcast %940 : f32 to vector<4x16xf32>
    %943 = arith.mulf %942, %941 : vector<4x16xf32>
    %944 = arith.addf %923, %943 : vector<4x16xf32>
    %c159 = arith.constant 159 : index
    %945 = memref.load %arg1[%c159] : memref<297xf32, #tpu.memory_space<smem>>
    %946 = vector.extract_strided_slice %939 {offsets = [1, 0], sizes = [4, 16], strides = [1, 1]} : vector<10x16xf32> to vector<4x16xf32>
    %947 = vector.broadcast %945 : f32 to vector<4x16xf32>
    %948 = arith.mulf %947, %946 : vector<4x16xf32>
    %949 = arith.addf %928, %948 : vector<4x16xf32>
    %c166 = arith.constant 166 : index
    %950 = memref.load %arg1[%c166] : memref<297xf32, #tpu.memory_space<smem>>
    %951 = vector.extract_strided_slice %939 {offsets = [2, 0], sizes = [4, 16], strides = [1, 1]} : vector<10x16xf32> to vector<4x16xf32>
    %952 = vector.broadcast %950 : f32 to vector<4x16xf32>
    %953 = arith.mulf %952, %951 : vector<4x16xf32>
    %954 = arith.addf %933, %953 : vector<4x16xf32>
    %c173 = arith.constant 173 : index
    %955 = memref.load %arg1[%c173] : memref<297xf32, #tpu.memory_space<smem>>
    %956 = vector.extract_strided_slice %939 {offsets = [3, 0], sizes = [4, 16], strides = [1, 1]} : vector<10x16xf32> to vector<4x16xf32>
    %957 = vector.broadcast %955 : f32 to vector<4x16xf32>
    %958 = arith.mulf %957, %956 : vector<4x16xf32>
    %959 = arith.addf %938, %958 : vector<4x16xf32>
    %c180 = arith.constant 180 : index
    %960 = memref.load %arg1[%c180] : memref<297xf32, #tpu.memory_space<smem>>
    %961 = vector.extract_strided_slice %939 {offsets = [4, 0], sizes = [4, 16], strides = [1, 1]} : vector<10x16xf32> to vector<4x16xf32>
    %962 = vector.broadcast %960 : f32 to vector<4x16xf32>
    %963 = arith.mulf %962, %961 : vector<4x16xf32>
    %964 = arith.addf %944, %963 : vector<4x16xf32>
    %c187 = arith.constant 187 : index
    %965 = memref.load %arg1[%c187] : memref<297xf32, #tpu.memory_space<smem>>
    %966 = vector.extract_strided_slice %939 {offsets = [5, 0], sizes = [4, 16], strides = [1, 1]} : vector<10x16xf32> to vector<4x16xf32>
    %967 = vector.broadcast %965 : f32 to vector<4x16xf32>
    %968 = arith.mulf %967, %966 : vector<4x16xf32>
    %969 = arith.addf %949, %968 : vector<4x16xf32>
    %c194 = arith.constant 194 : index
    %970 = memref.load %arg1[%c194] : memref<297xf32, #tpu.memory_space<smem>>
    %971 = vector.extract_strided_slice %939 {offsets = [6, 0], sizes = [4, 16], strides = [1, 1]} : vector<10x16xf32> to vector<4x16xf32>
    %972 = vector.broadcast %970 : f32 to vector<4x16xf32>
    %973 = arith.mulf %972, %971 : vector<4x16xf32>
    %974 = arith.addf %954, %973 : vector<4x16xf32>
    %975 = vector.extract_strided_slice %546 {offsets = [0, 5], sizes = [10, 16], strides = [1, 1]} : vector<10x22xf32> to vector<10x16xf32>
    %c153 = arith.constant 153 : index
    %976 = memref.load %arg1[%c153] : memref<297xf32, #tpu.memory_space<smem>>
    %977 = vector.extract_strided_slice %975 {offsets = [0, 0], sizes = [4, 16], strides = [1, 1]} : vector<10x16xf32> to vector<4x16xf32>
    %978 = vector.broadcast %976 : f32 to vector<4x16xf32>
    %979 = arith.mulf %978, %977 : vector<4x16xf32>
    %980 = arith.addf %959, %979 : vector<4x16xf32>
    %c160 = arith.constant 160 : index
    %981 = memref.load %arg1[%c160] : memref<297xf32, #tpu.memory_space<smem>>
    %982 = vector.extract_strided_slice %975 {offsets = [1, 0], sizes = [4, 16], strides = [1, 1]} : vector<10x16xf32> to vector<4x16xf32>
    %983 = vector.broadcast %981 : f32 to vector<4x16xf32>
    %984 = arith.mulf %983, %982 : vector<4x16xf32>
    %985 = arith.addf %964, %984 : vector<4x16xf32>
    %c167 = arith.constant 167 : index
    %986 = memref.load %arg1[%c167] : memref<297xf32, #tpu.memory_space<smem>>
    %987 = vector.extract_strided_slice %975 {offsets = [2, 0], sizes = [4, 16], strides = [1, 1]} : vector<10x16xf32> to vector<4x16xf32>
    %988 = vector.broadcast %986 : f32 to vector<4x16xf32>
    %989 = arith.mulf %988, %987 : vector<4x16xf32>
    %990 = arith.addf %969, %989 : vector<4x16xf32>
    %c174 = arith.constant 174 : index
    %991 = memref.load %arg1[%c174] : memref<297xf32, #tpu.memory_space<smem>>
    %992 = vector.extract_strided_slice %975 {offsets = [3, 0], sizes = [4, 16], strides = [1, 1]} : vector<10x16xf32> to vector<4x16xf32>
    %993 = vector.broadcast %991 : f32 to vector<4x16xf32>
    %994 = arith.mulf %993, %992 : vector<4x16xf32>
    %995 = arith.addf %974, %994 : vector<4x16xf32>
    %c181 = arith.constant 181 : index
    %996 = memref.load %arg1[%c181] : memref<297xf32, #tpu.memory_space<smem>>
    %997 = vector.extract_strided_slice %975 {offsets = [4, 0], sizes = [4, 16], strides = [1, 1]} : vector<10x16xf32> to vector<4x16xf32>
    %998 = vector.broadcast %996 : f32 to vector<4x16xf32>
    %999 = arith.mulf %998, %997 : vector<4x16xf32>
    %1000 = arith.addf %980, %999 : vector<4x16xf32>
    %c188 = arith.constant 188 : index
    %1001 = memref.load %arg1[%c188] : memref<297xf32, #tpu.memory_space<smem>>
    %1002 = vector.extract_strided_slice %975 {offsets = [5, 0], sizes = [4, 16], strides = [1, 1]} : vector<10x16xf32> to vector<4x16xf32>
    %1003 = vector.broadcast %1001 : f32 to vector<4x16xf32>
    %1004 = arith.mulf %1003, %1002 : vector<4x16xf32>
    %1005 = arith.addf %985, %1004 : vector<4x16xf32>
    %c195 = arith.constant 195 : index
    %1006 = memref.load %arg1[%c195] : memref<297xf32, #tpu.memory_space<smem>>
    %1007 = vector.extract_strided_slice %975 {offsets = [6, 0], sizes = [4, 16], strides = [1, 1]} : vector<10x16xf32> to vector<4x16xf32>
    %1008 = vector.broadcast %1006 : f32 to vector<4x16xf32>
    %1009 = arith.mulf %1008, %1007 : vector<4x16xf32>
    %1010 = arith.addf %990, %1009 : vector<4x16xf32>
    %1011 = vector.extract_strided_slice %546 {offsets = [0, 6], sizes = [10, 16], strides = [1, 1]} : vector<10x22xf32> to vector<10x16xf32>
    %c154 = arith.constant 154 : index
    %1012 = memref.load %arg1[%c154] : memref<297xf32, #tpu.memory_space<smem>>
    %1013 = vector.extract_strided_slice %1011 {offsets = [0, 0], sizes = [4, 16], strides = [1, 1]} : vector<10x16xf32> to vector<4x16xf32>
    %1014 = vector.broadcast %1012 : f32 to vector<4x16xf32>
    %1015 = arith.mulf %1014, %1013 : vector<4x16xf32>
    %1016 = arith.addf %995, %1015 : vector<4x16xf32>
    %c161 = arith.constant 161 : index
    %1017 = memref.load %arg1[%c161] : memref<297xf32, #tpu.memory_space<smem>>
    %1018 = vector.extract_strided_slice %1011 {offsets = [1, 0], sizes = [4, 16], strides = [1, 1]} : vector<10x16xf32> to vector<4x16xf32>
    %1019 = vector.broadcast %1017 : f32 to vector<4x16xf32>
    %1020 = arith.mulf %1019, %1018 : vector<4x16xf32>
    %1021 = arith.addf %1000, %1020 : vector<4x16xf32>
    %c168 = arith.constant 168 : index
    %1022 = memref.load %arg1[%c168] : memref<297xf32, #tpu.memory_space<smem>>
    %1023 = vector.extract_strided_slice %1011 {offsets = [2, 0], sizes = [4, 16], strides = [1, 1]} : vector<10x16xf32> to vector<4x16xf32>
    %1024 = vector.broadcast %1022 : f32 to vector<4x16xf32>
    %1025 = arith.mulf %1024, %1023 : vector<4x16xf32>
    %1026 = arith.addf %1005, %1025 : vector<4x16xf32>
    %c175 = arith.constant 175 : index
    %1027 = memref.load %arg1[%c175] : memref<297xf32, #tpu.memory_space<smem>>
    %1028 = vector.extract_strided_slice %1011 {offsets = [3, 0], sizes = [4, 16], strides = [1, 1]} : vector<10x16xf32> to vector<4x16xf32>
    %1029 = vector.broadcast %1027 : f32 to vector<4x16xf32>
    %1030 = arith.mulf %1029, %1028 : vector<4x16xf32>
    %1031 = arith.addf %1010, %1030 : vector<4x16xf32>
    %c182 = arith.constant 182 : index
    %1032 = memref.load %arg1[%c182] : memref<297xf32, #tpu.memory_space<smem>>
    %1033 = vector.extract_strided_slice %1011 {offsets = [4, 0], sizes = [4, 16], strides = [1, 1]} : vector<10x16xf32> to vector<4x16xf32>
    %1034 = vector.broadcast %1032 : f32 to vector<4x16xf32>
    %1035 = arith.mulf %1034, %1033 : vector<4x16xf32>
    %1036 = arith.addf %1016, %1035 : vector<4x16xf32>
    %c189 = arith.constant 189 : index
    %1037 = memref.load %arg1[%c189] : memref<297xf32, #tpu.memory_space<smem>>
    %1038 = vector.extract_strided_slice %1011 {offsets = [5, 0], sizes = [4, 16], strides = [1, 1]} : vector<10x16xf32> to vector<4x16xf32>
    %1039 = vector.broadcast %1037 : f32 to vector<4x16xf32>
    %1040 = arith.mulf %1039, %1038 : vector<4x16xf32>
    %1041 = arith.addf %1021, %1040 : vector<4x16xf32>
    %c196 = arith.constant 196 : index
    %1042 = memref.load %arg1[%c196] : memref<297xf32, #tpu.memory_space<smem>>
    %1043 = vector.extract_strided_slice %1011 {offsets = [6, 0], sizes = [4, 16], strides = [1, 1]} : vector<10x16xf32> to vector<4x16xf32>
    %1044 = vector.broadcast %1042 : f32 to vector<4x16xf32>
    %1045 = arith.mulf %1044, %1043 : vector<4x16xf32>
    %1046 = arith.addf %1026, %1045 : vector<4x16xf32>
    %1047 = arith.addf %1041, %1046 : vector<4x16xf32>
    %1048 = arith.addf %1047, %1031 : vector<4x16xf32>
    %1049 = arith.addf %1048, %1036 : vector<4x16xf32>
    %c197 = arith.constant 197 : index
    %1050 = memref.load %arg1[%c197] : memref<297xf32, #tpu.memory_space<smem>>
    %1051 = vector.broadcast %1050 : f32 to vector<4x16xf32>
    %1052 = arith.addf %1049, %1051 : vector<4x16xf32>
    %1053 = arith.negf %1052 : vector<4x16xf32>
    %1054 = math.exp %1053 : vector<4x16xf32>
    %cst_29 = arith.constant 1.000000e+00 : f32
    %1055 = vector.broadcast %cst_29 : f32 to vector<4x16xf32>
    %1056 = arith.addf %1055, %1054 : vector<4x16xf32>
    %1057 = arith.divf %1055, %1056 : vector<4x16xf32>
    %cst_30 = arith.constant 0.000000e+00 : f32
    %1058 = vector.broadcast %cst_30 : f32 to vector<3x16xf32>
    %1059 = tpu.concatenate %1058, %10, %1058 in 0 : vector<3x16xf32>, vector<4x16xf32>, vector<3x16xf32> -> vector<10x16xf32>
    %cst_31 = arith.constant 0.000000e+00 : f32
    %1060 = vector.broadcast %cst_31 : f32 to vector<10x3xf32>
    %1061 = tpu.concatenate %1060, %1059, %1060 in 1 : vector<10x3xf32>, vector<10x16xf32>, vector<10x3xf32> -> vector<10x22xf32>
    %cst_32 = arith.constant 0.000000e+00 : f32
    %1062 = vector.broadcast %cst_32 : f32 to vector<3x16xf32>
    %1063 = tpu.concatenate %1062, %13, %1062 in 0 : vector<3x16xf32>, vector<4x16xf32>, vector<3x16xf32> -> vector<10x16xf32>
    %cst_33 = arith.constant 0.000000e+00 : f32
    %1064 = vector.broadcast %cst_33 : f32 to vector<10x3xf32>
    %1065 = tpu.concatenate %1064, %1063, %1064 in 1 : vector<10x3xf32>, vector<10x16xf32>, vector<10x3xf32> -> vector<10x22xf32>
    %1066 = vector.extract_strided_slice %1061 {offsets = [0, 0], sizes = [10, 16], strides = [1, 1]} : vector<10x22xf32> to vector<10x16xf32>
    %c198 = arith.constant 198 : index
    %1067 = memref.load %arg1[%c198] : memref<297xf32, #tpu.memory_space<smem>>
    %1068 = vector.extract_strided_slice %1066 {offsets = [0, 0], sizes = [4, 16], strides = [1, 1]} : vector<10x16xf32> to vector<4x16xf32>
    %1069 = vector.broadcast %1067 : f32 to vector<4x16xf32>
    %1070 = arith.mulf %1069, %1068 : vector<4x16xf32>
    %c205 = arith.constant 205 : index
    %1071 = memref.load %arg1[%c205] : memref<297xf32, #tpu.memory_space<smem>>
    %1072 = vector.extract_strided_slice %1066 {offsets = [1, 0], sizes = [4, 16], strides = [1, 1]} : vector<10x16xf32> to vector<4x16xf32>
    %1073 = vector.broadcast %1071 : f32 to vector<4x16xf32>
    %1074 = arith.mulf %1073, %1072 : vector<4x16xf32>
    %c212 = arith.constant 212 : index
    %1075 = memref.load %arg1[%c212] : memref<297xf32, #tpu.memory_space<smem>>
    %1076 = vector.extract_strided_slice %1066 {offsets = [2, 0], sizes = [4, 16], strides = [1, 1]} : vector<10x16xf32> to vector<4x16xf32>
    %1077 = vector.broadcast %1075 : f32 to vector<4x16xf32>
    %1078 = arith.mulf %1077, %1076 : vector<4x16xf32>
    %c219 = arith.constant 219 : index
    %1079 = memref.load %arg1[%c219] : memref<297xf32, #tpu.memory_space<smem>>
    %1080 = vector.extract_strided_slice %1066 {offsets = [3, 0], sizes = [4, 16], strides = [1, 1]} : vector<10x16xf32> to vector<4x16xf32>
    %1081 = vector.broadcast %1079 : f32 to vector<4x16xf32>
    %1082 = arith.mulf %1081, %1080 : vector<4x16xf32>
    %c226 = arith.constant 226 : index
    %1083 = memref.load %arg1[%c226] : memref<297xf32, #tpu.memory_space<smem>>
    %1084 = vector.extract_strided_slice %1066 {offsets = [4, 0], sizes = [4, 16], strides = [1, 1]} : vector<10x16xf32> to vector<4x16xf32>
    %1085 = vector.broadcast %1083 : f32 to vector<4x16xf32>
    %1086 = arith.mulf %1085, %1084 : vector<4x16xf32>
    %1087 = arith.addf %1070, %1086 : vector<4x16xf32>
    %c233 = arith.constant 233 : index
    %1088 = memref.load %arg1[%c233] : memref<297xf32, #tpu.memory_space<smem>>
    %1089 = vector.extract_strided_slice %1066 {offsets = [5, 0], sizes = [4, 16], strides = [1, 1]} : vector<10x16xf32> to vector<4x16xf32>
    %1090 = vector.broadcast %1088 : f32 to vector<4x16xf32>
    %1091 = arith.mulf %1090, %1089 : vector<4x16xf32>
    %1092 = arith.addf %1074, %1091 : vector<4x16xf32>
    %c240 = arith.constant 240 : index
    %1093 = memref.load %arg1[%c240] : memref<297xf32, #tpu.memory_space<smem>>
    %1094 = vector.extract_strided_slice %1066 {offsets = [6, 0], sizes = [4, 16], strides = [1, 1]} : vector<10x16xf32> to vector<4x16xf32>
    %1095 = vector.broadcast %1093 : f32 to vector<4x16xf32>
    %1096 = arith.mulf %1095, %1094 : vector<4x16xf32>
    %1097 = arith.addf %1078, %1096 : vector<4x16xf32>
    %1098 = vector.extract_strided_slice %1061 {offsets = [0, 1], sizes = [10, 16], strides = [1, 1]} : vector<10x22xf32> to vector<10x16xf32>
    %c199 = arith.constant 199 : index
    %1099 = memref.load %arg1[%c199] : memref<297xf32, #tpu.memory_space<smem>>
    %1100 = vector.extract_strided_slice %1098 {offsets = [0, 0], sizes = [4, 16], strides = [1, 1]} : vector<10x16xf32> to vector<4x16xf32>
    %1101 = vector.broadcast %1099 : f32 to vector<4x16xf32>
    %1102 = arith.mulf %1101, %1100 : vector<4x16xf32>
    %1103 = arith.addf %1082, %1102 : vector<4x16xf32>
    %c206 = arith.constant 206 : index
    %1104 = memref.load %arg1[%c206] : memref<297xf32, #tpu.memory_space<smem>>
    %1105 = vector.extract_strided_slice %1098 {offsets = [1, 0], sizes = [4, 16], strides = [1, 1]} : vector<10x16xf32> to vector<4x16xf32>
    %1106 = vector.broadcast %1104 : f32 to vector<4x16xf32>
    %1107 = arith.mulf %1106, %1105 : vector<4x16xf32>
    %1108 = arith.addf %1087, %1107 : vector<4x16xf32>
    %c213 = arith.constant 213 : index
    %1109 = memref.load %arg1[%c213] : memref<297xf32, #tpu.memory_space<smem>>
    %1110 = vector.extract_strided_slice %1098 {offsets = [2, 0], sizes = [4, 16], strides = [1, 1]} : vector<10x16xf32> to vector<4x16xf32>
    %1111 = vector.broadcast %1109 : f32 to vector<4x16xf32>
    %1112 = arith.mulf %1111, %1110 : vector<4x16xf32>
    %1113 = arith.addf %1092, %1112 : vector<4x16xf32>
    %c220 = arith.constant 220 : index
    %1114 = memref.load %arg1[%c220] : memref<297xf32, #tpu.memory_space<smem>>
    %1115 = vector.extract_strided_slice %1098 {offsets = [3, 0], sizes = [4, 16], strides = [1, 1]} : vector<10x16xf32> to vector<4x16xf32>
    %1116 = vector.broadcast %1114 : f32 to vector<4x16xf32>
    %1117 = arith.mulf %1116, %1115 : vector<4x16xf32>
    %1118 = arith.addf %1097, %1117 : vector<4x16xf32>
    %c227 = arith.constant 227 : index
    %1119 = memref.load %arg1[%c227] : memref<297xf32, #tpu.memory_space<smem>>
    %1120 = vector.extract_strided_slice %1098 {offsets = [4, 0], sizes = [4, 16], strides = [1, 1]} : vector<10x16xf32> to vector<4x16xf32>
    %1121 = vector.broadcast %1119 : f32 to vector<4x16xf32>
    %1122 = arith.mulf %1121, %1120 : vector<4x16xf32>
    %1123 = arith.addf %1103, %1122 : vector<4x16xf32>
    %c234 = arith.constant 234 : index
    %1124 = memref.load %arg1[%c234] : memref<297xf32, #tpu.memory_space<smem>>
    %1125 = vector.extract_strided_slice %1098 {offsets = [5, 0], sizes = [4, 16], strides = [1, 1]} : vector<10x16xf32> to vector<4x16xf32>
    %1126 = vector.broadcast %1124 : f32 to vector<4x16xf32>
    %1127 = arith.mulf %1126, %1125 : vector<4x16xf32>
    %1128 = arith.addf %1108, %1127 : vector<4x16xf32>
    %c241 = arith.constant 241 : index
    %1129 = memref.load %arg1[%c241] : memref<297xf32, #tpu.memory_space<smem>>
    %1130 = vector.extract_strided_slice %1098 {offsets = [6, 0], sizes = [4, 16], strides = [1, 1]} : vector<10x16xf32> to vector<4x16xf32>
    %1131 = vector.broadcast %1129 : f32 to vector<4x16xf32>
    %1132 = arith.mulf %1131, %1130 : vector<4x16xf32>
    %1133 = arith.addf %1113, %1132 : vector<4x16xf32>
    %1134 = vector.extract_strided_slice %1061 {offsets = [0, 2], sizes = [10, 16], strides = [1, 1]} : vector<10x22xf32> to vector<10x16xf32>
    %c200 = arith.constant 200 : index
    %1135 = memref.load %arg1[%c200] : memref<297xf32, #tpu.memory_space<smem>>
    %1136 = vector.extract_strided_slice %1134 {offsets = [0, 0], sizes = [4, 16], strides = [1, 1]} : vector<10x16xf32> to vector<4x16xf32>
    %1137 = vector.broadcast %1135 : f32 to vector<4x16xf32>
    %1138 = arith.mulf %1137, %1136 : vector<4x16xf32>
    %1139 = arith.addf %1118, %1138 : vector<4x16xf32>
    %c207 = arith.constant 207 : index
    %1140 = memref.load %arg1[%c207] : memref<297xf32, #tpu.memory_space<smem>>
    %1141 = vector.extract_strided_slice %1134 {offsets = [1, 0], sizes = [4, 16], strides = [1, 1]} : vector<10x16xf32> to vector<4x16xf32>
    %1142 = vector.broadcast %1140 : f32 to vector<4x16xf32>
    %1143 = arith.mulf %1142, %1141 : vector<4x16xf32>
    %1144 = arith.addf %1123, %1143 : vector<4x16xf32>
    %c214 = arith.constant 214 : index
    %1145 = memref.load %arg1[%c214] : memref<297xf32, #tpu.memory_space<smem>>
    %1146 = vector.extract_strided_slice %1134 {offsets = [2, 0], sizes = [4, 16], strides = [1, 1]} : vector<10x16xf32> to vector<4x16xf32>
    %1147 = vector.broadcast %1145 : f32 to vector<4x16xf32>
    %1148 = arith.mulf %1147, %1146 : vector<4x16xf32>
    %1149 = arith.addf %1128, %1148 : vector<4x16xf32>
    %c221 = arith.constant 221 : index
    %1150 = memref.load %arg1[%c221] : memref<297xf32, #tpu.memory_space<smem>>
    %1151 = vector.extract_strided_slice %1134 {offsets = [3, 0], sizes = [4, 16], strides = [1, 1]} : vector<10x16xf32> to vector<4x16xf32>
    %1152 = vector.broadcast %1150 : f32 to vector<4x16xf32>
    %1153 = arith.mulf %1152, %1151 : vector<4x16xf32>
    %1154 = arith.addf %1133, %1153 : vector<4x16xf32>
    %c228 = arith.constant 228 : index
    %1155 = memref.load %arg1[%c228] : memref<297xf32, #tpu.memory_space<smem>>
    %1156 = vector.extract_strided_slice %1134 {offsets = [4, 0], sizes = [4, 16], strides = [1, 1]} : vector<10x16xf32> to vector<4x16xf32>
    %1157 = vector.broadcast %1155 : f32 to vector<4x16xf32>
    %1158 = arith.mulf %1157, %1156 : vector<4x16xf32>
    %1159 = arith.addf %1139, %1158 : vector<4x16xf32>
    %c235 = arith.constant 235 : index
    %1160 = memref.load %arg1[%c235] : memref<297xf32, #tpu.memory_space<smem>>
    %1161 = vector.extract_strided_slice %1134 {offsets = [5, 0], sizes = [4, 16], strides = [1, 1]} : vector<10x16xf32> to vector<4x16xf32>
    %1162 = vector.broadcast %1160 : f32 to vector<4x16xf32>
    %1163 = arith.mulf %1162, %1161 : vector<4x16xf32>
    %1164 = arith.addf %1144, %1163 : vector<4x16xf32>
    %c242 = arith.constant 242 : index
    %1165 = memref.load %arg1[%c242] : memref<297xf32, #tpu.memory_space<smem>>
    %1166 = vector.extract_strided_slice %1134 {offsets = [6, 0], sizes = [4, 16], strides = [1, 1]} : vector<10x16xf32> to vector<4x16xf32>
    %1167 = vector.broadcast %1165 : f32 to vector<4x16xf32>
    %1168 = arith.mulf %1167, %1166 : vector<4x16xf32>
    %1169 = arith.addf %1149, %1168 : vector<4x16xf32>
    %1170 = vector.extract_strided_slice %1061 {offsets = [0, 3], sizes = [10, 16], strides = [1, 1]} : vector<10x22xf32> to vector<10x16xf32>
    %c201 = arith.constant 201 : index
    %1171 = memref.load %arg1[%c201] : memref<297xf32, #tpu.memory_space<smem>>
    %1172 = vector.extract_strided_slice %1170 {offsets = [0, 0], sizes = [4, 16], strides = [1, 1]} : vector<10x16xf32> to vector<4x16xf32>
    %1173 = vector.broadcast %1171 : f32 to vector<4x16xf32>
    %1174 = arith.mulf %1173, %1172 : vector<4x16xf32>
    %1175 = arith.addf %1154, %1174 : vector<4x16xf32>
    %c208 = arith.constant 208 : index
    %1176 = memref.load %arg1[%c208] : memref<297xf32, #tpu.memory_space<smem>>
    %1177 = vector.extract_strided_slice %1170 {offsets = [1, 0], sizes = [4, 16], strides = [1, 1]} : vector<10x16xf32> to vector<4x16xf32>
    %1178 = vector.broadcast %1176 : f32 to vector<4x16xf32>
    %1179 = arith.mulf %1178, %1177 : vector<4x16xf32>
    %1180 = arith.addf %1159, %1179 : vector<4x16xf32>
    %c215 = arith.constant 215 : index
    %1181 = memref.load %arg1[%c215] : memref<297xf32, #tpu.memory_space<smem>>
    %1182 = vector.extract_strided_slice %1170 {offsets = [2, 0], sizes = [4, 16], strides = [1, 1]} : vector<10x16xf32> to vector<4x16xf32>
    %1183 = vector.broadcast %1181 : f32 to vector<4x16xf32>
    %1184 = arith.mulf %1183, %1182 : vector<4x16xf32>
    %1185 = arith.addf %1164, %1184 : vector<4x16xf32>
    %c222 = arith.constant 222 : index
    %1186 = memref.load %arg1[%c222] : memref<297xf32, #tpu.memory_space<smem>>
    %1187 = vector.extract_strided_slice %1170 {offsets = [3, 0], sizes = [4, 16], strides = [1, 1]} : vector<10x16xf32> to vector<4x16xf32>
    %1188 = vector.broadcast %1186 : f32 to vector<4x16xf32>
    %1189 = arith.mulf %1188, %1187 : vector<4x16xf32>
    %1190 = arith.addf %1169, %1189 : vector<4x16xf32>
    %c229 = arith.constant 229 : index
    %1191 = memref.load %arg1[%c229] : memref<297xf32, #tpu.memory_space<smem>>
    %1192 = vector.extract_strided_slice %1170 {offsets = [4, 0], sizes = [4, 16], strides = [1, 1]} : vector<10x16xf32> to vector<4x16xf32>
    %1193 = vector.broadcast %1191 : f32 to vector<4x16xf32>
    %1194 = arith.mulf %1193, %1192 : vector<4x16xf32>
    %1195 = arith.addf %1175, %1194 : vector<4x16xf32>
    %c236 = arith.constant 236 : index
    %1196 = memref.load %arg1[%c236] : memref<297xf32, #tpu.memory_space<smem>>
    %1197 = vector.extract_strided_slice %1170 {offsets = [5, 0], sizes = [4, 16], strides = [1, 1]} : vector<10x16xf32> to vector<4x16xf32>
    %1198 = vector.broadcast %1196 : f32 to vector<4x16xf32>
    %1199 = arith.mulf %1198, %1197 : vector<4x16xf32>
    %1200 = arith.addf %1180, %1199 : vector<4x16xf32>
    %c243 = arith.constant 243 : index
    %1201 = memref.load %arg1[%c243] : memref<297xf32, #tpu.memory_space<smem>>
    %1202 = vector.extract_strided_slice %1170 {offsets = [6, 0], sizes = [4, 16], strides = [1, 1]} : vector<10x16xf32> to vector<4x16xf32>
    %1203 = vector.broadcast %1201 : f32 to vector<4x16xf32>
    %1204 = arith.mulf %1203, %1202 : vector<4x16xf32>
    %1205 = arith.addf %1185, %1204 : vector<4x16xf32>
    %1206 = vector.extract_strided_slice %1061 {offsets = [0, 4], sizes = [10, 16], strides = [1, 1]} : vector<10x22xf32> to vector<10x16xf32>
    %c202 = arith.constant 202 : index
    %1207 = memref.load %arg1[%c202] : memref<297xf32, #tpu.memory_space<smem>>
    %1208 = vector.extract_strided_slice %1206 {offsets = [0, 0], sizes = [4, 16], strides = [1, 1]} : vector<10x16xf32> to vector<4x16xf32>
    %1209 = vector.broadcast %1207 : f32 to vector<4x16xf32>
    %1210 = arith.mulf %1209, %1208 : vector<4x16xf32>
    %1211 = arith.addf %1190, %1210 : vector<4x16xf32>
    %c209 = arith.constant 209 : index
    %1212 = memref.load %arg1[%c209] : memref<297xf32, #tpu.memory_space<smem>>
    %1213 = vector.extract_strided_slice %1206 {offsets = [1, 0], sizes = [4, 16], strides = [1, 1]} : vector<10x16xf32> to vector<4x16xf32>
    %1214 = vector.broadcast %1212 : f32 to vector<4x16xf32>
    %1215 = arith.mulf %1214, %1213 : vector<4x16xf32>
    %1216 = arith.addf %1195, %1215 : vector<4x16xf32>
    %c216 = arith.constant 216 : index
    %1217 = memref.load %arg1[%c216] : memref<297xf32, #tpu.memory_space<smem>>
    %1218 = vector.extract_strided_slice %1206 {offsets = [2, 0], sizes = [4, 16], strides = [1, 1]} : vector<10x16xf32> to vector<4x16xf32>
    %1219 = vector.broadcast %1217 : f32 to vector<4x16xf32>
    %1220 = arith.mulf %1219, %1218 : vector<4x16xf32>
    %1221 = arith.addf %1200, %1220 : vector<4x16xf32>
    %c223 = arith.constant 223 : index
    %1222 = memref.load %arg1[%c223] : memref<297xf32, #tpu.memory_space<smem>>
    %1223 = vector.extract_strided_slice %1206 {offsets = [3, 0], sizes = [4, 16], strides = [1, 1]} : vector<10x16xf32> to vector<4x16xf32>
    %1224 = vector.broadcast %1222 : f32 to vector<4x16xf32>
    %1225 = arith.mulf %1224, %1223 : vector<4x16xf32>
    %1226 = arith.addf %1205, %1225 : vector<4x16xf32>
    %c230 = arith.constant 230 : index
    %1227 = memref.load %arg1[%c230] : memref<297xf32, #tpu.memory_space<smem>>
    %1228 = vector.extract_strided_slice %1206 {offsets = [4, 0], sizes = [4, 16], strides = [1, 1]} : vector<10x16xf32> to vector<4x16xf32>
    %1229 = vector.broadcast %1227 : f32 to vector<4x16xf32>
    %1230 = arith.mulf %1229, %1228 : vector<4x16xf32>
    %1231 = arith.addf %1211, %1230 : vector<4x16xf32>
    %c237 = arith.constant 237 : index
    %1232 = memref.load %arg1[%c237] : memref<297xf32, #tpu.memory_space<smem>>
    %1233 = vector.extract_strided_slice %1206 {offsets = [5, 0], sizes = [4, 16], strides = [1, 1]} : vector<10x16xf32> to vector<4x16xf32>
    %1234 = vector.broadcast %1232 : f32 to vector<4x16xf32>
    %1235 = arith.mulf %1234, %1233 : vector<4x16xf32>
    %1236 = arith.addf %1216, %1235 : vector<4x16xf32>
    %c244 = arith.constant 244 : index
    %1237 = memref.load %arg1[%c244] : memref<297xf32, #tpu.memory_space<smem>>
    %1238 = vector.extract_strided_slice %1206 {offsets = [6, 0], sizes = [4, 16], strides = [1, 1]} : vector<10x16xf32> to vector<4x16xf32>
    %1239 = vector.broadcast %1237 : f32 to vector<4x16xf32>
    %1240 = arith.mulf %1239, %1238 : vector<4x16xf32>
    %1241 = arith.addf %1221, %1240 : vector<4x16xf32>
    %1242 = vector.extract_strided_slice %1061 {offsets = [0, 5], sizes = [10, 16], strides = [1, 1]} : vector<10x22xf32> to vector<10x16xf32>
    %c203 = arith.constant 203 : index
    %1243 = memref.load %arg1[%c203] : memref<297xf32, #tpu.memory_space<smem>>
    %1244 = vector.extract_strided_slice %1242 {offsets = [0, 0], sizes = [4, 16], strides = [1, 1]} : vector<10x16xf32> to vector<4x16xf32>
    %1245 = vector.broadcast %1243 : f32 to vector<4x16xf32>
    %1246 = arith.mulf %1245, %1244 : vector<4x16xf32>
    %1247 = arith.addf %1226, %1246 : vector<4x16xf32>
    %c210 = arith.constant 210 : index
    %1248 = memref.load %arg1[%c210] : memref<297xf32, #tpu.memory_space<smem>>
    %1249 = vector.extract_strided_slice %1242 {offsets = [1, 0], sizes = [4, 16], strides = [1, 1]} : vector<10x16xf32> to vector<4x16xf32>
    %1250 = vector.broadcast %1248 : f32 to vector<4x16xf32>
    %1251 = arith.mulf %1250, %1249 : vector<4x16xf32>
    %1252 = arith.addf %1231, %1251 : vector<4x16xf32>
    %c217 = arith.constant 217 : index
    %1253 = memref.load %arg1[%c217] : memref<297xf32, #tpu.memory_space<smem>>
    %1254 = vector.extract_strided_slice %1242 {offsets = [2, 0], sizes = [4, 16], strides = [1, 1]} : vector<10x16xf32> to vector<4x16xf32>
    %1255 = vector.broadcast %1253 : f32 to vector<4x16xf32>
    %1256 = arith.mulf %1255, %1254 : vector<4x16xf32>
    %1257 = arith.addf %1236, %1256 : vector<4x16xf32>
    %c224 = arith.constant 224 : index
    %1258 = memref.load %arg1[%c224] : memref<297xf32, #tpu.memory_space<smem>>
    %1259 = vector.extract_strided_slice %1242 {offsets = [3, 0], sizes = [4, 16], strides = [1, 1]} : vector<10x16xf32> to vector<4x16xf32>
    %1260 = vector.broadcast %1258 : f32 to vector<4x16xf32>
    %1261 = arith.mulf %1260, %1259 : vector<4x16xf32>
    %1262 = arith.addf %1241, %1261 : vector<4x16xf32>
    %c231 = arith.constant 231 : index
    %1263 = memref.load %arg1[%c231] : memref<297xf32, #tpu.memory_space<smem>>
    %1264 = vector.extract_strided_slice %1242 {offsets = [4, 0], sizes = [4, 16], strides = [1, 1]} : vector<10x16xf32> to vector<4x16xf32>
    %1265 = vector.broadcast %1263 : f32 to vector<4x16xf32>
    %1266 = arith.mulf %1265, %1264 : vector<4x16xf32>
    %1267 = arith.addf %1247, %1266 : vector<4x16xf32>
    %c238 = arith.constant 238 : index
    %1268 = memref.load %arg1[%c238] : memref<297xf32, #tpu.memory_space<smem>>
    %1269 = vector.extract_strided_slice %1242 {offsets = [5, 0], sizes = [4, 16], strides = [1, 1]} : vector<10x16xf32> to vector<4x16xf32>
    %1270 = vector.broadcast %1268 : f32 to vector<4x16xf32>
    %1271 = arith.mulf %1270, %1269 : vector<4x16xf32>
    %1272 = arith.addf %1252, %1271 : vector<4x16xf32>
    %c245 = arith.constant 245 : index
    %1273 = memref.load %arg1[%c245] : memref<297xf32, #tpu.memory_space<smem>>
    %1274 = vector.extract_strided_slice %1242 {offsets = [6, 0], sizes = [4, 16], strides = [1, 1]} : vector<10x16xf32> to vector<4x16xf32>
    %1275 = vector.broadcast %1273 : f32 to vector<4x16xf32>
    %1276 = arith.mulf %1275, %1274 : vector<4x16xf32>
    %1277 = arith.addf %1257, %1276 : vector<4x16xf32>
    %1278 = vector.extract_strided_slice %1061 {offsets = [0, 6], sizes = [10, 16], strides = [1, 1]} : vector<10x22xf32> to vector<10x16xf32>
    %c204 = arith.constant 204 : index
    %1279 = memref.load %arg1[%c204] : memref<297xf32, #tpu.memory_space<smem>>
    %1280 = vector.extract_strided_slice %1278 {offsets = [0, 0], sizes = [4, 16], strides = [1, 1]} : vector<10x16xf32> to vector<4x16xf32>
    %1281 = vector.broadcast %1279 : f32 to vector<4x16xf32>
    %1282 = arith.mulf %1281, %1280 : vector<4x16xf32>
    %1283 = arith.addf %1262, %1282 : vector<4x16xf32>
    %c211 = arith.constant 211 : index
    %1284 = memref.load %arg1[%c211] : memref<297xf32, #tpu.memory_space<smem>>
    %1285 = vector.extract_strided_slice %1278 {offsets = [1, 0], sizes = [4, 16], strides = [1, 1]} : vector<10x16xf32> to vector<4x16xf32>
    %1286 = vector.broadcast %1284 : f32 to vector<4x16xf32>
    %1287 = arith.mulf %1286, %1285 : vector<4x16xf32>
    %1288 = arith.addf %1267, %1287 : vector<4x16xf32>
    %c218 = arith.constant 218 : index
    %1289 = memref.load %arg1[%c218] : memref<297xf32, #tpu.memory_space<smem>>
    %1290 = vector.extract_strided_slice %1278 {offsets = [2, 0], sizes = [4, 16], strides = [1, 1]} : vector<10x16xf32> to vector<4x16xf32>
    %1291 = vector.broadcast %1289 : f32 to vector<4x16xf32>
    %1292 = arith.mulf %1291, %1290 : vector<4x16xf32>
    %1293 = arith.addf %1272, %1292 : vector<4x16xf32>
    %c225 = arith.constant 225 : index
    %1294 = memref.load %arg1[%c225] : memref<297xf32, #tpu.memory_space<smem>>
    %1295 = vector.extract_strided_slice %1278 {offsets = [3, 0], sizes = [4, 16], strides = [1, 1]} : vector<10x16xf32> to vector<4x16xf32>
    %1296 = vector.broadcast %1294 : f32 to vector<4x16xf32>
    %1297 = arith.mulf %1296, %1295 : vector<4x16xf32>
    %1298 = arith.addf %1277, %1297 : vector<4x16xf32>
    %c232 = arith.constant 232 : index
    %1299 = memref.load %arg1[%c232] : memref<297xf32, #tpu.memory_space<smem>>
    %1300 = vector.extract_strided_slice %1278 {offsets = [4, 0], sizes = [4, 16], strides = [1, 1]} : vector<10x16xf32> to vector<4x16xf32>
    %1301 = vector.broadcast %1299 : f32 to vector<4x16xf32>
    %1302 = arith.mulf %1301, %1300 : vector<4x16xf32>
    %1303 = arith.addf %1283, %1302 : vector<4x16xf32>
    %c239 = arith.constant 239 : index
    %1304 = memref.load %arg1[%c239] : memref<297xf32, #tpu.memory_space<smem>>
    %1305 = vector.extract_strided_slice %1278 {offsets = [5, 0], sizes = [4, 16], strides = [1, 1]} : vector<10x16xf32> to vector<4x16xf32>
    %1306 = vector.broadcast %1304 : f32 to vector<4x16xf32>
    %1307 = arith.mulf %1306, %1305 : vector<4x16xf32>
    %1308 = arith.addf %1288, %1307 : vector<4x16xf32>
    %c246 = arith.constant 246 : index
    %1309 = memref.load %arg1[%c246] : memref<297xf32, #tpu.memory_space<smem>>
    %1310 = vector.extract_strided_slice %1278 {offsets = [6, 0], sizes = [4, 16], strides = [1, 1]} : vector<10x16xf32> to vector<4x16xf32>
    %1311 = vector.broadcast %1309 : f32 to vector<4x16xf32>
    %1312 = arith.mulf %1311, %1310 : vector<4x16xf32>
    %1313 = arith.addf %1293, %1312 : vector<4x16xf32>
    %1314 = vector.extract_strided_slice %1065 {offsets = [0, 0], sizes = [10, 16], strides = [1, 1]} : vector<10x22xf32> to vector<10x16xf32>
    %c247 = arith.constant 247 : index
    %1315 = memref.load %arg1[%c247] : memref<297xf32, #tpu.memory_space<smem>>
    %1316 = vector.extract_strided_slice %1314 {offsets = [0, 0], sizes = [4, 16], strides = [1, 1]} : vector<10x16xf32> to vector<4x16xf32>
    %1317 = vector.broadcast %1315 : f32 to vector<4x16xf32>
    %1318 = arith.mulf %1317, %1316 : vector<4x16xf32>
    %1319 = arith.addf %1298, %1318 : vector<4x16xf32>
    %c254 = arith.constant 254 : index
    %1320 = memref.load %arg1[%c254] : memref<297xf32, #tpu.memory_space<smem>>
    %1321 = vector.extract_strided_slice %1314 {offsets = [1, 0], sizes = [4, 16], strides = [1, 1]} : vector<10x16xf32> to vector<4x16xf32>
    %1322 = vector.broadcast %1320 : f32 to vector<4x16xf32>
    %1323 = arith.mulf %1322, %1321 : vector<4x16xf32>
    %1324 = arith.addf %1303, %1323 : vector<4x16xf32>
    %c261 = arith.constant 261 : index
    %1325 = memref.load %arg1[%c261] : memref<297xf32, #tpu.memory_space<smem>>
    %1326 = vector.extract_strided_slice %1314 {offsets = [2, 0], sizes = [4, 16], strides = [1, 1]} : vector<10x16xf32> to vector<4x16xf32>
    %1327 = vector.broadcast %1325 : f32 to vector<4x16xf32>
    %1328 = arith.mulf %1327, %1326 : vector<4x16xf32>
    %1329 = arith.addf %1308, %1328 : vector<4x16xf32>
    %c268 = arith.constant 268 : index
    %1330 = memref.load %arg1[%c268] : memref<297xf32, #tpu.memory_space<smem>>
    %1331 = vector.extract_strided_slice %1314 {offsets = [3, 0], sizes = [4, 16], strides = [1, 1]} : vector<10x16xf32> to vector<4x16xf32>
    %1332 = vector.broadcast %1330 : f32 to vector<4x16xf32>
    %1333 = arith.mulf %1332, %1331 : vector<4x16xf32>
    %1334 = arith.addf %1313, %1333 : vector<4x16xf32>
    %c275 = arith.constant 275 : index
    %1335 = memref.load %arg1[%c275] : memref<297xf32, #tpu.memory_space<smem>>
    %1336 = vector.extract_strided_slice %1314 {offsets = [4, 0], sizes = [4, 16], strides = [1, 1]} : vector<10x16xf32> to vector<4x16xf32>
    %1337 = vector.broadcast %1335 : f32 to vector<4x16xf32>
    %1338 = arith.mulf %1337, %1336 : vector<4x16xf32>
    %1339 = arith.addf %1319, %1338 : vector<4x16xf32>
    %c282 = arith.constant 282 : index
    %1340 = memref.load %arg1[%c282] : memref<297xf32, #tpu.memory_space<smem>>
    %1341 = vector.extract_strided_slice %1314 {offsets = [5, 0], sizes = [4, 16], strides = [1, 1]} : vector<10x16xf32> to vector<4x16xf32>
    %1342 = vector.broadcast %1340 : f32 to vector<4x16xf32>
    %1343 = arith.mulf %1342, %1341 : vector<4x16xf32>
    %1344 = arith.addf %1324, %1343 : vector<4x16xf32>
    %c289 = arith.constant 289 : index
    %1345 = memref.load %arg1[%c289] : memref<297xf32, #tpu.memory_space<smem>>
    %1346 = vector.extract_strided_slice %1314 {offsets = [6, 0], sizes = [4, 16], strides = [1, 1]} : vector<10x16xf32> to vector<4x16xf32>
    %1347 = vector.broadcast %1345 : f32 to vector<4x16xf32>
    %1348 = arith.mulf %1347, %1346 : vector<4x16xf32>
    %1349 = arith.addf %1329, %1348 : vector<4x16xf32>
    %1350 = vector.extract_strided_slice %1065 {offsets = [0, 1], sizes = [10, 16], strides = [1, 1]} : vector<10x22xf32> to vector<10x16xf32>
    %c248 = arith.constant 248 : index
    %1351 = memref.load %arg1[%c248] : memref<297xf32, #tpu.memory_space<smem>>
    %1352 = vector.extract_strided_slice %1350 {offsets = [0, 0], sizes = [4, 16], strides = [1, 1]} : vector<10x16xf32> to vector<4x16xf32>
    %1353 = vector.broadcast %1351 : f32 to vector<4x16xf32>
    %1354 = arith.mulf %1353, %1352 : vector<4x16xf32>
    %1355 = arith.addf %1334, %1354 : vector<4x16xf32>
    %c255 = arith.constant 255 : index
    %1356 = memref.load %arg1[%c255] : memref<297xf32, #tpu.memory_space<smem>>
    %1357 = vector.extract_strided_slice %1350 {offsets = [1, 0], sizes = [4, 16], strides = [1, 1]} : vector<10x16xf32> to vector<4x16xf32>
    %1358 = vector.broadcast %1356 : f32 to vector<4x16xf32>
    %1359 = arith.mulf %1358, %1357 : vector<4x16xf32>
    %1360 = arith.addf %1339, %1359 : vector<4x16xf32>
    %c262 = arith.constant 262 : index
    %1361 = memref.load %arg1[%c262] : memref<297xf32, #tpu.memory_space<smem>>
    %1362 = vector.extract_strided_slice %1350 {offsets = [2, 0], sizes = [4, 16], strides = [1, 1]} : vector<10x16xf32> to vector<4x16xf32>
    %1363 = vector.broadcast %1361 : f32 to vector<4x16xf32>
    %1364 = arith.mulf %1363, %1362 : vector<4x16xf32>
    %1365 = arith.addf %1344, %1364 : vector<4x16xf32>
    %c269 = arith.constant 269 : index
    %1366 = memref.load %arg1[%c269] : memref<297xf32, #tpu.memory_space<smem>>
    %1367 = vector.extract_strided_slice %1350 {offsets = [3, 0], sizes = [4, 16], strides = [1, 1]} : vector<10x16xf32> to vector<4x16xf32>
    %1368 = vector.broadcast %1366 : f32 to vector<4x16xf32>
    %1369 = arith.mulf %1368, %1367 : vector<4x16xf32>
    %1370 = arith.addf %1349, %1369 : vector<4x16xf32>
    %c276 = arith.constant 276 : index
    %1371 = memref.load %arg1[%c276] : memref<297xf32, #tpu.memory_space<smem>>
    %1372 = vector.extract_strided_slice %1350 {offsets = [4, 0], sizes = [4, 16], strides = [1, 1]} : vector<10x16xf32> to vector<4x16xf32>
    %1373 = vector.broadcast %1371 : f32 to vector<4x16xf32>
    %1374 = arith.mulf %1373, %1372 : vector<4x16xf32>
    %1375 = arith.addf %1355, %1374 : vector<4x16xf32>
    %c283 = arith.constant 283 : index
    %1376 = memref.load %arg1[%c283] : memref<297xf32, #tpu.memory_space<smem>>
    %1377 = vector.extract_strided_slice %1350 {offsets = [5, 0], sizes = [4, 16], strides = [1, 1]} : vector<10x16xf32> to vector<4x16xf32>
    %1378 = vector.broadcast %1376 : f32 to vector<4x16xf32>
    %1379 = arith.mulf %1378, %1377 : vector<4x16xf32>
    %1380 = arith.addf %1360, %1379 : vector<4x16xf32>
    %c290 = arith.constant 290 : index
    %1381 = memref.load %arg1[%c290] : memref<297xf32, #tpu.memory_space<smem>>
    %1382 = vector.extract_strided_slice %1350 {offsets = [6, 0], sizes = [4, 16], strides = [1, 1]} : vector<10x16xf32> to vector<4x16xf32>
    %1383 = vector.broadcast %1381 : f32 to vector<4x16xf32>
    %1384 = arith.mulf %1383, %1382 : vector<4x16xf32>
    %1385 = arith.addf %1365, %1384 : vector<4x16xf32>
    %1386 = vector.extract_strided_slice %1065 {offsets = [0, 2], sizes = [10, 16], strides = [1, 1]} : vector<10x22xf32> to vector<10x16xf32>
    %c249 = arith.constant 249 : index
    %1387 = memref.load %arg1[%c249] : memref<297xf32, #tpu.memory_space<smem>>
    %1388 = vector.extract_strided_slice %1386 {offsets = [0, 0], sizes = [4, 16], strides = [1, 1]} : vector<10x16xf32> to vector<4x16xf32>
    %1389 = vector.broadcast %1387 : f32 to vector<4x16xf32>
    %1390 = arith.mulf %1389, %1388 : vector<4x16xf32>
    %1391 = arith.addf %1370, %1390 : vector<4x16xf32>
    %c256 = arith.constant 256 : index
    %1392 = memref.load %arg1[%c256] : memref<297xf32, #tpu.memory_space<smem>>
    %1393 = vector.extract_strided_slice %1386 {offsets = [1, 0], sizes = [4, 16], strides = [1, 1]} : vector<10x16xf32> to vector<4x16xf32>
    %1394 = vector.broadcast %1392 : f32 to vector<4x16xf32>
    %1395 = arith.mulf %1394, %1393 : vector<4x16xf32>
    %1396 = arith.addf %1375, %1395 : vector<4x16xf32>
    %c263 = arith.constant 263 : index
    %1397 = memref.load %arg1[%c263] : memref<297xf32, #tpu.memory_space<smem>>
    %1398 = vector.extract_strided_slice %1386 {offsets = [2, 0], sizes = [4, 16], strides = [1, 1]} : vector<10x16xf32> to vector<4x16xf32>
    %1399 = vector.broadcast %1397 : f32 to vector<4x16xf32>
    %1400 = arith.mulf %1399, %1398 : vector<4x16xf32>
    %1401 = arith.addf %1380, %1400 : vector<4x16xf32>
    %c270 = arith.constant 270 : index
    %1402 = memref.load %arg1[%c270] : memref<297xf32, #tpu.memory_space<smem>>
    %1403 = vector.extract_strided_slice %1386 {offsets = [3, 0], sizes = [4, 16], strides = [1, 1]} : vector<10x16xf32> to vector<4x16xf32>
    %1404 = vector.broadcast %1402 : f32 to vector<4x16xf32>
    %1405 = arith.mulf %1404, %1403 : vector<4x16xf32>
    %1406 = arith.addf %1385, %1405 : vector<4x16xf32>
    %c277 = arith.constant 277 : index
    %1407 = memref.load %arg1[%c277] : memref<297xf32, #tpu.memory_space<smem>>
    %1408 = vector.extract_strided_slice %1386 {offsets = [4, 0], sizes = [4, 16], strides = [1, 1]} : vector<10x16xf32> to vector<4x16xf32>
    %1409 = vector.broadcast %1407 : f32 to vector<4x16xf32>
    %1410 = arith.mulf %1409, %1408 : vector<4x16xf32>
    %1411 = arith.addf %1391, %1410 : vector<4x16xf32>
    %c284 = arith.constant 284 : index
    %1412 = memref.load %arg1[%c284] : memref<297xf32, #tpu.memory_space<smem>>
    %1413 = vector.extract_strided_slice %1386 {offsets = [5, 0], sizes = [4, 16], strides = [1, 1]} : vector<10x16xf32> to vector<4x16xf32>
    %1414 = vector.broadcast %1412 : f32 to vector<4x16xf32>
    %1415 = arith.mulf %1414, %1413 : vector<4x16xf32>
    %1416 = arith.addf %1396, %1415 : vector<4x16xf32>
    %c291 = arith.constant 291 : index
    %1417 = memref.load %arg1[%c291] : memref<297xf32, #tpu.memory_space<smem>>
    %1418 = vector.extract_strided_slice %1386 {offsets = [6, 0], sizes = [4, 16], strides = [1, 1]} : vector<10x16xf32> to vector<4x16xf32>
    %1419 = vector.broadcast %1417 : f32 to vector<4x16xf32>
    %1420 = arith.mulf %1419, %1418 : vector<4x16xf32>
    %1421 = arith.addf %1401, %1420 : vector<4x16xf32>
    %1422 = vector.extract_strided_slice %1065 {offsets = [0, 3], sizes = [10, 16], strides = [1, 1]} : vector<10x22xf32> to vector<10x16xf32>
    %c250 = arith.constant 250 : index
    %1423 = memref.load %arg1[%c250] : memref<297xf32, #tpu.memory_space<smem>>
    %1424 = vector.extract_strided_slice %1422 {offsets = [0, 0], sizes = [4, 16], strides = [1, 1]} : vector<10x16xf32> to vector<4x16xf32>
    %1425 = vector.broadcast %1423 : f32 to vector<4x16xf32>
    %1426 = arith.mulf %1425, %1424 : vector<4x16xf32>
    %1427 = arith.addf %1406, %1426 : vector<4x16xf32>
    %c257 = arith.constant 257 : index
    %1428 = memref.load %arg1[%c257] : memref<297xf32, #tpu.memory_space<smem>>
    %1429 = vector.extract_strided_slice %1422 {offsets = [1, 0], sizes = [4, 16], strides = [1, 1]} : vector<10x16xf32> to vector<4x16xf32>
    %1430 = vector.broadcast %1428 : f32 to vector<4x16xf32>
    %1431 = arith.mulf %1430, %1429 : vector<4x16xf32>
    %1432 = arith.addf %1411, %1431 : vector<4x16xf32>
    %c264 = arith.constant 264 : index
    %1433 = memref.load %arg1[%c264] : memref<297xf32, #tpu.memory_space<smem>>
    %1434 = vector.extract_strided_slice %1422 {offsets = [2, 0], sizes = [4, 16], strides = [1, 1]} : vector<10x16xf32> to vector<4x16xf32>
    %1435 = vector.broadcast %1433 : f32 to vector<4x16xf32>
    %1436 = arith.mulf %1435, %1434 : vector<4x16xf32>
    %1437 = arith.addf %1416, %1436 : vector<4x16xf32>
    %c271 = arith.constant 271 : index
    %1438 = memref.load %arg1[%c271] : memref<297xf32, #tpu.memory_space<smem>>
    %1439 = vector.extract_strided_slice %1422 {offsets = [3, 0], sizes = [4, 16], strides = [1, 1]} : vector<10x16xf32> to vector<4x16xf32>
    %1440 = vector.broadcast %1438 : f32 to vector<4x16xf32>
    %1441 = arith.mulf %1440, %1439 : vector<4x16xf32>
    %1442 = arith.addf %1421, %1441 : vector<4x16xf32>
    %c278 = arith.constant 278 : index
    %1443 = memref.load %arg1[%c278] : memref<297xf32, #tpu.memory_space<smem>>
    %1444 = vector.extract_strided_slice %1422 {offsets = [4, 0], sizes = [4, 16], strides = [1, 1]} : vector<10x16xf32> to vector<4x16xf32>
    %1445 = vector.broadcast %1443 : f32 to vector<4x16xf32>
    %1446 = arith.mulf %1445, %1444 : vector<4x16xf32>
    %1447 = arith.addf %1427, %1446 : vector<4x16xf32>
    %c285 = arith.constant 285 : index
    %1448 = memref.load %arg1[%c285] : memref<297xf32, #tpu.memory_space<smem>>
    %1449 = vector.extract_strided_slice %1422 {offsets = [5, 0], sizes = [4, 16], strides = [1, 1]} : vector<10x16xf32> to vector<4x16xf32>
    %1450 = vector.broadcast %1448 : f32 to vector<4x16xf32>
    %1451 = arith.mulf %1450, %1449 : vector<4x16xf32>
    %1452 = arith.addf %1432, %1451 : vector<4x16xf32>
    %c292 = arith.constant 292 : index
    %1453 = memref.load %arg1[%c292] : memref<297xf32, #tpu.memory_space<smem>>
    %1454 = vector.extract_strided_slice %1422 {offsets = [6, 0], sizes = [4, 16], strides = [1, 1]} : vector<10x16xf32> to vector<4x16xf32>
    %1455 = vector.broadcast %1453 : f32 to vector<4x16xf32>
    %1456 = arith.mulf %1455, %1454 : vector<4x16xf32>
    %1457 = arith.addf %1437, %1456 : vector<4x16xf32>
    %1458 = vector.extract_strided_slice %1065 {offsets = [0, 4], sizes = [10, 16], strides = [1, 1]} : vector<10x22xf32> to vector<10x16xf32>
    %c251 = arith.constant 251 : index
    %1459 = memref.load %arg1[%c251] : memref<297xf32, #tpu.memory_space<smem>>
    %1460 = vector.extract_strided_slice %1458 {offsets = [0, 0], sizes = [4, 16], strides = [1, 1]} : vector<10x16xf32> to vector<4x16xf32>
    %1461 = vector.broadcast %1459 : f32 to vector<4x16xf32>
    %1462 = arith.mulf %1461, %1460 : vector<4x16xf32>
    %1463 = arith.addf %1442, %1462 : vector<4x16xf32>
    %c258 = arith.constant 258 : index
    %1464 = memref.load %arg1[%c258] : memref<297xf32, #tpu.memory_space<smem>>
    %1465 = vector.extract_strided_slice %1458 {offsets = [1, 0], sizes = [4, 16], strides = [1, 1]} : vector<10x16xf32> to vector<4x16xf32>
    %1466 = vector.broadcast %1464 : f32 to vector<4x16xf32>
    %1467 = arith.mulf %1466, %1465 : vector<4x16xf32>
    %1468 = arith.addf %1447, %1467 : vector<4x16xf32>
    %c265 = arith.constant 265 : index
    %1469 = memref.load %arg1[%c265] : memref<297xf32, #tpu.memory_space<smem>>
    %1470 = vector.extract_strided_slice %1458 {offsets = [2, 0], sizes = [4, 16], strides = [1, 1]} : vector<10x16xf32> to vector<4x16xf32>
    %1471 = vector.broadcast %1469 : f32 to vector<4x16xf32>
    %1472 = arith.mulf %1471, %1470 : vector<4x16xf32>
    %1473 = arith.addf %1452, %1472 : vector<4x16xf32>
    %c272 = arith.constant 272 : index
    %1474 = memref.load %arg1[%c272] : memref<297xf32, #tpu.memory_space<smem>>
    %1475 = vector.extract_strided_slice %1458 {offsets = [3, 0], sizes = [4, 16], strides = [1, 1]} : vector<10x16xf32> to vector<4x16xf32>
    %1476 = vector.broadcast %1474 : f32 to vector<4x16xf32>
    %1477 = arith.mulf %1476, %1475 : vector<4x16xf32>
    %1478 = arith.addf %1457, %1477 : vector<4x16xf32>
    %c279 = arith.constant 279 : index
    %1479 = memref.load %arg1[%c279] : memref<297xf32, #tpu.memory_space<smem>>
    %1480 = vector.extract_strided_slice %1458 {offsets = [4, 0], sizes = [4, 16], strides = [1, 1]} : vector<10x16xf32> to vector<4x16xf32>
    %1481 = vector.broadcast %1479 : f32 to vector<4x16xf32>
    %1482 = arith.mulf %1481, %1480 : vector<4x16xf32>
    %1483 = arith.addf %1463, %1482 : vector<4x16xf32>
    %c286 = arith.constant 286 : index
    %1484 = memref.load %arg1[%c286] : memref<297xf32, #tpu.memory_space<smem>>
    %1485 = vector.extract_strided_slice %1458 {offsets = [5, 0], sizes = [4, 16], strides = [1, 1]} : vector<10x16xf32> to vector<4x16xf32>
    %1486 = vector.broadcast %1484 : f32 to vector<4x16xf32>
    %1487 = arith.mulf %1486, %1485 : vector<4x16xf32>
    %1488 = arith.addf %1468, %1487 : vector<4x16xf32>
    %c293 = arith.constant 293 : index
    %1489 = memref.load %arg1[%c293] : memref<297xf32, #tpu.memory_space<smem>>
    %1490 = vector.extract_strided_slice %1458 {offsets = [6, 0], sizes = [4, 16], strides = [1, 1]} : vector<10x16xf32> to vector<4x16xf32>
    %1491 = vector.broadcast %1489 : f32 to vector<4x16xf32>
    %1492 = arith.mulf %1491, %1490 : vector<4x16xf32>
    %1493 = arith.addf %1473, %1492 : vector<4x16xf32>
    %1494 = vector.extract_strided_slice %1065 {offsets = [0, 5], sizes = [10, 16], strides = [1, 1]} : vector<10x22xf32> to vector<10x16xf32>
    %c252 = arith.constant 252 : index
    %1495 = memref.load %arg1[%c252] : memref<297xf32, #tpu.memory_space<smem>>
    %1496 = vector.extract_strided_slice %1494 {offsets = [0, 0], sizes = [4, 16], strides = [1, 1]} : vector<10x16xf32> to vector<4x16xf32>
    %1497 = vector.broadcast %1495 : f32 to vector<4x16xf32>
    %1498 = arith.mulf %1497, %1496 : vector<4x16xf32>
    %1499 = arith.addf %1478, %1498 : vector<4x16xf32>
    %c259 = arith.constant 259 : index
    %1500 = memref.load %arg1[%c259] : memref<297xf32, #tpu.memory_space<smem>>
    %1501 = vector.extract_strided_slice %1494 {offsets = [1, 0], sizes = [4, 16], strides = [1, 1]} : vector<10x16xf32> to vector<4x16xf32>
    %1502 = vector.broadcast %1500 : f32 to vector<4x16xf32>
    %1503 = arith.mulf %1502, %1501 : vector<4x16xf32>
    %1504 = arith.addf %1483, %1503 : vector<4x16xf32>
    %c266 = arith.constant 266 : index
    %1505 = memref.load %arg1[%c266] : memref<297xf32, #tpu.memory_space<smem>>
    %1506 = vector.extract_strided_slice %1494 {offsets = [2, 0], sizes = [4, 16], strides = [1, 1]} : vector<10x16xf32> to vector<4x16xf32>
    %1507 = vector.broadcast %1505 : f32 to vector<4x16xf32>
    %1508 = arith.mulf %1507, %1506 : vector<4x16xf32>
    %1509 = arith.addf %1488, %1508 : vector<4x16xf32>
    %c273 = arith.constant 273 : index
    %1510 = memref.load %arg1[%c273] : memref<297xf32, #tpu.memory_space<smem>>
    %1511 = vector.extract_strided_slice %1494 {offsets = [3, 0], sizes = [4, 16], strides = [1, 1]} : vector<10x16xf32> to vector<4x16xf32>
    %1512 = vector.broadcast %1510 : f32 to vector<4x16xf32>
    %1513 = arith.mulf %1512, %1511 : vector<4x16xf32>
    %1514 = arith.addf %1493, %1513 : vector<4x16xf32>
    %c280 = arith.constant 280 : index
    %1515 = memref.load %arg1[%c280] : memref<297xf32, #tpu.memory_space<smem>>
    %1516 = vector.extract_strided_slice %1494 {offsets = [4, 0], sizes = [4, 16], strides = [1, 1]} : vector<10x16xf32> to vector<4x16xf32>
    %1517 = vector.broadcast %1515 : f32 to vector<4x16xf32>
    %1518 = arith.mulf %1517, %1516 : vector<4x16xf32>
    %1519 = arith.addf %1499, %1518 : vector<4x16xf32>
    %c287 = arith.constant 287 : index
    %1520 = memref.load %arg1[%c287] : memref<297xf32, #tpu.memory_space<smem>>
    %1521 = vector.extract_strided_slice %1494 {offsets = [5, 0], sizes = [4, 16], strides = [1, 1]} : vector<10x16xf32> to vector<4x16xf32>
    %1522 = vector.broadcast %1520 : f32 to vector<4x16xf32>
    %1523 = arith.mulf %1522, %1521 : vector<4x16xf32>
    %1524 = arith.addf %1504, %1523 : vector<4x16xf32>
    %c294 = arith.constant 294 : index
    %1525 = memref.load %arg1[%c294] : memref<297xf32, #tpu.memory_space<smem>>
    %1526 = vector.extract_strided_slice %1494 {offsets = [6, 0], sizes = [4, 16], strides = [1, 1]} : vector<10x16xf32> to vector<4x16xf32>
    %1527 = vector.broadcast %1525 : f32 to vector<4x16xf32>
    %1528 = arith.mulf %1527, %1526 : vector<4x16xf32>
    %1529 = arith.addf %1509, %1528 : vector<4x16xf32>
    %1530 = vector.extract_strided_slice %1065 {offsets = [0, 6], sizes = [10, 16], strides = [1, 1]} : vector<10x22xf32> to vector<10x16xf32>
    %c253 = arith.constant 253 : index
    %1531 = memref.load %arg1[%c253] : memref<297xf32, #tpu.memory_space<smem>>
    %1532 = vector.extract_strided_slice %1530 {offsets = [0, 0], sizes = [4, 16], strides = [1, 1]} : vector<10x16xf32> to vector<4x16xf32>
    %1533 = vector.broadcast %1531 : f32 to vector<4x16xf32>
    %1534 = arith.mulf %1533, %1532 : vector<4x16xf32>
    %1535 = arith.addf %1514, %1534 : vector<4x16xf32>
    %c260 = arith.constant 260 : index
    %1536 = memref.load %arg1[%c260] : memref<297xf32, #tpu.memory_space<smem>>
    %1537 = vector.extract_strided_slice %1530 {offsets = [1, 0], sizes = [4, 16], strides = [1, 1]} : vector<10x16xf32> to vector<4x16xf32>
    %1538 = vector.broadcast %1536 : f32 to vector<4x16xf32>
    %1539 = arith.mulf %1538, %1537 : vector<4x16xf32>
    %1540 = arith.addf %1519, %1539 : vector<4x16xf32>
    %c267 = arith.constant 267 : index
    %1541 = memref.load %arg1[%c267] : memref<297xf32, #tpu.memory_space<smem>>
    %1542 = vector.extract_strided_slice %1530 {offsets = [2, 0], sizes = [4, 16], strides = [1, 1]} : vector<10x16xf32> to vector<4x16xf32>
    %1543 = vector.broadcast %1541 : f32 to vector<4x16xf32>
    %1544 = arith.mulf %1543, %1542 : vector<4x16xf32>
    %1545 = arith.addf %1524, %1544 : vector<4x16xf32>
    %c274 = arith.constant 274 : index
    %1546 = memref.load %arg1[%c274] : memref<297xf32, #tpu.memory_space<smem>>
    %1547 = vector.extract_strided_slice %1530 {offsets = [3, 0], sizes = [4, 16], strides = [1, 1]} : vector<10x16xf32> to vector<4x16xf32>
    %1548 = vector.broadcast %1546 : f32 to vector<4x16xf32>
    %1549 = arith.mulf %1548, %1547 : vector<4x16xf32>
    %1550 = arith.addf %1529, %1549 : vector<4x16xf32>
    %c281 = arith.constant 281 : index
    %1551 = memref.load %arg1[%c281] : memref<297xf32, #tpu.memory_space<smem>>
    %1552 = vector.extract_strided_slice %1530 {offsets = [4, 0], sizes = [4, 16], strides = [1, 1]} : vector<10x16xf32> to vector<4x16xf32>
    %1553 = vector.broadcast %1551 : f32 to vector<4x16xf32>
    %1554 = arith.mulf %1553, %1552 : vector<4x16xf32>
    %1555 = arith.addf %1535, %1554 : vector<4x16xf32>
    %c288 = arith.constant 288 : index
    %1556 = memref.load %arg1[%c288] : memref<297xf32, #tpu.memory_space<smem>>
    %1557 = vector.extract_strided_slice %1530 {offsets = [5, 0], sizes = [4, 16], strides = [1, 1]} : vector<10x16xf32> to vector<4x16xf32>
    %1558 = vector.broadcast %1556 : f32 to vector<4x16xf32>
    %1559 = arith.mulf %1558, %1557 : vector<4x16xf32>
    %1560 = arith.addf %1540, %1559 : vector<4x16xf32>
    %c295 = arith.constant 295 : index
    %1561 = memref.load %arg1[%c295] : memref<297xf32, #tpu.memory_space<smem>>
    %1562 = vector.extract_strided_slice %1530 {offsets = [6, 0], sizes = [4, 16], strides = [1, 1]} : vector<10x16xf32> to vector<4x16xf32>
    %1563 = vector.broadcast %1561 : f32 to vector<4x16xf32>
    %1564 = arith.mulf %1563, %1562 : vector<4x16xf32>
    %1565 = arith.addf %1545, %1564 : vector<4x16xf32>
    %1566 = arith.addf %1560, %1565 : vector<4x16xf32>
    %1567 = arith.addf %1566, %1550 : vector<4x16xf32>
    %1568 = arith.addf %1567, %1555 : vector<4x16xf32>
    %c296 = arith.constant 296 : index
    %1569 = memref.load %arg1[%c296] : memref<297xf32, #tpu.memory_space<smem>>
    %1570 = vector.broadcast %1569 : f32 to vector<4x16xf32>
    %1571 = arith.addf %1568, %1570 : vector<4x16xf32>
    %1572 = arith.negf %1571 : vector<4x16xf32>
    %1573 = math.exp %1572 : vector<4x16xf32>
    %cst_34 = arith.constant 1.000000e+00 : f32
    %1574 = vector.broadcast %cst_34 : f32 to vector<4x16xf32>
    %1575 = arith.addf %1574, %1573 : vector<4x16xf32>
    %1576 = arith.divf %1574, %1575 : vector<4x16xf32>
    %1577 = vector.shape_cast %538 : vector<16x16xf32> to vector<1x16x16xf32>
    %1578 = vector.shape_cast %1057 : vector<4x16xf32> to vector<4x1x16xf32>
    %1579 = vector.broadcast %1577 : vector<1x16x16xf32> to vector<4x16x16xf32>
    %1580 = vector.broadcast %1578 : vector<4x1x16xf32> to vector<4x16x16xf32>
    %1581 = arith.addf %1579, %1580 : vector<4x16x16xf32>
    %1582 = vector.shape_cast %1576 : vector<4x16xf32> to vector<4x16x1xf32>
    %1583 = vector.broadcast %1582 : vector<4x16x1xf32> to vector<4x16x16xf32>
    %1584 = arith.addf %1581, %1583 : vector<4x16x16xf32>
    %cst_35 = arith.constant 0.333333343 : f32
    %1585 = vector.broadcast %cst_35 : f32 to vector<4x16x16xf32>
    %1586 = arith.mulf %1584, %1585 : vector<4x16x16xf32>
    %1587 = arith.mulf %1, %1586 : vector<4x16x16xf32>
    %c0_36 = arith.constant 0 : index
    %c0_37 = arith.constant 0 : index
    %c0_38 = arith.constant 0 : index
    %c0_39 = arith.constant 0 : index
    %1588 = vector.load %arg3[%c0_36, %c0_37, %c0_38, %c0_39] : memref<1x4x16x16xf32, #tpu.memory_space<vmem>>, vector<1x4x16x16xf32>
    %1589 = vector.shape_cast %1588 : vector<1x4x16x16xf32> to vector<4x16x16xf32>
    %1590 = vector.shape_cast %1587 : vector<4x16x16xf32> to vector<1x4x16x16xf32>
    tpu.vector_store %arg3[%c0_36, %c0_37, %c0_38, %c0_39], %1590 {strides = array<i32>} : memref<1x4x16x16xf32, #tpu.memory_space<vmem>>, vector<1x4x16x16xf32>,
    return
  }
  func.func @transform_0(%arg0: i32) -> i32 {
    %c0_i32 = arith.constant 0 : i32
    %c0_i32_0 = arith.constant 0 : i32
    return %c0_i32 : i32
  }
  func.func @transform_1(%arg0: i32) -> (i32, i32, i32, i32) {
    %c0_i32 = arith.constant 0 : i32
    %c0_i32_0 = arith.constant 0 : i32
    %c0_i32_1 = arith.constant 0 : i32
    %c0_i32_2 = arith.constant 0 : i32
    return %arg0, %c0_i32, %c0_i32_0, %c0_i32_1 : i32, i32, i32, i32
  }
  func.func @transform_2(%arg0: i32) -> (i32, i32, i32, i32) {
    %c0_i32 = arith.constant 0 : i32
    %c0_i32_0 = arith.constant 0 : i32
    %c0_i32_1 = arith.constant 0 : i32
    %c0_i32_2 = arith.constant 0 : i32
    return %arg0, %c0_i32, %c0_i32_0, %c0_i32_1 : i32, i32, i32, i32
  }
  func.func @transform_3(%arg0: i32) -> (i32, i32, i32, i32) {
    %c0_i32 = arith.constant 0 : i32
    %c0_i32_0 = arith.constant 0 : i32
    %c0_i32_1 = arith.constant 0 : i32
    %c0_i32_2 = arith.constant 0 : i32
    return %arg0, %c0_i32, %c0_i32_0, %c0_i32_1 : i32, i32, i32, i32
  }
}

</mosaic_0001>

<bundles_post_ra>
// kernel: tpu_custom_call.1
= control target key start
LH: loop header
LB: loop body
LE: loop exit
PB: predicated region body
PF: predicated region fallthrough
CT: control target
= control target key end

     0   :  { %9 = vsyncpa [#allocation5], 0  ;;  %s9093_s0 = inlined_call_operand.hbm [shape: f32[297], index: 0, kind: input, shape index: {}]   ;;  %s9094_s1 = inlined_call_operand.hbm [shape: f32[2,4,16,16], index: 1, kind: input, shape index: {}]   ;;  %s9095_s2 = inlined_call_operand.hbm [shape: f32[2,4,16,16], index: 2, kind: output, shape index: {0}]   ;;  %s9096_s3 = inlined_call_operand.hbm [shape: f32[2,2,16,16], index: 3, kind: output, shape index: {1}]  }
   0x1   :  { %10 = vsyncpa [#allocation3], 0 }
   0x2   :  { %12 = vsyncpa [#allocation3 + $0x1], 0 }
   0x3   :  { %13 = vsyncpa [#allocation4], 0 }
   0x4   :  { %15 = vsyncpa [#allocation4 + $0x1], 0 }
   0x5   :  { %16 = vsyncpa [#allocation9], 0 }
   0x6   :  { %18 = vsyncpa [#allocation9 + $0x1], 0  ;;  %s5538_s12 = smov 0   ;;  %s5540_s13 = smov 0  }
   0x7   :  { %s5542_s14 = smov 0   ;;  %s5544_s15 = smov 0  }
   0x8 LB: > { %s5559_s16 = sadd.s32 4294967295, %s5499_s15   ;;  %s4938_s17 = sadd.s32 4294967294, %s5499_s15   ;;  %s5499_s15 = sphi %s5544_s15, %s9771_s15   ;;  %s5495_s14 = sphi %s5542_s14, %s9770_s14   ;;  %s5491_s13 = sphi %s5540_s13, %s9769_s13   ;;  %s5487_s12 = sphi %s5538_s12, %s9768_s12  }
   0x9   : > { %s5563_s18 = sadd.s32 1, %s5499_s15   ;;  %s52_s19 = sadd.s32 1, %s5495_s14 }
   0xa   : > { %s49_s20 = ssub.s32 %s5499_s15, %s5563_s18  ;;  %p59_p0 = scmp.ne.s32.totalorder %s5495_s14, %s5491_s13 }
   0xb   : > { %p50_p1 = scmp.eq.s32.totalorder %s49_s20, 0  ;;  %p60_p2 = scmp.eq.s32.totalorder %s5499_s15, 0 }
   0xc   : > { %p65_p3 = scmp.ne.s32.totalorder %s5491_s13, %s5487_s12  ;;  %p9097_p4 = scmp.eq.s32.totalorder %s5559_s16, 0 }
   0xd   : > { %s5575_s21 = scalar_select %p50_p1, %s5495_s14, %s52_s19  }
   0xe   : > { %p5577_p5 = por %p60_p2, %p59_p0  ;;  %p5583_p6 = por %p9097_p4, %p65_p3 }
   0xf   : > { %p89_p7 = scmp.eq.s32.totalorder %s5559_s16, 1  ;;  %p95_p8 = scmp.eq.s32.totalorder %s4938_s17, 1 }
  0x10   : > { %s9122_s23 = scalar_select %p5583_p6, 1, 0 }
  0x11   : > { %p4939_p9 = scmp.ge.s32.totalorder %s5499_s15, 1  ;;  %p128_p10 = scmp.lt.s32.totalorder %s5499_s15, 3 }
  0x12   : > { %p5590_p11 = por %p89_p7, %p59_p0  ;;  %p5594_p12 = por %p95_p8, %p65_p3 }
  0x13   : > { %p5598_p13 = pnand %p4939_p9, %p128_p10  ;;  %p5289_p4 = scmp.lt.s32.totalorder %s5499_s15, 2 }
  0x14   : > { %s9123_s24 = scalar_select %p5590_p11, 1, 0 }
  0x15   : > { %s9124_s25 = scalar_select %p5594_p12, 1, 0 }
  0x16   : > { %s9125_s26 = scalar_select %p5598_p13, 1, 0 }
  0x17   : > { %p5273_p2 = pneg %p5598_p13  ;;  %s150_s27 = sand.u32 1, %s5495_s14  }
  0x18   : > { %s5260_s28 = sshll.u32 %s5499_s15, 10  ;;  %p9126_p6 = scmp.eq.s32.totalorder %s5559_s16, 0 }
  0x19   : > { %p5612_p7 = pnand %p5289_p4, %p5577_p5  ;;  %s4942_s30 = sshll.u32 %s150_s27, 6 }
  0x1a   : > { %p5274_p0 = pnand %p5273_p2, %p9126_p6  ;;  %s5501_s4 = smov [#allocation2]  }
  0x1b   : > { %s5622_s9 = scalar_lea.hbm %s9094_s1, %s5260_s28  ;;  %s154_s10 = scalar_lea.vmem [#allocation6], %s4942_s30 }
  0x1c   : > { %5276 = dma.hbm_to_smem (!%p5274_p0), %s9093_s0, 48, %s5501_s4, [#allocation5]  }
  0x1d   : > { %s161_s11 = sshll.u32 %s154_s10, 4  ;;  %s5626_s17 = scalar_lea.sflag [#allocation3], %s150_s27  ;;  %s5624_s11 = int_to_ptr.vmem [resolvable:$true] %s161_s11 }
  0x1e   : > { %s5373_s19 = scalar_lea.hbm %s5622_s9, 1024  ;;  %p5375_p4 = pneg %p5612_p7 }
  0x1f   : > { %p5374_p3 = scmp.ne.s32.totalorder %s5622_s9, %s5373_s19  ;;  %s5378_s28 = scalar_lea.hbm %s9094_s1, 2048 }
  0x20   : > { %p5379_p8 = scmp.lt.s32.totalorder %s5622_s9, %s9094_s1  ;;  %p5380_p9 = scmp.lt.s32.totalorder %s5378_s28, %s5373_s19 }
  0x21   : > { %p5376_p5 = pnand %p5375_p4, %p5374_p3 }
  0x22   : > { %p5381_p10 = por %p5380_p9, %p5379_p8 }
  0x23   : > { %p5377_p6 = pneg %p5376_p5 }
  0x25   : > { %p5382_p2 = pnand %p5381_p10, %p5377_p6 }
  0x27   : > { %5385 = shalt.err (!%p5382_p2)
}
  0x28   : > { %s5386_s27 = scalar_lea.vmem %s5624_s11, 1024  ;;  %s5502_s30 = smov [#allocation6]  }
  0x29   : > { %p5387_p0 = scmp.ne.s32.totalorder %s5624_s11, %s5386_s27  ;;  %s5391_s6 = sshll.u32 %s5502_s30, 4  ;;  %s5392_s6 = int_to_ptr.vmem [resolvable:$false] %s5391_s6 }
  0x2a   : > { %s5393_s7 = scalar_lea.vmem %s5392_s6, 2048  ;;  %p5394_p5 = scmp.lt.s32.totalorder %s5624_s11, %s5392_s6 }
  0x2b   : > { %p5389_p1 = pnand %p5387_p0, %p5375_p4  ;;  %p5395_p12 = scmp.lt.s32.totalorder %s5393_s7, %s5386_s27 }
  0x2d   : > { %p5390_p3 = pneg %p5389_p1  ;;  %p5396_p11 = por %p5395_p12, %p5394_p5 }
  0x2f   : > { %p5397_p13 = pnand %p5396_p11, %p5390_p3 }
  0x31   : > { %5400 = shalt.err (!%p5397_p13)
}
  0x32   : > { %s5503_s8 = smov 128   ;;  %s5504_s10 = smov 8  }
  0x33   : > { %5280 = dma.hbm_to_vmem [thread:$0]  (!%p5612_p7), %s5622_s9, 1024, %s5624_s11, %s5626_s17, %s5503_s8, %s5503_s8, %s5504_s10  }
  0x34   : > { %p9128_p4 = scmp.ne.s32.totalorder %s9125_s26, 0 }
  0x36   : > { %173 = sbr.rel (%p9128_p4) target bundleno = 1508 (0x5e4), region = 28 }
  0x3b   : > { %p9129_p1 = scmp.eq.s32.totalorder %s5559_s16, 0 }
  0x3d   : > { %5470 = dma.done.wait (%p9129_p1), [#allocation5], 48   ;;  %p9130_p6 = pmov %p9129_p1 }
  0x3e   : > { %s5654_s19 = sand.u32 1, %s5491_s13   ;;  %p9131_p11 = scmp.ne.s32.totalorder %s9122_s23, 0 }
  0x3f   : > { %5472 = vsyncadd (%p9130_p6), [#allocation5], 4294967248  ;;  %s9107_s20 = sshll.u32 %s5654_s19, 6  ;;  %s180_s22 = scalar_lea.sflag [#allocation3], %s5654_s19 }
  0x40   : > { %s5660_s29 = scalar_lea.vmem [#allocation6], %s9107_s20 }
  0x41   : > { %5474 = dma.done.wait (%p9131_p11), %s180_s22, 1024  }
  0x42   : > { %5476 = vsyncadd (%p9131_p11), %s180_s22, 4294966272 }
  0x43   : > { %188 = sfence }
  0x44   : > { %v214_v0 = vld [vmem:[%s5660_s29 + $0x10] sm:$0xff]  ;;  %vm220_vm0 = vcmask 130048   ;;  %v212_v1 = vld [vmem:[%s5660_s29] sm:$0xff]  ;;  %v215_v2 = vld [vmem:[%s5660_s29 + $0x18] sm:$0xff]  ;;  %s4949_s23 = sshll.u32 %s5654_s19, 5  ;;  %vm360_vm1 = vcmask 1042432  }
  0x45   : > { %v222_v3 = vsel %vm220_vm0, %v214_v0, -inf  ;;  %v221_v4 = vsel %vm220_vm0, %v212_v1, -inf  ;;  %v229_v5 = vsel %vm220_vm0, %v215_v2, -inf  ;;  %v213_v6 = vld [vmem:[%s5660_s29 + $0x8] sm:$0xff]  ;;  %v216_v8 = vld [vmem:[%s5660_s29 + $0x20] sm:$0xff]  ;;  %v219_v13 = vld [vmem:[%s5660_s29 + $0x38] sm:$0xff] }
  0x46   : > { %v217_v7 = vld [vmem:[%s5660_s29 + $0x28] sm:$0xff]  ;;  %317 = vmax.xlane.f32.xlu1 %v222_v3  ;;  %313 = vmax.xlane.f32.xlu0 %v221_v4  ;;  %v5675_v9 = vmax.f32 %v222_v3, %v229_v5  ;;  %v228_v10 = vsel %vm220_vm0, %v213_v6, -inf  ;;  %v223_v12 = vsel %vm220_vm0, %v216_v8, -inf  ;;  %v218_v14 = vld [vmem:[%s5660_s29 + $0x30] sm:$0xff]  ;;  %v232_v18 = vsel %vm220_vm0, %v219_v13, -inf  ;;  %s5697_s26 = scalar_lea.vmem [#allocation8], %s4949_s23 }
  0x47   : > { %v230_v11 = vsel %vm220_vm0, %v217_v7, -inf  ;;  %v5682_v15 = vmax.f32 %v221_v4, %v228_v10  ;;  %v233_v19 = vmax.f32 %v229_v5, %v232_v18  ;;  %v225_v20 = vsel %vm220_vm0, %v218_v14, -inf  ;;  %s5505_s9 = smov 3   ;;  %s4958_s11 = sld [smem:[#allocation2 + $0x1]] }
  0x48   : > { %v231_v16 = vmax.f32 %v228_v10, %v230_v11  ;;  %v5684_v17 = vmax.f32 %v223_v12, %v230_v11  ;;  %v5689_v21 = vmax.f32 %v225_v20, %v232_v18  ;;  %v242_v22 = vsel %vm220_vm0, %v213_v6, 0.0  ;;  %s4960_s17 = sld [smem:[#allocation2 + $0xf]]  ;;  %s5506_s6 = smov 127  }
  0x49   : > { %v235_v23 = vsel %vm220_vm0, %v212_v1, 0.0  ;;  %v243_v26 = vsel %vm220_vm0, %v215_v2, 0.0  ;;  %v236_v28 = vsel %vm220_vm0, %v214_v0, 0.0  ;;  %v245_v31 = vsel %vm220_vm0, %v217_v7, 0.0  ;;  %s4961_s28 = sld [smem:[#allocation2 + $0x16]]  ;;  %s9108_s23 = smov 126  }
  0x4a   : > { %319 = vmax.xlane.f32.xlu1 %v229_v5  ;;  %315 = vmax.xlane.f32.xlu0 %v228_v10  ;;  %v234_v24 = vmax.f32 %v231_v16, %v233_v19  ;;  %v5693_v25 = vadd.f32 %v242_v22, %v235_v23  ;;  %v244_v27 = vadd.f32 %v243_v26, %v242_v22  ;;  %v238_v33 = vsel %vm220_vm0, %v216_v8, 0.0  ;;  %s4962_s4 = sld [smem:[#allocation2 + $0x1d]]  ;;  %p9624_p13 = scmp.ne.s32.totalorder %s9123_s24, 0 }
  0x4b   : > { %v237_v29 = vadd.f32 %v236_v28, %v235_v23  ;;  %v5701_v30 = vadd.f32 %v243_v26, %v236_v28  ;;  %v224_v35 = vmax.f32 %v221_v4, %v223_v12  ;;  %v226_v36 = vmax.f32 %v222_v3, %v225_v20  ;;  %s5769_s5 = sld [smem:[#allocation2 + $0x2]] }
  0x4c   : > { %354 = vst.msk [vmem:[%s5697_s26 + $0x8] sm:$0xff] %vm220_vm0, %v234_v24  ;;  %v246_v32 = vadd.f32 %v245_v31, %v244_v27  ;;  %v5705_v37 = vadd.f32 %v245_v31, %v238_v33  ;;  %v247_v38 = vsel %vm220_vm0, %v219_v13, 0.0  ;;  %v240_v40 = vsel %vm220_vm0, %v218_v14, 0.0  ;;  %s4964_s27 = sld [smem:[#allocation2 + $0x2b]] }
  0x4d   : > { %v239_v34 = vadd.f32 %v238_v33, %v237_v29  ;;  %v5709_v42 = vadd.f32 %v247_v38, %v240_v40  ;;  %v227_v44 = vmax.f32 %v224_v35, %v226_v36  ;;  %v362_v47 = vrot.slane %v234_v24, 5  ;;  %s4966_s30 = sld [smem:[#allocation2 + $0x9]] }
  0x4e   : > { %323 = vmax.xlane.f32.xlu1 %v230_v11  ;;  %321 = vmax.xlane.f32.xlu0 %v223_v12  ;;  %v248_v39 = vadd.f32 %v247_v38, %v246_v32  ;;  %vm379_vm2 = vcmask 23552   ;;  %vm383_vm3 = vcmask 154624   ;;  %v489_v11 = vstv %s4958_s11  ;;  %s4969_s7 = sld [smem:[#allocation2 + $0x1e]] }
  0x4f   : > { %v241_v41 = vadd.f32 %v240_v40, %v239_v34  ;;  %353 = vst.msk [vmem:[%s5697_s26] sm:$0xff] %vm220_vm0, %v227_v44  ;;  %v361_v46 = vrot.slane %v227_v44, 5  ;;  %v367_v49 = vsel %vm360_vm1, %v362_v47, 0.0  ;;  %s4968_s8 = sld [smem:[#allocation2 + $0x17]]  ;;  %vm517_vm4 = vcmask 1046528  }
  0x50   : > { %v251_v43 = vmul.f32 0.25, %v248_v39  ;;  %v5791_v29 = vstv %s4962_s4  ;;  %s4959_s10 = sld [smem:[#allocation2 + $0x8]]  ;;  %vm658_vm5 = vcmask 1041408   ;;  %vm707_vm6 = vcmask 1045504  }
  0x51   : > { %v250_v45 = vmul.f32 0.25, %v241_v41  ;;  %v363_v48 = vsel %vm360_vm1, %v361_v46, %v362_v47  ;;  %v366_v51 = vsel %vm360_vm1, 0.0, %v361_v46  ;;  %v653_v35 = vstv %s5769_s5  ;;  %s4970_s22 = sld [smem:[#allocation2 + $0x25]] }
  0x52   : > { %327 = vmax.xlane.f32.xlu1 %v232_v18  ;;  %325 = vmax.xlane.f32.xlu0 %v225_v20  ;;  %4951 = vst.msk [vmem:[%s5697_s26 + $0x18] sm:$0xff] %vm220_vm0, %v251_v43  ;;  %v390_v52 = vrot.slane %v251_v43, 5  ;;  %v5805_v36 = vstv %s4964_s27  ;;  %s4963_s11 = sld [smem:[#allocation2 + $0x24]]  ;;  %vm823_vm7 = vcmask 1040384   ;;  %vm897_vm8 = vcmask 1044480  }
  0x53   : > { %4950 = vst.msk [vmem:[%s5697_s26 + $0x10] sm:$0xff] %vm220_vm0, %v250_v45  ;;  %v389_v50 = vrot.slane %v250_v45, 5  ;;  %v5816_v43 = vstv %s4966_s30  ;;  %s5960_s4 = sld [smem:[#allocation2 + $0x3]]  ;;  %vm440_vm9 = vcmask 1043456   ;;  %vm2586_vm10 = vcmask 1044484  }
  0x54   : > { %v395_v55 = vsel %vm360_vm1, %v390_v52, 0.0  ;;  %s4973_s5 = sld [smem:[#allocation2 + $0xa]]  ;;  %vm2588_vm11 = vcmask 1045509   ;;  %vm2590_vm12 = vcmask 1046534   ;;  %vm3601_vm13 = vcmask 130112  }
  0x55   : > { %v394_v53 = vsel %vm360_vm1, 0.0, %v389_v50  ;;  %v391_v54 = vsel %vm360_vm1, %v389_v50, %v390_v52  ;;  %s4974_s27 = sld [smem:[#allocation2 + $0x11]] }
  0x56   : > { %331 = vadd.xlane.f32.xlu1 %v242_v22  ;;  %329 = vadd.xlane.f32.xlu0 %v235_v23  ;;  %v510_v50 = vstv %s4959_s10  ;;  %s4975_s30 = sld [smem:[#allocation2 + $0x18]] }
  0x57   : > { %s4977_s10 = sld [smem:[#allocation2 + $0x26]] }
  0x58   : > { %s7038_s20 = sld [smem:[#allocation2 + $0x65]] }
  0x5a   : > { %335 = vadd.xlane.f32.xlu1 %v243_v26  ;;  %333 = vadd.xlane.f32.xlu0 %v236_v28  ;;  %v5782_v26 = vstv %s4960_s17  ;;  %v557_v28 = vstv %s4961_s28  ;;  %s4967_s17 = sld [smem:[#allocation2 + $0x10]] }
  0x5b   : > { %s4971_s28 = sld [smem:[#allocation2 + $0x2c]] }
  0x5e   : > { %339 = vadd.xlane.f32.xlu1 %v245_v31  ;;  %337 = vadd.xlane.f32.xlu0 %v238_v33 }
  0x62   : > { %343 = vadd.xlane.f32.xlu1 %v247_v38  ;;  %341 = vadd.xlane.f32.xlu0 %v240_v40 }
  0x73   : > { %372 = vrot.lane.b32.xlu1 %v363_v48, %s5505_s9  ;;  %v5839_v48 = vstv %s4969_s7  ;;  %s5508_s7 = smov 125  }
  0x77   : > { %374 = vrot.lane.b32.xlu1 %v367_v49, %s5505_s9  ;;  %v5841_v49 = vstv %s4968_s8  ;;  %s4976_s8 = sld [smem:[#allocation2 + $0x1f]] }
  0x78   : > { %370 = vrot.lane.b32.xlu0 %v366_v51, %s5505_s9 }
  0x7b   : > { %398 = vrot.lane.b32.xlu1 %v394_v53, %s5505_s9 }
  0x7c   : > { %400 = vrot.lane.b32.xlu0 %v391_v54, %s5505_s9 }
  0x7f   : > { %402 = vrot.lane.b32.xlu1 %v395_v55, %s5505_s9 }
  0xcf   : > { %v5729_v56 = vpop.xlane.xlu1 %317  ;;  %v5731_v57 = vpop.xlane.xlu0 %313 }
  0xd3   : > { %v5733_v58 = vpop.xlane.xlu1 %319  ;;  %v5735_v59 = vpop.xlane.xlu0 %315 }
  0xd7   : > { %v5737_v60 = vpop.xlane.xlu1 %323  ;;  %v5739_v61 = vpop.xlane.xlu0 %321 }
  0xdb   : > { %v5741_v62 = vpop.xlane.xlu1 %327  ;;  %v5743_v63 = vpop.xlane.xlu0 %325 }
  0xdf   : > { %v5745_v0 = vpop.xlane.xlu1 %331  ;;  %v5747_v1 = vpop.xlane.xlu0 %329 }
  0xe3   : > { %v5749_v2 = vpop.xlane.xlu1 %335  ;;  %v5751_v3 = vpop.xlane.xlu0 %333 }
  0xe7   : > { %v5753_v4 = vpop.xlane.xlu1 %339  ;;  %v5755_v5 = vpop.xlane.xlu0 %337 }
  0xeb   : > { %v5757_v6 = vpop.xlane.xlu1 %343  ;;  %v5759_v7 = vpop.xlane.xlu0 %341 }
  0xef   : > { %v371_v8 = vpop.permute.xlu0 %370  ;;  %v373_v10 = vpop.permute.xlu1 %372 }
  0xf0   : > { %v380_v12 = vsel %vm379_vm2, 0.0, %v371_v8  ;;  %v381_v13 = vsel %vm379_vm2, 0.0, %v373_v10  ;;  %v5860_v8 = vstv %s4970_s22  ;;  %s4978_s22 = sld [smem:[#allocation2 + $0x2d]] }
  0xf1   : > { %v5764_v14 = vsel %vm383_vm3, %v380_v12, 0.0  ;;  %v5767_v16 = vsel %vm383_vm3, %v381_v13, 0.0 }
  0xf2   : > { %v5772_v18 = vmul.f32 %v489_v11, %v5764_v14  ;;  %v5777_v23 = vmul.f32 %v489_v11, %v5767_v16  ;;  %v5814_v41 = vmul.f32 %v653_v35, %v5764_v14  ;;  %v5828_v46 = vmul.f32 %v5816_v43, %v5764_v14 }
  0xf3   : > { %v375_v19 = vpop.permute.xlu1 %374  ;;  %v5831_v47 = vmul.f32 %v653_v35, %v5767_v16  ;;  %v512_v10 = vmul.f32 %v510_v50, %v5767_v16  ;;  %v511_v35 = vmul.f32 %v510_v50, %v5764_v14 }
  0xf4   : > { %v382_v20 = vsel %vm379_vm2, 0.0, %v375_v19  ;;  %v494_v22 = vrot.slane %v5772_v18, 5  ;;  %v495_v31 = vrot.slane %v5777_v23, 5  ;;  %v9105_v45 = vrot.slane %v5814_v41, 6 }
  0xf5   : > { %v5780_v24 = vsel %vm383_vm3, %v382_v20, 0.0  ;;  %v9101_v51 = vrot.slane %v5828_v46, 6  ;;  %v9106_v52 = vrot.slane %v5831_v47, 6  ;;  %v519_v20 = vrot.slane %v512_v10, 1 }
  0xf6   : > { %497 = vrot.lane.b32.xlu0 %v494_v22, %s5506_s6  ;;  %v5789_v27 = vmul.f32 %v5782_v26, %v5780_v24  ;;  %v5796_v33 = vmul.f32 %v557_v28, %v5780_v24  ;;  %v5800_v34 = vmul.f32 %v5791_v29, %v5780_v24  ;;  %v5811_v40 = vmul.f32 %v5805_v36, %v5780_v24 }
  0xf7   : > { %v5847_v53 = vmul.f32 %v5839_v48, %v5780_v24  ;;  %v5851_v54 = vmul.f32 %v5841_v49, %v5780_v24  ;;  %v513_v55 = vmul.f32 %v510_v50, %v5780_v24  ;;  %v5867_v13 = vmul.f32 %v5860_v8, %v5780_v24 }
  0xf8   : > { %v542_v32 = vrot.slane %v5789_v27, 1  ;;  %v567_v38 = vrot.slane %v5796_v33, 1  ;;  %v592_v39 = vrot.slane %v5800_v34, 1  ;;  %v9102_v44 = vrot.slane %v5811_v40, 5 }
  0xf9   : > { %v9103_v11 = vrot.slane %v5847_v53, 2  ;;  %v9104_v12 = vrot.slane %v5851_v54, 2  ;;  %v521_v19 = vrot.slane %v513_v55, 1  ;;  %v534_v23 = vmul.f32 %v5782_v26, %v5767_v16 }
  0xfa   : > { %501 = vrot.lane.b32.xlu0 %v495_v31, %s5506_s6  ;;  %548 = vrot.lane.b32.xlu1 %v542_v32, %s5506_s6  ;;  %v782_v27 = vrot.slane %v5867_v13, 2  ;;  %v558_v55 = vmul.f32 %v557_v28, %v5764_v14  ;;  %v678_v33 = vmul.f32 %v5816_v43, %v5780_v24  ;;  %v840_v13 = vstv %s4973_s5  ;;  %s4982_s5 = sld [smem:[#allocation2 + $0x19]] }
  0xfb   : > { %v540_v10 = vrot.slane %v534_v23, 1 }
  0xfd   : > { %v543_v50 = vsel %vm517_vm4, %v540_v10, %v542_v32 }
  0xfe   : > { %573 = vrot.lane.b32.xlu0 %v567_v38, %s5506_s6  ;;  %598 = vrot.lane.b32.xlu1 %v592_v39, %s5506_s6 }
 0x102   : > { %644 = vrot.lane.b32.xlu0 %v9102_v44, %s5506_s6  ;;  %662 = vrot.lane.b32.xlu1 %v9105_v45, %s9108_s23  ;;  %v559_v44 = vmul.f32 %v557_v28, %v5767_v16  ;;  %v607_v45 = vstv %s4963_s11  ;;  %v533_v28 = vmul.f32 %v5782_v26, %v5764_v14  ;;  %s4979_s11 = sld [smem:[#allocation2 + $0x4]] }
 0x103   : > { %v608_v18 = vmul.f32 %v607_v45, %v5764_v14  ;;  %v609_v32 = vmul.f32 %v607_v45, %v5767_v16 }
 0x104   : > { %v539_v23 = vrot.slane %v533_v28, 1 }
 0x106   : > { %687 = vrot.lane.b32.xlu0 %v9101_v51, %s9108_s23  ;;  %666 = vrot.lane.b32.xlu1 %v9106_v52, %s9108_s23  ;;  %v522_v51 = vsel %vm517_vm4, %v519_v20, %v521_v19  ;;  %v564_v19 = vrot.slane %v558_v55, 1  ;;  %v565_v52 = vrot.slane %v559_v44, 1  ;;  %v614_v44 = vrot.slane %v608_v18, 5 }
 0x107   : > { %v541_v55 = vsel %vm517_vm4, %v539_v23, %v540_v10 }
 0x10a   : > { %763 = vrot.lane.b32.xlu0 %v9103_v11, %s9108_s23  ;;  %738 = vrot.lane.b32.xlu1 %v9104_v12, %s9108_s23  ;;  %v496_v11 = vsel %vm360_vm1, %v494_v22, %v495_v31  ;;  %v518_v12 = vrot.slane %v511_v35, 1  ;;  %v566_v31 = vsel %vm517_vm4, %v564_v19, %v565_v52  ;;  %v629_v35 = vmul.f32 %v5805_v36, %v5764_v14 }
 0x10c   : > { %v520_v22 = vsel %vm517_vm4, %v518_v12, %v519_v20  ;;  %v615_v20 = vrot.slane %v609_v32, 5  ;;  %v635_v28 = vrot.slane %v629_v35, 5  ;;  %v685_v32 = vrot.slane %v678_v33, 6 }
 0x10e   : > { %788 = vrot.lane.b32.xlu1 %v782_v27, %s9108_s23  ;;  %525 = vrot.lane.b32.xlu0 %v522_v51, %s5506_s6  ;;  %v584_v51 = vmul.f32 %v5791_v29, %v5767_v16  ;;  %v616_v10 = vsel %vm360_vm1, %v614_v44, %v615_v20 }
 0x110   : > { %v590_v26 = vrot.slane %v584_v51, 1 }
 0x112   : > { %499 = vrot.lane.b32.xlu1 %v496_v11, %s5506_s6  ;;  %546 = vrot.lane.b32.xlu0 %v543_v50, %s5506_s6  ;;  %v583_v11 = vmul.f32 %v5791_v29, %v5764_v14  ;;  %v593_v12 = vsel %vm517_vm4, %v590_v26, %v592_v39  ;;  %v630_v50 = vmul.f32 %v5805_v36, %v5767_v16 }
 0x113   : > { %v568_v29 = vsel %vm517_vm4, %v565_v52, %v567_v38  ;;  %v610_v39 = vmul.f32 %v607_v45, %v5780_v24  ;;  %v677_v38 = vmul.f32 %v5816_v43, %v5767_v16  ;;  %v700_v45 = vstv %s4967_s17  ;;  %s4980_s17 = sld [smem:[#allocation2 + $0xb]] }
 0x114   : > { %v589_v19 = vrot.slane %v583_v11, 1  ;;  %v636_v34 = vrot.slane %v630_v50, 5  ;;  %v702_v11 = vmul.f32 %v700_v45, %v5767_v16  ;;  %v9134_v43 = vrot.slane %v5811_v40, 5 }
 0x115   : > { %v617_v18 = vrot.slane %v610_v39, 5  ;;  %v683_v44 = vrot.slane %v677_v38, 6  ;;  %v9135_v50 = vrot.slane %v5828_v46, 6  ;;  %v774_v38 = vmul.f32 %v5860_v8, %v5767_v16 }
 0x116   : > { %523 = vrot.lane.b32.xlu1 %v520_v22, %s5506_s6  ;;  %569 = vrot.lane.b32.xlu0 %v566_v31, %s5506_s6  ;;  %v591_v36 = vsel %vm517_vm4, %v589_v19, %v590_v26  ;;  %v637_v51 = vsel %vm360_vm1, %v635_v28, %v636_v34  ;;  %v9132_v22 = vrot.slane %v5831_v47, 6  ;;  %v9133_v31 = vrot.slane %v5814_v41, 6 }
 0x117   : > { %v618_v52 = vsel %vm360_vm1, %v615_v20, %v617_v18  ;;  %v703_v26 = vmul.f32 %v700_v45, %v5780_v24  ;;  %v639_v35 = vsel %vm360_vm1, %v636_v34, %v9134_v43  ;;  %v686_v47 = vsel %vm658_vm5, %v683_v44, %v685_v32 }
 0x118   : > { %v661_v23 = vsel %vm658_vm5, %v9133_v31, %v9132_v22  ;;  %v701_v41 = vmul.f32 %v700_v45, %v5764_v14  ;;  %v724_v20 = vmul.f32 %v5841_v49, %v5767_v16  ;;  %v684_v40 = vsel %vm658_vm5, %v9135_v50, %v683_v44 }
 0x119   : > { %v748_v28 = vmul.f32 %v5839_v48, %v5764_v14  ;;  %v749_v34 = vmul.f32 %v5839_v48, %v5767_v16  ;;  %v797_v48 = vstv %s4971_s28  ;;  %v773_v45 = vmul.f32 %v5860_v8, %v5764_v14  ;;  %s4981_s28 = sld [smem:[#allocation2 + $0x12]] }
 0x11a   : > { %544 = vrot.lane.b32.xlu1 %v541_v55, %s5506_s6  ;;  %596 = vrot.lane.b32.xlu0 %v593_v12, %s5506_s6  ;;  %v711_v55 = vrot.slane %v703_v26, 2  ;;  %v709_v12 = vrot.slane %v702_v11, 2  ;;  %v730_v46 = vrot.slane %v724_v20, 2  ;;  %v798_v22 = vmul.f32 %v797_v48, %v5764_v14 }
 0x11b   : > { %v754_v18 = vrot.slane %v748_v28, 2  ;;  %v755_v33 = vrot.slane %v749_v34, 2  ;;  %v799_v31 = vmul.f32 %v797_v48, %v5767_v16  ;;  %v779_v32 = vrot.slane %v773_v45, 2 }
 0x11c   : > { %v712_v19 = vsel %vm707_vm6, %v709_v12, %v711_v55  ;;  %v800_v26 = vmul.f32 %v797_v48, %v5780_v24  ;;  %v818_v44 = vstv %s5960_s4  ;;  %v9137_v8 = vrot.slane %v5847_v53, 2  ;;  %s5509_s4 = smov 124  }
 0x11d   : > { %v819_v55 = vmul.f32 %v818_v44, %v5764_v14  ;;  %v820_v20 = vmul.f32 %v818_v44, %v5767_v16 }
 0x11e   : > { %571 = vrot.lane.b32.xlu1 %v568_v29, %s5506_s6  ;;  %619 = vrot.lane.b32.xlu0 %v616_v10, %s5506_s6  ;;  %v723_v29 = vmul.f32 %v5841_v49, %v5764_v14  ;;  %v708_v10 = vrot.slane %v701_v41, 2  ;;  %v9136_v49 = vrot.slane %v5851_v54, 2  ;;  %v756_v54 = vsel %vm707_vm6, %v754_v18, %v755_v33 }
 0x11f   : > { %v758_v11 = vsel %vm707_vm6, %v755_v33, %v9137_v8  ;;  %v807_v53 = vrot.slane %v800_v26, 6  ;;  %v937_v26 = vstv %s4977_s10  ;;  %s4986_s10 = sld [smem:[#allocation2 + $0x5]] }
 0x120   : > { %v729_v39 = vrot.slane %v723_v29, 2  ;;  %v841_v29 = vmul.f32 %v840_v13, %v5764_v14 }
 0x122   : > { %594 = vrot.lane.b32.xlu1 %v591_v36, %s5506_s6  ;;  %640 = vrot.lane.b32.xlu0 %v637_v51, %s5506_s6  ;;  %v710_v36 = vsel %vm707_vm6, %v708_v10, %v709_v12  ;;  %v733_v51 = vsel %vm707_vm6, %v730_v46, %v9136_v49  ;;  %v865_v10 = vstv %s4974_s27  ;;  %v847_v34 = vrot.slane %v841_v29, 7  ;;  %s4983_s27 = sld [smem:[#allocation2 + $0x20]] }
 0x123   : > { %v890_v49 = vstv %s4975_s30  ;;  %v867_v33 = vmul.f32 %v865_v10, %v5767_v16  ;;  %v868_v48 = vmul.f32 %v865_v10, %v5780_v24  ;;  %v940_v29 = vmul.f32 %v937_v26, %v5780_v24  ;;  %s4984_s30 = sld [smem:[#allocation2 + $0x27]] }
 0x124   : > { %v891_v45 = vmul.f32 %v890_v49, %v5764_v14 }
 0x126   : > { %621 = vrot.lane.b32.xlu1 %v618_v52, %s5506_s6  ;;  %664 = vrot.lane.b32.xlu0 %v661_v23, %s9108_s23  ;;  %v731_v52 = vsel %vm707_vm6, %v729_v39, %v730_v46  ;;  %v780_v23 = vrot.slane %v774_v38, 2  ;;  %v843_v39 = vmul.f32 %v840_v13, %v5780_v24  ;;  %v898_v44 = vrot.slane %v891_v45, 3 }
 0x128   : > { %v783_v43 = vsel %vm707_vm6, %v780_v23, %v782_v27  ;;  %v781_v41 = vsel %vm707_vm6, %v779_v32, %v780_v23  ;;  %v824_v27 = vrot.slane %v819_v55, 7  ;;  %v850_v18 = vrot.slane %v843_v39, 7 }
 0x129   : > { %v875_v23 = vrot.slane %v868_v48, 7  ;;  %v893_v32 = vmul.f32 %v890_v49, %v5780_v24  ;;  %v947_v39 = vrot.slane %v940_v29, 3  ;;  %v1041_v29 = vstv %s4982_s5  ;;  %s4990_s5 = sld [smem:[#allocation2 + $0x21]] }
 0x12a   : > { %642 = vrot.lane.b32.xlu1 %v639_v35, %s5506_s6  ;;  %691 = vrot.lane.b32.xlu0 %v686_v47, %s9108_s23  ;;  %v804_v35 = vrot.slane %v798_v22, 6  ;;  %v805_v47 = vrot.slane %v799_v31, 6  ;;  %v873_v31 = vrot.slane %v867_v33, 7 }
 0x12b   : > { %v901_v55 = vrot.slane %v893_v32, 3 }
 0x12c   : > { %v806_v12 = vsel %vm658_vm5, %v804_v35, %v805_v47  ;;  %v808_v50 = vsel %vm658_vm5, %v805_v47, %v807_v53  ;;  %v876_v47 = vsel %vm823_vm7, %v873_v31, %v875_v23  ;;  %v987_v23 = vstv %s4979_s11  ;;  %s4988_s11 = sld [smem:[#allocation2 + $0x13]] }
 0x12e   : > { %689 = vrot.lane.b32.xlu1 %v684_v40, %s9108_s23  ;;  %715 = vrot.lane.b32.xlu0 %v712_v19, %s9108_s23  ;;  %v825_v40 = vrot.slane %v820_v20, 7  ;;  %v842_v19 = vmul.f32 %v840_v13, %v5767_v16  ;;  %v938_v20 = vmul.f32 %v937_v26, %v5764_v14 }
 0x130   : > { %v826_v28 = vsel %vm823_vm7, %v824_v27, %v825_v40  ;;  %v848_v46 = vrot.slane %v842_v19, 7 }
 0x132   : > { %713 = vrot.lane.b32.xlu1 %v710_v36, %s9108_s23  ;;  %736 = vrot.lane.b32.xlu0 %v733_v51, %s9108_s23  ;;  %v866_v36 = vmul.f32 %v865_v10, %v5764_v14  ;;  %v849_v51 = vsel %vm823_vm7, %v847_v34, %v848_v46  ;;  %v851_v22 = vsel %vm823_vm7, %v848_v46, %v850_v18  ;;  %v962_v46 = vstv %s4978_s22  ;;  %s4987_s22 = sld [smem:[#allocation2 + $0xc]] }
 0x133   : > { %v965_v18 = vmul.f32 %v962_v46, %v5780_v24 }
 0x134   : > { %v872_v38 = vrot.slane %v866_v36, 7 }
 0x135   : > { %v972_v45 = vrot.slane %v965_v18, 3  ;;  %v1043_v18 = vmul.f32 %v1041_v29, %v5767_v16 }
 0x136   : > { %734 = vrot.lane.b32.xlu1 %v731_v52, %s9108_s23  ;;  %759 = vrot.lane.b32.xlu0 %v756_v54, %s9108_s23  ;;  %v892_v52 = vmul.f32 %v890_v49, %v5767_v16  ;;  %v912_v54 = vstv %s4976_s8  ;;  %v874_v35 = vsel %vm823_vm7, %v872_v38, %v873_v31  ;;  %v963_v49 = vmul.f32 %v962_v46, %v5764_v14  ;;  %s4985_s8 = sld [smem:[#allocation2 + $0x2e]] }
 0x138   : > { %v899_v8 = vrot.slane %v892_v52, 3  ;;  %v969_v48 = vrot.slane %v963_v49, 3  ;;  %v6040_v52 = vpop.permute.xlu1 %398 }
 0x13a   : > { %761 = vrot.lane.b32.xlu1 %v758_v11, %s9108_s23  ;;  %786 = vrot.lane.b32.xlu0 %v783_v43, %s9108_s23  ;;  %v913_v11 = vmul.f32 %v912_v54, %v5764_v14  ;;  %v914_v43 = vmul.f32 %v912_v54, %v5767_v16  ;;  %v902_v13 = vsel %vm897_vm8, %v899_v8, %v901_v55 }
 0x13c   : > { %v919_v53 = vrot.slane %v913_v11, 3  ;;  %v6050_v32 = vpop.permute.xlu1 %402 }
 0x13e   : > { %784 = vrot.lane.b32.xlu1 %v781_v41, %s9108_s23  ;;  %809 = vrot.lane.b32.xlu0 %v806_v12, %s9108_s23  ;;  %v915_v41 = vmul.f32 %v912_v54, %v5780_v24  ;;  %v900_v12 = vsel %vm897_vm8, %v898_v44, %v899_v8  ;;  %v6044_v54 = vpop.permute.xlu0 %400  ;;  %v988_v44 = vmul.f32 %v987_v23, %v5764_v14  ;;  %v1001_v8 = vstv %s4980_s17  ;;  %s4989_s17 = sld [smem:[#allocation2 + $0x1a]] }
 0x142   : > { %811 = vrot.lane.b32.xlu1 %v808_v50, %s9108_s23  ;;  %827 = vrot.lane.b32.xlu0 %v824_v27, %s5508_s7  ;;  %v920_v27 = vrot.slane %v914_v43, 3  ;;  %v922_v50 = vrot.slane %v915_v41, 3 }
 0x144   : > { %v921_v19 = vsel %vm897_vm8, %v919_v53, %v920_v27  ;;  %v923_v10 = vsel %vm897_vm8, %v920_v27, %v922_v50  ;;  %v1004_v53 = vmul.f32 %v1001_v8, %v5780_v24 }
 0x146   : > { %829 = vrot.lane.b32.xlu1 %v826_v28, %s5508_s7  ;;  %831 = vrot.lane.b32.xlu0 %v825_v40, %s5508_s7  ;;  %v939_v40 = vmul.f32 %v937_v26, %v5767_v16  ;;  %v944_v28 = vrot.slane %v938_v20, 3  ;;  %v1021_v20 = vstv %s4981_s28  ;;  %s9116_s28 = smov 123  }
 0x14a   : > { %852 = vrot.lane.b32.xlu1 %v847_v34, %s5508_s7  ;;  %854 = vrot.lane.b32.xlu0 %v849_v51, %s5508_s7  ;;  %v945_v34 = vrot.slane %v939_v40, 3  ;;  %v964_v51 = vmul.f32 %v962_v46, %v5767_v16  ;;  %v1023_v40 = vmul.f32 %v1021_v20, %v5767_v16  ;;  %v1042_v46 = vmul.f32 %v1041_v29, %v5764_v14 }
 0x14c   : > { %v946_v36 = vsel %vm897_vm8, %v944_v28, %v945_v34  ;;  %v948_v33 = vsel %vm897_vm8, %v945_v34, %v947_v39 }
 0x14e   : > { %856 = vrot.lane.b32.xlu1 %v851_v22, %s5508_s7  ;;  %877 = vrot.lane.b32.xlu0 %v872_v38, %s5508_s7  ;;  %v970_v38 = vrot.slane %v964_v51, 3  ;;  %v1082_v51 = vstv %s4984_s30  ;;  %s4992_s30 = sld [smem:[#allocation2 + $0x2f]] }
 0x150   : > { %v971_v22 = vsel %vm897_vm8, %v969_v48, %v970_v38  ;;  %v973_v31 = vsel %vm897_vm8, %v970_v38, %v972_v45 }
 0x152   : > { %879 = vrot.lane.b32.xlu1 %v874_v35, %s5508_s7  ;;  %881 = vrot.lane.b32.xlu0 %v876_v47, %s5508_s7  ;;  %v989_v35 = vmul.f32 %v987_v23, %v5767_v16  ;;  %v1002_v47 = vmul.f32 %v1001_v8, %v5764_v14  ;;  %v1083_v23 = vmul.f32 %v1082_v51, %v5764_v14 }
 0x156   : > { %903 = vrot.lane.b32.xlu1 %v900_v12, %s5508_s7  ;;  %905 = vrot.lane.b32.xlu0 %v902_v13, %s5508_s7  ;;  %v1003_v12 = vmul.f32 %v1001_v8, %v5767_v16  ;;  %v1085_v8 = vmul.f32 %v1082_v51, %v5780_v24 }
 0x15a   : > { %924 = vrot.lane.b32.xlu1 %v921_v19, %s5508_s7  ;;  %926 = vrot.lane.b32.xlu0 %v923_v10, %s5508_s7  ;;  %v1061_v19 = vstv %s4983_s27  ;;  %v1024_v10 = vmul.f32 %v1021_v20, %v5780_v24  ;;  %s4991_s27 = sld [smem:[#allocation2 + $0x28]] }
 0x15b   : > { %v1064_v49 = vmul.f32 %v1061_v19, %v5780_v24 }
 0x15e   : > { %928 = vrot.lane.b32.xlu1 %v922_v50, %s5508_s7  ;;  %949 = vrot.lane.b32.xlu0 %v946_v36, %s5508_s7  ;;  %v1022_v50 = vmul.f32 %v1021_v20, %v5764_v14  ;;  %v1063_v36 = vmul.f32 %v1061_v19, %v5767_v16 }
 0x162   : > { %951 = vrot.lane.b32.xlu1 %v948_v33, %s5508_s7  ;;  %953 = vrot.lane.b32.xlu0 %v947_v39, %s5508_s7  ;;  %v1062_v39 = vmul.f32 %v1061_v19, %v5764_v14  ;;  %v1044_v33 = vmul.f32 %v1041_v29, %v5780_v24  ;;  %v1092_v29 = vrot.slane %v1085_v8, 4 }
 0x166   : > { %974 = vrot.lane.b32.xlu1 %v971_v22, %s5508_s7  ;;  %976 = vrot.lane.b32.xlu0 %v973_v31, %s5508_s7  ;;  %v1069_v22 = vrot.slane %v1063_v36, 4  ;;  %v1071_v31 = vrot.slane %v1064_v49, 4 }
 0x168   : > { %v6052_v26 = vpop.permute.xlu0 %497  ;;  %v1072_v20 = vsel %vm440_vm9, %v1069_v22, %v1071_v31 }
 0x16a   : > { %978 = vrot.lane.b32.xlu1 %v972_v45, %s5508_s7  ;;  %992 = vrot.lane.b32.xlu0 %v988_v44, %s5509_s4  ;;  %v1068_v45 = vrot.slane %v1062_v39, 4  ;;  %v1084_v44 = vmul.f32 %v1082_v51, %v5767_v16 }
 0x16c   : > { %v6057_v11 = vpop.permute.xlu0 %501  ;;  %v6059_v43 = vpop.permute.xlu1 %548 }
 0x16e   : > { %994 = vrot.lane.b32.xlu1 %v989_v35, %s5509_s4  ;;  %1008 = vrot.lane.b32.xlu0 %v1002_v47, %s5509_s4  ;;  %v1107_v35 = vstv %s4985_s8  ;;  %s6194_s8 = sld [smem:[#allocation2 + $0x6]] }
 0x16f   : > { %v1108_v19 = vmul.f32 %v1107_v35, %v5764_v14  ;;  %v1110_v36 = vmul.f32 %v1107_v35, %v5780_v24 }
 0x170   : > { %v6065_v55 = vpop.permute.xlu0 %573  ;;  %v6067_v41 = vpop.permute.xlu1 %598 }
 0x171   : > { %9138 = vst [vmem:[#allocation14_spill] sm:$0xff] %v6067_v41 }
 0x172   : > { %1010 = vrot.lane.b32.xlu1 %v1003_v12, %s5509_s4  ;;  %1012 = vrot.lane.b32.xlu0 %v1004_v53, %s5509_s4  ;;  %v1070_v53 = vsel %vm440_vm9, %v1068_v45, %v1069_v22  ;;  %v1132_v45 = vstv %s4986_s10  ;;  %s4994_s10 = sld [smem:[#allocation2 + $0xd]] }
 0x173   : > { %v1133_v8 = vmul.f32 %v1132_v45, %v5764_v14 }
 0x174   : > { %v6073_v13 = vpop.permute.xlu0 %644  ;;  %v6075_v27 = vpop.permute.xlu1 %662 }
 0x175   : > { %9139 = vst [vmem:[#allocation15_spill] sm:$0xff] %v6073_v13  ;;  %9140 = vst [vmem:[#allocation16_spill] sm:$0xff] %v6075_v27 }
 0x176   : > { %1028 = vrot.lane.b32.xlu1 %v1022_v50, %s5509_s4  ;;  %1030 = vrot.lane.b32.xlu0 %v1023_v40, %s5509_s4  ;;  %v1089_v50 = vrot.slane %v1083_v23, 4  ;;  %v1090_v40 = vrot.slane %v1084_v44, 4  ;;  %v1117_v23 = vrot.slane %v1110_v36, 4 }
 0x178   : > { %v6082_v28 = vpop.permute.xlu0 %687  ;;  %v6084_v34 = vpop.permute.xlu1 %666  ;;  %v1091_v49 = vsel %vm440_vm9, %v1089_v50, %v1090_v40  ;;  %v1093_v51 = vsel %vm440_vm9, %v1090_v40, %v1092_v29 }
 0x179   : > { %9141 = vst [vmem:[#allocation17_spill] sm:$0xff] %v6082_v28  ;;  %9142 = vst [vmem:[#allocation18_spill] sm:$0xff] %v6084_v34  ;;  %v1199_v28 = vstv %s4989_s17  ;;  %s9114_s17 = smov 122  }
 0x17a   : > { %1032 = vrot.lane.b32.xlu1 %v1024_v10, %s5509_s4  ;;  %1048 = vrot.lane.b32.xlu0 %v1042_v46, %s5509_s4  ;;  %v1109_v10 = vmul.f32 %v1107_v35, %v5767_v16  ;;  %v1134_v35 = vmul.f32 %v1132_v45, %v5767_v16 }
 0x17c   : > { %v6094_v48 = vpop.permute.xlu0 %763  ;;  %v6096_v38 = vpop.permute.xlu1 %738  ;;  %v1138_v36 = vrot.slane %v1134_v35, 5 }
 0x17d   : > { %9143 = vst [vmem:[#allocation19_spill] sm:$0xff] %v6094_v48  ;;  %9144 = vst [vmem:[#allocation20_spill] sm:$0xff] %v6096_v38 }
 0x17e   : > { %1050 = vrot.lane.b32.xlu1 %v1043_v18, %s5509_s4  ;;  %1052 = vrot.lane.b32.xlu0 %v1044_v33, %s5509_s4  ;;  %v1114_v18 = vrot.slane %v1108_v19, 4  ;;  %v1115_v33 = vrot.slane %v1109_v10, 4  ;;  %v1174_v19 = vstv %s4988_s11  ;;  %v1137_v10 = vrot.slane %v1133_v8, 5  ;;  %s4996_s11 = sld [smem:[#allocation2 + $0x1b]] }
 0x180   : > { %v6103_v47 = vpop.permute.xlu0 %525  ;;  %v6105_v12 = vpop.permute.xlu1 %788  ;;  %v1116_v44 = vsel %vm440_vm9, %v1114_v18, %v1115_v33  ;;  %v1118_v40 = vsel %vm440_vm9, %v1115_v33, %v1117_v23  ;;  %v1175_v33 = vmul.f32 %v1174_v19, %v5764_v14 }
 0x181   : > { %9145 = vst [vmem:[#allocation21_spill] sm:$0xff] %v6103_v47  ;;  %9146 = vst [vmem:[#allocation22_spill] sm:$0xff] %v6105_v12  ;;  %v1176_v12 = vmul.f32 %v1174_v19, %v5767_v16 }
 0x182   : > { %1073 = vrot.lane.b32.xlu1 %v1070_v53, %s5509_s4  ;;  %1075 = vrot.lane.b32.xlu0 %v1072_v20, %s5509_s4  ;;  %v1153_v53 = vstv %s4987_s22  ;;  %s4995_s22 = sld [smem:[#allocation2 + $0x14]] }
 0x183   : > { %v1156_v45 = vmul.f32 %v1153_v53, %v5780_v24 }
 0x184   : > { %v6113_v46 = vpop.permute.xlu0 %546  ;;  %v6115_v39 = vpop.permute.xlu1 %499 }
 0x185   : > { %9147 = vst [vmem:[#allocation23_spill] sm:$0xff] %v6113_v46  ;;  %9148 = vst [vmem:[#allocation24_spill] sm:$0xff] %v6115_v39 }
 0x186   : > { %1094 = vrot.lane.b32.xlu1 %v1091_v49, %s5509_s4  ;;  %1096 = vrot.lane.b32.xlu0 %v1093_v51, %s5509_s4  ;;  %v1154_v49 = vmul.f32 %v1153_v53, %v5764_v14  ;;  %v1155_v51 = vmul.f32 %v1153_v53, %v5767_v16  ;;  %v1177_v53 = vmul.f32 %v1174_v19, %v5780_v24 }
 0x188   : > { %v6122_v22 = vpop.permute.xlu0 %569  ;;  %v6124_v31 = vpop.permute.xlu1 %523  ;;  %v1160_v8 = vrot.slane %v1154_v49, 1  ;;  %v1161_v35 = vrot.slane %v1155_v51, 1  ;;  %v1181_v49 = vrot.slane %v1175_v33, 1  ;;  %v1182_v51 = vrot.slane %v1176_v12, 1 }
 0x189   : > { %9149 = vst [vmem:[#allocation25_spill] sm:$0xff] %v6122_v22  ;;  %9150 = vst [vmem:[#allocation26_spill] sm:$0xff] %v6124_v31  ;;  %v1202_v12 = vmul.f32 %v1199_v28, %v5780_v24 }
 0x18a   : > { %1098 = vrot.lane.b32.xlu1 %v1092_v29, %s5509_s4  ;;  %1119 = vrot.lane.b32.xlu0 %v1116_v44, %s5509_s4  ;;  %v1139_v44 = vsel %vm360_vm1, %v1137_v10, %v1138_v36  ;;  %v1183_v27 = vsel %vm517_vm4, %v1181_v49, %v1182_v51 }
 0x18c   : > { %v6131_v20 = vpop.permute.xlu0 %596  ;;  %v6133_v50 = vpop.permute.xlu1 %544 }
 0x18d   : > { %9151 = vst [vmem:[#allocation27_spill] sm:$0xff] %v6131_v20  ;;  %9152 = vst [vmem:[#allocation28_spill] sm:$0xff] %v6133_v50  ;;  %v1184_v20 = vrot.slane %v1177_v53, 1 }
 0x18e   : > { %1121 = vrot.lane.b32.xlu1 %v1118_v40, %s5509_s4  ;;  %1123 = vrot.lane.b32.xlu0 %v1117_v23, %s5509_s4 }
 0x190   : > { %v6140_v29 = vpop.permute.xlu0 %619  ;;  %v6142_v18 = vpop.permute.xlu1 %571 }
 0x191   : > { %9153 = vst [vmem:[#allocation29_spill] sm:$0xff] %v6140_v29  ;;  %9154 = vst [vmem:[#allocation30_spill] sm:$0xff] %v6142_v18  ;;  %v1162_v29 = vsel %vm517_vm4, %v1160_v8, %v1161_v35  ;;  %v1163_v18 = vrot.slane %v1156_v45, 1  ;;  %v1201_v45 = vmul.f32 %v1199_v28, %v5767_v16  ;;  %v1185_v8 = vsel %vm517_vm4, %v1182_v51, %v1184_v20 }
 0x192   : > { %1140 = vrot.lane.b32.xlu1 %v1137_v10, %s9116_s28  ;;  %1142 = vrot.lane.b32.xlu0 %v1139_v44, %s9116_s28 }
 0x193   : > { %v1164_v19 = vsel %vm517_vm4, %v1161_v35, %v1163_v18  ;;  %v1209_v18 = vrot.slane %v1202_v12, 1 }
 0x194   : > { %v6150_v23 = vpop.permute.xlu0 %640  ;;  %v6152_v40 = vpop.permute.xlu1 %594 }
 0x195   : > { %9155 = vst [vmem:[#allocation31_spill] sm:$0xff] %v6150_v23  ;;  %9156 = vst [vmem:[#allocation32_spill] sm:$0xff] %v6152_v40  ;;  %v1200_v23 = vmul.f32 %v1199_v28, %v5764_v14 }
 0x196   : > { %1144 = vrot.lane.b32.xlu1 %v1138_v36, %s9116_s28  ;;  %1165 = vrot.lane.b32.xlu0 %v1162_v29, %s9116_s28  ;;  %v1224_v36 = vstv %s4990_s5  ;;  %s4997_s5 = sld [smem:[#allocation2 + $0x22]] }
 0x197   : > { %v1206_v53 = vrot.slane %v1200_v23, 1  ;;  %v1225_v35 = vmul.f32 %v1224_v36, %v5764_v14  ;;  %v1226_v49 = vmul.f32 %v1224_v36, %v5767_v16 }
 0x198   : > { %v6158_v10 = vpop.permute.xlu0 %664  ;;  %v6160_v44 = vpop.permute.xlu1 %621 }
 0x199   : > { %9157 = vst [vmem:[#allocation33_spill] sm:$0xff] %v6158_v10  ;;  %9158 = vst [vmem:[#allocation34_spill] sm:$0xff] %v6160_v44  ;;  %v1207_v10 = vrot.slane %v1201_v45, 1  ;;  %v1231_v45 = vrot.slane %v1225_v35, 1  ;;  %v1232_v12 = vrot.slane %v1226_v49, 1  ;;  %v1270_v35 = vstv %s4992_s30  ;;  %s4999_s30 = sld [smem:[#allocation2 + $0x30]] }
 0x19a   : > { %1167 = vrot.lane.b32.xlu1 %v1164_v19, %s9116_s28  ;;  %1186 = vrot.lane.b32.xlu0 %v1183_v27, %s9116_s28  ;;  %v1227_v19 = vmul.f32 %v1224_v36, %v5780_v24  ;;  %v1271_v44 = vmul.f32 %v1270_v35, %v5764_v14 }
 0x19b   : > { %v1208_v23 = vsel %vm517_vm4, %v1206_v53, %v1207_v10  ;;  %v1210_v51 = vsel %vm517_vm4, %v1207_v10, %v1209_v18  ;;  %v1233_v10 = vsel %vm517_vm4, %v1231_v45, %v1232_v12  ;;  %v1272_v45 = vmul.f32 %v1270_v35, %v5767_v16 }
 0x19c   : > { %v6169_v29 = vpop.permute.xlu0 %691  ;;  %v6171_v33 = vpop.permute.xlu1 %642  ;;  %v1234_v53 = vrot.slane %v1227_v19, 1  ;;  %v1273_v19 = vmul.f32 %v1270_v35, %v5780_v24 }
 0x19d   : > { %9159 = vst [vmem:[#allocation35_spill] sm:$0xff] %v6169_v29  ;;  %9160 = vst [vmem:[#allocation36_spill] sm:$0xff] %v6171_v33  ;;  %v1249_v33 = vstv %s4991_s27  ;;  %s4998_s27 = sld [smem:[#allocation2 + $0x29]] }
 0x19e   : > { %1188 = vrot.lane.b32.xlu1 %v1185_v8, %s9116_s28  ;;  %1190 = vrot.lane.b32.xlu0 %v1184_v20, %s9116_s28  ;;  %v1252_v36 = vmul.f32 %v1249_v33, %v5780_v24 }
 0x1a0   : > { %v6178_v27 = vpop.permute.xlu0 %715  ;;  %v6180_v28 = vpop.permute.xlu1 %689 }
 0x1a1   : > { %9161 = vst [vmem:[#allocation37_spill] sm:$0xff] %v6178_v27  ;;  %9162 = vst [vmem:[#allocation38_spill] sm:$0xff] %v6180_v28  ;;  %v1250_v27 = vmul.f32 %v1249_v33, %v5764_v14  ;;  %v1251_v28 = vmul.f32 %v1249_v33, %v5767_v16  ;;  %v1235_v33 = vsel %vm517_vm4, %v1232_v12, %v1234_v53 }
 0x1a2   : > { %1211 = vrot.lane.b32.xlu1 %v1208_v23, %s9116_s28  ;;  %1213 = vrot.lane.b32.xlu0 %v1210_v51, %s9116_s28 }
 0x1a3   : > { %v1256_v51 = vrot.slane %v1250_v27, 5 }
 0x1a4   : > { %v6187_v8 = vpop.permute.xlu0 %736  ;;  %v6189_v20 = vpop.permute.xlu1 %713 }
 0x1a5   : > { %9163 = vst [vmem:[#allocation39_spill] sm:$0xff] %v6187_v8  ;;  %9164 = vst [vmem:[#allocation40_spill] sm:$0xff] %v6189_v20  ;;  %v1257_v8 = vrot.slane %v1251_v28, 5  ;;  %v1259_v20 = vrot.slane %v1252_v36, 5  ;;  %v1295_v28 = vstv %s6194_s8  ;;  %v1277_v36 = vrot.slane %v1271_v44, 5  ;;  %s5007_s8 = sld [smem:[#allocation2 + $0x32]] }
 0x1a6   : > { %1215 = vrot.lane.b32.xlu1 %v1209_v18, %s9116_s28  ;;  %1236 = vrot.lane.b32.xlu0 %v1233_v10, %s9116_s28  ;;  %v1297_v44 = vmul.f32 %v1295_v28, %v5767_v16 }
 0x1a7   : > { %v1258_v27 = vsel %vm360_vm1, %v1256_v51, %v1257_v8  ;;  %v1260_v12 = vsel %vm360_vm1, %v1257_v8, %v1259_v20  ;;  %v1316_v8 = vstv %s4994_s10  ;;  %s5008_s10 = sld [smem:[#allocation2 + $0x39]] }
 0x1a8   : > { %v6199_v49 = vpop.permute.xlu0 %759  ;;  %v6201_v23 = vpop.permute.xlu1 %734 }
 0x1a9   : > { %9165 = vst [vmem:[#allocation41_spill] sm:$0xff] %v6199_v49  ;;  %9166 = vst [vmem:[#allocation42_spill] sm:$0xff] %v6201_v23  ;;  %v1278_v23 = vrot.slane %v1272_v45, 5  ;;  %v1280_v49 = vrot.slane %v1273_v19, 5 }
 0x1aa   : > { %1238 = vrot.lane.b32.xlu1 %v1235_v33, %s9116_s28  ;;  %1240 = vrot.lane.b32.xlu0 %v1234_v53, %s9116_s28  ;;  %v1296_v33 = vmul.f32 %v1295_v28, %v5764_v14 }
 0x1ab   : > { %v1279_v51 = vsel %vm360_vm1, %v1277_v36, %v1278_v23  ;;  %v1341_v36 = vstv %s4995_s22  ;;  %s5009_s22 = sld [smem:[#allocation2 + $0x40]] }
 0x1ac   : > { %v6209_v18 = vpop.permute.xlu0 %786  ;;  %v6211_v10 = vpop.permute.xlu1 %761  ;;  %v1300_v19 = vrot.slane %v1296_v33, 6  ;;  %v1342_v28 = vmul.f32 %v1341_v36, %v5764_v14  ;;  %v1362_v33 = vstv %s4996_s11  ;;  %s5011_s11 = sld [smem:[#allocation2 + $0x4e]] }
 0x1ad   : > { %9167 = vst [vmem:[#allocation43_spill] sm:$0xff] %v6209_v18  ;;  %9168 = vst [vmem:[#allocation44_spill] sm:$0xff] %v6211_v10  ;;  %v1281_v10 = vsel %vm360_vm1, %v1278_v23, %v1280_v49  ;;  %v1363_v29 = vmul.f32 %v1362_v33, %v5764_v14  ;;  %v1365_v40 = vmul.f32 %v1362_v33, %v5780_v24 }
 0x1ae   : > { %1261 = vrot.lane.b32.xlu1 %v1258_v27, %s9116_s28  ;;  %1263 = vrot.lane.b32.xlu0 %v1260_v12, %s9116_s28  ;;  %v1301_v27 = vrot.slane %v1297_v44, 6  ;;  %v1317_v12 = vmul.f32 %v1316_v8, %v5764_v14 }
 0x1b0   : > { %v6218_v35 = vpop.permute.xlu0 %809  ;;  %v6220_v53 = vpop.permute.xlu1 %784  ;;  %v1302_v44 = vsel %vm658_vm5, %v1300_v19, %v1301_v27 }
 0x1b1   : > { %9169 = vst [vmem:[#allocation45_spill] sm:$0xff] %v6218_v35  ;;  %9170 = vst [vmem:[#allocation46_spill] sm:$0xff] %v6220_v53  ;;  %v1318_v53 = vmul.f32 %v1316_v8, %v5767_v16  ;;  %v1319_v35 = vmul.f32 %v1316_v8, %v5780_v24  ;;  %v1344_v8 = vmul.f32 %v1341_v36, %v5780_v24 }
 0x1b2   : > { %1282 = vrot.lane.b32.xlu1 %v1279_v51, %s9116_s28  ;;  %1284 = vrot.lane.b32.xlu0 %v1281_v10, %s9116_s28  ;;  %v1343_v51 = vmul.f32 %v1341_v36, %v5767_v16 }
 0x1b4   : > { %v6228_v20 = vpop.permute.xlu0 %827  ;;  %v6230_v45 = vpop.permute.xlu1 %811  ;;  %v1349_v18 = vrot.slane %v1343_v51, 2  ;;  %v1369_v51 = vrot.slane %v1363_v29, 2  ;;  %v1412_v29 = vstv %s4998_s27  ;;  %s5012_s27 = sld [smem:[#allocation2 + $0x55]] }
 0x1b5   : > { %9171 = vst [vmem:[#allocation47_spill] sm:$0xff] %v6228_v20  ;;  %9172 = vst [vmem:[#allocation48_spill] sm:$0xff] %v6230_v45  ;;  %v1323_v45 = vrot.slane %v1317_v12, 6  ;;  %v1324_v20 = vrot.slane %v1318_v53, 6  ;;  %v1364_v53 = vmul.f32 %v1362_v33, %v5767_v16 }
 0x1b6   : > { %1303 = vrot.lane.b32.xlu0 %v1300_v19, %s9114_s17  ;;  %1286 = vrot.lane.b32.xlu1 %v1280_v49, %s9116_s28  ;;  %v1326_v19 = vrot.slane %v1319_v35, 6  ;;  %v1351_v35 = vrot.slane %v1344_v8, 2 }
 0x1b7   : > { %v1325_v50 = vsel %vm658_vm5, %v1323_v45, %v1324_v20 }
 0x1b8   : > { %v6236_v23 = vpop.permute.xlu0 %831  ;;  %v6238_v10 = vpop.permute.xlu1 %829 }
 0x1b9   : > { %9173 = vst [vmem:[#allocation49_spill] sm:$0xff] %v6236_v23  ;;  %9174 = vst [vmem:[#allocation50_spill] sm:$0xff] %v6238_v10  ;;  %v1348_v10 = vrot.slane %v1342_v28, 2 }
 0x1ba   : > { %1307 = vrot.lane.b32.xlu0 %v1301_v27, %s9114_s17  ;;  %1305 = vrot.lane.b32.xlu1 %v1302_v44, %s9114_s17  ;;  %v1387_v44 = vstv %s4997_s5  ;;  %s5010_s5 = sld [smem:[#allocation2 + $0x47]] }
 0x1bb   : > { %v1350_v28 = vsel %vm707_vm6, %v1348_v10, %v1349_v18  ;;  %v1389_v36 = vmul.f32 %v1387_v44, %v5767_v16  ;;  %v1390_v10 = vmul.f32 %v1387_v44, %v5780_v24  ;;  %v1388_v33 = vmul.f32 %v1387_v44, %v5764_v14 }
 0x1bc   : > { %v6246_v49 = vpop.permute.xlu0 %854  ;;  %v6248_v23 = vpop.permute.xlu1 %852 }
 0x1bd   : > { %9175 = vst [vmem:[#allocation51_spill] sm:$0xff] %v6246_v49  ;;  %9176 = vst [vmem:[#allocation52_spill] sm:$0xff] %v6248_v23  ;;  %v1327_v23 = vsel %vm658_vm5, %v1324_v20, %v1326_v19  ;;  %v1370_v49 = vrot.slane %v1364_v53, 2  ;;  %v1352_v19 = vsel %vm707_vm6, %v1349_v18, %v1351_v35  ;;  %v1372_v53 = vrot.slane %v1365_v40, 2 }
 0x1be   : > { %1330 = vrot.lane.b32.xlu0 %v1325_v50, %s9114_s17  ;;  %1328 = vrot.lane.b32.xlu1 %v1323_v45, %s9114_s17  ;;  %v1414_v18 = vmul.f32 %v1412_v29, %v5767_v16 }
 0x1bf   : > { %v1371_v20 = vsel %vm707_vm6, %v1369_v51, %v1370_v49  ;;  %v1394_v51 = vrot.slane %v1388_v33, 2 }
 0x1c0   : > { %v6256_v27 = vpop.permute.xlu0 %877  ;;  %v6258_v12 = vpop.permute.xlu1 %856 }
 0x1c1   : > { %9177 = vst [vmem:[#allocation53_spill] sm:$0xff] %v6256_v27  ;;  %9178 = vst [vmem:[#allocation54_spill] sm:$0xff] %v6258_v12  ;;  %v1397_v12 = vrot.slane %v1390_v10, 2 }
 0x1c2   : > { %1353 = vrot.lane.b32.xlu0 %v1350_v28, %s9114_s17  ;;  %1332 = vrot.lane.b32.xlu1 %v1327_v23, %s9114_s17  ;;  %v1395_v28 = vrot.slane %v1389_v36, 2 }
 0x1c4   : > { %v6265_v50 = vpop.permute.xlu0 %881  ;;  %v6267_v45 = vpop.permute.xlu1 %879  ;;  %v1398_v36 = vsel %vm707_vm6, %v1395_v28, %v1397_v12 }
 0x1c5   : > { %9179 = vst [vmem:[#allocation55_spill] sm:$0xff] %v6265_v50  ;;  %9180 = vst [vmem:[#allocation56_spill] sm:$0xff] %v6267_v45  ;;  %v1413_v45 = vmul.f32 %v1412_v29, %v5764_v14  ;;  %v1373_v50 = vsel %vm707_vm6, %v1370_v49, %v1372_v53  ;;  %v1415_v49 = vmul.f32 %v1412_v29, %v5780_v24 }
 0x1c6   : > { %1374 = vrot.lane.b32.xlu0 %v1371_v20, %s9114_s17  ;;  %1355 = vrot.lane.b32.xlu1 %v1352_v19, %s9114_s17  ;;  %v1437_v20 = vstv %s4999_s30  ;;  %v1396_v19 = vsel %vm707_vm6, %v1394_v51, %v1395_v28  ;;  %s5013_s30 = sld [smem:[#allocation2 + $0x5c]] }
 0x1c7   : > { %v1419_v35 = vrot.slane %v1413_v45, 2  ;;  %v1422_v33 = vrot.slane %v1415_v49, 2  ;;  %v1438_v28 = vmul.f32 %v1437_v20, %v5764_v14 }
 0x1c8   : > { %v6276_v23 = vpop.permute.xlu0 %905  ;;  %v6278_v8 = vpop.permute.xlu1 %903 }
 0x1c9   : > { %9181 = vst [vmem:[#allocation57_spill] sm:$0xff] %v6276_v23  ;;  %9182 = vst [vmem:[#allocation58_spill] sm:$0xff] %v6278_v8  ;;  %v1420_v8 = vrot.slane %v1414_v18, 2 }
 0x1ca   : > { %1378 = vrot.lane.b32.xlu0 %v1372_v53, %s9114_s17  ;;  %1376 = vrot.lane.b32.xlu1 %v1373_v50, %s9114_s17  ;;  %v1439_v53 = vmul.f32 %v1437_v20, %v5767_v16 }
 0x1cb   : > { %v1421_v45 = vsel %vm707_vm6, %v1419_v35, %v1420_v8  ;;  %v1423_v18 = vsel %vm707_vm6, %v1420_v8, %v1422_v33  ;;  %v408_v35 = vsel %vm379_vm2, 0.0, %v6044_v54 }
 0x1cc   : > { %v6285_v40 = vpop.permute.xlu0 %926  ;;  %v6287_v44 = vpop.permute.xlu1 %924  ;;  %v6320_v8 = vsel %vm383_vm3, %v408_v35, 0.0 }
 0x1cd   : > { %9183 = vst [vmem:[#allocation59_spill] sm:$0xff] %v6285_v40  ;;  %9184 = vst [vmem:[#allocation60_spill] sm:$0xff] %v6287_v44  ;;  %v1440_v44 = vmul.f32 %v1437_v20, %v5780_v24 }
 0x1ce   : > { %1401 = vrot.lane.b32.xlu0 %v1398_v36, %s9114_s17  ;;  %1399 = vrot.lane.b32.xlu1 %v1396_v19, %s9114_s17  ;;  %v1445_v36 = vrot.slane %v1439_v53, 6 }
 0x1cf   : > { %v1447_v19 = vrot.slane %v1440_v44, 6 }
 0x1d0   : > { %v6294_v10 = vpop.permute.xlu0 %949  ;;  %v6296_v50 = vpop.permute.xlu1 %928 }
 0x1d1   : > { %9185 = vst [vmem:[#allocation61_spill] sm:$0xff] %v6294_v10  ;;  %9186 = vst [vmem:[#allocation62_spill] sm:$0xff] %v6296_v50  ;;  %v1444_v50 = vrot.slane %v1438_v28, 6  ;;  %v1448_v44 = vsel %vm658_vm5, %v1445_v36, %v1447_v19  ;;  %v1599_v19 = vstv %s5008_s10  ;;  %v1705_v10 = vstv %s5013_s30  ;;  %s5015_s10 = sld [smem:[#allocation2 + $0x3a]] }
 0x1d2   : > { %1424 = vrot.lane.b32.xlu0 %v1421_v45, %s9114_s17  ;;  %1403 = vrot.lane.b32.xlu1 %v1397_v12, %s9114_s17  ;;  %v407_v12 = vsel %vm379_vm2, 0.0, %v6040_v52  ;;  %v1585_v45 = vstv %s5007_s8  ;;  %s5014_s8 = sld [smem:[#allocation2 + $0x33]] }
 0x1d3   : > { %v1446_v53 = vsel %vm658_vm5, %v1444_v50, %v1445_v36  ;;  %v6327_v54 = vsel %vm383_vm3, %v407_v12, 0.0  ;;  %v1587_v28 = vmul.f32 %v1585_v45, %v6320_v8  ;;  %v409_v50 = vsel %vm379_vm2, 0.0, %v6050_v32  ;;  %s5020_s30 = sld [smem:[#allocation2 + $0x5d]] }
 0x1d4   : > { %v6304_v29 = vpop.permute.xlu0 %953  ;;  %v6306_v51 = vpop.permute.xlu1 %951  ;;  %v1601_v12 = vmul.f32 %v1599_v19, %v6320_v8 }
 0x1d5   : > { %9187 = vst [vmem:[#allocation63_spill] sm:$0xff] %v6304_v29  ;;  %9188 = vst [vmem:[#allocation64_spill] sm:$0xff] %v6306_v51 }
 0x1d6   : > { %1428 = vrot.lane.b32.xlu0 %v1422_v33, %s9114_s17  ;;  %1426 = vrot.lane.b32.xlu1 %v1423_v18, %s9114_s17  ;;  %v1586_v18 = vmul.f32 %v1585_v45, %v6327_v54  ;;  %v1619_v45 = vstv %s5009_s22  ;;  %s5016_s22 = sld [smem:[#allocation2 + $0x41]] }
 0x1d8   : > { %v6315_v20 = vpop.permute.xlu0 %976  ;;  %v6317_v49 = vpop.permute.xlu1 %974 }
 0x1d9   : > { %9189 = vst [vmem:[#allocation65_spill] sm:$0xff] %v6315_v20  ;;  %9190 = vst [vmem:[#allocation66_spill] sm:$0xff] %v6317_v49 }
 0x1da   : > { %1451 = vrot.lane.b32.xlu0 %v1448_v44, %s9114_s17  ;;  %1449 = vrot.lane.b32.xlu1 %v1446_v53, %s9114_s17  ;;  %v1600_v44 = vmul.f32 %v1599_v19, %v6327_v54  ;;  %v6348_v53 = vsel %vm383_vm3, %v409_v50, 0.0 }
 0x1db   : > { %9195 = vst [vmem:[#allocation71_spill] sm:$0xff] %v6348_v53  ;;  %v1622_v50 = vmul.f32 %v1619_v45, %v6348_v53 }
 0x1dc   : > { %v6329_v52 = vpop.permute.xlu0 %992  ;;  %v6331_v33 = vpop.permute.xlu1 %978 }
 0x1dd   : > { %9191 = vst [vmem:[#allocation67_spill] sm:$0xff] %v6329_v52  ;;  %9192 = vst [vmem:[#allocation68_spill] sm:$0xff] %v6331_v33  ;;  %v1621_v33 = vmul.f32 %v1619_v45, %v6320_v8 }
 0x1de   : > { %1592 = vrot.lane.b32.xlu0 %v1587_v28, %s5506_s6  ;;  %1590 = vrot.lane.b32.xlu1 %v1586_v18, %s5506_s6  ;;  %v1620_v18 = vmul.f32 %v1619_v45, %v6327_v54 }
 0x1e0   : > { %v6339_v36 = vpop.permute.xlu0 %1008  ;;  %v6341_v35 = vpop.permute.xlu1 %994 }
 0x1e1   : > { %9193 = vst [vmem:[#allocation69_spill] sm:$0xff] %v6339_v36  ;;  %9194 = vst [vmem:[#allocation70_spill] sm:$0xff] %v6341_v35  ;;  %v1602_v35 = vmul.f32 %v1599_v19, %v6348_v53  ;;  %v1659_v36 = vstv %s5011_s11  ;;  %v1680_v19 = vstv %s5012_s27  ;;  %s5017_s11 = sld [smem:[#allocation2 + $0x48]] }
 0x1e2   : > { %1608 = vrot.lane.b32.xlu0 %v1601_v12, %s5506_s6  ;;  %1606 = vrot.lane.b32.xlu1 %v1600_v44, %s5506_s6  ;;  %v1661_v52 = vmul.f32 %v1659_v36, %v6320_v8  ;;  %v1681_v45 = vmul.f32 %v1680_v19, %v6327_v54  ;;  %v1682_v51 = vmul.f32 %v1680_v19, %v6320_v8  ;;  %s5019_s27 = sld [smem:[#allocation2 + $0x56]] }
 0x1e3   : > { %v1662_v29 = vmul.f32 %v1659_v36, %v6348_v53 }
 0x1e4   : > { %v6350_v28 = vpop.permute.xlu0 %1012  ;;  %v6352_v32 = vpop.permute.xlu1 %1010  ;;  %v1667_v20 = vrot.slane %v1661_v52, 4  ;;  %v1687_v52 = vrot.slane %v1681_v45, 4  ;;  %v1688_v40 = vrot.slane %v1682_v51, 4 }
 0x1e5   : > { %9196 = vst [vmem:[#allocation72_spill] sm:$0xff] %v6350_v28  ;;  %9197 = vst [vmem:[#allocation73_spill] sm:$0xff] %v6352_v32  ;;  %v1639_v28 = vstv %s5010_s5  ;;  %v1660_v32 = vmul.f32 %v1659_v36, %v6327_v54  ;;  %v1669_v23 = vrot.slane %v1662_v29, 4  ;;  %v1706_v29 = vmul.f32 %v1705_v10, %v6327_v54  ;;  %s5018_s5 = sld [smem:[#allocation2 + $0x4f]] }
 0x1e6   : > { %1626 = vrot.lane.b32.xlu0 %v1620_v18, %s5506_s6  ;;  %1610 = vrot.lane.b32.xlu1 %v1602_v35, %s5506_s6 }
 0x1e7   : > { %v1666_v49 = vrot.slane %v1660_v32, 4 }
 0x1e8   : > { %v6358_v12 = vpop.permute.xlu0 %1030  ;;  %v6360_v44 = vpop.permute.xlu1 %1028 }
 0x1e9   : > { %9198 = vst [vmem:[#allocation74_spill] sm:$0xff] %v6358_v12  ;;  %9199 = vst [vmem:[#allocation75_spill] sm:$0xff] %v6360_v44  ;;  %v1641_v44 = vmul.f32 %v1639_v28, %v6320_v8  ;;  %v1640_v12 = vmul.f32 %v1639_v28, %v6327_v54  ;;  %v1668_v32 = vsel %vm440_vm9, %v1666_v49, %v1667_v20 }
 0x1ea   : > { %1630 = vrot.lane.b32.xlu0 %v1622_v50, %s5506_s6  ;;  %1628 = vrot.lane.b32.xlu1 %v1621_v33, %s5506_s6  ;;  %v1670_v49 = vsel %vm440_vm9, %v1667_v20, %v1669_v23 }
 0x1ec   : > { %v6368_v35 = vpop.permute.xlu0 %1048  ;;  %v6370_v18 = vpop.permute.xlu1 %1032 }
 0x1ed   : > { %9200 = vst [vmem:[#allocation76_spill] sm:$0xff] %v6368_v35  ;;  %9201 = vst [vmem:[#allocation77_spill] sm:$0xff] %v6370_v18  ;;  %v1642_v18 = vmul.f32 %v1639_v28, %v6348_v53  ;;  %v1683_v35 = vmul.f32 %v1680_v19, %v6348_v53  ;;  %v1708_v28 = vmul.f32 %v1705_v10, %v6348_v53 }
 0x1ee   : > { %1648 = vrot.lane.b32.xlu0 %v1641_v44, %s5506_s6  ;;  %1646 = vrot.lane.b32.xlu1 %v1640_v12, %s5506_s6  ;;  %v1707_v44 = vmul.f32 %v1705_v10, %v6320_v8  ;;  %v1689_v19 = vsel %vm440_vm9, %v1687_v52, %v1688_v40  ;;  %v1730_v52 = vstv %s5014_s8  ;;  %s5021_s8 = sld [smem:[#allocation2 + $0x34]] }
 0x1ef   : > { %v1690_v45 = vrot.slane %v1683_v35, 4  ;;  %v1731_v20 = vmul.f32 %v1730_v52, %v6327_v54 }
 0x1f0   : > { %v6379_v33 = vpop.permute.xlu0 %1052  ;;  %v6381_v50 = vpop.permute.xlu1 %1050 }
 0x1f1   : > { %9202 = vst [vmem:[#allocation78_spill] sm:$0xff] %v6379_v33  ;;  %9203 = vst [vmem:[#allocation79_spill] sm:$0xff] %v6381_v50  ;;  %v1712_v50 = vrot.slane %v1706_v29, 4 }
 0x1f2   : > { %1671 = vrot.lane.b32.xlu0 %v1668_v32, %s5506_s6  ;;  %1650 = vrot.lane.b32.xlu1 %v1642_v18, %s5506_s6  ;;  %v1713_v32 = vrot.slane %v1707_v44, 4 }
 0x1f4   : > { %v6388_v36 = vpop.permute.xlu0 %1075  ;;  %v6390_v12 = vpop.permute.xlu1 %1073  ;;  %v1714_v44 = vsel %vm440_vm9, %v1712_v50, %v1713_v32 }
 0x1f5   : > { %9204 = vst [vmem:[#allocation80_spill] sm:$0xff] %v6388_v36  ;;  %9205 = vst [vmem:[#allocation81_spill] sm:$0xff] %v6390_v12  ;;  %v1691_v12 = vsel %vm440_vm9, %v1688_v40, %v1690_v45  ;;  %v1715_v36 = vrot.slane %v1708_v28, 4  ;;  %v1732_v40 = vmul.f32 %v1730_v52, %v6320_v8  ;;  %v1751_v28 = vstv %s5015_s10  ;;  %s5022_s10 = sld [smem:[#allocation2 + $0x3b]] }
 0x1f6   : > { %1692 = vrot.lane.b32.xlu0 %v1689_v19, %s5506_s6  ;;  %1673 = vrot.lane.b32.xlu1 %v1670_v49, %s5506_s6  ;;  %v1735_v49 = vrot.slane %v1731_v20, 5  ;;  %v1754_v29 = vmul.f32 %v1751_v28, %v6348_v53  ;;  %v1752_v50 = vmul.f32 %v1751_v28, %v6327_v54 }
 0x1f7   : > { %v1716_v35 = vsel %vm440_vm9, %v1713_v32, %v1715_v36  ;;  %v1772_v32 = vstv %s5016_s22  ;;  %s5023_s22 = sld [smem:[#allocation2 + $0x42]] }
 0x1f8   : > { %v6399_v51 = vpop.permute.xlu0 %1096  ;;  %v6401_v18 = vpop.permute.xlu1 %1094  ;;  %v1774_v20 = vmul.f32 %v1772_v32, %v6320_v8 }
 0x1f9   : > { %9206 = vst [vmem:[#allocation82_spill] sm:$0xff] %v6399_v51  ;;  %9207 = vst [vmem:[#allocation83_spill] sm:$0xff] %v6401_v18 }
 0x1fa   : > { %1696 = vrot.lane.b32.xlu0 %v1690_v45, %s5506_s6  ;;  %1694 = vrot.lane.b32.xlu1 %v1691_v12, %s5506_s6  ;;  %v1753_v45 = vmul.f32 %v1751_v28, %v6320_v8  ;;  %v1773_v28 = vmul.f32 %v1772_v32, %v6327_v54 }
 0x1fc   : > { %v6406_v23 = vpop.permute.xlu0 %1119  ;;  %v6408_v10 = vpop.permute.xlu1 %1098 }
 0x1fd   : > { %9208 = vst [vmem:[#allocation84_spill] sm:$0xff] %v6406_v23  ;;  %9209 = vst [vmem:[#allocation85_spill] sm:$0xff] %v6408_v10  ;;  %v1736_v10 = vrot.slane %v1732_v40, 5  ;;  %v1758_v40 = vrot.slane %v1752_v50, 1 }
 0x1fe   : > { %1719 = vrot.lane.b32.xlu0 %v1716_v35, %s5506_s6  ;;  %1717 = vrot.lane.b32.xlu1 %v1714_v44, %s5506_s6  ;;  %v1759_v44 = vrot.slane %v1753_v45, 1 }
 0x1ff   : > { %v1737_v23 = vsel %vm360_vm1, %v1735_v49, %v1736_v10 }
 0x200   : > { %v6416_v19 = vpop.permute.xlu0 %1123  ;;  %v6418_v12 = vpop.permute.xlu1 %1121  ;;  %v1760_v51 = vsel %vm517_vm4, %v1758_v40, %v1759_v44 }
 0x201   : > { %9210 = vst [vmem:[#allocation86_spill] sm:$0xff] %v6416_v19  ;;  %9211 = vst [vmem:[#allocation87_spill] sm:$0xff] %v6418_v12  ;;  %v1761_v19 = vrot.slane %v1754_v29, 1  ;;  %v1775_v12 = vmul.f32 %v1772_v32, %v6348_v53  ;;  %v1780_v29 = vrot.slane %v1774_v20, 1 }
 0x202   : > { %1738 = vrot.lane.b32.xlu0 %v1735_v49, %s9108_s23  ;;  %1721 = vrot.lane.b32.xlu1 %v1715_v36, %s5506_s6  ;;  %v1797_v36 = vstv %s5017_s11  ;;  %v1779_v49 = vrot.slane %v1773_v28, 1  ;;  %v1822_v28 = vstv %s5018_s5  ;;  %s5024_s11 = sld [smem:[#allocation2 + $0x49]] }
 0x203   : > { %v1762_v45 = vsel %vm517_vm4, %v1759_v44, %v1761_v19  ;;  %v1782_v18 = vrot.slane %v1775_v12, 1  ;;  %v1798_v50 = vmul.f32 %v1797_v36, %v6327_v54  ;;  %v1799_v32 = vmul.f32 %v1797_v36, %v6320_v8  ;;  %s6521_s5 = sld [smem:[#allocation2 + $0x50]] }
 0x204   : > { %v6425_v52 = vpop.permute.xlu0 %1142  ;;  %v6427_v35 = vpop.permute.xlu1 %1140  ;;  %v1800_v12 = vmul.f32 %v1797_v36, %v6348_v53  ;;  %v1781_v44 = vsel %vm517_vm4, %v1779_v49, %v1780_v29  ;;  %v1825_v36 = vmul.f32 %v1822_v28, %v6348_v53  ;;  %v1847_v49 = vstv %s5019_s27  ;;  %s6550_s27 = sld [smem:[#allocation2 + $0x57]] }
 0x205   : > { %9212 = vst [vmem:[#allocation88_spill] sm:$0xff] %v6425_v52  ;;  %9213 = vst [vmem:[#allocation89_spill] sm:$0xff] %v6427_v35  ;;  %v1783_v19 = vsel %vm517_vm4, %v1780_v29, %v1782_v18  ;;  %v1804_v20 = vrot.slane %v1798_v50, 1  ;;  %v1805_v40 = vrot.slane %v1799_v32, 1  ;;  %v1823_v29 = vmul.f32 %v1822_v28, %v6327_v54 }
 0x206   : > { %1742 = vrot.lane.b32.xlu0 %v1736_v10, %s9108_s23  ;;  %1740 = vrot.lane.b32.xlu1 %v1737_v23, %s9108_s23 }
 0x208   : > { %v6435_v52 = vpop.permute.xlu0 %1165  ;;  %v6437_v35 = vpop.permute.xlu1 %1144 }
 0x209   : > { %9214 = vst [vmem:[#allocation90_spill] sm:$0xff] %v6435_v52  ;;  %9215 = vst [vmem:[#allocation91_spill] sm:$0xff] %v6437_v35  ;;  %v1806_v35 = vsel %vm517_vm4, %v1804_v20, %v1805_v40  ;;  %v1868_v52 = vstv %s5020_s30  ;;  %s6571_s30 = sld [smem:[#allocation2 + $0x5e]] }
 0x20a   : > { %1765 = vrot.lane.b32.xlu0 %v1762_v45, %s9108_s23  ;;  %1763 = vrot.lane.b32.xlu1 %v1760_v51, %s9108_s23 }
 0x20c   : > { %v6445_v23 = vpop.permute.xlu0 %1186  ;;  %v6447_v10 = vpop.permute.xlu1 %1167 }
 0x20d   : > { %9216 = vst [vmem:[#allocation92_spill] sm:$0xff] %v6445_v23  ;;  %9217 = vst [vmem:[#allocation93_spill] sm:$0xff] %v6447_v10  ;;  %v1807_v23 = vrot.slane %v1800_v12, 1  ;;  %v1824_v10 = vmul.f32 %v1822_v28, %v6320_v8  ;;  %v1848_v12 = vmul.f32 %v1847_v49, %v6327_v54 }
 0x20e   : > { %1786 = vrot.lane.b32.xlu0 %v1783_v19, %s9108_s23  ;;  %1784 = vrot.lane.b32.xlu1 %v1781_v44, %s9108_s23  ;;  %v1849_v44 = vmul.f32 %v1847_v49, %v6320_v8 }
 0x20f   : > { %v1830_v19 = vrot.slane %v1824_v10, 1  ;;  %v1808_v20 = vsel %vm517_vm4, %v1805_v40, %v1807_v23  ;;  %v1854_v28 = vrot.slane %v1848_v12, 5  ;;  %v1871_v12 = vmul.f32 %v1868_v52, %v6348_v53 }
 0x210   : > { %v6454_v45 = vpop.permute.xlu0 %1190  ;;  %v6456_v51 = vpop.permute.xlu1 %1188  ;;  %v1855_v10 = vrot.slane %v1849_v44, 5 }
 0x211   : > { %9218 = vst [vmem:[#allocation94_spill] sm:$0xff] %v6454_v45  ;;  %9219 = vst [vmem:[#allocation95_spill] sm:$0xff] %v6456_v51  ;;  %v1832_v51 = vrot.slane %v1825_v36, 1  ;;  %v1829_v45 = vrot.slane %v1823_v29, 1  ;;  %v1870_v36 = vmul.f32 %v1868_v52, %v6320_v8  ;;  %v1850_v29 = vmul.f32 %v1847_v49, %v6348_v53 }
 0x212   : > { %1809 = vrot.lane.b32.xlu0 %v1806_v35, %s9108_s23  ;;  %1788 = vrot.lane.b32.xlu1 %v1782_v18, %s9108_s23  ;;  %v1856_v44 = vsel %vm360_vm1, %v1854_v28, %v1855_v10 }
 0x213   : > { %v1831_v40 = vsel %vm517_vm4, %v1829_v45, %v1830_v19  ;;  %v1857_v33 = vrot.slane %v1850_v29, 5  ;;  %v1893_v45 = vstv %s5021_s8  ;;  %s6591_s8 = sld [smem:[#allocation2 + $0x35]] }
 0x214   : > { %v6464_v50 = vpop.permute.xlu0 %1213  ;;  %v6466_v32 = vpop.permute.xlu1 %1211  ;;  %v1894_v28 = vmul.f32 %v1893_v45, %v6327_v54 }
 0x215   : > { %9220 = vst [vmem:[#allocation96_spill] sm:$0xff] %v6464_v50  ;;  %9221 = vst [vmem:[#allocation97_spill] sm:$0xff] %v6466_v32  ;;  %v1869_v32 = vmul.f32 %v1868_v52, %v6327_v54  ;;  %v1833_v50 = vsel %vm517_vm4, %v1830_v19, %v1832_v51  ;;  %v1878_v19 = vrot.slane %v1871_v12, 5  ;;  %v1858_v52 = vsel %vm360_vm1, %v1855_v10, %v1857_v33 }
 0x216   : > { %1813 = vrot.lane.b32.xlu0 %v1807_v23, %s9108_s23  ;;  %1811 = vrot.lane.b32.xlu1 %v1808_v20, %s9108_s23  ;;  %v1898_v12 = vrot.slane %v1894_v28, 6  ;;  %v260_v33 = vrot.slane %v5675_v9, 4  ;;  %v1939_v28 = vstv %s5023_s22  ;;  %s5030_s22 = sld [smem:[#allocation2 + $0x43]] }
 0x218   : > { %v6473_v18 = vpop.permute.xlu0 %1236  ;;  %v6475_v35 = vpop.permute.xlu1 %1215 }
 0x219   : > { %9222 = vst [vmem:[#allocation98_spill] sm:$0xff] %v6473_v18  ;;  %9223 = vst [vmem:[#allocation99_spill] sm:$0xff] %v6475_v35  ;;  %v1875_v35 = vrot.slane %v1869_v32, 5  ;;  %v1876_v18 = vrot.slane %v1870_v36, 5  ;;  %v1895_v32 = vmul.f32 %v1893_v45, %v6320_v8 }
 0x21a   : > { %1836 = vrot.lane.b32.xlu0 %v1833_v50, %s9108_s23  ;;  %1834 = vrot.lane.b32.xlu1 %v1831_v40, %s9108_s23 }
 0x21b   : > { %v1877_v40 = vsel %vm360_vm1, %v1875_v35, %v1876_v18  ;;  %v1879_v29 = vsel %vm360_vm1, %v1876_v18, %v1878_v19  ;;  %v1899_v35 = vrot.slane %v1895_v32, 6  ;;  %v253_v32 = vrot.slane %v5682_v15, 4 }
 0x21c   : > { %v6484_v23 = vpop.permute.xlu0 %1240  ;;  %v6486_v20 = vpop.permute.xlu1 %1238 }
 0x21d   : > { %9224 = vst [vmem:[#allocation100_spill] sm:$0xff] %v6484_v23  ;;  %9225 = vst [vmem:[#allocation101_spill] sm:$0xff] %v6486_v20  ;;  %v254_v23 = vmax.f32 %v5682_v15, %v253_v32 }
 0x21e   : > { %1859 = vrot.lane.b32.xlu0 %v1856_v44, %s9108_s23  ;;  %1838 = vrot.lane.b32.xlu1 %v1832_v51, %s9108_s23  ;;  %v1914_v44 = vstv %s5022_s10  ;;  %s6607_s10 = sld [smem:[#allocation2 + $0x3c]] }
 0x21f   : > { %v1917_v18 = vmul.f32 %v1914_v44, %v6348_v53  ;;  %v255_v39 = vrot.slane %v254_v23, 2 }
 0x220   : > { %v6492_v49 = vpop.permute.xlu0 %1263  ;;  %v6494_v50 = vpop.permute.xlu1 %1261 }
 0x221   : > { %9226 = vst [vmem:[#allocation102_spill] sm:$0xff] %v6492_v49  ;;  %9227 = vst [vmem:[#allocation103_spill] sm:$0xff] %v6494_v50  ;;  %v1960_v50 = vstv %s5024_s11  ;;  %v1924_v20 = vrot.slane %v1917_v18, 6  ;;  %s5031_s11 = sld [smem:[#allocation2 + $0x4a]] }
 0x222   : > { %1880 = vrot.lane.b32.xlu0 %v1877_v40, %s9108_s23  ;;  %1861 = vrot.lane.b32.xlu1 %v1858_v52, %s9108_s23  ;;  %v1915_v40 = vmul.f32 %v1914_v44, %v6327_v54  ;;  %v1900_v52 = vsel %vm658_vm5, %v1898_v12, %v1899_v35  ;;  %v1962_v15 = vmul.f32 %v1960_v50, %v6320_v8 }
 0x223   : > { %v6545_v32 = vmul.f32 %v1960_v50, %v6348_v53 }
 0x224   : > { %v6502_v51 = vpop.permute.xlu0 %1284  ;;  %v6504_v36 = vpop.permute.xlu1 %1282 }
 0x225   : > { %9228 = vst [vmem:[#allocation104_spill] sm:$0xff] %v6502_v51  ;;  %9229 = vst [vmem:[#allocation105_spill] sm:$0xff] %v6504_v36  ;;  %v1916_v36 = vmul.f32 %v1914_v44, %v6320_v8  ;;  %v1921_v51 = vrot.slane %v1915_v40, 6  ;;  %v1941_v44 = vmul.f32 %v1939_v28, %v6320_v8 }
 0x226   : > { %1884 = vrot.lane.b32.xlu0 %v1878_v19, %s9108_s23  ;;  %1882 = vrot.lane.b32.xlu1 %v1879_v29, %s9108_s23  ;;  %v261_v19 = vmax.f32 %v5675_v9, %v260_v33  ;;  %v267_v29 = vrot.slane %v5684_v17, 4  ;;  %v274_v9 = vrot.slane %v5689_v21, 4 }
 0x227   : > { %v1922_v49 = vrot.slane %v1916_v36, 6  ;;  %v288_v36 = vrot.slane %v5701_v30, 4 }
 0x228   : > { %v6510_v10 = vpop.permute.xlu0 %1303  ;;  %v6512_v45 = vpop.permute.xlu1 %1286  ;;  %v262_v33 = vrot.slane %v261_v19, 2  ;;  %v268_v40 = vmax.f32 %v5684_v17, %v267_v29 }
 0x229   : > { %9230 = vst [vmem:[#allocation106_spill] sm:$0xff] %v6510_v10  ;;  %9231 = vst [vmem:[#allocation107_spill] sm:$0xff] %v6512_v45  ;;  %v1925_v27 = vsel %vm658_vm5, %v1922_v49, %v1924_v20  ;;  %v1923_v17 = vsel %vm658_vm5, %v1921_v51, %v1922_v49  ;;  %v295_v20 = vrot.slane %v5705_v37, 4  ;;  %v289_v49 = vadd.f32 %v288_v36, %v5701_v30 }
 0x22a   : > { %1903 = vrot.lane.b32.xlu0 %v1900_v52, %s5508_s7  ;;  %1901 = vrot.lane.b32.xlu1 %v1898_v12, %s5508_s7  ;;  %v1942_v52 = vmul.f32 %v1939_v28, %v6348_v53  ;;  %v1940_v12 = vmul.f32 %v1939_v28, %v6327_v54  ;;  %v1947_v28 = vrot.slane %v1941_v44, 2  ;;  %v1985_v44 = vstv %s6521_s5  ;;  %s5032_s5 = sld [smem:[#allocation2 + $0x51]] }
 0x22b   : > { %v269_v22 = vrot.slane %v268_v40, 2  ;;  %v302_v30 = vrot.slane %v5709_v42, 4 }
 0x22c   : > { %v6525_v45 = vpop.permute.xlu0 %1307  ;;  %v6527_v10 = vpop.permute.xlu1 %1305  ;;  %v1949_v29 = vrot.slane %v1942_v52, 2  ;;  %v1946_v31 = vrot.slane %v1940_v12, 2  ;;  %v1968_v12 = vrot.slane %v1962_v15, 2 }
 0x22d   : > { %9232 = vst [vmem:[#allocation108_spill] sm:$0xff] %v6525_v45  ;;  %9233 = vst [vmem:[#allocation109_spill] sm:$0xff] %v6527_v10  ;;  %v281_v10 = vrot.slane %v5693_v25, 4  ;;  %v270_v36 = vmax.f32 %v268_v40, %v269_v22  ;;  %v303_v40 = vadd.f32 %v302_v30, %v5709_v42 }
 0x22e   : > { %1926 = vrot.lane.b32.xlu0 %v1921_v51, %s5508_s7  ;;  %1905 = vrot.lane.b32.xlu1 %v1899_v35, %s5508_s7  ;;  %v1961_v35 = vmul.f32 %v1960_v50, %v6327_v54 }
 0x22f   : > { %v282_v50 = vadd.f32 %v281_v10, %v5693_v25  ;;  %v1987_v25 = vmul.f32 %v1985_v44, %v6320_v8  ;;  %v256_v10 = vmax.f32 %v254_v23, %v255_v39  ;;  %v304_v30 = vrot.slane %v303_v40, 2 }
 0x230   : > { %v6539_v18 = vpop.permute.xlu0 %1330  ;;  %v6541_v45 = vpop.permute.xlu1 %1328 }
 0x231   : > { %9234 = vst [vmem:[#allocation110_spill] sm:$0xff] %v6539_v18  ;;  %9235 = vst [vmem:[#allocation111_spill] sm:$0xff] %v6541_v45  ;;  %v275_v18 = vmax.f32 %v5689_v21, %v274_v9  ;;  %v263_v45 = vmax.f32 %v261_v19, %v262_v33  ;;  %v1970_v21 = vrot.slane %v6545_v32, 2  ;;  %v1967_v9 = vrot.slane %v1961_v35, 2 }
 0x232   : > { %1930 = vrot.lane.b32.xlu0 %v1925_v27, %s5508_s7  ;;  %1928 = vrot.lane.b32.xlu1 %v1923_v17, %s5508_s7  ;;  %v1950_v27 = vsel %vm707_vm6, %v1947_v28, %v1949_v29  ;;  %v1948_v17 = vsel %vm707_vm6, %v1946_v31, %v1947_v28  ;;  %v1986_v19 = vmul.f32 %v1985_v44, %v6327_v54  ;;  %v283_v15 = vrot.slane %v282_v50, 2 }
 0x233   : > { %v276_v33 = vrot.slane %v275_v18, 2  ;;  %v296_v32 = vadd.f32 %v295_v20, %v5705_v37  ;;  %v264_v31 = vrot.slane %v263_v45, 1  ;;  %v290_v28 = vrot.slane %v289_v49, 2 }
 0x234   : > { %v6559_v51 = vpop.permute.xlu0 %1353  ;;  %v6561_v52 = vpop.permute.xlu1 %1332  ;;  %v1971_v39 = vsel %vm707_vm6, %v1968_v12, %v1970_v21  ;;  %v1969_v23 = vsel %vm707_vm6, %v1967_v9, %v1968_v12  ;;  %v257_v46 = vrot.slane %v256_v10, 1  ;;  %v271_v37 = vrot.slane %v270_v36, 1 }
 0x235   : > { %9236 = vst [vmem:[#allocation112_spill] sm:$0xff] %v6559_v51  ;;  %9237 = vst [vmem:[#allocation113_spill] sm:$0xff] %v6561_v52  ;;  %v1992_v52 = vrot.slane %v1986_v19, 2  ;;  %v2010_v51 = vstv %s6550_s27  ;;  %v277_v22 = vmax.f32 %v275_v18, %v276_v33  ;;  %v284_v20 = vadd.f32 %v283_v15, %v282_v50  ;;  %s5033_s27 = sld [smem:[#allocation2 + $0x58]] }
 0x236   : > { %1953 = vrot.lane.b32.xlu0 %v1950_v27, %s5508_s7  ;;  %1951 = vrot.lane.b32.xlu1 %v1948_v17, %s5508_s7  ;;  %v1993_v27 = vrot.slane %v1987_v25, 2  ;;  %v1988_v17 = vmul.f32 %v1985_v44, %v6348_v53  ;;  %v2012_v44 = vmul.f32 %v2010_v51, %v6320_v8  ;;  %v2013_v9 = vmul.f32 %v2010_v51, %v6348_v53 }
 0x237   : > { %v265_v42 = vmax.f32 %v263_v45, %v264_v31  ;;  %v2011_v25 = vmul.f32 %v2010_v51, %v6327_v54  ;;  %v258_v50 = vmax.f32 %v256_v10, %v257_v46  ;;  %v278_v33 = vrot.slane %v277_v22, 1 }
 0x238   : > { %v6574_v35 = vpop.permute.xlu0 %1374  ;;  %v6576_v29 = vpop.permute.xlu1 %1355  ;;  %v1994_v18 = vsel %vm707_vm6, %v1992_v52, %v1993_v27  ;;  %v1995_v19 = vrot.slane %v1988_v17, 2  ;;  %v272_v15 = vmax.f32 %v270_v36, %v271_v37  ;;  %v2018_v52 = vrot.slane %v2012_v44, 2 }
 0x239   : > { %9238 = vst [vmem:[#allocation114_spill] sm:$0xff] %v6574_v35  ;;  %9239 = vst [vmem:[#allocation115_spill] sm:$0xff] %v6576_v29  ;;  %v297_v29 = vrot.slane %v296_v32, 2  ;;  %v291_v35 = vadd.f32 %v290_v28, %v289_v49  ;;  %v2035_v49 = vstv %s6571_s30  ;;  %v285_v28 = vrot.slane %v284_v20, 1  ;;  %s5034_s30 = sld [smem:[#allocation2 + $0x5f]] }
 0x23a   : > { %1974 = vrot.lane.b32.xlu0 %v1971_v39, %s5508_s7  ;;  %1972 = vrot.lane.b32.xlu1 %v1969_v23, %s5508_s7  ;;  %v2020_v31 = vrot.slane %v2013_v9, 2  ;;  %v1996_v46 = vsel %vm707_vm6, %v1993_v27, %v1995_v19  ;;  %v2017_v51 = vrot.slane %v2011_v25, 2  ;;  %v2036_v10 = vmul.f32 %v2035_v49, %v6327_v54 }
 0x23b   : > { %v298_v39 = vadd.f32 %v297_v29, %v296_v32  ;;  %v292_v23 = vrot.slane %v291_v35, 1  ;;  %v305_v17 = vadd.f32 %v304_v30, %v303_v40  ;;  %v279_v36 = vmax.f32 %v277_v22, %v278_v33 }
 0x23c   : > { %v6585_v47 = vpop.permute.xlu0 %1378  ;;  %v6587_v12 = vpop.permute.xlu1 %1376  ;;  %v2587_v32 = vsel %vm2586_vm10, %v265_v42, %v258_v50  ;;  %v2021_v40 = vsel %vm707_vm6, %v2018_v52, %v2020_v31  ;;  %v2056_v9 = vstv %s6591_s8  ;;  %v2042_v22 = vrot.slane %v2036_v10, 6  ;;  %s5035_s8 = sld [smem:[#allocation2 + $0x36]] }
 0x23d   : > { %9240 = vst [vmem:[#allocation116_spill] sm:$0xff] %v6585_v47  ;;  %9241 = vst [vmem:[#allocation117_spill] sm:$0xff] %v6587_v12  ;;  %v299_v29 = vrot.slane %v298_v39, 1  ;;  %v2589_v27 = vsel %vm2588_vm11, %v272_v15, %v2587_v32  ;;  %v2038_v42 = vmul.f32 %v2035_v49, %v6348_v53  ;;  %v286_v50 = vadd.f32 %v285_v28, %v284_v20 }
 0x23e   : > { %1997 = vrot.lane.b32.xlu0 %v1994_v18, %s5508_s7  ;;  %1976 = vrot.lane.b32.xlu1 %v1970_v21, %s5508_s7  ;;  %v2037_v21 = vmul.f32 %v2035_v49, %v6320_v8  ;;  %v6618_v18 = vsel %vm2590_vm12, %v279_v36, %v2589_v27  ;;  %v293_v33 = vadd.f32 %v292_v23, %v291_v35  ;;  %v306_v30 = vrot.slane %v305_v17, 1 }
 0x23f   : > { %v300_v15 = vadd.f32 %v299_v29, %v298_v39  ;;  %v2057_v36 = vmul.f32 %v2056_v9, %v6327_v54  ;;  %v2058_v20 = vmul.f32 %v2056_v9, %v6320_v8  ;;  %v309_v35 = vmul.f32 0.0625, %v286_v50 }
 0x240   : > { %v6598_v12 = vpop.permute.xlu0 %1401  ;;  %v6600_v45 = vpop.permute.xlu1 %1399  ;;  %v2043_v25 = vrot.slane %v2037_v21, 6  ;;  %v310_v49 = vmul.f32 0.0625, %v293_v33  ;;  %v307_v28 = vadd.f32 %v306_v30, %v305_v17  ;;  %v2077_v39 = vstv %s6607_s10  ;;  %s5036_s10 = sld [smem:[#allocation2 + $0x3d]] }
 0x241   : > { %9242 = vst [vmem:[#allocation118_spill] sm:$0xff] %v6598_v12  ;;  %9243 = vst [vmem:[#allocation119_spill] sm:$0xff] %v6600_v45  ;;  %v311_v23 = vmul.f32 0.0625, %v300_v15  ;;  %v2061_v29 = vrot.slane %v2057_v36, 7  ;;  %v2079_v9 = vmul.f32 %v2077_v39, %v6320_v8 }
 0x242   : > { %2001 = vrot.lane.b32.xlu0 %v1995_v19, %s5508_s7  ;;  %1999 = vrot.lane.b32.xlu1 %v1996_v46, %s5508_s7  ;;  %v2019_v19 = vsel %vm707_vm6, %v2017_v51, %v2018_v52  ;;  %v2044_v52 = vsel %vm658_vm5, %v2042_v22, %v2043_v25  ;;  %v2045_v51 = vrot.slane %v2038_v42, 6  ;;  %v2611_v17 = vsel %vm2586_vm10, %v310_v49, %v309_v35 }
 0x243   : > { %v2612_v22 = vsel %vm2588_vm11, %v311_v23, %v2611_v17  ;;  %v2085_v36 = vrot.slane %v2079_v9, 7 }
 0x244   : > { %v6611_v37 = vpop.permute.xlu0 %1424  ;;  %v6613_v44 = vpop.permute.xlu1 %1403  ;;  %v2046_v27 = vsel %vm658_vm5, %v2043_v25, %v2045_v51  ;;  %v2102_v25 = vstv %s5030_s22  ;;  %s5037_s22 = sld [smem:[#allocation2 + $0x44]] }
 0x245   : > { %9244 = vst [vmem:[#allocation120_spill] sm:$0xff] %v6611_v37  ;;  %9245 = vst [vmem:[#allocation121_spill] sm:$0xff] %v6613_v44  ;;  %v2104_v51 = vmul.f32 %v2102_v25, %v6320_v8 }
 0x246   : > { %2024 = vrot.lane.b32.xlu0 %v2021_v40, %s5508_s7  ;;  %2022 = vrot.lane.b32.xlu1 %v2019_v19, %s5508_s7  ;;  %v2062_v40 = vrot.slane %v2058_v20, 7  ;;  %v2078_v19 = vmul.f32 %v2077_v39, %v6327_v54  ;;  %v2105_v20 = vmul.f32 %v2102_v25, %v6348_v53 }
 0x248   : > { %v6624_v46 = vpop.permute.xlu0 %1428  ;;  %v6626_v32 = vpop.permute.xlu1 %1426  ;;  %v2063_v30 = vsel %vm823_vm7, %v2061_v29, %v2062_v40  ;;  %v2084_v15 = vrot.slane %v2078_v19, 7 }
 0x249   : > { %9246 = vst [vmem:[#allocation122_spill] sm:$0xff] %v6624_v46  ;;  %9247 = vst [vmem:[#allocation123_spill] sm:$0xff] %v6626_v32 }
 0x24a   : > { %2047 = vrot.lane.b32.xlu0 %v2044_v52, %s5508_s7  ;;  %2026 = vrot.lane.b32.xlu1 %v2020_v31, %s5508_s7  ;;  %v312_v31 = vmul.f32 0.0625, %v307_v28  ;;  %v2080_v52 = vmul.f32 %v2077_v39, %v6348_v53  ;;  %v2103_v28 = vmul.f32 %v2102_v25, %v6327_v54  ;;  %v2086_v23 = vsel %vm823_vm7, %v2084_v15, %v2085_v36 }
 0x24b   : > { %v2127_v39 = vstv %s5031_s11  ;;  %s5039_s11 = sld [smem:[#allocation2 + $0x52]] }
 0x24c   : > { %v6634_v10 = vpop.permute.xlu0 %1451  ;;  %v6636_v21 = vpop.permute.xlu1 %1449  ;;  %v6650_v33 = vsel %vm2590_vm12, %v312_v31, %v2612_v22  ;;  %v2109_v31 = vrot.slane %v2103_v28, 7  ;;  %v2129_v17 = vmul.f32 %v2127_v39, %v6320_v8  ;;  %v2130_v22 = vmul.f32 %v2127_v39, %v6348_v53 }
 0x24d   : > { %9248 = vst [vmem:[#allocation124_spill] sm:$0xff] %v6634_v10  ;;  %9249 = vst [vmem:[#allocation125_spill] sm:$0xff] %v6636_v21 }
 0x24e   : > { %2064 = vrot.lane.b32.xlu0 %v2061_v29, %s5509_s4  ;;  %2049 = vrot.lane.b32.xlu1 %v2046_v27, %s5508_s7  ;;  %v2087_v29 = vrot.slane %v2080_v52, 7  ;;  %v2110_v27 = vrot.slane %v2104_v51, 7 }
 0x250   : > { %v6645_v42 = vpop.permute.xlu0 %1592  ;;  %v6647_v50 = vpop.permute.xlu1 %1590  ;;  %v2088_v25 = vsel %vm823_vm7, %v2085_v36, %v2087_v29  ;;  %v2111_v28 = vsel %vm823_vm7, %v2109_v31, %v2110_v27 }
 0x251   : > { %9250 = vst [vmem:[#allocation126_spill] sm:$0xff] %v6645_v42  ;;  %9251 = vst [vmem:[#allocation127_spill] sm:$0xff] %v6647_v50 }
 0x252   : > { %2068 = vrot.lane.b32.xlu0 %v2062_v40, %s5509_s4  ;;  %2066 = vrot.lane.b32.xlu1 %v2063_v30, %s5509_s4  ;;  %v2112_v40 = vrot.slane %v2105_v20, 7  ;;  %v2128_v30 = vmul.f32 %v2127_v39, %v6327_v54 }
 0x254   : > { %v6658_v35 = vpop.permute.xlu0 %1608  ;;  %v6660_v49 = vpop.permute.xlu1 %1606  ;;  %v2113_v52 = vsel %vm823_vm7, %v2110_v27, %v2112_v40 }
 0x255   : > { %9252 = vst [vmem:[#allocation128_spill] sm:$0xff] %v6658_v35  ;;  %9253 = vst [vmem:[#allocation129_spill] sm:$0xff] %v6660_v49  ;;  %v2134_v49 = vrot.slane %v2128_v30, 3 }
 0x256   : > { %2091 = vrot.lane.b32.xlu0 %v2086_v23, %s5509_s4  ;;  %2089 = vrot.lane.b32.xlu1 %v2084_v15, %s5509_s4  ;;  %v2148_v15 = vstv %s5032_s5  ;;  %v2135_v23 = vrot.slane %v2129_v17, 3  ;;  %s5038_s5 = sld [smem:[#allocation2 + $0x4b]] }
 0x257   : > { %v2150_v36 = vmul.f32 %v2148_v15, %v6320_v8  ;;  %v2151_v29 = vmul.f32 %v2148_v15, %v6348_v53  ;;  %v2149_v39 = vmul.f32 %v2148_v15, %v6327_v54 }
 0x258   : > { %v6666_v19 = vpop.permute.xlu0 %1626  ;;  %v6668_v9 = vpop.permute.xlu1 %1610 }
 0x259   : > { %9254 = vst [vmem:[#allocation130_spill] sm:$0xff] %v6666_v19  ;;  %9255 = vst [vmem:[#allocation131_spill] sm:$0xff] %v6668_v9  ;;  %v2137_v9 = vrot.slane %v2130_v22, 3  ;;  %v2173_v19 = vstv %s5033_s27  ;;  %v2136_v22 = vsel %vm897_vm8, %v2134_v49, %v2135_v23  ;;  %v2156_v30 = vrot.slane %v2150_v36, 3  ;;  %s5040_s27 = sld [smem:[#allocation2 + $0x59]] }
 0x25a   : > { %2114 = vrot.lane.b32.xlu0 %v2109_v31, %s5509_s4  ;;  %2093 = vrot.lane.b32.xlu1 %v2088_v25, %s5509_s4  ;;  %v2174_v31 = vmul.f32 %v2173_v19, %v6327_v54  ;;  %v2175_v17 = vmul.f32 %v2173_v19, %v6320_v8  ;;  %v2155_v15 = vrot.slane %v2149_v39, 3  ;;  %v2198_v49 = vstv %s5034_s30  ;;  %s5041_s30 = sld [smem:[#allocation2 + $0x60]] }
 0x25b   : > { %v2138_v27 = vsel %vm897_vm8, %v2135_v23, %v2137_v9 }
 0x25c   : > { %v6677_v51 = vpop.permute.xlu0 %1630  ;;  %v6679_v20 = vpop.permute.xlu1 %1628  ;;  %v2181_v35 = vrot.slane %v2175_v17, 3 }
 0x25d   : > { %9256 = vst [vmem:[#allocation132_spill] sm:$0xff] %v6677_v51  ;;  %9257 = vst [vmem:[#allocation133_spill] sm:$0xff] %v6679_v20  ;;  %v2158_v20 = vrot.slane %v2151_v29, 3  ;;  %v2180_v51 = vrot.slane %v2174_v31, 3 }
 0x25e   : > { %2118 = vrot.lane.b32.xlu0 %v2113_v52, %s5509_s4  ;;  %2116 = vrot.lane.b32.xlu1 %v2111_v28, %s5509_s4 }
 0x25f   : > { %v2159_v9 = vsel %vm897_vm8, %v2156_v30, %v2158_v20  ;;  %v2182_v39 = vsel %vm897_vm8, %v2180_v51, %v2181_v35 }
 0x260   : > { %v6687_v40 = vpop.permute.xlu0 %1648  ;;  %v6689_v25 = vpop.permute.xlu1 %1646 }
 0x261   : > { %9258 = vst [vmem:[#allocation134_spill] sm:$0xff] %v6687_v40  ;;  %9259 = vst [vmem:[#allocation135_spill] sm:$0xff] %v6689_v25  ;;  %v2176_v25 = vmul.f32 %v2173_v19, %v6348_v53  ;;  %v2157_v40 = vsel %vm897_vm8, %v2155_v15, %v2156_v30  ;;  %v2200_v19 = vmul.f32 %v2198_v49, %v6320_v8 }
 0x262   : > { %2141 = vrot.lane.b32.xlu0 %v2138_v27, %s5509_s4  ;;  %2139 = vrot.lane.b32.xlu1 %v2136_v22, %s5509_s4  ;;  %v2201_v27 = vmul.f32 %v2198_v49, %v6348_v53  ;;  %v2199_v22 = vmul.f32 %v2198_v49, %v6327_v54 }
 0x263   : > { %v2183_v29 = vrot.slane %v2176_v25, 3  ;;  %v2206_v25 = vrot.slane %v2200_v19, 3 }
 0x264   : > { %v6697_v52 = vpop.permute.xlu0 %1671  ;;  %v6699_v28 = vpop.permute.xlu1 %1650  ;;  %v2208_v30 = vrot.slane %v2201_v27, 3  ;;  %v2205_v51 = vrot.slane %v2199_v22, 3  ;;  %v2237_v27 = vstv %s5036_s10  ;;  %s5043_s10 = sld [smem:[#allocation2 + $0x3e]] }
 0x265   : > { %9260 = vst [vmem:[#allocation136_spill] sm:$0xff] %v6697_v52  ;;  %9261 = vst [vmem:[#allocation137_spill] sm:$0xff] %v6699_v28  ;;  %v2184_v17 = vsel %vm897_vm8, %v2181_v35, %v2183_v29  ;;  %v2223_v35 = vstv %s5035_s8  ;;  %s5042_s8 = sld [smem:[#allocation2 + $0x37]] }
 0x266   : > { %2162 = vrot.lane.b32.xlu0 %v2159_v9, %s5509_s4  ;;  %2160 = vrot.lane.b32.xlu1 %v2157_v40, %s5509_s4  ;;  %v2207_v49 = vsel %vm897_vm8, %v2205_v51, %v2206_v25  ;;  %v2225_v51 = vmul.f32 %v2223_v35, %v6320_v8 }
 0x268   : > { %v6706_v23 = vpop.permute.xlu0 %1692  ;;  %v6708_v36 = vpop.permute.xlu1 %1673 }
 0x269   : > { %9262 = vst [vmem:[#allocation138_spill] sm:$0xff] %v6706_v23  ;;  %9263 = vst [vmem:[#allocation139_spill] sm:$0xff] %v6708_v36 }
 0x26a   : > { %2185 = vrot.lane.b32.xlu0 %v2182_v39, %s5509_s4  ;;  %2164 = vrot.lane.b32.xlu1 %v2158_v20, %s5509_s4  ;;  %v2209_v20 = vsel %vm897_vm8, %v2206_v25, %v2208_v30  ;;  %v2238_v25 = vmul.f32 %v2237_v27, %v6327_v54 }
 0x26c   : > { %v6716_v40 = vpop.permute.xlu0 %1696  ;;  %v6718_v31 = vpop.permute.xlu1 %1694 }
 0x26d   : > { %9264 = vst [vmem:[#allocation140_spill] sm:$0xff] %v6716_v40  ;;  %9265 = vst [vmem:[#allocation141_spill] sm:$0xff] %v6718_v31 }
 0x26e   : > { %2189 = vrot.lane.b32.xlu0 %v2183_v29, %s5509_s4  ;;  %2187 = vrot.lane.b32.xlu1 %v2184_v17, %s5509_s4  ;;  %v2224_v29 = vmul.f32 %v2223_v35, %v6327_v54 }
 0x270   : > { %v6723_v15 = vpop.permute.xlu0 %1719  ;;  %v6725_v9 = vpop.permute.xlu1 %1717 }
 0x271   : > { %9266 = vst [vmem:[#allocation142_spill] sm:$0xff] %v6723_v15  ;;  %9267 = vst [vmem:[#allocation143_spill] sm:$0xff] %v6725_v9 }
 0x272   : > { %2212 = vrot.lane.b32.xlu0 %v2209_v20, %s5509_s4  ;;  %2210 = vrot.lane.b32.xlu1 %v2207_v49, %s5509_s4 }
 0x274   : > { %v6731_v39 = vpop.permute.xlu0 %1738  ;;  %v6733_v19 = vpop.permute.xlu1 %1721 }
 0x275   : > { %9268 = vst [vmem:[#allocation144_spill] sm:$0xff] %v6731_v39  ;;  %9269 = vst [vmem:[#allocation145_spill] sm:$0xff] %v6733_v19 }
 0x276   : > { %2228 = vrot.lane.b32.xlu0 %v2224_v29, %s9116_s28  ;;  %2214 = vrot.lane.b32.xlu1 %v2208_v30, %s5509_s4  ;;  %v2240_v30 = vmul.f32 %v2237_v27, %v6348_v53  ;;  %v2239_v29 = vmul.f32 %v2237_v27, %v6320_v8  ;;  %v2277_v27 = vstv %s5038_s5  ;;  %s5046_s5 = sld [smem:[#allocation2 + $0x53]] }
 0x277   : > { %v2279_v9 = vmul.f32 %v2277_v27, %v6320_v8 }
 0x278   : > { %v6738_v22 = vpop.permute.xlu0 %1742  ;;  %v6740_v17 = vpop.permute.xlu1 %1740 }
 0x279   : > { %9270 = vst [vmem:[#allocation146_spill] sm:$0xff] %v6738_v22  ;;  %9271 = vst [vmem:[#allocation147_spill] sm:$0xff] %v6740_v17  ;;  %v2257_v22 = vstv %s5037_s22  ;;  %s5044_s22 = sld [smem:[#allocation2 + $0x45]] }
 0x27a   : > { %2244 = vrot.lane.b32.xlu0 %v2238_v25, %s9116_s28  ;;  %2230 = vrot.lane.b32.xlu1 %v2225_v51, %s9116_s28  ;;  %v2259_v51 = vmul.f32 %v2257_v22, %v6320_v8  ;;  %v2260_v19 = vmul.f32 %v2257_v22, %v6348_v53 }
 0x27c   : > { %v6746_v20 = vpop.permute.xlu0 %1765  ;;  %v6748_v49 = vpop.permute.xlu1 %1763 }
 0x27d   : > { %9272 = vst [vmem:[#allocation148_spill] sm:$0xff] %v6746_v20  ;;  %9273 = vst [vmem:[#allocation149_spill] sm:$0xff] %v6748_v49  ;;  %v2258_v20 = vmul.f32 %v2257_v22, %v6327_v54  ;;  %v2297_v49 = vstv %s5039_s11  ;;  %s5045_s11 = sld [smem:[#allocation2 + $0x4c]] }
 0x27e   : > { %2248 = vrot.lane.b32.xlu0 %v2240_v30, %s9116_s28  ;;  %2246 = vrot.lane.b32.xlu1 %v2239_v29, %s9116_s28  ;;  %v2278_v29 = vmul.f32 %v2277_v27, %v6327_v54  ;;  %v2298_v39 = vmul.f32 %v2297_v49, %v6327_v54 }
 0x280   : > { %v6754_v35 = vpop.permute.xlu0 %1786  ;;  %v6756_v25 = vpop.permute.xlu1 %1784  ;;  %v2304_v36 = vrot.slane %v2298_v39, 4 }
 0x281   : > { %9274 = vst [vmem:[#allocation150_spill] sm:$0xff] %v6754_v35  ;;  %9275 = vst [vmem:[#allocation151_spill] sm:$0xff] %v6756_v25  ;;  %v2299_v25 = vmul.f32 %v2297_v49, %v6320_v8  ;;  %v2300_v35 = vmul.f32 %v2297_v49, %v6348_v53 }
 0x282   : > { %2266 = vrot.lane.b32.xlu0 %v2259_v51, %s9116_s28  ;;  %2264 = vrot.lane.b32.xlu1 %v2258_v20, %s9116_s28  ;;  %v2318_v51 = vstv %s5040_s27  ;;  %v2280_v20 = vmul.f32 %v2277_v27, %v6348_v53  ;;  %s5047_s27 = sld [smem:[#allocation2 + $0x5a]] }
 0x283   : > { %v2320_v22 = vmul.f32 %v2318_v51, %v6320_v8  ;;  %v2321_v15 = vmul.f32 %v2318_v51, %v6348_v53  ;;  %v2319_v31 = vmul.f32 %v2318_v51, %v6327_v54  ;;  %v2305_v49 = vrot.slane %v2299_v25, 4 }
 0x284   : > { %v6762_v17 = vpop.permute.xlu0 %1809  ;;  %v6764_v30 = vpop.permute.xlu1 %1788  ;;  %v2307_v40 = vrot.slane %v2300_v35, 4 }
 0x285   : > { %9276 = vst [vmem:[#allocation152_spill] sm:$0xff] %v6762_v17  ;;  %9277 = vst [vmem:[#allocation153_spill] sm:$0xff] %v6764_v30  ;;  %v2326_v27 = vrot.slane %v2320_v22, 4  ;;  %v2325_v23 = vrot.slane %v2319_v31, 4  ;;  %v2306_v51 = vsel %vm440_vm9, %v2304_v36, %v2305_v49  ;;  %v2368_v22 = vstv %s5042_s8  ;;  %s5060_s8 = sld [smem:[#allocation2 + $0x6b]] }
 0x286   : > { %2284 = vrot.lane.b32.xlu0 %v2278_v29, %s9116_s28  ;;  %2268 = vrot.lane.b32.xlu1 %v2260_v19, %s9116_s28  ;;  %v2343_v19 = vstv %s5041_s30  ;;  %v2308_v28 = vsel %vm440_vm9, %v2305_v49, %v2307_v40  ;;  %s5048_s30 = sld [smem:[#allocation2 + $0x61]] }
 0x287   : > { %v2344_v35 = vmul.f32 %v2343_v19, %v6327_v54  ;;  %v2345_v39 = vmul.f32 %v2343_v19, %v6320_v8  ;;  %v2327_v40 = vsel %vm440_vm9, %v2325_v23, %v2326_v27  ;;  %v2389_v23 = vstv %s5043_s10  ;;  %s5059_s10 = sld [smem:[#allocation2 + $0x64]] }
 0x288   : > { %v6774_v17 = vpop.permute.xlu0 %1813  ;;  %v6776_v30 = vpop.permute.xlu1 %1811 }
 0x289   : > { %9278 = vst [vmem:[#allocation154_spill] sm:$0xff] %v6774_v17  ;;  %9279 = vst [vmem:[#allocation155_spill] sm:$0xff] %v6776_v30  ;;  %v2328_v17 = vrot.slane %v2321_v15, 4  ;;  %v2346_v15 = vmul.f32 %v2343_v19, %v6348_v53  ;;  %v2350_v36 = vrot.slane %v2344_v35, 4  ;;  %v2369_v19 = vmul.f32 %v2368_v22, %v6327_v54 }
 0x28a   : > { %2288 = vrot.lane.b32.xlu0 %v2280_v20, %s9116_s28  ;;  %2286 = vrot.lane.b32.xlu1 %v2279_v9, %s9116_s28  ;;  %v2351_v20 = vrot.slane %v2345_v39, 4  ;;  %v2390_v39 = vmul.f32 %v2389_v23, %v6327_v54 }
 0x28b   : > { %v2329_v31 = vsel %vm440_vm9, %v2326_v27, %v2328_v17 }
 0x28c   : > { %v6784_v29 = vpop.permute.xlu0 %1836  ;;  %v6786_v30 = vpop.permute.xlu1 %1834 }
 0x28d   : > { %9280 = vst [vmem:[#allocation156_spill] sm:$0xff] %v6784_v29  ;;  %9281 = vst [vmem:[#allocation157_spill] sm:$0xff] %v6786_v30  ;;  %v2392_v30 = vmul.f32 %v2389_v23, %v6348_v53 }
 0x28e   : > { %2311 = vrot.lane.b32.xlu0 %v2308_v28, %s9116_s28  ;;  %2309 = vrot.lane.b32.xlu1 %v2306_v51, %s9116_s28  ;;  %v2353_v51 = vrot.slane %v2346_v15, 4  ;;  %v2373_v15 = vrot.slane %v2369_v19, 5 }
 0x290   : > { %v6794_v9 = vpop.permute.xlu0 %1859  ;;  %v6796_v25 = vpop.permute.xlu1 %1838 }
 0x291   : > { %9282 = vst [vmem:[#allocation158_spill] sm:$0xff] %v6794_v9  ;;  %9283 = vst [vmem:[#allocation159_spill] sm:$0xff] %v6796_v25  ;;  %v2352_v25 = vsel %vm440_vm9, %v2350_v36, %v2351_v20  ;;  %v2370_v9 = vmul.f32 %v2368_v22, %v6320_v8  ;;  %v2391_v36 = vmul.f32 %v2389_v23, %v6320_v8 }
 0x292   : > { %2332 = vrot.lane.b32.xlu0 %v2329_v31, %s9116_s28  ;;  %2330 = vrot.lane.b32.xlu1 %v2327_v40, %s9116_s28  ;;  %v2354_v31 = vsel %vm440_vm9, %v2351_v20, %v2353_v51 }
 0x293   : > { %v2374_v40 = vrot.slane %v2370_v9, 5  ;;  %v2397_v20 = vrot.slane %v2391_v36, 1 }
 0x294   : > { %v6803_v28 = vpop.permute.xlu0 %1880  ;;  %v6805_v49 = vpop.permute.xlu1 %1861 }
 0x295   : > { %9284 = vst [vmem:[#allocation160_spill] sm:$0xff] %v6803_v28  ;;  %9285 = vst [vmem:[#allocation161_spill] sm:$0xff] %v6805_v49  ;;  %v2396_v49 = vrot.slane %v2390_v39, 1  ;;  %v2375_v29 = vsel %vm360_vm1, %v2373_v15, %v2374_v40 }
 0x296   : > { %2355 = vrot.lane.b32.xlu0 %v2352_v25, %s9116_s28  ;;  %2334 = vrot.lane.b32.xlu1 %v2328_v17, %s9116_s28  ;;  %v2410_v25 = vstv %s5044_s22  ;;  %s5062_s22 = sld [smem:[#allocation2 + $0x79]] }
 0x297   : > { %v2411_v9 = vmul.f32 %v2410_v25, %v6327_v54  ;;  %v2412_v19 = vmul.f32 %v2410_v25, %v6320_v8  ;;  %v2413_v39 = vmul.f32 %v2410_v25, %v6348_v53  ;;  %v2398_v23 = vsel %vm517_vm4, %v2396_v49, %v2397_v20 }
 0x298   : > { %v6812_v27 = vpop.permute.xlu0 %1884  ;;  %v6814_v35 = vpop.permute.xlu1 %1882 }
 0x299   : > { %9286 = vst [vmem:[#allocation162_spill] sm:$0xff] %v6812_v27  ;;  %9287 = vst [vmem:[#allocation163_spill] sm:$0xff] %v6814_v35  ;;  %v2418_v36 = vrot.slane %v2412_v19, 1  ;;  %v2435_v27 = vstv %s5045_s11  ;;  %v2420_v35 = vrot.slane %v2413_v39, 1  ;;  %s5061_s11 = sld [smem:[#allocation2 + $0x72]] }
 0x29a   : > { %2359 = vrot.lane.b32.xlu0 %v2353_v51, %s9116_s28  ;;  %2357 = vrot.lane.b32.xlu1 %v2354_v31, %s9116_s28  ;;  %v2438_v49 = vmul.f32 %v2435_v27, %v6348_v53 }
 0x29b   : > { %v2421_v39 = vsel %vm517_vm4, %v2418_v36, %v2420_v35 }
 0x29c   : > { %v6821_v22 = vpop.permute.xlu0 %1903  ;;  %v6823_v17 = vpop.permute.xlu1 %1901 }
 0x29d   : > { %9288 = vst [vmem:[#allocation164_spill] sm:$0xff] %v6821_v22  ;;  %9289 = vst [vmem:[#allocation165_spill] sm:$0xff] %v6823_v17  ;;  %v2399_v17 = vrot.slane %v2392_v30, 1  ;;  %v2417_v22 = vrot.slane %v2411_v9, 1  ;;  %v2436_v9 = vmul.f32 %v2435_v27, %v6327_v54 }
 0x29e   : > { %2378 = vrot.lane.b32.xlu0 %v2375_v29, %s9114_s17  ;;  %2376 = vrot.lane.b32.xlu1 %v2373_v15, %s9114_s17 }
 0x29f   : > { %v2419_v30 = vsel %vm517_vm4, %v2417_v22, %v2418_v36  ;;  %v2400_v25 = vsel %vm517_vm4, %v2397_v20, %v2399_v17  ;;  %v2445_v22 = vrot.slane %v2438_v49, 1 }
 0x2a0   : > { %v6831_v51 = vpop.permute.xlu0 %1926  ;;  %v6833_v31 = vpop.permute.xlu1 %1905 }
 0x2a1   : > { %9290 = vst [vmem:[#allocation166_spill] sm:$0xff] %v6831_v51  ;;  %9291 = vst [vmem:[#allocation167_spill] sm:$0xff] %v6833_v31  ;;  %v2437_v51 = vmul.f32 %v2435_v27, %v6320_v8  ;;  %v2506_v31 = vstv %s5048_s30  ;;  %s7033_s30 = sld [smem:[#allocation2 + $0x8e]] }
 0x2a2   : > { %2401 = vrot.lane.b32.xlu0 %v2398_v23, %s9114_s17  ;;  %2380 = vrot.lane.b32.xlu1 %v2374_v40, %s9114_s17  ;;  %v2460_v40 = vstv %s5046_s5  ;;  %s5064_s5 = sld [smem:[#allocation2 + $0x87]] }
 0x2a3   : > { %v2461_v17 = vmul.f32 %v2460_v40, %v6327_v54  ;;  %v2462_v20 = vmul.f32 %v2460_v40, %v6320_v8 }
 0x2a4   : > { %v6839_v29 = vpop.permute.xlu0 %1930  ;;  %v6841_v15 = vpop.permute.xlu1 %1928 }
 0x2a5   : > { %9292 = vst [vmem:[#allocation168_spill] sm:$0xff] %v6839_v29  ;;  %9293 = vst [vmem:[#allocation169_spill] sm:$0xff] %v6841_v15  ;;  %v2443_v15 = vrot.slane %v2437_v51, 1  ;;  %v2442_v29 = vrot.slane %v2436_v9, 1  ;;  %v2467_v49 = vrot.slane %v2461_v17, 1  ;;  %v2468_v9 = vrot.slane %v2462_v20, 1 }
 0x2a6   : > { %2422 = vrot.lane.b32.xlu0 %v2419_v30, %s9114_s17  ;;  %2403 = vrot.lane.b32.xlu1 %v2400_v25, %s9114_s17  ;;  %v2463_v25 = vmul.f32 %v2460_v40, %v6348_v53 }
 0x2a7   : > { %v2446_v51 = vsel %vm517_vm4, %v2443_v15, %v2445_v22  ;;  %v2444_v36 = vsel %vm517_vm4, %v2442_v29, %v2443_v15  ;;  %v2469_v40 = vsel %vm517_vm4, %v2467_v49, %v2468_v9 }
 0x2a8   : > { %v6850_v19 = vpop.permute.xlu0 %1953  ;;  %v6852_v23 = vpop.permute.xlu1 %1951 }
 0x2a9   : > { %9294 = vst [vmem:[#allocation170_spill] sm:$0xff] %v6850_v19  ;;  %9295 = vst [vmem:[#allocation171_spill] sm:$0xff] %v6852_v23  ;;  %v2485_v23 = vstv %s5047_s27  ;;  %s5063_s27 = sld [smem:[#allocation2 + $0x80]] }
 0x2aa   : > { %2426 = vrot.lane.b32.xlu0 %v2420_v35, %s9114_s17  ;;  %2424 = vrot.lane.b32.xlu1 %v2421_v39, %s9114_s17  ;;  %v2487_v19 = vmul.f32 %v2485_v23, %v6320_v8  ;;  %v2486_v29 = vmul.f32 %v2485_v23, %v6327_v54 }
 0x2ac   : > { %v6859_v27 = vpop.permute.xlu0 %1974  ;;  %v6861_v30 = vpop.permute.xlu1 %1972  ;;  %v2493_v20 = vrot.slane %v2487_v19, 5 }
 0x2ad   : > { %9296 = vst [vmem:[#allocation172_spill] sm:$0xff] %v6859_v27  ;;  %9297 = vst [vmem:[#allocation173_spill] sm:$0xff] %v6861_v30  ;;  %v2470_v30 = vrot.slane %v2463_v25, 1  ;;  %v2488_v27 = vmul.f32 %v2485_v23, %v6348_v53 }
 0x2ae   : > { %2449 = vrot.lane.b32.xlu0 %v2446_v51, %s9114_s17  ;;  %2447 = vrot.lane.b32.xlu1 %v2444_v36, %s9114_s17  ;;  %v2508_v51 = vmul.f32 %v2506_v31, %v6320_v8  ;;  %v2509_v36 = vmul.f32 %v2506_v31, %v6348_v53 }
 0x2af   : > { %v2471_v49 = vsel %vm517_vm4, %v2468_v9, %v2470_v30  ;;  %v2495_v25 = vrot.slane %v2488_v27, 5 }
 0x2b0   : > { %v6868_v35 = vpop.permute.xlu0 %1997  ;;  %v6870_v39 = vpop.permute.xlu1 %1976 }
 0x2b1   : > { %9298 = vst [vmem:[#allocation174_spill] sm:$0xff] %v6868_v35  ;;  %9299 = vst [vmem:[#allocation175_spill] sm:$0xff] %v6870_v39  ;;  %v2492_v35 = vrot.slane %v2486_v29, 5  ;;  %v2507_v39 = vmul.f32 %v2506_v31, %v6327_v54  ;;  %v2496_v19 = vsel %vm360_vm1, %v2493_v20, %v2495_v25 }
 0x2b2   : > { %2472 = vrot.lane.b32.xlu0 %v2469_v40, %s9114_s17  ;;  %2451 = vrot.lane.b32.xlu1 %v2445_v22, %s9114_s17  ;;  %v2514_v40 = vrot.slane %v2508_v51, 5 }
 0x2b3   : > { %v2513_v28 = vrot.slane %v2507_v39, 5 }
 0x2b4   : > { %v6878_v15 = vpop.permute.xlu0 %2001  ;;  %v6880_v17 = vpop.permute.xlu1 %1999 }
 0x2b5   : > { %9300 = vst [vmem:[#allocation176_spill] sm:$0xff] %v6878_v15  ;;  %9301 = vst [vmem:[#allocation177_spill] sm:$0xff] %v6880_v17  ;;  %v2494_v17 = vsel %vm360_vm1, %v2492_v35, %v2493_v20  ;;  %v2516_v15 = vrot.slane %v2509_v36, 5  ;;  %v2515_v29 = vsel %vm360_vm1, %v2513_v28, %v2514_v40  ;;  %v2615_v20 = vsel %vm360_vm1, 0.0, %v6650_v33 }
 0x2b6   : > { %2476 = vrot.lane.b32.xlu0 %v2470_v30, %s9114_s17  ;;  %2474 = vrot.lane.b32.xlu1 %v2471_v49, %s9114_s17  ;;  %v2593_v30 = vsel %vm360_vm1, 0.0, %v6618_v18  ;;  %v2616_v18 = vsel %vm517_vm4, %v2615_v20, 0.0  ;;  %v5512_v36 = vmov 0.0  }
 0x2b7   : > { %v2517_v9 = vsel %vm360_vm1, %v2514_v40, %v2516_v15  ;;  %v2594_v35 = vsel %vm517_vm4, %v2593_v30, 0.0 }
 0x2b8   : > { %v6888_v23 = vpop.permute.xlu0 %2024  ;;  %v6890_v22 = vpop.permute.xlu1 %2022 }
 0x2b9   : > { %9302 = vst [vmem:[#allocation178_spill] sm:$0xff] %v6888_v23  ;;  %9303 = vst [vmem:[#allocation179_spill] sm:$0xff] %v6890_v22  ;;  %v2710_v23 = vstv %s5064_s5  ;;  %s7066_s5 = sld [smem:[#allocation2 + $0x88]] }
 0x2ba   : > { %2499 = vrot.lane.b32.xlu0 %v2496_v19, %s9114_s17  ;;  %2497 = vrot.lane.b32.xlu1 %v2494_v17, %s9114_s17 }
 0x2bc   : > { %v6896_v31 = vpop.permute.xlu0 %2047  ;;  %v6898_v27 = vpop.permute.xlu1 %2026 }
 0x2bd   : > { %9304 = vst [vmem:[#allocation180_spill] sm:$0xff] %v6896_v31  ;;  %9305 = vst [vmem:[#allocation181_spill] sm:$0xff] %v6898_v27 }
 0x2be   : > { %2520 = vrot.lane.b32.xlu0 %v2517_v9, %s9114_s17  ;;  %2518 = vrot.lane.b32.xlu1 %v2515_v29, %s9114_s17 }
 0x2c0   : > { %v6907_v39 = vpop.permute.xlu0 %2064  ;;  %v6909_v17 = vpop.permute.xlu1 %2049 }
 0x2c1   : > { %9306 = vst [vmem:[#allocation182_spill] sm:$0xff] %v6907_v39  ;;  %9307 = vst [vmem:[#allocation183_spill] sm:$0xff] %v6909_v17 }
 0x2c2   : > { %2597 = vrot.lane.b32.xlu0 %v2594_v35, %s5505_s9  ;;  %2522 = vrot.lane.b32.xlu1 %v2516_v15, %s9114_s17 }
 0x2c4   : > { %v6916_v28 = vpop.permute.xlu0 %2068  ;;  %v6918_v51 = vpop.permute.xlu1 %2066 }
 0x2c5   : > { %9308 = vst [vmem:[#allocation184_spill] sm:$0xff] %v6916_v28  ;;  %9309 = vst [vmem:[#allocation185_spill] sm:$0xff] %v6918_v51 }
 0x2c6   : > { %2599 = vrot.lane.b32.xlu1 %v5512_v36, %s5505_s9  ;;  %2618 = vrot.lane.b32.xlu0 %v2616_v18, %s5505_s9 }
 0x2c8   : > { %v6922_v49 = vpop.permute.xlu0 %2091  ;;  %v6924_v25 = vpop.permute.xlu1 %2089 }
 0x2c9   : > { %9310 = vst [vmem:[#allocation186_spill] sm:$0xff] %v6922_v49  ;;  %9311 = vst [vmem:[#allocation187_spill] sm:$0xff] %v6924_v25 }
 0x2cc   : > { %v6926_v33 = vpop.permute.xlu0 %2114  ;;  %v6928_v40 = vpop.permute.xlu1 %2093 }
 0x2cd   : > { %9312 = vst [vmem:[#allocation188_spill] sm:$0xff] %v6926_v33  ;;  %9313 = vst [vmem:[#allocation189_spill] sm:$0xff] %v6928_v40 }
 0x2d0   : > { %v6930_v15 = vpop.permute.xlu0 %2118  ;;  %v6932_v19 = vpop.permute.xlu1 %2116 }
 0x2d1   : > { %9314 = vst [vmem:[#allocation190_spill] sm:$0xff] %v6930_v15  ;;  %9315 = vst [vmem:[#allocation191_spill] sm:$0xff] %v6932_v19 }
 0x2d4   : > { %v6934_v30 = vpop.permute.xlu0 %2141  ;;  %v6936_v9 = vpop.permute.xlu1 %2139 }
 0x2d5   : > { %9316 = vst [vmem:[#allocation192_spill] sm:$0xff] %v6934_v30  ;;  %9317 = vst [vmem:[#allocation193_spill] sm:$0xff] %v6936_v9 }
 0x2d8   : > { %v6938_v29 = vpop.permute.xlu0 %2162  ;;  %v6940_v35 = vpop.permute.xlu1 %2160 }
 0x2d9   : > { %9318 = vst [vmem:[#allocation194_spill] sm:$0xff] %v6938_v29  ;;  %9319 = vst [vmem:[#allocation195_spill] sm:$0xff] %v6940_v35  ;;  %v2736_v35 = vstv %s7038_s20  ;;  %s7079_s20 = sld [smem:[#allocation2 + $0x66]] }
 0x2dc   : > { %v6942_v20 = vpop.permute.xlu0 %2185  ;;  %v6944_v18 = vpop.permute.xlu1 %2164 }
 0x2dd   : > { %9320 = vst [vmem:[#allocation196_spill] sm:$0xff] %v6942_v20  ;;  %9321 = vst [vmem:[#allocation197_spill] sm:$0xff] %v6944_v18 }
 0x2e0   : > { %v6946_v36 = vpop.permute.xlu0 %2189  ;;  %v6948_v33 = vpop.permute.xlu1 %2187 }
 0x2e1   : > { %9322 = vst [vmem:[#allocation198_spill] sm:$0xff] %v6946_v36  ;;  %9323 = vst [vmem:[#allocation199_spill] sm:$0xff] %v6948_v33 }
 0x2e4   : > { %v6950_v40 = vpop.permute.xlu0 %2212  ;;  %v6952_v15 = vpop.permute.xlu1 %2210 }
 0x2e5   : > { %9324 = vst [vmem:[#allocation200_spill] sm:$0xff] %v6950_v40  ;;  %9325 = vst [vmem:[#allocation201_spill] sm:$0xff] %v6952_v15 }
 0x2e8   : > { %v6954_v19 = vpop.permute.xlu0 %2228  ;;  %v6956_v30 = vpop.permute.xlu1 %2214 }
 0x2e9   : > { %9326 = vst [vmem:[#allocation202_spill] sm:$0xff] %v6954_v19  ;;  %9327 = vst [vmem:[#allocation203_spill] sm:$0xff] %v6956_v30 }
 0x2ec   : > { %v6958_v9 = vpop.permute.xlu0 %2244  ;;  %v6960_v25 = vpop.permute.xlu1 %2230 }
 0x2ed   : > { %9328 = vst [vmem:[#allocation204_spill] sm:$0xff] %v6958_v9  ;;  %9329 = vst [vmem:[#allocation205_spill] sm:$0xff] %v6960_v25 }
 0x2f0   : > { %v6962_v49 = vpop.permute.xlu0 %2248  ;;  %v6964_v20 = vpop.permute.xlu1 %2246 }
 0x2f1   : > { %9330 = vst [vmem:[#allocation206_spill] sm:$0xff] %v6962_v49  ;;  %9331 = vst [vmem:[#allocation207_spill] sm:$0xff] %v6964_v20 }
 0x2f4   : > { %v6966_v17 = vpop.permute.xlu0 %2266  ;;  %v6968_v36 = vpop.permute.xlu1 %2264 }
 0x2f5   : > { %9332 = vst [vmem:[#allocation208_spill] sm:$0xff] %v6966_v17  ;;  %9333 = vst [vmem:[#allocation209_spill] sm:$0xff] %v6968_v36 }
 0x2f8   : > { %v6970_v33 = vpop.permute.xlu0 %2284  ;;  %v6972_v40 = vpop.permute.xlu1 %2268 }
 0x2f9   : > { %9334 = vst [vmem:[#allocation210_spill] sm:$0xff] %v6970_v33  ;;  %9335 = vst [vmem:[#allocation211_spill] sm:$0xff] %v6972_v40 }
 0x2fc   : > { %v6974_v15 = vpop.permute.xlu0 %2288  ;;  %v6976_v19 = vpop.permute.xlu1 %2286 }
 0x2fd   : > { %9336 = vst [vmem:[#allocation212_spill] sm:$0xff] %v6974_v15  ;;  %9337 = vst [vmem:[#allocation213_spill] sm:$0xff] %v6976_v19 }
 0x300   : > { %v6978_v30 = vpop.permute.xlu0 %2311  ;;  %v6980_v27 = vpop.permute.xlu1 %2309 }
 0x301   : > { %9338 = vst [vmem:[#allocation214_spill] sm:$0xff] %v6978_v30  ;;  %9339 = vst [vmem:[#allocation215_spill] sm:$0xff] %v6980_v27 }
 0x304   : > { %v6982_v25 = vpop.permute.xlu0 %2332  ;;  %v6984_v31 = vpop.permute.xlu1 %2330 }
 0x305   : > { %9340 = vst [vmem:[#allocation216_spill] sm:$0xff] %v6982_v25  ;;  %9341 = vst [vmem:[#allocation217_spill] sm:$0xff] %v6984_v31 }
 0x308   : > { %v6986_v22 = vpop.permute.xlu0 %2355  ;;  %v6988_v17 = vpop.permute.xlu1 %2334 }
 0x309   : > { %9342 = vst [vmem:[#allocation218_spill] sm:$0xff] %v6986_v22  ;;  %9343 = vst [vmem:[#allocation219_spill] sm:$0xff] %v6988_v17 }
 0x30c   : > { %v6990_v36 = vpop.permute.xlu0 %2359  ;;  %v6992_v33 = vpop.permute.xlu1 %2357 }
 0x30d   : > { %9344 = vst [vmem:[#allocation220_spill] sm:$0xff] %v6990_v36  ;;  %9345 = vst [vmem:[#allocation221_spill] sm:$0xff] %v6992_v33 }
 0x310   : > { %v6994_v40 = vpop.permute.xlu0 %2378  ;;  %v6996_v15 = vpop.permute.xlu1 %2376 }
 0x311   : > { %9346 = vst [vmem:[#allocation222_spill] sm:$0xff] %v6994_v40  ;;  %9347 = vst [vmem:[#allocation223_spill] sm:$0xff] %v6996_v15 }
 0x314   : > { %v6998_v19 = vpop.permute.xlu0 %2401  ;;  %v7000_v30 = vpop.permute.xlu1 %2380 }
 0x315   : > { %9348 = vst [vmem:[#allocation224_spill] sm:$0xff] %v6998_v19  ;;  %9349 = vst [vmem:[#allocation225_spill] sm:$0xff] %v7000_v30 }
 0x318   : > { %v7002_v27 = vpop.permute.xlu0 %2422  ;;  %v7004_v25 = vpop.permute.xlu1 %2403 }
 0x319   : > { %9350 = vst [vmem:[#allocation226_spill] sm:$0xff] %v7002_v27  ;;  %9351 = vst [vmem:[#allocation227_spill] sm:$0xff] %v7004_v25 }
 0x31c   : > { %v7006_v31 = vpop.permute.xlu0 %2426  ;;  %v7008_v22 = vpop.permute.xlu1 %2424 }
 0x31d   : > { %9352 = vst [vmem:[#allocation228_spill] sm:$0xff] %v7006_v31  ;;  %9353 = vst [vmem:[#allocation229_spill] sm:$0xff] %v7008_v22  ;;  %v2692_v22 = vstv %s5062_s22  ;;  %s7058_s22 = sld [smem:[#allocation2 + $0x7a]] }
 0x320   : > { %v7010_v17 = vpop.permute.xlu0 %2449  ;;  %v7012_v36 = vpop.permute.xlu1 %2447 }
 0x321   : > { %9354 = vst [vmem:[#allocation230_spill] sm:$0xff] %v7010_v17  ;;  %9355 = vst [vmem:[#allocation231_spill] sm:$0xff] %v7012_v36  ;;  %v2665_v36 = vstv %s5059_s10  ;;  %s7050_s10 = sld [smem:[#allocation2 + $0x73]] }
 0x324   : > { %v7014_v33 = vpop.permute.xlu0 %2472  ;;  %v7016_v40 = vpop.permute.xlu1 %2451 }
 0x325   : > { %9356 = vst [vmem:[#allocation232_spill] sm:$0xff] %v7014_v33  ;;  %9357 = vst [vmem:[#allocation233_spill] sm:$0xff] %v7016_v40 }
 0x328   : > { %v7018_v15 = vpop.permute.xlu0 %2476  ;;  %v7020_v19 = vpop.permute.xlu1 %2474 }
 0x329   : > { %9358 = vst [vmem:[#allocation234_spill] sm:$0xff] %v7018_v15  ;;  %9359 = vst [vmem:[#allocation235_spill] sm:$0xff] %v7020_v19  ;;  %v2674_v15 = vstv %s5060_s8  ;;  %s7045_s8 = sld [smem:[#allocation2 + $0x6c]] }
 0x32c   : > { %v7022_v30 = vpop.permute.xlu0 %2499  ;;  %v7024_v25 = vpop.permute.xlu1 %2497 }
 0x32d   : > { %9360 = vst [vmem:[#allocation236_spill] sm:$0xff] %v7022_v30  ;;  %9361 = vst [vmem:[#allocation237_spill] sm:$0xff] %v7024_v25  ;;  %v2683_v25 = vstv %s5061_s11  ;;  %s7062_s11 = sld [smem:[#allocation2 + $0x81]] }
 0x330   : > { %v7026_v31 = vpop.permute.xlu0 %2520  ;;  %v7028_v17 = vpop.permute.xlu1 %2518 }
 0x331   : > { %9362 = vst [vmem:[#allocation238_spill] sm:$0xff] %v7026_v31  ;;  %9363 = vst [vmem:[#allocation239_spill] sm:$0xff] %v7028_v17 }
 0x334   : > { %v2598_v33 = vpop.permute.xlu0 %2597  ;;  %v7030_v40 = vpop.permute.xlu1 %2522 }
 0x335   : > { %9364 = vst [vmem:[#allocation240_spill] sm:$0xff] %v7030_v40  ;;  %v2603_v19 = vsel %vm379_vm2, 0.0, %v2598_v33 }
 0x336   : > { %v7036_v30 = vsel %vm383_vm3, %v2603_v19, 0.0 }
 0x337   : > { %v2675_v17 = vmul.f32 %v2674_v15, %v7036_v30  ;;  %v2666_v31 = vmul.f32 %v2665_v36, %v7036_v30  ;;  %v2693_v40 = vmul.f32 %v2692_v22, %v7036_v30  ;;  %v2684_v9 = vmul.f32 %v2683_v25, %v7036_v30 }
 0x338   : > { %v2600_v27 = vpop.permute.xlu1 %2599  ;;  %v2701_v15 = vstv %s5063_s27  ;;  %v2723_v36 = vstv %s7033_s30  ;;  %s7069_s27 = sld [smem:[#allocation2 + $0x8f]] }
 0x339   : > { %v2604_v33 = vsel %vm379_vm2, 0.0, %v2600_v27  ;;  %v2677_v49 = vrot.slane %v2675_v17, 1  ;;  %v2668_v20 = vrot.slane %v2666_v31, 5  ;;  %v2711_v27 = vmul.f32 %v2710_v23, %v7036_v30  ;;  %s5074_s30 = sld [smem:[#allocation2 + $0x6d]] }
 0x33a   : > { %v7048_v19 = vsel %vm383_vm3, %v2604_v33, 0.0  ;;  %v2695_v31 = vrot.slane %v2693_v40, 1  ;;  %v2686_v17 = vrot.slane %v2684_v9, 1  ;;  %v2702_v25 = vmul.f32 %v2701_v15, %v7036_v30 }
 0x33b   : > { %2678 = vrot.lane.b32.xlu0 %v2677_v49, %s5506_s6  ;;  %2669 = vrot.lane.b32.xlu1 %v2668_v20, %s5506_s6  ;;  %v2712_v22 = vmul.f32 %v2710_v23, %v7048_v19  ;;  %v2725_v18 = vmul.f32 %v2723_v36, %v7048_v19  ;;  %v2715_v23 = vrot.slane %v2711_v27, 5  ;;  %v2724_v49 = vmul.f32 %v2723_v36, %v7036_v30 }
 0x33c   : > { %v2704_v40 = vrot.slane %v2702_v25, 1  ;;  %v2737_v9 = vmul.f32 %v2736_v35, %v7036_v30  ;;  %v2763_v25 = vstv %s7058_s22  ;;  %s7098_s22 = sld [smem:[#allocation2 + $0x89]] }
 0x33d   : > { %v2716_v33 = vrot.slane %v2712_v22, 5  ;;  %v2729_v15 = vrot.slane %v2725_v18, 5  ;;  %v2745_v22 = vstv %s7045_s8  ;;  %v2728_v27 = vrot.slane %v2724_v49, 5  ;;  %s7090_s8 = sld [smem:[#allocation2 + $0x74]] }
 0x33e   : > { %v2746_v36 = vmul.f32 %v2745_v22, %v7036_v30  ;;  %v2772_v18 = vstv %s7062_s11  ;;  %s5077_s11 = sld [smem:[#allocation2 + $0x82]] }
 0x33f   : > { %2696 = vrot.lane.b32.xlu0 %v2695_v31, %s5506_s6  ;;  %2687 = vrot.lane.b32.xlu1 %v2686_v17, %s5506_s6  ;;  %v2717_v20 = vsel %vm360_vm1, %v2715_v23, %v2716_v33  ;;  %v2754_v31 = vstv %s7050_s10  ;;  %v2739_v17 = vrot.slane %v2737_v9, 6  ;;  %v2730_v35 = vsel %vm360_vm1, %v2728_v27, %v2729_v15  ;;  %s5076_s10 = sld [smem:[#allocation2 + $0x7b]] }
 0x340   : > { %v2755_v29 = vmul.f32 %v2754_v31, %v7036_v30  ;;  %v2781_v33 = vstv %s7066_s5  ;;  %v2794_v23 = vstv %s7069_s27  ;;  %v2764_v9 = vmul.f32 %v2763_v25, %v7036_v30  ;;  %s5079_s5 = sld [smem:[#allocation2 + $0x90]] }
 0x341   : > { %v2783_v15 = vmul.f32 %v2781_v33, %v7048_v19  ;;  %v2796_v22 = vmul.f32 %v2794_v23, %v7048_v19  ;;  %v2782_v31 = vmul.f32 %v2781_v33, %v7036_v30  ;;  %v2807_v25 = vstv %s7079_s20  ;;  %s5080_s27 = sld [smem:[#allocation2 + $0x67]] }
 0x342   : > { %v2757_v49 = vrot.slane %v2755_v29, 2  ;;  %v2795_v29 = vmul.f32 %v2794_v23, %v7036_v30  ;;  %v2766_v27 = vrot.slane %v2764_v9, 2  ;;  %v2808_v33 = vmul.f32 %v2807_v25, %v7036_v30  ;;  %s7117_s20 = sld [smem:[#allocation2 + $0x6e]] }
 0x343   : > { %2705 = vrot.lane.b32.xlu1 %v2704_v40, %s5506_s6  ;;  %2718 = vrot.lane.b32.xlu0 %v2717_v20, %s5506_s6  ;;  %v2748_v40 = vrot.slane %v2746_v36, 6  ;;  %v2773_v20 = vmul.f32 %v2772_v18, %v7036_v30  ;;  %v2787_v36 = vrot.slane %v2783_v15, 2  ;;  %v2816_v18 = vstv %s5074_s30  ;;  %s5082_s30 = sld [smem:[#allocation2 + $0x75]] }
 0x344   : > { %v2817_v23 = vmul.f32 %v2816_v18, %v7036_v30  ;;  %v2825_v15 = vstv %s7090_s8  ;;  %v2810_v28 = vrot.slane %v2808_v33, 7  ;;  %v2843_v25 = vstv %s5077_s11  ;;  %s5084_s8 = sld [smem:[#allocation2 + $0x83]] }
 0x345   : > { %s5083_s11 = sld [smem:[#allocation2 + $0x7c]] }
 0x346   : > { %v2865_v33 = vstv %s5079_s5  ;;  %s7130_s5 = sld [smem:[#allocation2 + $0x68]] }
 0x347   : > { %2731 = vrot.lane.b32.xlu1 %v2730_v35, %s5506_s6  ;;  %2740 = vrot.lane.b32.xlu0 %v2739_v17, %s9108_s23  ;;  %v2775_v17 = vrot.slane %v2773_v20, 2  ;;  %v2800_v35 = vrot.slane %v2796_v22, 6  ;;  %v2834_v22 = vstv %s5076_s10  ;;  %s7124_s10 = sld [smem:[#allocation2 + $0x8a]] }
 0x34b   : > { %2749 = vrot.lane.b32.xlu1 %v2748_v40, %s9108_s23  ;;  %2758 = vrot.lane.b32.xlu0 %v2757_v49, %s9108_s23  ;;  %v2786_v40 = vrot.slane %v2782_v31, 2  ;;  %v2799_v49 = vrot.slane %v2795_v29, 6  ;;  %v2826_v31 = vmul.f32 %v2825_v15, %v7036_v30  ;;  %v2835_v29 = vmul.f32 %v2834_v22, %v7036_v30 }
 0x34d   : > { %v2788_v9 = vsel %vm707_vm6, %v2786_v40, %v2787_v36  ;;  %v2801_v20 = vsel %vm658_vm5, %v2799_v49, %v2800_v35  ;;  %v2828_v35 = vrot.slane %v2826_v31, 7  ;;  %v2837_v40 = vrot.slane %v2835_v29, 3 }
 0x34e   : > { %v2844_v49 = vmul.f32 %v2843_v25, %v7036_v30 }
 0x34f   : > { %2767 = vrot.lane.b32.xlu1 %v2766_v27, %s9108_s23  ;;  %2776 = vrot.lane.b32.xlu0 %v2775_v17, %s9108_s23  ;;  %v2852_v27 = vstv %s7098_s22  ;;  %v2819_v17 = vrot.slane %v2817_v23, 7  ;;  %s5086_s22 = sld [smem:[#allocation2 + $0x91]] }
 0x350   : > { %v2854_v18 = vmul.f32 %v2852_v27, %v7048_v19  ;;  %v2853_v36 = vmul.f32 %v2852_v27, %v7036_v30  ;;  %v2846_v15 = vrot.slane %v2844_v49, 3 }
 0x352   : > { %v2858_v23 = vrot.slane %v2854_v18, 3  ;;  %v2886_v18 = vstv %s7117_s20  ;;  %s7146_s20 = sld [smem:[#allocation2 + $0x7d]] }
 0x353   : > { %2789 = vrot.lane.b32.xlu1 %v2788_v9, %s9108_s23  ;;  %2802 = vrot.lane.b32.xlu0 %v2801_v20, %s9108_s23  ;;  %v2867_v9 = vmul.f32 %v2865_v33, %v7048_v19  ;;  %v2866_v20 = vmul.f32 %v2865_v33, %v7036_v30  ;;  %s7134_s23 = sld [smem:[#allocation2 + $0x6f]]  ;;  %v2887_v49 = vmul.f32 %v2886_v18, %v7036_v30  ;;  %v2945_v18 = vstv %s7130_s5 }
 0x354   : > { %s7189_s5 = sld [smem:[#allocation2 + $0x7e]] }
 0x355   : > { %v2871_v27 = vrot.slane %v2867_v9, 3  ;;  %v2870_v31 = vrot.slane %v2866_v20, 3  ;;  %v2932_v9 = vstv %s5086_s22  ;;  %s7176_s22 = sld [smem:[#allocation2 + $0x70]] }
 0x357   : > { %2811 = vrot.lane.b32.xlu1 %v2810_v28, %s5508_s7  ;;  %2820 = vrot.lane.b32.xlu0 %v2819_v17, %s5508_s7  ;;  %v2857_v28 = vrot.slane %v2853_v36, 3  ;;  %v2878_v17 = vstv %s5080_s27  ;;  %v2872_v25 = vsel %vm897_vm8, %v2870_v31, %v2871_v27  ;;  %v2894_v36 = vstv %s5082_s30  ;;  %s7142_s27 = sld [smem:[#allocation2 + $0x76]] }
 0x358   : > { %v2879_v29 = vmul.f32 %v2878_v17, %v7036_v30  ;;  %v2895_v33 = vmul.f32 %v2894_v36, %v7036_v30  ;;  %v2933_v27 = vmul.f32 %v2932_v9, %v7036_v30  ;;  %s7152_s30 = sld [smem:[#allocation2 + $0x8b]] }
 0x359   : > { %v2859_v22 = vsel %vm897_vm8, %v2857_v28, %v2858_v23  ;;  %v2902_v28 = vstv %s5083_s11  ;;  %v2954_v36 = vstv %s7134_s23  ;;  %s7169_s23 = sld [smem:[#allocation2 + $0x69]] }
 0x35a   : > { %v2903_v17 = vmul.f32 %v2902_v28, %v7036_v30  ;;  %s7180_s11 = sld [smem:[#allocation2 + $0x77]] }
 0x35b   : > { %2829 = vrot.lane.b32.xlu1 %v2828_v35, %s5508_s7  ;;  %2838 = vrot.lane.b32.xlu0 %v2837_v40, %s5508_s7  ;;  %v2910_v35 = vstv %s5084_s8  ;;  %v2919_v40 = vstv %s7124_s10  ;;  %s7157_s8 = sld [smem:[#allocation2 + $0x84]] }
 0x35c   : > { %v2911_v23 = vmul.f32 %v2910_v35, %v7036_v30  ;;  %v2921_v20 = vmul.f32 %v2919_v40, %v7048_v19  ;;  %v3590_v35 = vlaneseq  ;;  %s7163_s10 = sld [smem:[#allocation2 + $0x92]] }
 0x35e   : > { %v2913_v31 = vrot.slane %v2911_v23, 4  ;;  %v2955_v23 = vmul.f32 %v2954_v36, %v7036_v30 }
 0x35f   : > { %2847 = vrot.lane.b32.xlu1 %v2846_v15, %s5508_s7  ;;  %2860 = vrot.lane.b32.xlu0 %v2859_v22, %s5508_s7  ;;  %v2934_v15 = vmul.f32 %v2932_v9, %v7048_v19  ;;  %v2920_v22 = vmul.f32 %v2919_v40, %v7036_v30 }
 0x360   : > { %v3034_v52 = vstv %s7180_s11  ;;  %s7261_s11 = sld [smem:[#allocation2 + $0xb8]] }
 0x361   : > { %v2924_v40 = vrot.slane %v2920_v22, 4  ;;  %v3591_v22 = vand.u32 127, %v3590_v35 }
 0x363   : > { %2873 = vrot.lane.b32.xlu1 %v2872_v25, %s5508_s7  ;;  %2881 = vrot.lane.b32.xlu0 %v2879_v29, %s5509_s4  ;;  %v2925_v29 = vrot.slane %v2921_v20, 4  ;;  %v2938_v25 = vrot.slane %v2934_v15, 4  ;;  %v2963_v20 = vstv %s7142_s27  ;;  %v2972_v15 = vstv %s7146_s20  ;;  %s7193_s27 = sld [smem:[#allocation2 + $0x85]] }
 0x364   : > { %v2973_v36 = vmul.f32 %v2972_v15, %v7036_v30  ;;  %s7204_s20 = sld [smem:[#allocation2 + $0x8c]] }
 0x365   : > { %v2926_v9 = vsel %vm440_vm9, %v2924_v40, %v2925_v29  ;;  %v2981_v29 = vstv %s7157_s8  ;;  %v7182_v40 = vshrl.u32 %v3590_v35, 7  ;;  %v3016_v35 = vstv %s7169_s23  ;;  %s7242_s8 = sld [smem:[#allocation2 + $0x95]] }
 0x366   : > { %s7253_s23 = sld [smem:[#allocation2 + $0xa3]] }
 0x367   : > { %2889 = vrot.lane.b32.xlu1 %v2887_v49, %s5509_s4  ;;  %2897 = vrot.lane.b32.xlu0 %v2895_v33, %s5509_s4  ;;  %v2937_v49 = vrot.slane %v2933_v27, 4  ;;  %v2946_v33 = vmul.f32 %v2945_v18, %v7036_v30  ;;  %v2990_v27 = vstv %s7152_s30  ;;  %v2964_v18 = vmul.f32 %v2963_v20, %v7036_v30  ;;  %9365 = vst [vmem:[#allocation241_spill] sm:$0xff] %v7182_v40  ;;  %s7230_s30 = sld [smem:[#allocation2 + $0x93]] }
 0x368   : > { %v3003_v20 = vstv %s7163_s10  ;;  %s7248_s10 = sld [smem:[#allocation2 + $0x9c]] }
 0x369   : > { %v2939_v28 = vsel %vm440_vm9, %v2937_v49, %v2938_v25  ;;  %v2992_v25 = vmul.f32 %v2990_v27, %v7048_v19  ;;  %v3596_v49 = vadd.s32 4294967288, %v3591_v22  ;;  %v3005_v51 = vmul.f32 %v3003_v20, %v7048_v19 }
 0x36b   : > { %2905 = vrot.lane.b32.xlu1 %v2903_v17, %s5509_s4  ;;  %2914 = vrot.lane.b32.xlu0 %v2913_v31, %s5509_s4  ;;  %v2948_v17 = vrot.slane %v2946_v33, 5  ;;  %v2957_v31 = vrot.slane %v2955_v23, 1  ;;  %v2991_v33 = vmul.f32 %v2990_v27, %v7036_v30  ;;  %v2966_v23 = vrot.slane %v2964_v18, 1 }
 0x36c   : > { %v2996_v15 = vrot.slane %v2992_v25, 5  ;;  %v7199_v27 = vsub.s32 %v3596_v49, %v7182_v40  ;;  %v3004_v18 = vmul.f32 %v3003_v20, %v7036_v30  ;;  %v3017_v25 = vmul.f32 %v3016_v35, %v7036_v30 }
 0x36d   : > { %v3009_v39 = vrot.slane %v3005_v51, 5  ;;  %v3025_v49 = vstv %s7176_s22  ;;  %v3043_v35 = vstv %s7189_s5  ;;  %s7257_s22 = sld [smem:[#allocation2 + $0xb1]] }
 0x36e   : > { %v3019_v20 = vrot.slane %v3017_v25, 6  ;;  %s7267_s5 = sld [smem:[#allocation2 + $0xbf]] }
 0x36f   : > { %2927 = vrot.lane.b32.xlu1 %v2926_v9, %s5509_s4  ;;  %2940 = vrot.lane.b32.xlu0 %v2939_v28, %s5509_s4  ;;  %v2975_v9 = vrot.slane %v2973_v36, 1  ;;  %v2982_v28 = vmul.f32 %v2981_v29, %v7036_v30 }
 0x371   : > { %v2984_v29 = vrot.slane %v2982_v28, 1  ;;  %v3008_v28 = vrot.slane %v3004_v18, 5 }
 0x373   : > { %2949 = vrot.lane.b32.xlu1 %v2948_v17, %s9116_s28  ;;  %2958 = vrot.lane.b32.xlu0 %v2957_v31, %s9116_s28  ;;  %v7196_v17 = vsub.s32 %v3591_v22, %v7182_v40  ;;  %v2995_v31 = vrot.slane %v2991_v33, 5  ;;  %v3610_v33 = vrot.slane %v5733_v58, %v7199_v27 }
 0x375   : > { %v3606_v36 = vrot.slane %v5729_v56, %v7196_v17  ;;  %v2997_v22 = vsel %vm360_vm1, %v2995_v31, %v2996_v15  ;;  %v3619_v56 = vrot.slane %v5737_v60, %v7199_v27  ;;  %v3615_v51 = vrot.slane %v5739_v61, %v7196_v17 }
 0x376   : > { %v3624_v58 = vrot.slane %v5743_v63, %v7196_v17  ;;  %v3026_v60 = vmul.f32 %v3025_v49, %v7036_v30  ;;  %v3035_v15 = vmul.f32 %v3034_v52, %v7036_v30  ;;  %v3010_v61 = vsel %vm360_vm1, %v3008_v28, %v3009_v39 }
 0x377   : > { %2967 = vrot.lane.b32.xlu1 %v2966_v23, %s9116_s28  ;;  %2976 = vrot.lane.b32.xlu0 %v2975_v9, %s9116_s28  ;;  %v3600_v23 = vrot.slane %v5735_v59, %v7199_v27  ;;  %v3628_v9 = vrot.slane %v5741_v62, %v7199_v27  ;;  %v3595_v59 = vrot.slane %v5731_v57, %v7196_v17  ;;  %v3052_v31 = vstv %s7193_s27  ;;  %s7271_s27 = sld [smem:[#allocation2 + $0xaa]] }
 0x378   : > { %v3611_v62 = vsel %vm3601_vm13, %v3610_v33, %v3606_v36  ;;  %v3620_v57 = vsel %vm3601_vm13, %v3619_v56, %v3615_v51  ;;  %v3028_v52 = vrot.slane %v3026_v60, 6  ;;  %v3037_v25 = vrot.slane %v3035_v15, 2 }
 0x379   : > { %v3602_v63 = vsel %vm3601_vm13, %v3600_v23, %v3595_v59  ;;  %v3629_v18 = vsel %vm3601_vm13, %v3628_v9, %v3624_v58  ;;  %v3044_v39 = vmul.f32 %v3043_v35, %v7036_v30  ;;  %v3053_v36 = vmul.f32 %v3052_v31, %v7036_v30  ;;  %v2619_v23 = vpop.permute.xlu0 %2618 }
 0x37a   : > { %v3074_v28 = vstv %s7230_s30  ;;  %v2621_v60 = vsel %vm379_vm2, 0.0, %v2619_v23  ;;  %v3144_v31 = vstv %s7242_s8  ;;  %s7286_s30 = sld [smem:[#allocation2 + $0x9d]]  ;;  %v347_v23 = vmul.f32 0.0625, %v5751_v3 }
 0x37b   : > { %2985 = vrot.lane.b32.xlu1 %v2984_v29, %s9116_s28  ;;  %2998 = vrot.lane.b32.xlu0 %v2997_v22, %s9116_s28  ;;  %v3061_v29 = vstv %s7204_s20  ;;  %v3630_v22 = vsel %vm2586_vm10, %v3611_v62, %v3602_v63  ;;  %v3046_v9 = vrot.slane %v3044_v39, 2  ;;  %v3055_v58 = vrot.slane %v3053_v36, 2  ;;  %s7281_s20 = sld [smem:[#allocation2 + $0x96]] }
 0x37c   : > { %v3063_v49 = vmul.f32 %v3061_v29, %v7048_v19  ;;  %v3631_v33 = vsel %vm2588_vm11, %v3620_v57, %v3630_v22  ;;  %v3062_v51 = vmul.f32 %v3061_v29, %v7036_v30  ;;  %v3075_v35 = vmul.f32 %v3074_v28, %v7036_v30  ;;  %s7305_s8 = sld [smem:[#allocation2 + $0xa4]] }
 0x37d   : > { %v3632_v56 = vsel %vm2590_vm12, %v3629_v18, %v3631_v33  ;;  %v7274_v62 = vsel %vm383_vm3, %v2621_v60, 0.0  ;;  %v3160_v39 = vstv %s7253_s23  ;;  %v3176_v36 = vstv %s7257_s22  ;;  %s7326_s23 = sld [smem:[#allocation2 + $0xb2]] }
 0x37e   : > { %v3067_v59 = vrot.slane %v3063_v49, 2  ;;  %v3634_v15 = vsel %vm360_vm1, 0.0, %v3632_v56  ;;  %v3145_v29 = vmul.f32 %v3144_v31, %v7274_v62  ;;  %v346_v22 = vmul.f32 0.0625, %v5745_v0  ;;  %s7329_s22 = sld [smem:[#allocation2 + $0xb9]] }
 0x37f   : > { %3011 = vrot.lane.b32.xlu1 %v3010_v61, %s9116_s28  ;;  %3020 = vrot.lane.b32.xlu0 %v3019_v20, %s9114_s17  ;;  %v3076_v20 = vmul.f32 %v3074_v28, %v7048_v19  ;;  %v3066_v61 = vrot.slane %v3062_v51, 2  ;;  %v3635_v63 = vsel %vm517_vm4, %v3634_v15, 0.0  ;;  %v345_v49 = vmul.f32 0.0625, %v5747_v1 }
 0x380   : > { %v348_v33 = vmul.f32 0.0625, %v5749_v2  ;;  %v350_v56 = vmul.f32 0.0625, %v5753_v4  ;;  %v349_v51 = vmul.f32 0.0625, %v5755_v5  ;;  %v3161_v28 = vmul.f32 %v3160_v39, %v7274_v62 }
 0x381   : > { %v3068_v57 = vsel %vm707_vm6, %v3066_v61, %v3067_v59  ;;  %v3080_v18 = vrot.slane %v3076_v20, 6  ;;  %v3177_v1 = vmul.f32 %v3176_v36, %v7274_v62  ;;  %v3198_v2 = vstv %s7267_s5  ;;  %s7349_s5 = sld [smem:[#allocation2 + $0x97]] }
 0x382   : > { %v352_v3 = vmul.f32 0.0625, %v5757_v6  ;;  %v351_v4 = vmul.f32 0.0625, %v5759_v7  ;;  %v3168_v59 = vstv %s7271_s27  ;;  %v3657_v5 = vrot.slane %v346_v22, %v7199_v27  ;;  %s7353_s27 = sld [smem:[#allocation2 + $0x9e]] }
 0x383   : > { %3029 = vrot.lane.b32.xlu1 %v3028_v52, %s9114_s17  ;;  %3038 = vrot.lane.b32.xlu0 %v3037_v25, %s9114_s17  ;;  %v3079_v52 = vrot.slane %v3075_v35, 6  ;;  %v3152_v25 = vstv %s7248_s10  ;;  %v3653_v20 = vrot.slane %v345_v49, %v7196_v17  ;;  %v3666_v60 = vrot.slane %v348_v33, %v7199_v27  ;;  %s7320_s10 = sld [smem:[#allocation2 + $0xab]] }
 0x384   : > { %v3153_v0 = vmul.f32 %v3152_v25, %v7274_v62  ;;  %v3662_v15 = vrot.slane %v347_v23, %v7196_v17  ;;  %v3199_v6 = vmul.f32 %v3198_v2, %v7274_v62  ;;  %v3200_v7 = vmul.f32 %v3198_v2, %v7048_v19 }
 0x385   : > { %v3675_v31 = vrot.slane %v350_v56, %v7199_v27  ;;  %v3211_v25 = vstv %s7281_s20  ;;  %v3220_v39 = vstv %s7286_s30  ;;  %s9366_s20 = smov 126   ;;  %s7362_s30 = sld [smem:[#allocation2 + $0xa5]] }
 0x386   : > { %v3667_v36 = vsel %vm3601_vm13, %v3666_v60, %v3662_v15  ;;  %v3203_v33 = vrot.slane %v3199_v6, 4  ;;  %v3204_v23 = vrot.slane %v3200_v7, 4  ;;  %v3247_v60 = vstv %s7326_s23  ;;  %s7377_s23 = sld [smem:[#allocation2 + $0xb3]] }
 0x387   : > { %3047 = vrot.lane.b32.xlu1 %v3046_v9, %s9114_s17  ;;  %3056 = vrot.lane.b32.xlu0 %v3055_v58, %s9114_s17  ;;  %v3081_v9 = vsel %vm658_vm5, %v3079_v52, %v3080_v18  ;;  %v3185_v58 = vstv %s7261_s11  ;;  %v3179_v18 = vrot.slane %v3177_v1, 4  ;;  %v3680_v52 = vrot.slane %v351_v4, %v7196_v17  ;;  %s7336_s11 = sld [smem:[#allocation2 + $0xc0]] }
 0x388   : > { %v3186_v61 = vmul.f32 %v3185_v58, %v7274_v62  ;;  %v3187_v35 = vmul.f32 %v3185_v58, %v7048_v19  ;;  %v3229_v58 = vstv %s7305_s8  ;;  %v3205_v1 = vsel %vm440_vm9, %v3203_v33, %v3204_v23  ;;  %s7364_s8 = sld [smem:[#allocation2 + $0xac]] }
 0x389   : > { %v3248_v7 = vmul.f32 %v3247_v60, %v7274_v62 }
 0x38a   : > { %v3190_v22 = vrot.slane %v3186_v61, 4  ;;  %v3191_v49 = vrot.slane %v3187_v35, 4  ;;  %v3256_v61 = vstv %s7329_s22  ;;  %s7387_s22 = sld [smem:[#allocation2 + $0x98]] }
 0x38b   : > { %3637 = vrot.lane.b32.xlu1 %v3635_v63, %s5505_s9  ;;  %3069 = vrot.lane.b32.xlu0 %v3068_v57, %s9114_s17  ;;  %v3671_v63 = vrot.slane %v349_v51, %v7196_v17  ;;  %v3169_v57 = vmul.f32 %v3168_v59, %v7274_v62  ;;  %v3212_v17 = vmul.f32 %v3211_v25, %v7274_v62 }
 0x38c   : > { %v3658_v51 = vsel %vm3601_vm13, %v3657_v5, %v3653_v20  ;;  %v3230_v5 = vmul.f32 %v3229_v58, %v7274_v62  ;;  %v3238_v20 = vstv %s7320_s10  ;;  %s7371_s10 = sld [smem:[#allocation2 + $0xba]] }
 0x38d   : > { %v3676_v56 = vsel %vm3601_vm13, %v3675_v31, %v3671_v63  ;;  %v3239_v6 = vmul.f32 %v3238_v20, %v7274_v62  ;;  %v3269_v31 = vstv %s7336_s11  ;;  %s7396_s11 = sld [smem:[#allocation2 + $0x9f]] }
 0x38e   : > { %v3232_v35 = vrot.slane %v3230_v5, 1 }
 0x38f   : > { %3082 = vrot.lane.b32.xlu1 %v3081_v9, %s9114_s17  ;;  %3147 = vrot.lane.b32.xlu0 %v3145_v29, %s5506_s6  ;;  %v3684_v29 = vrot.slane %v352_v3, %v7199_v27  ;;  %v3221_v27 = vmul.f32 %v3220_v39, %v7274_v62  ;;  %v3214_v3 = vrot.slane %v3212_v17, 5  ;;  %v3241_v25 = vrot.slane %v3239_v6, 1 }
 0x390   : > { %v3250_v39 = vrot.slane %v3248_v7, 1 }
 0x391   : > { %v3685_v9 = vsel %vm3601_vm13, %v3684_v29, %v3680_v52  ;;  %v3223_v4 = vrot.slane %v3221_v27, 1  ;;  %v3270_v29 = vmul.f32 %v3269_v31, %v7274_v62  ;;  %v3271_v52 = vmul.f32 %v3269_v31, %v7048_v19 }
 0x392   : > { %v3353_v31 = vstv %s7387_s22  ;;  %s5165_s22 = sld [smem:[#allocation2 + $0xf1]] }
 0x393   : > { %3155 = vrot.lane.b32.xlu1 %v3153_v0, %s5506_s6  ;;  %3163 = vrot.lane.b32.xlu0 %v3161_v28, %s5506_s6  ;;  %v3686_v0 = vsel %vm2586_vm10, %v3667_v36, %v3658_v51  ;;  %v3192_v28 = vsel %vm440_vm9, %v3190_v22, %v3191_v49  ;;  %v3282_v36 = vstv %s7349_s5  ;;  %v3291_v22 = vstv %s7353_s27  ;;  %s7399_s5 = sld [smem:[#allocation2 + $0xa6]] }
 0x394   : > { %v3687_v2 = vsel %vm2588_vm11, %v3676_v56, %v3686_v0  ;;  %v3274_v23 = vrot.slane %v3270_v29, 5  ;;  %v3275_v56 = vrot.slane %v3271_v52, 5  ;;  %v3283_v17 = vmul.f32 %v3282_v36, %v7274_v62  ;;  %s7411_s27 = sld [smem:[#allocation2 + $0xad]] }
 0x395   : > { %v3688_v59 = vsel %vm2590_vm12, %v3685_v9, %v3687_v2  ;;  %v3292_v27 = vmul.f32 %v3291_v22, %v7274_v62  ;;  %v3300_v51 = vstv %s7362_s30  ;;  %v3309_v9 = vstv %s7364_s8  ;;  %s7414_s30 = sld [smem:[#allocation2 + $0xb4]] }
 0x396   : > { %v3690_v15 = vsel %vm360_vm1, 0.0, %v3688_v59  ;;  %v3276_v0 = vsel %vm360_vm1, %v3274_v23, %v3275_v56  ;;  %v3318_v59 = vstv %s7377_s23  ;;  %s7420_s8 = sld [smem:[#allocation2 + $0xbb]]  ;;  %v3354_v36 = vmul.f32 %v3353_v31, %v7274_v62 }
 0x397   : > { %3171 = vrot.lane.b32.xlu1 %v3169_v57, %s5506_s6  ;;  %3180 = vrot.lane.b32.xlu0 %v3179_v18, %s5506_s6  ;;  %v3691_v63 = vsel %vm517_vm4, %v3690_v15, 0.0  ;;  %v3257_v57 = vmul.f32 %v3256_v61, %v7274_v62  ;;  %v3258_v18 = vmul.f32 %v3256_v61, %v7048_v19  ;;  %v3294_v2 = vrot.slane %v3292_v27, 6  ;;  %s5161_s23 = sld [smem:[#allocation2 + $0xd5]] }
 0x398   : > { %v3319_v6 = vmul.f32 %v3318_v59, %v7274_v62  ;;  %v3362_v22 = vstv %s7396_s11  ;;  %s5159_s11 = sld [smem:[#allocation2 + $0xc7]]  ;;  %v3798_v44 = vstv %s5165_s22 }
 0x399   : > { %v3261_v49 = vrot.slane %v3257_v57, 5  ;;  %v3262_v33 = vrot.slane %v3258_v18, 5  ;;  %v3800_v48 = vmul.f32 %v3798_v44, %v7048_v19  ;;  %s5167_s22 = sld [smem:[#allocation2 + $0xcf]] }
 0x39b   : > { %3193 = vrot.lane.b32.xlu1 %v3192_v28, %s5506_s6  ;;  %3206 = vrot.lane.b32.xlu0 %v3205_v1, %s5506_s6  ;;  %v3263_v58 = vsel %vm360_vm1, %v3261_v49, %v3262_v33  ;;  %v3327_v28 = vstv %s7371_s10  ;;  %v3285_v1 = vrot.slane %v3283_v17, 6  ;;  %s7424_s10 = sld [smem:[#allocation2 + $0xc2]]  ;;  %v3371_v49 = vstv %s7399_s5 }
 0x39c   : > { %v3328_v60 = vmul.f32 %v3327_v28, %v7274_v62  ;;  %v3329_v15 = vmul.f32 %v3327_v28, %v7048_v19  ;;  %v3389_v28 = vstv %s7414_s30  ;;  %s5164_s5 = sld [smem:[#allocation2 + $0xea]] }
 0x39d   : > { %v3758_v10 = vstv %s5161_s23  ;;  %s7522_s30 = sld [smem:[#allocation2 + $0xdd]] }
 0x39e   : > { %v3332_v18 = vrot.slane %v3328_v60, 2  ;;  %v3333_v29 = vrot.slane %v3329_v15, 2  ;;  %v3740_v12 = vstv %s5159_s11  ;;  %s7539_s23 = sld [smem:[#allocation2 + $0xd6]] }
 0x39f   : > { %3215 = vrot.lane.b32.xlu1 %v3214_v3, %s9366_s20  ;;  %3224 = vrot.lane.b32.xlu0 %v3223_v4, %s9366_s20  ;;  %v3301_v3 = vmul.f32 %v3300_v51, %v7274_v62  ;;  %v3310_v4 = vmul.f32 %v3309_v9, %v7274_v62  ;;  %v3356_v51 = vrot.slane %v3354_v36, 7  ;;  %v3363_v9 = vmul.f32 %v3362_v22, %v7274_v62  ;;  %s7554_s11 = sld [smem:[#allocation2 + $0xf2]] }
 0x3a0   : > { %v3334_v56 = vsel %vm707_vm6, %v3332_v18, %v3333_v29 }
 0x3a1   : > { %v3303_v61 = vrot.slane %v3301_v3, 2  ;;  %v3411_v59 = vstv %s7424_s10  ;;  %v3365_v60 = vrot.slane %v3363_v9, 7  ;;  %s7536_s10 = sld [smem:[#allocation2 + $0xc8]] }
 0x3a2   : > { %v3412_v29 = vmul.f32 %v3411_v59, %v7274_v62  ;;  %v3785_v53 = vstv %s5164_s5  ;;  %s5170_s5 = sld [smem:[#allocation2 + $0xe4]] }
 0x3a3   : > { %3693 = vrot.lane.b32.xlu1 %v3691_v63, %s5505_s9  ;;  %3233 = vrot.lane.b32.xlu0 %v3232_v35, %s9366_s20  ;;  %s7383_s9 = sld [smem:[#allocation2 + $0xc1]]  ;;  %v3312_v35 = vrot.slane %v3310_v4, 2  ;;  %v3398_v4 = vstv %s7420_s8 }
 0x3a4   : > { %v3399_v31 = vmul.f32 %v3398_v4, %v7274_v62  ;;  %v3400_v18 = vmul.f32 %v3398_v4, %v7048_v19  ;;  %s7527_s8 = sld [smem:[#allocation2 + $0xe3]] }
 0x3a7   : > { %3242 = vrot.lane.b32.xlu1 %v3241_v25, %s9366_s20  ;;  %3251 = vrot.lane.b32.xlu0 %v3250_v39, %s9366_s20  ;;  %v3321_v39 = vrot.slane %v3319_v6, 2 }
 0x3a9   : > { %v3340_v7 = vstv %s7383_s9  ;;  %s5160_s9 = sld [smem:[#allocation2 + $0xce]] }
 0x3aa   : > { %v3341_v52 = vmul.f32 %v3340_v7, %v7274_v62  ;;  %v3342_v25 = vmul.f32 %v3340_v7, %v7048_v19 }
 0x3ab   : > { %3264 = vrot.lane.b32.xlu1 %v3263_v58, %s9366_s20  ;;  %3277 = vrot.lane.b32.xlu0 %v3276_v0, %s9366_s20  ;;  %v3372_v58 = vmul.f32 %v3371_v49, %v7274_v62  ;;  %v3380_v0 = vstv %s7411_s27  ;;  %v3403_v49 = vrot.slane %v3399_v31, 3  ;;  %s5162_s27 = sld [smem:[#allocation2 + $0xdc]] }
 0x3ac   : > { %v3345_v17 = vrot.slane %v3341_v52, 6  ;;  %v3346_v27 = vrot.slane %v3342_v25, 6  ;;  %v3413_v52 = vmul.f32 %v3411_v59, %v7048_v19 }
 0x3ad   : > { %v7401_v5 = vpop.permute.xlu0 %2678  ;;  %v7403_v20 = vpop.permute.xlu1 %2669  ;;  %v3374_v15 = vrot.slane %v3372_v58, 7 }
 0x3ae   : > { %v3347_v3 = vsel %vm658_vm5, %v3345_v17, %v3346_v27  ;;  %v3416_v17 = vrot.slane %v3412_v29, 3  ;;  %v3417_v27 = vrot.slane %v3413_v52, 3 }
 0x3af   : > { %3286 = vrot.lane.b32.xlu1 %v3285_v1, %s5508_s7  ;;  %3295 = vrot.lane.b32.xlu0 %v3294_v2, %s5508_s7  ;;  %v3749_v46 = vstv %s5160_s9  ;;  %s7547_s9 = sld [smem:[#allocation2 + $0xc9]] }
 0x3b1   : > { %v7416_v63 = vpop.permute.xlu0 %2696  ;;  %v7418_v57 = vpop.permute.xlu1 %2687  ;;  %v3767_v41 = vstv %s5162_s27  ;;  %s7567_s27 = sld [smem:[#allocation2 + $0xeb]] }
 0x3b3   : > { %3304 = vrot.lane.b32.xlu1 %v3303_v61, %s5508_s7  ;;  %3313 = vrot.lane.b32.xlu0 %v3312_v35, %s5508_s7  ;;  %v3381_v61 = vmul.f32 %v3380_v0, %v7274_v62  ;;  %v3390_v35 = vmul.f32 %v3389_v28, %v7274_v62  ;;  %v3418_v0 = vsel %vm897_vm8, %v3416_v17, %v3417_v27 }
 0x3b5   : > { %v7431_v33 = vpop.permute.xlu0 %2718  ;;  %v7433_v23 = vpop.permute.xlu1 %2705  ;;  %v3383_v25 = vrot.slane %v3381_v61, 3 }
 0x3b7   : > { %3322 = vrot.lane.b32.xlu1 %v3321_v39, %s5508_s7  ;;  %3335 = vrot.lane.b32.xlu0 %v3334_v56, %s5508_s7  ;;  %v3392_v39 = vrot.slane %v3390_v35, 3  ;;  %v3404_v56 = vrot.slane %v3400_v18, 3 }
 0x3b9   : > { %v7442_v1 = vpop.permute.xlu0 %2740  ;;  %v7444_v2 = vpop.permute.xlu1 %2731  ;;  %v3405_v58 = vsel %vm897_vm8, %v3403_v49, %v3404_v56 }
 0x3bb   : > { %3348 = vrot.lane.b32.xlu1 %v3347_v3, %s5508_s7  ;;  %3357 = vrot.lane.b32.xlu0 %v3356_v51, %s5509_s4 }
 0x3bd   : > { %v7453_v6 = vpop.permute.xlu0 %2758  ;;  %v7455_v7 = vpop.permute.xlu1 %2749 }
 0x3be   : > { %9367 = vst [vmem:[#allocation242_spill] sm:$0xff] %v7455_v7 }
 0x3bf   : > { %3366 = vrot.lane.b32.xlu1 %v3365_v60, %s5509_s4  ;;  %3375 = vrot.lane.b32.xlu0 %v3374_v15, %s5509_s4 }
 0x3c1   : > { %v7463_v36 = vpop.permute.xlu0 %2776  ;;  %v7465_v22 = vpop.permute.xlu1 %2767 }
 0x3c2   : > { %9368 = vst [vmem:[#allocation243_spill] sm:$0xff] %v7463_v36 }
 0x3c3   : > { %3384 = vrot.lane.b32.xlu1 %v3383_v25, %s5509_s4  ;;  %3393 = vrot.lane.b32.xlu0 %v3392_v39, %s5509_s4 }
 0x3c5   : > { %v7469_v51 = vpop.permute.xlu0 %2802  ;;  %v7471_v9 = vpop.permute.xlu1 %2789 }
 0x3c6   : > { %9369 = vst [vmem:[#allocation244_spill] sm:$0xff] %v7469_v51  ;;  %9370 = vst [vmem:[#allocation245_spill] sm:$0xff] %v7471_v9 }
 0x3c7   : > { %3406 = vrot.lane.b32.xlu1 %v3405_v58, %s5509_s4  ;;  %3419 = vrot.lane.b32.xlu0 %v3418_v0, %s5509_s4 }
 0x3c9   : > { %v7477_v28 = vpop.permute.xlu1 %2811  ;;  %v7479_v3 = vpop.permute.xlu0 %2820 }
 0x3ca   : > { %9371 = vst [vmem:[#allocation246_spill] sm:$0xff] %v7479_v3 }
 0x3cd   : > { %v7481_v4 = vpop.permute.xlu1 %2829  ;;  %v7483_v59 = vpop.permute.xlu0 %2838 }
 0x3ce   : > { %9372 = vst [vmem:[#allocation247_spill] sm:$0xff] %v7481_v4  ;;  %9373 = vst [vmem:[#allocation248_spill] sm:$0xff] %v7483_v59 }
 0x3d1   : > { %v7485_v60 = vpop.permute.xlu1 %2847  ;;  %v7489_v61 = vpop.permute.xlu0 %2860 }
 0x3d2   : > { %9374 = vst [vmem:[#allocation249_spill] sm:$0xff] %v7485_v60  ;;  %9376 = vst [vmem:[#allocation251_spill] sm:$0xff] %v7489_v61 }
 0x3d5   : > { %v7487_v15 = vpop.permute.xlu1 %2873  ;;  %v7493_v31 = vpop.permute.xlu0 %2881 }
 0x3d6   : > { %9375 = vst [vmem:[#allocation250_spill] sm:$0xff] %v7487_v15  ;;  %9378 = vst [vmem:[#allocation253_spill] sm:$0xff] %v7493_v31 }
 0x3d9   : > { %v7491_v35 = vpop.permute.xlu1 %2889  ;;  %v7499_v52 = vpop.permute.xlu0 %2897 }
 0x3da   : > { %9377 = vst [vmem:[#allocation252_spill] sm:$0xff] %v7491_v35  ;;  %9381 = vst [vmem:[#allocation256_spill] sm:$0xff] %v7499_v52 }
 0x3dd   : > { %v7495_v18 = vpop.permute.xlu1 %2905  ;;  %v7503_v39 = vpop.permute.xlu0 %2914 }
 0x3de   : > { %9379 = vst [vmem:[#allocation254_spill] sm:$0xff] %v7495_v18  ;;  %9383 = vst [vmem:[#allocation258_spill] sm:$0xff] %v7503_v39 }
 0x3e1   : > { %v7497_v29 = vpop.permute.xlu1 %2927  ;;  %v7509_v17 = vpop.permute.xlu0 %2940 }
 0x3e2   : > { %9380 = vst [vmem:[#allocation255_spill] sm:$0xff] %v7497_v29  ;;  %9386 = vst [vmem:[#allocation261_spill] sm:$0xff] %v7509_v17 }
 0x3e5   : > { %v7501_v25 = vpop.permute.xlu1 %2949  ;;  %v7513_v58 = vpop.permute.xlu0 %2958 }
 0x3e6   : > { %9382 = vst [vmem:[#allocation257_spill] sm:$0xff] %v7501_v25  ;;  %9388 = vst [vmem:[#allocation263_spill] sm:$0xff] %v7513_v58 }
 0x3e9   : > { %v7505_v49 = vpop.permute.xlu1 %2967  ;;  %v7519_v42 = vpop.permute.xlu0 %2976 }
 0x3ea   : > { %9384 = vst [vmem:[#allocation259_spill] sm:$0xff] %v7505_v49  ;;  %9391 = vst [vmem:[#allocation266_spill] sm:$0xff] %v7519_v42 }
 0x3ed   : > { %v7507_v56 = vpop.permute.xlu1 %2985  ;;  %v7529_v45 = vpop.permute.xlu0 %2998 }
 0x3ee   : > { %9385 = vst [vmem:[#allocation260_spill] sm:$0xff] %v7507_v56  ;;  %9392 = vst [vmem:[#allocation267_spill] sm:$0xff] %v7529_v45  ;;  %v3838_v56 = vstv %s7522_s30  ;;  %v3776_v45 = vstv %s7527_s8  ;;  %s5177_s30 = sld [smem:[#allocation2 + $0xe5]] }
 0x3ef   : > { %s7577_s8 = sld [smem:[#allocation2 + $0xd0]] }
 0x3f1   : > { %v7511_v27 = vpop.permute.xlu1 %3011 }
 0x3f2   : > { %9387 = vst [vmem:[#allocation262_spill] sm:$0xff] %v7511_v27 }
 0x3f5   : > { %v7515_v0 = vpop.permute.xlu1 %3029 }
 0x3f6   : > { %9389 = vst [vmem:[#allocation264_spill] sm:$0xff] %v7515_v0 }
 0x3f9   : > { %v7517_v50 = vpop.permute.xlu1 %3047 }
 0x3fa   : > { %9390 = vst [vmem:[#allocation265_spill] sm:$0xff] %v7517_v50 }
 0x3fd   : > { %v3638_v21 = vpop.permute.xlu1 %3637 }
 0x3fe   : > { %v3640_v32 = vsel %vm379_vm2, 0.0, %v3638_v21 }
 0x3ff   : > { %v7525_v37 = vsel %vm383_vm3, %v3640_v32, 0.0 }
 0x400   : > { %v3759_v47 = vmul.f32 %v3758_v10, %v7525_v37  ;;  %v3750_v40 = vmul.f32 %v3749_v46, %v7525_v37  ;;  %v3799_v38 = vmul.f32 %v3798_v44, %v7525_v37  ;;  %v3741_v13 = vmul.f32 %v3740_v12, %v7525_v37  ;;  %v7544_v46 = vpop.permute.xlu0 %3020 }
 0x401   : > { %v3786_v0 = vmul.f32 %v3785_v53, %v7525_v37  ;;  %v3804_v44 = vrot.slane %v3800_v48, 5  ;;  %9393 = vst [vmem:[#allocation268_spill] sm:$0xff] %v7544_v46  ;;  %v3768_v10 = vmul.f32 %v3767_v41, %v7525_v37  ;;  %v3839_v41 = vmul.f32 %v3838_v56, %v7525_v37 }
 0x402   : > { %v3761_v21 = vrot.slane %v3759_v47, 1  ;;  %v3752_v34 = vrot.slane %v3750_v40, 1  ;;  %v3803_v32 = vrot.slane %v3799_v38, 5  ;;  %v3787_v47 = vmul.f32 %v3785_v53, %v7048_v19 }
 0x403   : > { %v3743_v12 = vrot.slane %v3741_v13, 5  ;;  %v3790_v40 = vrot.slane %v3786_v0, 5  ;;  %v3770_v13 = vrot.slane %v3768_v10, 1  ;;  %v3777_v48 = vmul.f32 %v3776_v45, %v7525_v37 }
 0x404   : > { %3762 = vrot.lane.b32.xlu1 %v3761_v21, %s5506_s6  ;;  %3753 = vrot.lane.b32.xlu0 %v3752_v34, %s5506_s6  ;;  %v3805_v38 = vsel %vm360_vm1, %v3803_v32, %v3804_v44  ;;  %v3791_v34 = vrot.slane %v3787_v47, 5  ;;  %v3811_v21 = vstv %s7536_s10  ;;  %v3829_v0 = vstv %s7539_s23  ;;  %v7561_v32 = vpop.permute.xlu0 %3038  ;;  %s7580_s10 = sld [smem:[#allocation2 + $0xde]] }
 0x405   : > { %9394 = vst [vmem:[#allocation269_spill] sm:$0xff] %v7561_v32  ;;  %v3841_v44 = vrot.slane %v3839_v41, 2  ;;  %v3779_v47 = vrot.slane %v3777_v48, 1  ;;  %v3830_v56 = vmul.f32 %v3829_v0, %v7525_v37  ;;  %v3882_v45 = vstv %s7547_s9  ;;  %s7588_s23 = sld [smem:[#allocation2 + $0xd7]] }
 0x406   : > { %v3792_v53 = vsel %vm360_vm1, %v3790_v40, %v3791_v34  ;;  %v3820_v10 = vstv %s5167_s22  ;;  %v3883_v41 = vmul.f32 %v3882_v45, %v7525_v37  ;;  %s7596_s9 = sld [smem:[#allocation2 + $0xec]] }
 0x407   : > { %v3821_v48 = vmul.f32 %v3820_v10, %v7525_v37  ;;  %v3918_v10 = vstv %s5177_s30  ;;  %s5181_s22 = sld [smem:[#allocation2 + $0xd1]] }
 0x408   : > { %3806 = vrot.lane.b32.xlu1 %v3805_v38, %s5506_s6  ;;  %3744 = vrot.lane.b32.xlu0 %v3743_v12, %s5506_s6  ;;  %v3812_v12 = vmul.f32 %v3811_v21, %v7525_v37  ;;  %v3869_v38 = vstv %s7554_s11  ;;  %v7573_v40 = vpop.permute.xlu0 %3056  ;;  %s7603_s11 = sld [smem:[#allocation2 + $0xed]] }
 0x409   : > { %9395 = vst [vmem:[#allocation270_spill] sm:$0xff] %v7573_v40  ;;  %v3870_v21 = vmul.f32 %v3869_v38, %v7525_v37  ;;  %v3871_v0 = vmul.f32 %v3869_v38, %v7048_v19  ;;  %s7622_s30 = sld [smem:[#allocation2 + $0xe6]] }
 0x40a   : > { %v3814_v34 = vrot.slane %v3812_v12, 6  ;;  %v3909_v46 = vstv %s7580_s10  ;;  %s7639_s10 = sld [smem:[#allocation2 + $0xd9]] }
 0x40b   : > { %v3874_v45 = vrot.slane %v3870_v21, 6  ;;  %v3875_v38 = vrot.slane %v3871_v0, 6  ;;  %v3891_v21 = vstv %s7577_s8  ;;  %s7634_s8 = sld [smem:[#allocation2 + $0xd8]] }
 0x40c   : > { %3771 = vrot.lane.b32.xlu1 %v3770_v13, %s5506_s6  ;;  %3793 = vrot.lane.b32.xlu0 %v3792_v53, %s5506_s6  ;;  %v3832_v13 = vrot.slane %v3830_v56, 2  ;;  %v3847_v53 = vstv %s5170_s5  ;;  %v3856_v56 = vstv %s7567_s27  ;;  %v7590_v32 = vpop.permute.xlu0 %3069  ;;  %s7611_s5 = sld [smem:[#allocation2 + $0xf3]] }
 0x40d   : > { %v3848_v12 = vmul.f32 %v3847_v53, %v7525_v37  ;;  %v3857_v40 = vmul.f32 %v3856_v56, %v7525_v37  ;;  %9396 = vst [vmem:[#allocation271_spill] sm:$0xff] %v7590_v32  ;;  %s7615_s27 = sld [smem:[#allocation2 + $0xca]] }
 0x40f   : > { %v3861_v53 = vrot.slane %v3857_v40, 2  ;;  %v3910_v40 = vmul.f32 %v3909_v46, %v7525_v37  ;;  %v3961_v46 = vstv %s5181_s22  ;;  %s7656_s22 = sld [smem:[#allocation2 + $0xd2]] }
 0x410   : > { %3842 = vrot.lane.b32.xlu1 %v3841_v44, %s9366_s20  ;;  %3780 = vrot.lane.b32.xlu0 %v3779_v47, %s5506_s6  ;;  %v3885_v44 = vrot.slane %v3883_v41, 7  ;;  %v3823_v47 = vrot.slane %v3821_v48, 6  ;;  %v3919_v41 = vmul.f32 %v3918_v10, %v7525_v37  ;;  %v3876_v48 = vsel %vm658_vm5, %v3874_v45, %v3875_v38  ;;  %v7605_v0 = vpop.permute.xlu0 %3147 }
 0x411   : > { %9397 = vst [vmem:[#allocation272_spill] sm:$0xff] %v7605_v0  ;;  %v3900_v10 = vstv %s7588_s23  ;;  %s7645_s23 = sld [smem:[#allocation2 + $0xf4]] }
 0x413   : > { %v3953_v0 = vstv %s7615_s27  ;;  %s7678_s27 = sld [smem:[#allocation2 + $0xee]] }
 0x414   : > { %3815 = vrot.lane.b32.xlu1 %v3814_v34, %s9366_s20  ;;  %3833 = vrot.lane.b32.xlu0 %v3832_v13, %s9366_s20  ;;  %v3858_v34 = vmul.f32 %v3856_v56, %v7048_v19  ;;  %v3850_v13 = vrot.slane %v3848_v12, 2  ;;  %v3921_v12 = vrot.slane %v3919_v41, 3  ;;  %v3892_v56 = vmul.f32 %v3891_v21, %v7525_v37 }
 0x415   : > { %v3927_v41 = vstv %s7596_s9  ;;  %s7652_s9 = sld [smem:[#allocation2 + $0xdf]] }
 0x416   : > { %v3894_v38 = vrot.slane %v3892_v56, 7 }
 0x418   : > { %3886 = vrot.lane.b32.xlu1 %v3885_v44, %s5508_s7  ;;  %3824 = vrot.lane.b32.xlu0 %v3823_v47, %s9366_s20  ;;  %v3862_v44 = vrot.slane %v3858_v34, 2  ;;  %v7607_v47 = vpop.permute.xlu1 %3082  ;;  %v3912_v34 = vrot.slane %v3910_v40, 3  ;;  %v3994_v40 = vstv %s7603_s11  ;;  %s7661_s11 = sld [smem:[#allocation2 + $0xf5]] }
 0x419   : > { %9398 = vst [vmem:[#allocation273_spill] sm:$0xff] %v7607_v47  ;;  %v3995_v32 = vmul.f32 %v3994_v40, %v7525_v37 }
 0x41a   : > { %v3863_v45 = vsel %vm707_vm6, %v3861_v53, %v3862_v44  ;;  %v7624_v53 = vpop.permute.xlu0 %3163  ;;  %v3929_v44 = vmul.f32 %v3927_v41, %v7048_v19 }
 0x41b   : > { %9399 = vst [vmem:[#allocation274_spill] sm:$0xff] %v7624_v53 }
 0x41c   : > { %3851 = vrot.lane.b32.xlu1 %v3850_v13, %s9366_s20  ;;  %3877 = vrot.lane.b32.xlu0 %v3876_v48, %s9366_s20  ;;  %v3901_v13 = vmul.f32 %v3900_v10, %v7525_v37  ;;  %v3928_v48 = vmul.f32 %v3927_v41, %v7525_v37  ;;  %v7626_v21 = vpop.permute.xlu1 %3155 }
 0x41d   : > { %9400 = vst [vmem:[#allocation275_spill] sm:$0xff] %v7626_v21  ;;  %v3985_v21 = vstv %s7622_s30  ;;  %s7683_s30 = sld [smem:[#allocation2 + $0xe0]] }
 0x41e   : > { %v3903_v56 = vrot.slane %v3901_v13, 7  ;;  %v3932_v10 = vrot.slane %v3928_v48, 3  ;;  %v7647_v41 = vpop.permute.xlu0 %3180  ;;  %v3954_v48 = vmul.f32 %v3953_v0, %v7525_v37 }
 0x41f   : > { %9401 = vst [vmem:[#allocation276_spill] sm:$0xff] %v7647_v41 }
 0x420   : > { %3922 = vrot.lane.b32.xlu1 %v3921_v12, %s5508_s7  ;;  %3864 = vrot.lane.b32.xlu0 %v3863_v45, %s9366_s20  ;;  %v3962_v12 = vmul.f32 %v3961_v46, %v7525_v37  ;;  %v3940_v45 = vstv %s7611_s5  ;;  %v7649_v46 = vpop.permute.xlu1 %3171  ;;  %s7667_s5 = sld [smem:[#allocation2 + $0xcb]] }
 0x421   : > { %v3941_v53 = vmul.f32 %v3940_v45, %v7525_v37  ;;  %v3942_v13 = vmul.f32 %v3940_v45, %v7048_v19  ;;  %9402 = vst [vmem:[#allocation277_spill] sm:$0xff] %v7649_v46  ;;  %v3986_v46 = vmul.f32 %v3985_v21, %v7525_v37 }
 0x423   : > { %v3946_v45 = vrot.slane %v3942_v13, 3 }
 0x424   : > { %3895 = vrot.lane.b32.xlu1 %v3894_v38, %s5508_s7  ;;  %3913 = vrot.lane.b32.xlu0 %v3912_v34, %s5508_s7  ;;  %v3933_v38 = vrot.slane %v3929_v44, 3  ;;  %v3996_v34 = vmul.f32 %v3994_v40, %v7048_v19  ;;  %v3945_v44 = vrot.slane %v3941_v53, 3  ;;  %v3969_v53 = vstv %s7634_s8  ;;  %s7695_s8 = sld [smem:[#allocation2 + $0xe1]] }
 0x425   : > { %v3970_v21 = vmul.f32 %v3969_v53, %v7525_v37 }
 0x426   : > { %v4000_v40 = vrot.slane %v3996_v34, 4  ;;  %v3988_v34 = vrot.slane %v3986_v46, 4 }
 0x428   : > { %3964 = vrot.lane.b32.xlu1 %v3962_v12, %s5509_s4  ;;  %3904 = vrot.lane.b32.xlu0 %v3903_v56, %s5508_s7  ;;  %v3934_v12 = vsel %vm897_vm8, %v3932_v10, %v3933_v38  ;;  %v3999_v56 = vrot.slane %v3995_v32, 4  ;;  %v3947_v32 = vsel %vm897_vm8, %v3945_v44, %v3946_v45  ;;  %v4038_v10 = vstv %s7639_s10  ;;  %v7669_v38 = vpop.permute.xlu0 %3206  ;;  %s7699_s10 = sld [smem:[#allocation2 + $0xe7]] }
 0x429   : > { %9403 = vst [vmem:[#allocation278_spill] sm:$0xff] %v7669_v38  ;;  %v4039_v13 = vmul.f32 %v4038_v10, %v7525_v37  ;;  %v4078_v38 = vstv %s7661_s11  ;;  %s7724_s11 = sld [smem:[#allocation2 + $0xe8]] }
 0x42a   : > { %v4001_v0 = vsel %vm440_vm9, %v3999_v56, %v4000_v40  ;;  %v3977_v56 = vstv %s7652_s9  ;;  %v4029_v40 = vstv %s7656_s22  ;;  %s7711_s9 = sld [smem:[#allocation2 + $0xda]] }
 0x42b   : > { %v3978_v53 = vmul.f32 %v3977_v56, %v7525_v37  ;;  %v4030_v10 = vmul.f32 %v4029_v40, %v7525_v37  ;;  %s7719_s22 = sld [smem:[#allocation2 + $0xd3]] }
 0x42c   : > { %3935 = vrot.lane.b32.xlu1 %v3934_v12, %s5508_s7  ;;  %3956 = vrot.lane.b32.xlu0 %v3954_v48, %s5509_s4  ;;  %v7671_v48 = vpop.permute.xlu1 %3193  ;;  %v4007_v12 = vstv %s7645_s23  ;;  %v7688_v46 = vpop.permute.xlu0 %3224  ;;  %s7706_s23 = sld [smem:[#allocation2 + $0xcc]] }
 0x42d   : > { %9404 = vst [vmem:[#allocation279_spill] sm:$0xff] %v7671_v48  ;;  %v4008_v44 = vmul.f32 %v4007_v12, %v7525_v37  ;;  %v4009_v45 = vmul.f32 %v4007_v12, %v7048_v19  ;;  %9405 = vst [vmem:[#allocation280_spill] sm:$0xff] %v7688_v46  ;;  %v4032_v56 = vrot.slane %v4030_v10, 1  ;;  %v4047_v48 = vstv %s7683_s30  ;;  %s7755_s30 = sld [smem:[#allocation2 + $0x11b]] }
 0x42f   : > { %v4012_v41 = vrot.slane %v4008_v44, 4  ;;  %v4013_v12 = vrot.slane %v4009_v45, 4 }
 0x430   : > { %4002 = vrot.lane.b32.xlu1 %v4001_v0, %s5509_s4  ;;  %3948 = vrot.lane.b32.xlu0 %v3947_v32, %s5508_s7  ;;  %v7690_v0 = vpop.permute.xlu1 %3215  ;;  %v4041_v32 = vrot.slane %v4039_v13, 1  ;;  %v4080_v13 = vmul.f32 %v4078_v38, %v7048_v19 }
 0x431   : > { %9406 = vst [vmem:[#allocation281_spill] sm:$0xff] %v7690_v0  ;;  %v4065_v0 = vstv %s7678_s27  ;;  %v4014_v44 = vsel %vm440_vm9, %v4012_v41, %v4013_v12  ;;  %v4048_v41 = vmul.f32 %v4047_v48, %v7525_v37  ;;  %v4118_v12 = vstv %s7695_s8  ;;  %s7730_s27 = sld [smem:[#allocation2 + $0xef]] }
 0x432   : > { %v4066_v47 = vmul.f32 %v4065_v0, %v7525_v37  ;;  %s7759_s8 = sld [smem:[#allocation2 + $0xff]] }
 0x434   : > { %3972 = vrot.lane.b32.xlu1 %v3970_v21, %s5509_s4  ;;  %3989 = vrot.lane.b32.xlu0 %v3988_v34, %s5509_s4  ;;  %v4079_v21 = vmul.f32 %v4078_v38, %v7525_v37  ;;  %v4020_v34 = vstv %s7667_s5  ;;  %v3694_v45 = vpop.permute.xlu1 %3693  ;;  %v4084_v38 = vrot.slane %v4080_v13, 5  ;;  %s7728_s5 = sld [smem:[#allocation2 + $0xf6]]  ;;  %v4119_v13 = vmul.f32 %v4118_v12, %v7525_v37 }
 0x435   : > { %v4021_v40 = vmul.f32 %v4020_v34, %v7525_v37  ;;  %v4070_v34 = vrot.slane %v4066_v47, 5  ;;  %v4050_v47 = vrot.slane %v4048_v41, 1  ;;  %v4127_v12 = vstv %s7724_s11  ;;  %s7787_s11 = sld [smem:[#allocation2 + $0x122]] }
 0x436   : > { %v4083_v46 = vrot.slane %v4079_v21, 5 }
 0x437   : > { %v4023_v10 = vrot.slane %v4021_v40, 5 }
 0x438   : > { %4042 = vrot.lane.b32.xlu1 %v4041_v32, %s9116_s28  ;;  %3980 = vrot.lane.b32.xlu0 %v3978_v53, %s5509_s4  ;;  %v7713_v32 = vpop.permute.xlu0 %3233  ;;  %v4067_v53 = vmul.f32 %v4065_v0, %v7048_v19  ;;  %v4085_v21 = vsel %vm360_vm1, %v4083_v46, %v4084_v38  ;;  %v7734_v46 = vpop.permute.xlu1 %3242  ;;  %v4109_v38 = vstv %s7711_s9  ;;  %s7776_s9 = sld [smem:[#allocation2 + $0x114]] }
 0x439   : > { %9407 = vst [vmem:[#allocation282_spill] sm:$0xff] %v7713_v32  ;;  %v4056_v32 = vstv %s7699_s10  ;;  %9409 = vst [vmem:[#allocation284_spill] sm:$0xff] %v7734_v46  ;;  %v4110_v41 = vmul.f32 %v4109_v38, %v7525_v37  ;;  %s7763_s10 = sld [smem:[#allocation2 + $0xf8]] }
 0x43a   : > { %v4071_v0 = vrot.slane %v4067_v53, 5  ;;  %v4121_v53 = vrot.slane %v4119_v13, 2 }
 0x43b   : > { %v4112_v13 = vrot.slane %v4110_v41, 2 }
 0x43c   : > { %4015 = vrot.lane.b32.xlu1 %v4014_v44, %s5509_s4  ;;  %4033 = vrot.lane.b32.xlu0 %v4032_v56, %s9116_s28  ;;  %v7732_v48 = vpop.permute.xlu0 %3251  ;;  %v4057_v56 = vmul.f32 %v4056_v32, %v7525_v37  ;;  %v4072_v40 = vsel %vm360_vm1, %v4070_v34, %v4071_v0  ;;  %v4091_v44 = vstv %s7706_s23  ;;  %v7749_v32 = vpop.permute.xlu1 %3264  ;;  %v4149_v34 = vstv %s7728_s5  ;;  %s7770_s23 = sld [smem:[#allocation2 + $0x106]] }
 0x43d   : > { %9408 = vst [vmem:[#allocation283_spill] sm:$0xff] %v7732_v48  ;;  %v4100_v48 = vstv %s7719_s22  ;;  %9411 = vst [vmem:[#allocation286_spill] sm:$0xff] %v7749_v32  ;;  %v4136_v0 = vstv %s7730_s27  ;;  %s7778_s22 = sld [smem:[#allocation2 + $0x107]] }
 0x43e   : > { %v4137_v38 = vmul.f32 %v4136_v0, %v7525_v37  ;;  %s7800_s5 = sld [smem:[#allocation2 + $0x123]] }
 0x43f   : > { %s7804_s27 = sld [smem:[#allocation2 + $0x10d]] }
 0x440   : > { %4086 = vrot.lane.b32.xlu1 %v4085_v21, %s9116_s28  ;;  %4024 = vrot.lane.b32.xlu0 %v4023_v10, %s9116_s28  ;;  %v4059_v10 = vrot.slane %v4057_v56, 1  ;;  %v4092_v21 = vmul.f32 %v4091_v44, %v7525_v37  ;;  %v7747_v46 = vpop.permute.xlu0 %3277  ;;  %v4101_v56 = vmul.f32 %v4100_v48, %v7525_v37  ;;  %v4150_v44 = vmul.f32 %v4149_v34, %v7525_v37  ;;  %v7774_v41 = vpop.permute.xlu1 %3286 }
 0x441   : > { %9410 = vst [vmem:[#allocation285_spill] sm:$0xff] %v7747_v46  ;;  %v4138_v48 = vmul.f32 %v4136_v0, %v7048_v19  ;;  %9413 = vst [vmem:[#allocation288_spill] sm:$0xff] %v7774_v41  ;;  %v4260_v41 = vstv %s7755_s30  ;;  %s7809_s30 = sld [smem:[#allocation2 + $0x100]] }
 0x443   : > { %v4142_v0 = vrot.slane %v4138_v48, 2 }
 0x444   : > { %4051 = vrot.lane.b32.xlu1 %v4050_v47, %s9116_s28  ;;  %4073 = vrot.lane.b32.xlu0 %v4072_v40, %s9116_s28  ;;  %v4094_v47 = vrot.slane %v4092_v21, 6  ;;  %v4128_v40 = vmul.f32 %v4127_v12, %v7525_v37  ;;  %v7772_v21 = vpop.permute.xlu0 %3295  ;;  %v4103_v12 = vrot.slane %v4101_v56, 6 }
 0x445   : > { %9412 = vst [vmem:[#allocation287_spill] sm:$0xff] %v7772_v21  ;;  %v4227_v21 = vstv %s7759_s8  ;;  %s7821_s8 = sld [smem:[#allocation2 + $0xf9]] }
 0x446   : > { %v4130_v32 = vrot.slane %v4128_v40, 2 }
 0x448   : > { %4122 = vrot.lane.b32.xlu1 %v4121_v53, %s9114_s17  ;;  %4060 = vrot.lane.b32.xlu0 %v4059_v10, %s9116_s28  ;;  %v3696_v53 = vsel %vm379_vm2, 0.0, %v3694_v45  ;;  %v4151_v10 = vmul.f32 %v4149_v34, %v7048_v19  ;;  %s7923_s28 = sld [smem:[#allocation2 + $0xd4]] }
 0x449   : > { %v7781_v45 = vsel %vm383_vm3, %v3696_v53, 0.0  ;;  %v7793_v53 = vpop.permute.xlu0 %3313 }
 0x44a   : > { %v4155_v34 = vrot.slane %v4151_v10, 6  ;;  %9414 = vst [vmem:[#allocation289_spill] sm:$0xff] %v7793_v53  ;;  %v4228_v10 = vmul.f32 %v4227_v21, %v7781_v45 }
 0x44c   : > { %4095 = vrot.lane.b32.xlu1 %v4094_v47, %s9114_s17  ;;  %4113 = vrot.lane.b32.xlu0 %v4112_v13, %s9114_s17  ;;  %v4154_v47 = vrot.slane %v4150_v44, 6  ;;  %v4141_v13 = vrot.slane %v4137_v38, 2  ;;  %v4219_v44 = vstv %s7763_s10  ;;  %v4261_v38 = vmul.f32 %v4260_v41, %v7781_v45  ;;  %s7825_s10 = sld [smem:[#allocation2 + $0x10e]] }
 0x44d   : > { %v4220_v48 = vmul.f32 %v4219_v44, %v7781_v45 }
 0x44e   : > { %v4156_v56 = vsel %vm658_vm5, %v4154_v47, %v4155_v34  ;;  %v4143_v40 = vsel %vm707_vm6, %v4141_v13, %v4142_v0  ;;  %v4265_v47 = vrot.slane %v4261_v38, 4  ;;  %v4235_v13 = vstv %s7770_s23  ;;  %s7831_s23 = sld [smem:[#allocation2 + $0x11c]] }
 0x44f   : > { %v4251_v34 = vstv %s7776_s9  ;;  %v4304_v0 = vstv %s7778_s22  ;;  %s7836_s9 = sld [smem:[#allocation2 + $0x10f]]  ;;  %v3705_v15 = vstv %s7923_s28 }
 0x450   : > { %4104 = vrot.lane.b32.xlu1 %v4103_v12, %s9114_s17  ;;  %4131 = vrot.lane.b32.xlu0 %v4130_v32, %s9114_s17  ;;  %v7795_v12 = vpop.permute.xlu1 %3304  ;;  %v4262_v32 = vmul.f32 %v4260_v41, %v7048_v19  ;;  %v4252_v44 = vmul.f32 %v4251_v34, %v7781_v45  ;;  %v4305_v38 = vmul.f32 %v4304_v0, %v7781_v45  ;;  %v4243_v0 = vstv %s7804_s27  ;;  %s7847_s22 = sld [smem:[#allocation2 + $0x115]] }
 0x451   : > { %9415 = vst [vmem:[#allocation290_spill] sm:$0xff] %v7795_v12  ;;  %v4273_v12 = vstv %s7787_s11  ;;  %s7852_s11 = sld [smem:[#allocation2 + $0xfa]] }
 0x452   : > { %v4266_v41 = vrot.slane %v4262_v32, 4  ;;  %v4274_v32 = vmul.f32 %v4273_v12, %v7781_v45  ;;  %v4307_v34 = vrot.slane %v4305_v38, 1  ;;  %s7872_s27 = sld [smem:[#allocation2 + $0xe9]] }
 0x453   : > { %s7982_s28 = sld [smem:[#allocation2 + $0x125]] }
 0x454   : > { %4157 = vrot.lane.b32.xlu1 %v4156_v56, %s9114_s17  ;;  %4144 = vrot.lane.b32.xlu0 %v4143_v40, %s9114_s17  ;;  %v7813_v56 = vpop.permute.xlu0 %3335  ;;  %v7815_v21 = vpop.permute.xlu1 %3322  ;;  %v4236_v40 = vmul.f32 %v4235_v13, %v7781_v45  ;;  %v4254_v13 = vrot.slane %v4252_v44, 4  ;;  %v4244_v44 = vmul.f32 %v4243_v0, %v7781_v45  ;;  %s7919_s17 = sld [smem:[#allocation2 + $0xcd]] }
 0x455   : > { %9416 = vst [vmem:[#allocation291_spill] sm:$0xff] %v7813_v56  ;;  %9417 = vst [vmem:[#allocation292_spill] sm:$0xff] %v7815_v21  ;;  %v4344_v56 = vstv %s7800_s5  ;;  %v4278_v21 = vrot.slane %v4274_v32, 4  ;;  %s7863_s5 = sld [smem:[#allocation2 + $0x108]] }
 0x458   : > { %4230 = vrot.lane.b32.xlu1 %v4228_v10, %s5506_s6  ;;  %4222 = vrot.lane.b32.xlu0 %v4220_v48, %s5506_s6  ;;  %v4267_v10 = vsel %vm440_vm9, %v4265_v47, %v4266_v41  ;;  %v4275_v48 = vmul.f32 %v4273_v12, %v7048_v19  ;;  %v4295_v47 = vstv %s7809_s30  ;;  %v4345_v41 = vmul.f32 %v4344_v56, %v7781_v45  ;;  %v7838_v53 = vpop.permute.xlu0 %3357  ;;  %s7875_s30 = sld [smem:[#allocation2 + $0xf0]] }
 0x459   : > { %9418 = vst [vmem:[#allocation293_spill] sm:$0xff] %v7838_v53  ;;  %v4296_v38 = vmul.f32 %v4295_v47, %v7781_v45  ;;  %v4286_v53 = vstv %s7821_s8  ;;  %v4331_v47 = vstv %s7831_s23  ;;  %s7878_s8 = sld [smem:[#allocation2 + $0x101]] }
 0x45a   : > { %v4279_v12 = vrot.slane %v4275_v48, 4  ;;  %v4349_v46 = vrot.slane %v4345_v41, 5  ;;  %v4287_v0 = vmul.f32 %v4286_v53, %v7781_v45  ;;  %v4333_v53 = vmul.f32 %v4331_v47, %v7048_v19  ;;  %s7890_s23 = sld [smem:[#allocation2 + $0x124]] }
 0x45c   : > { %4268 = vrot.lane.b32.xlu1 %v4267_v10, %s5506_s6  ;;  %4238 = vrot.lane.b32.xlu0 %v4236_v40, %s5506_s6  ;;  %v7840_v10 = vpop.permute.xlu1 %3348  ;;  %v4346_v40 = vmul.f32 %v4344_v56, %v7048_v19  ;;  %v4280_v32 = vsel %vm440_vm9, %v4278_v21, %v4279_v12  ;;  %v7856_v48 = vpop.permute.xlu0 %3375  ;;  %v4332_v12 = vmul.f32 %v4331_v47, %v7781_v45 }
 0x45d   : > { %9419 = vst [vmem:[#allocation294_spill] sm:$0xff] %v7840_v10  ;;  %v4313_v10 = vstv %s7825_s10  ;;  %9420 = vst [vmem:[#allocation295_spill] sm:$0xff] %v7856_v48  ;;  %s7882_s10 = sld [smem:[#allocation2 + $0x116]]  ;;  %v4375_v48 = vstv %s7863_s5 }
 0x45e   : > { %v4350_v56 = vrot.slane %v4346_v40, 5  ;;  %v4314_v21 = vmul.f32 %v4313_v10, %v7781_v45  ;;  %v4289_v10 = vrot.slane %v4287_v0, 5  ;;  %v4337_v0 = vrot.slane %v4333_v53, 5  ;;  %s7909_s5 = sld [smem:[#allocation2 + $0xc6]] }
 0x460   : > { %4255 = vrot.lane.b32.xlu1 %v4254_v13, %s5506_s6  ;;  %4308 = vrot.lane.b32.xlu0 %v4307_v34, %s9366_s20  ;;  %v7858_v13 = vpop.permute.xlu1 %3366  ;;  %v4298_v34 = vrot.slane %v4296_v38, 1  ;;  %v4351_v41 = vsel %vm360_vm1, %v4349_v46, %v4350_v56  ;;  %v4316_v40 = vrot.slane %v4314_v21, 1  ;;  %v4336_v46 = vrot.slane %v4332_v12, 5 }
 0x461   : > { %9421 = vst [vmem:[#allocation296_spill] sm:$0xff] %v7858_v13  ;;  %v4357_v56 = vstv %s7852_s11  ;;  %s7903_s11 = sld [smem:[#allocation2 + $0x11d]] }
 0x462   : > { %v4358_v12 = vmul.f32 %v4357_v56, %v7781_v45  ;;  %v4366_v56 = vstv %s7878_s8  ;;  %s7950_s8 = sld [smem:[#allocation2 + $0x103]] }
 0x464   : > { %4246 = vrot.lane.b32.xlu1 %v4244_v44, %s5506_s6  ;;  %4281 = vrot.lane.b32.xlu0 %v4280_v32, %s5506_s6  ;;  %v4384_v44 = vstv %s7836_s9  ;;  %s7868_s6 = sld [smem:[#allocation2 + $0xfb]]  ;;  %v4322_v32 = vstv %s7847_s22 }
 0x465   : > { %v4385_v38 = vmul.f32 %v4384_v44, %v7781_v45  ;;  %s7892_s9 = sld [smem:[#allocation2 + $0xe2]]  ;;  %v4323_v47 = vmul.f32 %v4322_v32, %v7781_v45  ;;  %v4338_v44 = vsel %vm360_vm1, %v4336_v46, %v4337_v0  ;;  %v4376_v46 = vmul.f32 %v4375_v48, %v7781_v45 }
 0x466   : > { %s7899_s22 = sld [smem:[#allocation2 + $0x117]]  ;;  %v4393_v0 = vstv %s7882_s10  ;;  %v3699_v18 = vstv %s7909_s5 }
 0x467   : > { %v4387_v21 = vrot.slane %v4385_v38, 2  ;;  %v4360_v38 = vrot.slane %v4358_v12, 6  ;;  %v3729_v12 = vstv %s7875_s30  ;;  %s7943_s30 = sld [smem:[#allocation2 + $0xdb]]  ;;  %v4402_v25 = vstv %s7903_s11  ;;  %s9426_s11 = smov 123  }
 0x468   : > { %4299 = vrot.lane.b32.xlu1 %v4298_v34, %s9366_s20  ;;  %4352 = vrot.lane.b32.xlu0 %v4351_v41, %s9366_s20  ;;  %v7884_v34 = vpop.permute.xlu0 %3393  ;;  %v7886_v41 = vpop.permute.xlu1 %3384  ;;  %s7957_s10 = sld [smem:[#allocation2 + $0x109]] }
 0x469   : > { %9422 = vst [vmem:[#allocation297_spill] sm:$0xff] %v7884_v34  ;;  %9423 = vst [vmem:[#allocation298_spill] sm:$0xff] %v7886_v41  ;;  %s8014_s5 = sld [smem:[#allocation2 + $0x126]] }
 0x46a   : > { %v4428_v41 = vstv %s7868_s6  ;;  %s7915_s6 = sld [smem:[#allocation2 + $0x102]] }
 0x46b   : > { %v4429_v32 = vmul.f32 %v4428_v41, %v7781_v45 }
 0x46c   : > { %4290 = vrot.lane.b32.xlu1 %v4289_v10, %s9366_s20  ;;  %4317 = vrot.lane.b32.xlu0 %v4316_v40, %s9366_s20  ;;  %v7905_v53 = vpop.permute.xlu0 %3419  ;;  %v7907_v10 = vpop.permute.xlu1 %3406  ;;  %v4325_v40 = vrot.slane %v4323_v47, 1  ;;  %v3711_v47 = vstv %s7892_s9  ;;  %v4464_v50 = vstv %s7899_s22  ;;  %s7996_s9 = sld [smem:[#allocation2 + $0x10a]] }
 0x46d   : > { %9424 = vst [vmem:[#allocation299_spill] sm:$0xff] %v7905_v53  ;;  %9425 = vst [vmem:[#allocation300_spill] sm:$0xff] %v7907_v10  ;;  %v4378_v53 = vrot.slane %v4376_v46, 2  ;;  %v4431_v10 = vrot.slane %v4429_v32, 7  ;;  %v3730_v46 = vmul.f32 %v3729_v12, %v7525_v37  ;;  %v3712_v32 = vmul.f32 %v3711_v47, %v7525_v37  ;;  %s7999_s22 = sld [smem:[#allocation2 + $0x118]] }
 0x46e   : > { %v4465_v27 = vmul.f32 %v4464_v50, %v7781_v45  ;;  %v3708_v4 = vstv %s7943_s30  ;;  %s8033_s30 = sld [smem:[#allocation2 + $0x112]] }
 0x46f   : > { %v3714_v50 = vrot.slane %v3712_v32, 4 }
 0x470   : > { %4339 = vrot.lane.b32.xlu1 %v4338_v44, %s9366_s20  ;;  %4388 = vrot.lane.b32.xlu0 %v4387_v21, %s5508_s7  ;;  %v3718_v21 = vstv %s7872_s27  ;;  %v4415_v44 = vstv %s7890_s23  ;;  %s7938_s27 = sld [smem:[#allocation2 + $0x11e]]  ;;  %v4467_v29 = vrot.slane %v4465_v27, 3 }
 0x471   : > { %v3720_v13 = vmul.f32 %v3718_v21, %v7048_v19  ;;  %v4416_v34 = vmul.f32 %v4415_v44, %v7781_v45  ;;  %v3719_v42 = vmul.f32 %v3718_v21, %v7525_v37  ;;  %s7965_s23 = sld [smem:[#allocation2 + $0x11f]] }
 0x473   : > { %v3724_v17 = vrot.slane %v3720_v13, 4  ;;  %v4420_v47 = vrot.slane %v4416_v34, 6  ;;  %v3723_v39 = vrot.slane %v3719_v42, 4  ;;  %v3702_v13 = vstv %s7919_s17  ;;  %s7987_s17 = sld [smem:[#allocation2 + $0xfc]] }
 0x474   : > { %4326 = vrot.lane.b32.xlu1 %v4325_v40, %s9366_s20  ;;  %4361 = vrot.lane.b32.xlu0 %v4360_v38, %s5508_s7  ;;  %v4367_v40 = vmul.f32 %v4366_v56, %v7781_v45  ;;  %v4394_v38 = vmul.f32 %v4393_v0, %v7781_v45  ;;  %s7933_s20 = sld [smem:[#allocation2 + $0x110]]  ;;  %v3731_v56 = vmul.f32 %v3729_v12, %v7048_v19 }
 0x475   : > { %v4417_v0 = vmul.f32 %v4415_v44, %v7048_v19  ;;  %v4403_v12 = vmul.f32 %v4402_v25, %v7781_v45  ;;  %v4437_v44 = vstv %s7915_s6  ;;  %v3725_v32 = vsel %vm440_vm9, %v3723_v39, %v3724_v17  ;;  %s8019_s6 = sld [smem:[#allocation2 + $0x127]] }
 0x476   : > { %v7927_v48 = vpop.permute.xlu0 %3753  ;;  %v7929_v41 = vpop.permute.xlu1 %3762  ;;  %v4396_v58 = vrot.slane %v4394_v38, 2  ;;  %v4404_v38 = vmul.f32 %v4402_v25, %v7048_v19  ;;  %v3735_v34 = vrot.slane %v3731_v56, 4  ;;  %v4438_v42 = vmul.f32 %v4437_v44, %v7781_v45 }
 0x477   : > { %v4421_v49 = vrot.slane %v4417_v0, 6  ;;  %v4407_v61 = vrot.slane %v4403_v12, 2  ;;  %v4473_v25 = vstv %s7938_s27  ;;  %v3703_v44 = vmul.f32 %v3702_v13, %v7525_v37  ;;  %s8028_s27 = sld [smem:[#allocation2 + $0x104]] }
 0x478   : > { %4379 = vrot.lane.b32.xlu1 %v4378_v53, %s5508_s7  ;;  %4432 = vrot.lane.b32.xlu0 %v4431_v10, %s5509_s4  ;;  %v4369_v10 = vrot.slane %v4367_v40, 6  ;;  %v3734_v40 = vrot.slane %v3730_v46, 4  ;;  %v4408_v27 = vrot.slane %v4404_v38, 2  ;;  %v4440_v17 = vrot.slane %v4438_v42, 7 }
 0x479   : > { %v4422_v46 = vsel %vm658_vm5, %v4420_v47, %v4421_v49  ;;  %v4507_v12 = vstv %s7950_s8  ;;  %v3727_v38 = vadd.f32 %v3725_v32, %v3703_v44  ;;  %v3709_v13 = vmul.f32 %v3708_v4, %v7525_v37  ;;  %s8039_s8 = sld [smem:[#allocation2 + $0xfd]] }
 0x47a   : > { %v7952_v21 = vpop.permute.xlu0 %3744  ;;  %v7954_v53 = vpop.permute.xlu1 %3806  ;;  %v3736_v56 = vsel %vm440_vm9, %v3734_v40, %v3735_v34  ;;  %v4446_v40 = vstv %s7957_s10  ;;  %v4474_v34 = vmul.f32 %v4473_v25, %v7781_v45  ;;  %v4475_v42 = vmul.f32 %v4473_v25, %v7048_v19  ;;  %s8047_s10 = sld [smem:[#allocation2 + $0x120]] }
 0x47b   : > { %v4447_v4 = vmul.f32 %v4446_v40, %v7781_v45 }
 0x47c   : > { %4370 = vrot.lane.b32.xlu1 %v4369_v10, %s5508_s7  ;;  %4397 = vrot.lane.b32.xlu0 %v4396_v58, %s5508_s7  ;;  %v4455_v10 = vstv %s7933_s20  ;;  %v3700_v58 = vmul.f32 %v3699_v18, %v7525_v37  ;;  %v3706_v18 = vmul.f32 %v3705_v15, %v7525_v37  ;;  %v4409_v15 = vsel %vm707_vm6, %v4407_v61, %v4408_v27  ;;  %s8022_s20 = sld [smem:[#allocation2 + $0x111]] }
 0x47d   : > { %v4456_v49 = vmul.f32 %v4455_v10, %v7781_v45  ;;  %v4540_v10 = vstv %s7965_s23  ;;  %v4508_v37 = vmul.f32 %v4507_v12, %v7781_v45  ;;  %s8051_s23 = sld [smem:[#allocation2 + $0x119]] }
 0x47e   : > { %v3794_v52 = vpop.permute.xlu0 %3793  ;;  %v3772_v31 = vpop.permute.xlu1 %3771  ;;  %v3716_v0 = vadd.f32 %v3714_v50, %v3700_v58  ;;  %v3738_v50 = vadd.f32 %v3736_v56, %v3706_v18  ;;  %v3765_v58 = vadd.f32 %v7929_v41, %v3727_v38  ;;  %v4478_v56 = vrot.slane %v4474_v34, 3 }
 0x47f   : > { %v4541_v25 = vmul.f32 %v4540_v10, %v7781_v45  ;;  %v3747_v41 = vadd.f32 %v7952_v21, %v3709_v13  ;;  %v4449_v34 = vrot.slane %v4447_v4, 7 }
 0x480   : > { %4423 = vrot.lane.b32.xlu1 %v4422_v46, %s5508_s7  ;;  %4468 = vrot.lane.b32.xlu0 %v4467_v29, %s5509_s4  ;;  %v3756_v29 = vadd.f32 %v7927_v48, %v3716_v0  ;;  %v3774_v59 = vadd.f32 %v3772_v31, %v3738_v50  ;;  %v4458_v48 = vrot.slane %v4456_v49, 3  ;;  %v3809_v31 = vadd.f32 %v7954_v53, %v3765_v58 }
 0x481   : > { %v4479_v0 = vrot.slane %v4475_v42, 3  ;;  %v4542_v49 = vmul.f32 %v4540_v10, %v7048_v19  ;;  %v4515_v10 = vstv %s7996_s9  ;;  %v4531_v58 = vstv %s7999_s22  ;;  %s8074_s9 = sld [smem:[#allocation2 + $0xa0]] }
 0x482   : > { %v3781_v47 = vpop.permute.xlu0 %3780  ;;  %v3843_v39 = vpop.permute.xlu1 %3842  ;;  %v3796_v46 = vadd.f32 %v3794_v52, %v3756_v29  ;;  %v4499_v29 = vstv %s7987_s17  ;;  %s8070_s17 = sld [smem:[#allocation2 + $0x99]] }
 0x483   : > { %v3783_v44 = vadd.f32 %v3781_v47, %v3747_v41  ;;  %v3845_v18 = vadd.f32 %v3843_v39, %v3809_v31  ;;  %v4480_v38 = vsel %vm897_vm8, %v4478_v56, %v4479_v0  ;;  %v4545_v47 = vrot.slane %v4541_v25, 4  ;;  %s8078_s22 = sld [smem:[#allocation2 + $0xc3]] }
 0x484   : > { %4410 = vrot.lane.b32.xlu1 %v4409_v15, %s5508_s7  ;;  %4441 = vrot.lane.b32.xlu0 %v4440_v17, %s5509_s4  ;;  %s8004_s7 = sld [smem:[#allocation2 + $0x10b]]  ;;  %v4486_v17 = vstv %s7982_s28  ;;  %v4546_v39 = vrot.slane %v4542_v49, 4  ;;  %v4500_v42 = vmul.f32 %v4499_v29, %v7781_v45  ;;  %v4516_v41 = vmul.f32 %v4515_v10, %v7781_v45 }
 0x485   : > { %v4487_v21 = vmul.f32 %v4486_v17, %v7781_v45  ;;  %v4488_v50 = vmul.f32 %v4486_v17, %v7048_v19  ;;  %v4532_v31 = vmul.f32 %v4531_v58, %v7781_v45  ;;  %s8061_s28 = sld [smem:[#allocation2 + $0xbc]] }
 0x486   : > { %v3834_v32 = vpop.permute.xlu0 %3833  ;;  %v3816_v61 = vpop.permute.xlu1 %3815 }
 0x487   : > { %v3836_v52 = vadd.f32 %v3834_v32, %v3796_v46  ;;  %v3818_v27 = vadd.f32 %v3816_v61, %v3774_v59  ;;  %v4547_v61 = vsel %vm440_vm9, %v4545_v47, %v4546_v39  ;;  %v4492_v4 = vrot.slane %v4488_v50, 3 }
 0x488   : > { %4459 = vrot.lane.b32.xlu1 %v4458_v48, %s5509_s4  ;;  %4510 = vrot.lane.b32.xlu0 %v4508_v37, %s9426_s11  ;;  %v4491_v37 = vrot.slane %v4487_v21, 3  ;;  %v4534_v29 = vrot.slane %v4532_v31, 4 }
 0x48a   : > { %v3825_v12 = vpop.permute.xlu0 %3824  ;;  %v3887_v40 = vpop.permute.xlu1 %3886  ;;  %v4584_v46 = vstv %s8004_s7  ;;  %s8081_s7 = sld [smem:[#allocation2 + $0xa7]] }
 0x48b   : > { %v3827_v59 = vadd.f32 %v3825_v12, %v3783_v44  ;;  %v3889_v53 = vadd.f32 %v3887_v40, %v3845_v18  ;;  %v4493_v18 = vsel %vm897_vm8, %v4491_v37, %v4492_v4  ;;  %v4624_v12 = vstv %s8019_s6  ;;  %s8087_s6 = sld [smem:[#allocation2 + $0xb5]] }
 0x48c   : > { %4450 = vrot.lane.b32.xlu1 %v4449_v34, %s5509_s4  ;;  %4481 = vrot.lane.b32.xlu0 %v4480_v38, %s5509_s4  ;;  %v4625_v50 = vmul.f32 %v4624_v12, %v7781_v45 }
 0x48e   : > { %v3878_v15 = vpop.permute.xlu0 %3877  ;;  %v3852_v13 = vpop.permute.xlu1 %3851 }
 0x48f   : > { %v3880_v48 = vadd.f32 %v3878_v15, %v3836_v52  ;;  %v3854_v32 = vadd.f32 %v3852_v13, %v3818_v27  ;;  %v4585_v52 = vmul.f32 %v4584_v46, %v7781_v45  ;;  %v4553_v27 = vstv %s8014_s5  ;;  %s8085_s5 = sld [smem:[#allocation2 + $0xa8]] }
 0x490   : > { %4502 = vrot.lane.b32.xlu1 %v4500_v42, %s9426_s11  ;;  %4548 = vrot.lane.b32.xlu0 %v4547_v61, %s9426_s11  ;;  %v4554_v49 = vmul.f32 %v4553_v27, %v7781_v45  ;;  %v4555_v17 = vmul.f32 %v4553_v27, %v7048_v19  ;;  %v4626_v13 = vmul.f32 %v4624_v12, %v7048_v19  ;;  %v4593_v61 = vstv %s8033_s30  ;;  %s8106_s30 = sld [smem:[#allocation2 + $0xae]] }
 0x491   : > { %v4587_v21 = vrot.slane %v4585_v52, 1 }
 0x492   : > { %v3865_v56 = vpop.permute.xlu0 %3864  ;;  %v3923_v25 = vpop.permute.xlu1 %3922  ;;  %v4558_v39 = vrot.slane %v4554_v49, 4  ;;  %v4559_v15 = vrot.slane %v4555_v17, 4  ;;  %v4602_v17 = vstv %s8051_s23  ;;  %s8118_s23 = sld [smem:[#allocation2 + $0xaf]] }
 0x493   : > { %v3867_v0 = vadd.f32 %v3865_v56, %v3827_v59  ;;  %v3925_v44 = vadd.f32 %v3923_v25, %v3889_v53  ;;  %v4523_v59 = vstv %s8022_s20  ;;  %v4575_v53 = vstv %s8028_s27  ;;  %s8094_s20 = sld [smem:[#allocation2 + $0xc4]] }
 0x494   : > { %4494 = vrot.lane.b32.xlu1 %v4493_v18, %s5509_s4  ;;  %4518 = vrot.lane.b32.xlu0 %v4516_v41, %s9426_s11  ;;  %s9427_s4 = smov 122   ;;  %v4524_v58 = vmul.f32 %v4523_v59, %v7781_v45  ;;  %v4576_v46 = vmul.f32 %v4575_v53, %v7781_v45  ;;  %v4560_v4 = vsel %vm440_vm9, %v4558_v39, %v4559_v15  ;;  %v4629_v56 = vrot.slane %v4625_v50, 5  ;;  %s8101_s27 = sld [smem:[#allocation2 + $0xbd]] }
 0x495   : > { %v4630_v25 = vrot.slane %v4626_v13, 5  ;;  %v4611_v41 = vstv %s8047_s10  ;;  %v4594_v18 = vmul.f32 %v4593_v61, %v7781_v45  ;;  %v3424_v61 = vstv %s8070_s17  ;;  %s8114_s10 = sld [smem:[#allocation2 + $0xf7]] }
 0x496   : > { %v3914_v40 = vpop.permute.xlu0 %3913  ;;  %v3896_v34 = vpop.permute.xlu1 %3895  ;;  %v4578_v27 = vrot.slane %v4576_v46, 1  ;;  %s8127_s17 = sld [smem:[#allocation2 + $0x9a]] }
 0x497   : > { %v3916_v38 = vadd.f32 %v3914_v40, %v3880_v48  ;;  %v3898_v47 = vadd.f32 %v3896_v34, %v3854_v32  ;;  %v4566_v48 = vstv %s8039_s8  ;;  %v4631_v12 = vsel %vm360_vm1, %v4629_v56, %v4630_v25  ;;  %s8110_s8 = sld [smem:[#allocation2 + $0xa1]] }
 0x498   : > { %4535 = vrot.lane.b32.xlu1 %v4534_v29, %s9426_s11  ;;  %4588 = vrot.lane.b32.xlu0 %v4587_v21, %s9427_s4  ;;  %v4567_v49 = vmul.f32 %v4566_v48, %v7781_v45  ;;  %v4612_v40 = vmul.f32 %v4611_v41, %v7781_v45  ;;  %v4613_v34 = vmul.f32 %v4611_v41, %v7048_v19  ;;  %v4596_v59 = vrot.slane %v4594_v18, 1 }
 0x499   : > { %v3432_v56 = vstv %s8074_s9  ;;  %v3478_v41 = vstv %s8078_s22  ;;  %s8133_s9 = sld [smem:[#allocation2 + $0x11a]] }
 0x49a   : > { %v3905_v42 = vpop.permute.xlu0 %3904  ;;  %v3965_v10 = vpop.permute.xlu1 %3964  ;;  %v4569_v53 = vrot.slane %v4567_v49, 5  ;;  %v4616_v15 = vrot.slane %v4612_v40, 5  ;;  %v4617_v13 = vrot.slane %v4613_v34, 5  ;;  %v3433_v18 = vmul.f32 %v3432_v56, %v7274_v62  ;;  %s8137_s22 = sld [smem:[#allocation2 + $0xb6]] }
 0x49b   : > { %v3907_v32 = vadd.f32 %v3905_v42, %v3867_v0  ;;  %v3967_v37 = vadd.f32 %v3965_v10, %v3925_v44  ;;  %v3440_v49 = vstv %s8081_s7  ;;  %v3456_v40 = vstv %s8087_s6  ;;  %s8142_s7 = sld [smem:[#allocation2 + $0xfe]] }
 0x49c   : > { %4526 = vrot.lane.b32.xlu1 %v4524_v58, %s9426_s11  ;;  %4561 = vrot.lane.b32.xlu0 %v4560_v4, %s9426_s11  ;;  %v4618_v4 = vsel %vm360_vm1, %v4616_v15, %v4617_v13  ;;  %v3479_v34 = vmul.f32 %v3478_v41, %v7274_v62  ;;  %s8157_s6 = sld [smem:[#allocation2 + $0x10c]] }
 0x49e   : > { %v3957_v31 = vpop.permute.xlu0 %3956  ;;  %v3936_v52 = vpop.permute.xlu1 %3935 }
 0x49f   : > { %v3959_v0 = vadd.f32 %v3957_v31, %v3916_v38  ;;  %v3938_v44 = vadd.f32 %v3936_v52, %v3898_v47  ;;  %v4603_v38 = vmul.f32 %v4602_v17, %v7781_v45  ;;  %v3465_v47 = vstv %s8061_s28  ;;  %s8124_s28 = sld [smem:[#allocation2 + $0x113]] }
 0x4a0   : > { %4579 = vrot.lane.b32.xlu1 %v4578_v27, %s9427_s4  ;;  %4632 = vrot.lane.b32.xlu0 %v4631_v12, %s9427_s4  ;;  %v3466_v42 = vmul.f32 %v3465_v47, %v7274_v62  ;;  %v3467_v48 = vmul.f32 %v3465_v47, %v7048_v19  ;;  %v3425_v27 = vmul.f32 %v3424_v61, %v7274_v62  ;;  %v3509_v12 = vstv %s8085_s5  ;;  %s8149_s5 = sld [smem:[#allocation2 + $0x105]] }
 0x4a1   : > { %v4605_v46 = vrot.slane %v4603_v38, 1  ;;  %v3510_v38 = vmul.f32 %v3509_v12, %v7274_v62  ;;  %v3457_v47 = vmul.f32 %v3456_v40, %v7274_v62  ;;  %v3518_v40 = vstv %s8118_s23  ;;  %s8229_s23 = sld [smem:[#allocation2]] }
 0x4a2   : > { %v3949_v29 = vpop.permute.xlu0 %3948  ;;  %v4003_v21 = vpop.permute.xlu1 %4002  ;;  %v3470_v25 = vrot.slane %v3466_v42, 4  ;;  %v3471_v17 = vrot.slane %v3467_v48, 4  ;;  %v3483_v42 = vrot.slane %v3479_v34, 4 }
 0x4a3   : > { %v3951_v39 = vadd.f32 %v3949_v29, %v3907_v32  ;;  %v4005_v50 = vadd.f32 %v4003_v21, %v3967_v37  ;;  %v3480_v29 = vmul.f32 %v3478_v41, %v7048_v19  ;;  %v3500_v41 = vstv %s8110_s8  ;;  %s4952_s8 = sld [smem:[#allocation2 + $0x7]] }
 0x4a4   : > { %4597 = vrot.lane.b32.xlu0 %v4596_v59, %s9427_s4  ;;  %4570 = vrot.lane.b32.xlu1 %v4569_v53, %s9427_s4  ;;  %v3441_v53 = vmul.f32 %v3440_v49, %v7274_v62  ;;  %v3472_v13 = vsel %vm440_vm9, %v3470_v25, %v3471_v17  ;;  %v3448_v25 = vstv %s8106_s30  ;;  %v3536_v49 = vstv %s8101_s27  ;;  %s4954_s27 = sld [smem:[#allocation2 + $0x15]] }
 0x4a5   : > { %v3501_v12 = vmul.f32 %v3500_v41, %v7274_v62  ;;  %v4190_v34 = vstv %s8124_s28  ;;  %v4197_v41 = vstv %s8133_s9  ;;  %s4957_s30 = sld [smem:[#allocation2 + $0x2a]] }
 0x4a6   : > { %v3990_v10 = vpop.permute.xlu0 %3989  ;;  %v3973_v58 = vpop.permute.xlu1 %3972  ;;  %s8238_s28 = sld [smem:[#allocation2 + $0x31]] }
 0x4a7   : > { %v3992_v32 = vadd.f32 %v3990_v10, %v3959_v0  ;;  %v3975_v37 = vadd.f32 %v3973_v58, %v3938_v44  ;;  %v3484_v10 = vrot.slane %v3480_v29, 4  ;;  %s8249_s9 = sld [smem:[#allocation2 + $0x38]] }
 0x4a8   : > { %4606 = vrot.lane.b32.xlu0 %v4605_v46, %s9427_s4  ;;  %4619 = vrot.lane.b32.xlu1 %v4618_v4, %s9427_s4 }
 0x4aa   : > { %v3981_v31 = vpop.permute.xlu0 %3980  ;;  %v4043_v52 = vpop.permute.xlu1 %4042 }
 0x4ab   : > { %v3983_v0 = vadd.f32 %v3981_v31, %v3951_v39  ;;  %v4045_v44 = vadd.f32 %v4043_v52, %v4005_v50  ;;  %v3549_v39 = vstv %s8094_s20  ;;  %v4162_v31 = vstv %s8114_s10  ;;  %s8162_s20 = sld [smem:[#allocation2 + $0x121]] }
 0x4ac   : > { %3427 = vrot.lane.b32.xlu0 %v3425_v27, %s9426_s11  ;;  %3435 = vrot.lane.b32.xlu1 %v3433_v18, %s9426_s11  ;;  %v3550_v58 = vmul.f32 %v3549_v39, %v7274_v62  ;;  %v3551_v46 = vmul.f32 %v3549_v39, %v7048_v19  ;;  %v3485_v52 = vsel %vm440_vm9, %v3483_v42, %v3484_v10  ;;  %v3503_v10 = vrot.slane %v3501_v12, 1  ;;  %s4953_s10 = sld [smem:[#allocation2 + $0xe]] }
 0x4ad   : > { %v3538_v39 = vmul.f32 %v3536_v49, %v7048_v19 }
 0x4ae   : > { %v4034_v21 = vpop.permute.xlu0 %4033  ;;  %v4016_v59 = vpop.permute.xlu1 %4015  ;;  %v3554_v27 = vrot.slane %v3550_v58, 5  ;;  %v3555_v18 = vrot.slane %v3551_v46, 5 }
 0x4af   : > { %v4036_v50 = vadd.f32 %v4034_v21, %v3992_v32  ;;  %v4018_v15 = vadd.f32 %v4016_v59, %v3975_v37  ;;  %v3512_v32 = vrot.slane %v3510_v38, 1  ;;  %v3459_v37 = vrot.slane %v3457_v47, 4 }
 0x4b0   : > { %3443 = vrot.lane.b32.xlu0 %v3441_v53, %s9426_s11  ;;  %3473 = vrot.lane.b32.xlu1 %v3472_v13, %s9426_s11  ;;  %v4163_v59 = vmul.f32 %v4162_v31, %v7781_v45  ;;  %v3491_v53 = vstv %s8127_s17  ;;  %v3537_v38 = vmul.f32 %v3536_v49, %v7274_v62  ;;  %v3519_v47 = vmul.f32 %v3518_v40, %v7274_v62  ;;  %s8243_s17 = sld [smem:[#allocation2 + $0x86]] }
 0x4b1   : > { %v3556_v42 = vsel %vm360_vm1, %v3554_v27, %v3555_v18  ;;  %v3492_v58 = vmul.f32 %v3491_v53, %v7274_v62  ;;  %v3542_v49 = vrot.slane %v3538_v39, 5  ;;  %v4183_v53 = vstv %s8157_s6  ;;  %s8283_s6 = sld [smem:[#allocation2 + $0x6a]] }
 0x4b2   : > { %v4025_v61 = vpop.permute.xlu0 %4024  ;;  %v4087_v48 = vpop.permute.xlu1 %4086  ;;  %v4208_v39 = vstv %s8162_s20  ;;  %s8291_s20 = sld [smem:[#allocation2 + $0x78]] }
 0x4b3   : > { %v4027_v4 = vadd.f32 %v4025_v61, %v3983_v0  ;;  %v4089_v56 = vadd.f32 %v4087_v48, %v4045_v44  ;;  %v3449_v44 = vmul.f32 %v3448_v25, %v7274_v62  ;;  %v4165_v61 = vrot.slane %v4163_v59, 7 }
 0x4b4   : > { %3513 = vrot.lane.b32.xlu0 %v3512_v32, %s9427_s4  ;;  %3460 = vrot.lane.b32.xlu1 %v3459_v37, %s9426_s11  ;;  %v3527_v32 = vstv %s8137_s22  ;;  %v4169_v37 = vstv %s8142_s7  ;;  %v3541_v25 = vrot.slane %v3537_v38, 5  ;;  %v4199_v38 = vmul.f32 %v4197_v41, %v7048_v19  ;;  %s8257_s22 = sld [smem:[#allocation2 + $0x8d]] }
 0x4b5   : > { %s8267_s7 = sld [smem:[#allocation2 + $0x7f]] }
 0x4b6   : > { %v4074_v17 = vpop.permute.xlu0 %4073  ;;  %v4052_v0 = vpop.permute.xlu1 %4051 }
 0x4b7   : > { %v4076_v29 = vadd.f32 %v4074_v17, %v4036_v50  ;;  %v4054_v21 = vadd.f32 %v4052_v0, %v4018_v15  ;;  %v4191_v50 = vmul.f32 %v4190_v34, %v7781_v45  ;;  %v3528_v0 = vmul.f32 %v3527_v32, %v7274_v62 }
 0x4b8   : > { %3486 = vrot.lane.b32.xlu0 %v3485_v52, %s9426_s11  ;;  %3451 = vrot.lane.b32.xlu1 %v3449_v44, %s9426_s11  ;;  %v3521_v52 = vrot.slane %v3519_v47, 1  ;;  %v4198_v44 = vmul.f32 %v4197_v41, %v7781_v45  ;;  %v4170_v34 = vmul.f32 %v4169_v37, %v7781_v45  ;;  %v3543_v47 = vsel %vm360_vm1, %v3541_v25, %v3542_v49  ;;  %s4955_s11 = sld [smem:[#allocation2 + $0x1c]] }
 0x4b9   : > { %v4193_v27 = vrot.slane %v4191_v50, 3  ;;  %v4203_v32 = vrot.slane %v4199_v38, 3  ;;  %v4210_v37 = vmul.f32 %v4208_v39, %v7048_v19 }
 0x4ba   : > { %v4061_v15 = vpop.permute.xlu0 %4060  ;;  %v4123_v13 = vpop.permute.xlu1 %4122 }
 0x4bb   : > { %v4063_v46 = vadd.f32 %v4061_v15, %v4027_v4  ;;  %v4125_v48 = vadd.f32 %v4123_v13, %v4089_v56  ;;  %v3494_v4 = vrot.slane %v3492_v58, 5  ;;  %v4176_v56 = vstv %s8149_s5  ;;  %s8273_s5 = sld [smem:[#allocation2 + $0x63]] }
 0x4bc   : > { %3557 = vrot.lane.b32.xlu0 %v3556_v42, %s9427_s4  ;;  %3504 = vrot.lane.b32.xlu1 %v3503_v10, %s9427_s4  ;;  %v3530_v13 = vrot.slane %v3528_v0, 1  ;;  %v4209_v42 = vmul.f32 %v4208_v39, %v7781_v45  ;;  %v4172_v58 = vrot.slane %v4170_v34, 7 }
 0x4bd   : > { %v4167_v31 = vadd.f32 %v4165_v61, %v4125_v48  ;;  %v4184_v48 = vmul.f32 %v4183_v53, %v7781_v45 }
 0x4be   : > { %v4114_v18 = vpop.permute.xlu0 %4113  ;;  %v4096_v17 = vpop.permute.xlu1 %4095 }
 0x4bf   : > { %v4116_v12 = vadd.f32 %v4114_v18, %v4076_v29  ;;  %v4098_v40 = vadd.f32 %v4096_v17, %v4054_v21  ;;  %v8175_v59 = vadd.f32 %v4193_v27, %v4167_v31  ;;  %v4177_v29 = vmul.f32 %v4176_v56, %v7781_v45 }
 0x4c0   : > { %3522 = vrot.lane.b32.xlu0 %v3521_v52, %s9427_s4  ;;  %3495 = vrot.lane.b32.xlu1 %v3494_v4, %s9427_s4  ;;  %v4202_v21 = vrot.slane %v4198_v44, 3  ;;  %v4213_v27 = vrot.slane %v4209_v42, 3  ;;  %v4186_v4 = vrot.slane %v4184_v48, 3  ;;  %v4214_v45 = vrot.slane %v4210_v37, 3 }
 0x4c1   : > { %v4179_v31 = vrot.slane %v4177_v29, 7 }
 0x4c2   : > { %v4132_v50 = vpop.permute.xlu0 %4131  ;;  %v4105_v15 = vpop.permute.xlu1 %4104  ;;  %v4204_v49 = vsel %vm897_vm8, %v4202_v21, %v4203_v32  ;;  %v4215_v34 = vsel %vm897_vm8, %v4213_v27, %v4214_v45  ;;  %v433_v32 = vstv %s4955_s11  ;;  %v423_v45 = vstv %s4953_s10  ;;  %s8297_s11 = sld [smem:[#allocation2 + $0x71]] }
 0x4c3   : > { %v4134_v10 = vadd.f32 %v4132_v50, %v4098_v40  ;;  %v4107_v61 = vadd.f32 %v4105_v15, %v4063_v46  ;;  %v435_v27 = vmul.f32 %v433_v32, %v5767_v16  ;;  %v426_v9 = vmul.f32 %v423_v45, %v5780_v24  ;;  %s8340_s10 = sld [smem:[#allocation2 + $0xa2]] }
 0x4c4   : > { %3531 = vrot.lane.b32.xlu0 %v3530_v13, %s9427_s4  ;;  %3544 = vrot.lane.b32.xlu1 %v3543_v47, %s9427_s4  ;;  %s4956_s4 = sld [smem:[#allocation2 + $0x23]] }
 0x4c5   : > { %v4174_v25 = vadd.f32 %v4172_v58, %v4134_v10  ;;  %v442_v51 = vrot.slane %v435_v27, 4 }
 0x4c6   : > { %v4145_v41 = vpop.permute.xlu0 %4144  ;;  %v4158_v52 = vpop.permute.xlu1 %4157 }
 0x4c7   : > { %v4147_v18 = vadd.f32 %v4145_v41, %v4107_v61  ;;  %v4160_v17 = vadd.f32 %v4158_v52, %v4116_v12  ;;  %v8190_v46 = vadd.f32 %v4204_v49, %v4174_v25  ;;  %v436_v25 = vmul.f32 %v433_v32, %v5780_v24 }
 0x4c8   : > { %v470_v49 = vstv %s4957_s30  ;;  %s8326_s30 = sld [smem:[#allocation2 + $0xbe]] }
 0x4c9   : > { %v4181_v0 = vadd.f32 %v4179_v31, %v4147_v18  ;;  %v8192_v56 = vadd.f32 %v4186_v4, %v4160_v17  ;;  %v428_v18 = vstv %s4954_s27  ;;  %v418_v4 = vstv %s4952_s8  ;;  %s8318_s27 = sld [smem:[#allocation2 + $0xb7]] }
 0x4ca   : > { %v8194_v44 = vpop.permute.xlu0 %4222  ;;  %v8196_v40 = vpop.permute.xlu1 %4230  ;;  %v451_v37 = vstv %s4956_s4  ;;  %v421_v3 = vmul.f32 %v418_v4, %v5780_v24  ;;  %v420_v7 = vmul.f32 %v418_v4, %v5767_v16  ;;  %s8308_s4 = sld [smem:[#allocation2 + $0x94]] }
 0x4cb   : > { %v8199_v53 = vadd.f32 %v4215_v34, %v4181_v0  ;;  %v454_v41 = vmul.f32 %v451_v37, %v5780_v24  ;;  %v8241_v17 = vmul.f32 %v451_v37, %v5767_v16  ;;  %v473_v0 = vmul.f32 %v470_v49, %v5780_v24  ;;  %s8333_s8 = sld [smem:[#allocation2 + $0x9b]] }
 0x4cc   : > { %v444_v34 = vrot.slane %v436_v25, 4  ;;  %v8260_v25 = vmul.f32 %v428_v18, %v5764_v14  ;;  %v452_v27 = vmul.f32 %v451_v37, %v5764_v14 }
 0x4ce   : > { %v8201_v38 = vpop.permute.xlu0 %4238  ;;  %v8203_v47 = vpop.permute.xlu1 %4268 }
 0x4d2   : > { %v8205_v12 = vpop.permute.xlu0 %4308  ;;  %v8207_v39 = vpop.permute.xlu1 %4255 }
 0x4d6   : > { %v8209_v50 = vpop.permute.xlu0 %4281  ;;  %v8211_v15 = vpop.permute.xlu1 %4246 }
 0x4da   : > { %v8213_v13 = vpop.permute.xlu0 %4352  ;;  %v8215_v29 = vpop.permute.xlu1 %4299 }
 0x4db   : > { %9428 = vst [vmem:[#allocation301_spill] sm:$0xff] %v8215_v29 }
 0x4de   : > { %v8217_v21 = vpop.permute.xlu0 %4317  ;;  %v8219_v42 = vpop.permute.xlu1 %4290 }
 0x4df   : > { %9429 = vst [vmem:[#allocation302_spill] sm:$0xff] %v8217_v21  ;;  %9430 = vst [vmem:[#allocation303_spill] sm:$0xff] %v8219_v42 }
 0x4e2   : > { %v8221_v10 = vpop.permute.xlu0 %4388  ;;  %v8223_v58 = vpop.permute.xlu1 %4339 }
 0x4e3   : > { %9431 = vst [vmem:[#allocation304_spill] sm:$0xff] %v8221_v10  ;;  %9432 = vst [vmem:[#allocation305_spill] sm:$0xff] %v8223_v58  ;;  %v445_v10 = vsel %vm440_vm9, %v442_v51, %v444_v34  ;;  %v1458_v34 = vstv %s8238_s28  ;;  %s8389_s28 = sld [smem:[#allocation2 + $0xb0]] }
 0x4e6   : > { %v8225_v61 = vpop.permute.xlu0 %4361  ;;  %v8227_v48 = vpop.permute.xlu1 %4326 }
 0x4e7   : > { %9433 = vst [vmem:[#allocation306_spill] sm:$0xff] %v8225_v61  ;;  %9434 = vst [vmem:[#allocation307_spill] sm:$0xff] %v8227_v48  ;;  %v472_v48 = vmul.f32 %v470_v49, %v5767_v16  ;;  %v434_v61 = vmul.f32 %v433_v32, %v5764_v14  ;;  %v414_v32 = vstv %s8229_s23  ;;  %s8371_s23 = sld [smem:[#allocation2 + $0xa9]] }
 0x4e9   : > { %v478_v29 = vrot.slane %v472_v48, 4  ;;  %v2643_v48 = vstv %s8243_s17  ;;  %s8504_s17 = sld [smem:[#allocation2 + $0x3f]] }
 0x4ea   : > { %v8233_v31 = vpop.permute.xlu0 %4432  ;;  %v8235_v52 = vpop.permute.xlu1 %4379 }
 0x4eb   : > { %9435 = vst [vmem:[#allocation308_spill] sm:$0xff] %v8233_v31  ;;  %9436 = vst [vmem:[#allocation309_spill] sm:$0xff] %v8235_v52  ;;  %v461_v31 = vrot.slane %v454_v41, 4  ;;  %v471_v52 = vmul.f32 %v470_v49, %v5764_v14  ;;  %v8263_v41 = vmul.f32 %v428_v18, %v5780_v24  ;;  %v459_v49 = vrot.slane %v8241_v17, 4 }
 0x4ec   : > { %v441_v24 = vrot.slane %v434_v61, 4  ;;  %v424_v61 = vmul.f32 %v423_v45, %v5764_v14 }
 0x4ed   : > { %v462_v42 = vsel %vm440_vm9, %v459_v49, %v461_v31  ;;  %v477_v21 = vrot.slane %v471_v52, 4  ;;  %v468_v36 = vadd.f32 %v461_v31, %v421_v3  ;;  %v8288_v52 = vmul.f32 %v428_v18, %v5767_v16 }
 0x4ee   : > { %v8251_v58 = vpop.permute.xlu0 %4397  ;;  %v8253_v35 = vpop.permute.xlu1 %4370  ;;  %v458_v3 = vrot.slane %v452_v27, 4  ;;  %v443_v31 = vsel %vm440_vm9, %v441_v24, %v442_v51  ;;  %v8303_v18 = vmul.f32 %v1458_v34, %v6327_v54  ;;  %v425_v51 = vmul.f32 %v423_v45, %v5767_v16 }
 0x4ef   : > { %9437 = vst [vmem:[#allocation310_spill] sm:$0xff] %v8251_v58  ;;  %9438 = vst [vmem:[#allocation311_spill] sm:$0xff] %v8253_v35  ;;  %v480_v35 = vrot.slane %v473_v0, 4  ;;  %v416_v58 = vmul.f32 %v414_v32, %v5767_v16  ;;  %v8322_v24 = vstv %s8249_s9  ;;  %v8363_v16 = vadd.f32 %v6059_v43, %v468_v36  ;;  %s8518_s9 = sld [smem:[#allocation2 + $0x128]] }
 0x4f0   : > { %9441 = vst [vmem:[#allocation314_spill] sm:$0xff] %v8288_v52  ;;  %9443 = vst [vmem:[#allocation316_spill] sm:$0xff] %v8303_v18  ;;  %v8306_v52 = vmul.f32 %v1458_v34, %v6320_v8  ;;  %v2636_v34 = vstv %s8267_s7  ;;  %v9450_v36 = vrot.slane %v8303_v18, 7  ;;  %v3094_v18 = vstv %s8333_s8  ;;  %s8554_s7 = sld [smem:[#allocation2 + $0x4d]] }
 0x4f1   : > { %v8279_v0 = vadd.f32 %v480_v35, %v426_v9  ;;  %v8285_v37 = vadd.f32 %v445_v10, %v416_v58  ;;  %v415_v9 = vmul.f32 %v414_v32, %v5764_v14  ;;  %v2645_v10 = vmul.f32 %v2643_v48, %v7048_v19 }
 0x4f2   : > { %v8275_v60 = vpop.permute.xlu0 %4468  ;;  %v8277_v17 = vpop.permute.xlu1 %4423  ;;  %v479_v58 = vsel %vm440_vm9, %v477_v21, %v478_v29  ;;  %9444 = vst [vmem:[#allocation317_spill] sm:$0xff] %v8306_v52  ;;  %v419_v32 = vmul.f32 %v418_v4, %v5764_v14  ;;  %v481_v27 = vsel %vm440_vm9, %v478_v29, %v480_v35  ;;  %v2644_v21 = vmul.f32 %v2643_v48, %v7036_v30 }
 0x4f3   : > { %9439 = vst [vmem:[#allocation312_spill] sm:$0xff] %v8277_v17  ;;  %9440 = vst [vmem:[#allocation313_spill] sm:$0xff] %v8285_v37  ;;  %v8294_v17 = vadd.f32 %v462_v42, %v420_v7  ;;  %v8330_v14 = vadd.f32 %v443_v31, %v415_v9  ;;  %v460_v35 = vsel %vm440_vm9, %v458_v3, %v459_v49  ;;  %v2649_v29 = vrot.slane %v2645_v10, 4 }
 0x4f4   : > { %v8335_v4 = vadd.f32 %v481_v27, %v425_v51  ;;  %v9120_v45 = vrot.slane %v8306_v52, 7  ;;  %v8348_v49 = vmul.f32 %v8322_v24, %v6320_v8  ;;  %v2637_v3 = vmul.f32 %v2636_v34, %v7036_v30 }
 0x4f5   : > { %9442 = vst [vmem:[#allocation315_spill] sm:$0xff] %v8294_v17  ;;  %v2654_v17 = vstv %s8257_s22  ;;  %9446 = vst [vmem:[#allocation319_spill] sm:$0xff] %v8330_v14  ;;  %v2627_v10 = vstv %s8283_s6  ;;  %v8354_v31 = vadd.f32 %v6052_v26, %v8260_v25  ;;  %v8360_v27 = vadd.f32 %v460_v35, %v419_v32  ;;  %s8528_s22 = sld [smem:[#allocation2 + $0x46]] }
 0x4f6   : > { %v8310_v7 = vpop.permute.xlu0 %4441  ;;  %v8312_v42 = vpop.permute.xlu1 %4410  ;;  %v2656_v37 = vmul.f32 %v2654_v17, %v7048_v19  ;;  %9447 = vst [vmem:[#allocation320_spill] sm:$0xff] %v8335_v4  ;;  %v2655_v48 = vmul.f32 %v2654_v17, %v7036_v30  ;;  %v8358_v17 = vadd.f32 %v6057_v11, %v8263_v41  ;;  %v8367_v34 = vmul.f32 %v8322_v24, %v6327_v54  ;;  %s8611_s6 = sld [smem:[#allocation2 + $0x5b]] }
 0x4f7   : > { %9445 = vst [vmem:[#allocation318_spill] sm:$0xff] %v8312_v42  ;;  %v8328_v42 = vadd.f32 %v479_v58, %v424_v61  ;;  %v2648_v58 = vrot.slane %v2644_v21, 4  ;;  %9448 = vst [vmem:[#allocation321_spill] sm:$0xff] %v8354_v31  ;;  %v2624_v21 = vstv %s8273_s5  ;;  %v2630_v11 = vstv %s8297_s11  ;;  %s8584_s5 = sld [smem:[#allocation2 + $0x54]]  ;;  %s5262_s11 = sshll.u32 %s5559_s16, 9 }
 0x4f8   : > { %9449 = vst [vmem:[#allocation322_spill] sm:$0xff] %v8360_v27  ;;  %v2660_v51 = vrot.slane %v2656_v37, 4  ;;  %v2659_v25 = vrot.slane %v2655_v48, 4  ;;  %v2628_v41 = vmul.f32 %v2627_v10, %v7036_v30  ;;  %v3087_v37 = vstv %s8308_s4  ;;  %s4821_s4 = sshll.u32 %s5697_s26, 4  ;;  %s8785_s8 = scalar_lea.hbm %s9096_s3, %s5262_s11  ;;  %s8787_s4 = int_to_ptr.vmem [resolvable:$true] %s4821_s4 }
 0x4f9   : > { %v2650_v26 = vsel %vm440_vm9, %v2648_v58, %v2649_v29  ;;  %v8385_v35 = vsel %vm823_vm7, %v9450_v36, %v9120_v45  ;;  %v2639_v58 = vrot.slane %v2637_v3, 4  ;;  %v2633_v48 = vstv %s8291_s20  ;;  %s8651_s20 = sld [smem:[#allocation2 + $0xc5]]  ;;  %s4792_s26 = scalar_lea.sflag [#allocation9], %s5654_s19 }
 0x4fa   : > { %v8342_v61 = vpop.permute.xlu0 %4510  ;;  %v8344_v9 = vpop.permute.xlu1 %4459  ;;  %v2661_v10 = vsel %vm440_vm9, %v2659_v25, %v2660_v51  ;;  %v2652_v4 = vadd.f32 %v2650_v26, %v2628_v41  ;;  %v3122_v27 = vstv %s8318_s27  ;;  %v3133_v31 = vstv %s8326_s30 }
 0x4fb   : > { %v2625_v14 = vmul.f32 %v2624_v21, %v7036_v30  ;;  %v2631_v52 = vmul.f32 %v2630_v11, %v7036_v30  ;;  %v8398_v36 = vmul.f32 %v3087_v37, %v7274_v62  ;;  %v8402_v3 = vadd.f32 %v6065_v55, %v8279_v0 }
 0x4fc   : > { %v2634_v45 = vmul.f32 %v2633_v48, %v7036_v30  ;;  %v2690_v51 = vadd.f32 %v7418_v57, %v2652_v4  ;;  %v3101_v26 = vstv %s8340_s10  ;;  %v8412_v29 = vmul.f32 %v3122_v27, %v7274_v62  ;;  %s5401_s10 = scalar_lea.vmem %s8787_s4, 512 }
 0x4fd   : > { %v2641_v11 = vadd.f32 %v2639_v58, %v2625_v14  ;;  %v2663_v41 = vadd.f32 %v2661_v10, %v2631_v52  ;;  %v4233_v55 = vadd.f32 %v8196_v40, %v8175_v59  ;;  %v8418_v30 = vmul.f32 %v3094_v18, %v7274_v62  ;;  %p5402_p12 = scmp.ne.s32.totalorder %s8787_s4, %s5401_s10 }
 0x4fe   : > { %v8376_v32 = vpop.permute.xlu0 %4481  ;;  %v8378_v43 = vpop.permute.xlu1 %4450  ;;  %v2734_v0 = vadd.f32 %v7444_v2, %v2690_v51  ;;  %v8421_v57 = vmul.f32 %v3122_v27, %v7048_v19  ;;  %v8426_v4 = vmul.f32 %v3133_v31, %v7274_v62  ;;  %v3090_v52 = vrot.slane %v8398_v36, 7 }
 0x4ff   : > { %v8430_v14 = vmul.f32 %v3101_v26, %v7274_v62  ;;  %v3108_v37 = vstv %s8371_s23  ;;  %v4271_v59 = vadd.f32 %v8203_v47, %v4233_v55  ;;  %v2681_v2 = vadd.f32 %v7401_v5, %v2641_v11  ;;  %p5403_p7 = pnand %p5402_p12, %p9624_p13  ;;  %s5513_s23 = smov [#allocation8]  }
 0x500   : > { %v2672_v40 = vadd.f32 %v7403_v20, %v2634_v45  ;;  %v2699_v18 = vadd.f32 %v7416_v63, %v2663_v41  ;;  %v2770_v27 = vadd.f32 %v7465_v22, %v2734_v0  ;;  %v3115_v10 = vstv %s8389_s28  ;;  %s5405_s28 = sshll.u32 %s5513_s23, 4  ;;  %s5406_s28 = int_to_ptr.vmem [resolvable:$false] %s5405_s28 }
 0x501   : > { %v4225_v51 = vadd.f32 %v8194_v44, %v8192_v56  ;;  %v4241_v26 = vadd.f32 %v8201_v38, %v8190_v46  ;;  %v4311_v47 = vadd.f32 %v8205_v12, %v4271_v59  ;;  %v2721_v5 = vadd.f32 %v7431_v33, %v2681_v2  ;;  %v9451_v38 = vld [vmem:[#allocation242_spill] sm:$0xff]  ;;  %v9452_v33 = vld [vmem:[#allocation243_spill] sm:$0xff]  ;;  %p5404_p8 = pneg %p5403_p7  ;;  %p5408_p9 = scmp.lt.s32.totalorder %s8787_s4, %s5406_s28 }
 0x502   : > { %v8407_v25 = vpop.permute.xlu0 %4548  ;;  %v8409_v21 = vpop.permute.xlu1 %4502  ;;  %v2708_v20 = vadd.f32 %v7433_v23, %v2672_v40  ;;  %v2743_v63 = vadd.f32 %v7442_v1, %v2699_v18  ;;  %v2814_v22 = vadd.f32 %v7477_v28, %v2770_v27  ;;  %v4249_v56 = vadd.f32 %v8211_v15, %v8199_v53  ;;  %v9453_v23 = vld [vmem:[#allocation249_spill] sm:$0xff]  ;;  %v9457_v18 = vld [vmem:[#allocation304_spill] sm:$0xff] }
 0x503   : > { %v4258_v45 = vadd.f32 %v8207_v39, %v4225_v51  ;;  %v4284_v11 = vadd.f32 %v8209_v50, %v4241_v26  ;;  %v4355_v44 = vadd.f32 %v8213_v13, %v4311_v47  ;;  %v2761_v46 = vadd.f32 %v7453_v6, %v2721_v5  ;;  %v9454_v28 = vld [vmem:[#allocation301_spill] sm:$0xff]  ;;  %v9455_v39 = vld [vmem:[#allocation302_spill] sm:$0xff]  ;;  %v9456_v50 = vld [vmem:[#allocation303_spill] sm:$0xff] }
 0x504   : > { %v2752_v12 = vadd.f32 %v9451_v38, %v2708_v20  ;;  %v2779_v41 = vadd.f32 %v9452_v33, %v2743_v63  ;;  %v2850_v55 = vadd.f32 %v9453_v23, %v2814_v22  ;;  %v4293_v40 = vadd.f32 %v9456_v50, %v4249_v56  ;;  %v9458_v15 = vld [vmem:[#allocation244_spill] sm:$0xff]  ;;  %v9459_v27 = vld [vmem:[#allocation245_spill] sm:$0xff]  ;;  %v9460_v51 = vld [vmem:[#allocation246_spill] sm:$0xff] }
 0x505   : > { %v4302_v59 = vadd.f32 %v9454_v28, %v4258_v45  ;;  %v4320_v2 = vadd.f32 %v9455_v39, %v4284_v11  ;;  %v4391_v53 = vadd.f32 %v9457_v18, %v4355_v44  ;;  %v2805_v13 = vadd.f32 %v9458_v15, %v2761_v46  ;;  %v9461_v47 = vld [vmem:[#allocation252_spill] sm:$0xff]  ;;  %v9462_v20 = vld [vmem:[#allocation305_spill] sm:$0xff]  ;;  %v9463_v22 = vld [vmem:[#allocation306_spill] sm:$0xff] }
 0x506   : > { %v8438_v58 = vpop.permute.xlu0 %4518  ;;  %v8440_v48 = vpop.permute.xlu1 %4494  ;;  %v2792_v6 = vadd.f32 %v9459_v27, %v2752_v12  ;;  %v2823_v26 = vadd.f32 %v9460_v51, %v2779_v41  ;;  %v2892_v5 = vadd.f32 %v9461_v47, %v2850_v55  ;;  %v9464_v33 = vld [vmem:[#allocation307_spill] sm:$0xff]  ;;  %v9465_v23 = vld [vmem:[#allocation308_spill] sm:$0xff]  ;;  %v9470_v27 = vld [vmem:[#allocation309_spill] sm:$0xff] }
 0x507   : > { %v4342_v63 = vadd.f32 %v9462_v20, %v4302_v59  ;;  %v4364_v38 = vadd.f32 %v9463_v22, %v4320_v2  ;;  %v4329_v45 = vadd.f32 %v9464_v33, %v4293_v40  ;;  %v4435_v11 = vadd.f32 %v9465_v23, %v4391_v53  ;;  %v9466_v28 = vld [vmem:[#allocation248_spill] sm:$0xff]  ;;  %v9467_v39 = vld [vmem:[#allocation247_spill] sm:$0xff]  ;;  %v9471_v51 = vld [vmem:[#allocation310_spill] sm:$0xff] }
 0x508   : > { %v2841_v56 = vadd.f32 %v9466_v28, %v2805_v13  ;;  %v2832_v44 = vadd.f32 %v9467_v39, %v2792_v6  ;;  %v9468_v50 = vld [vmem:[#allocation251_spill] sm:$0xff]  ;;  %v9473_v20 = vld [vmem:[#allocation253_spill] sm:$0xff]  ;;  %v9474_v22 = vld [vmem:[#allocation250_spill] sm:$0xff] }
 0x509   : > { %v2863_v46 = vadd.f32 %v9468_v50, %v2823_v26  ;;  %v9469_v18 = vld [vmem:[#allocation255_spill] sm:$0xff]  ;;  %v4382_v55 = vadd.f32 %v9470_v27, %v4342_v63  ;;  %v4400_v59 = vadd.f32 %v9471_v51, %v4364_v38  ;;  %v4471_v40 = vadd.f32 %v8275_v60, %v4435_v11  ;;  %v9475_v33 = vld [vmem:[#allocation256_spill] sm:$0xff]  ;;  %v9478_v50 = vld [vmem:[#allocation318_spill] sm:$0xff] }
 0x50a   : > { %v4589_v1 = vpop.permute.xlu0 %4588  ;;  %v4536_v0 = vpop.permute.xlu1 %4535  ;;  %v2930_v12 = vadd.f32 %v9469_v18, %v2892_v5  ;;  %v9472_v47 = vld [vmem:[#allocation311_spill] sm:$0xff]  ;;  %v2884_v53 = vadd.f32 %v9473_v20, %v2841_v56  ;;  %v2876_v13 = vadd.f32 %v9474_v22, %v2832_v44  ;;  %v9477_v28 = vld [vmem:[#allocation312_spill] sm:$0xff]  ;;  %v9479_v18 = vld [vmem:[#allocation258_spill] sm:$0xff] }
 0x50b   : > { %v4373_v2 = vadd.f32 %v9472_v47, %v4329_v45  ;;  %v2900_v6 = vadd.f32 %v9475_v33, %v2863_v46  ;;  %v9476_v23 = vld [vmem:[#allocation259_spill] sm:$0xff]  ;;  %v4426_v5 = vadd.f32 %v9477_v28, %v4382_v55  ;;  %v4444_v39 = vadd.f32 %v8310_v7, %v4400_v59  ;;  %v9480_v27 = vld [vmem:[#allocation254_spill] sm:$0xff]  ;;  %v9481_v11 = vld [vmem:[#allocation261_spill] sm:$0xff] }
 0x50c   : > { %v2970_v26 = vadd.f32 %v9476_v23, %v2930_v12  ;;  %v4513_v38 = vadd.f32 %v8342_v61, %v4471_v40  ;;  %v2917_v45 = vadd.f32 %v9479_v18, %v2884_v53  ;;  %v2908_v60 = vadd.f32 %v9480_v27, %v2876_v13  ;;  %v9482_v51 = vld [vmem:[#allocation262_spill] sm:$0xff]  ;;  %v9483_v61 = vld [vmem:[#allocation263_spill] sm:$0xff]  ;;  %v9484_v40 = vld [vmem:[#allocation257_spill] sm:$0xff] }
 0x50d   : > { %v4413_v63 = vadd.f32 %v9478_v50, %v4373_v2  ;;  %v2943_v56 = vadd.f32 %v9481_v11, %v2900_v6  ;;  %v4462_v12 = vadd.f32 %v8344_v9, %v4426_v5  ;;  %v4484_v55 = vadd.f32 %v8376_v32, %v4444_v39  ;;  %v9485_v53 = vld [vmem:[#allocation266_spill] sm:$0xff]  ;;  %v9486_v13 = vld [vmem:[#allocation265_spill] sm:$0xff]  ;;  %v9489_v5 = vld [vmem:[#allocation268_spill] sm:$0xff] }
 0x50e   : > { %v4562_v15 = vpop.permute.xlu0 %4561  ;;  %v4527_v41 = vpop.permute.xlu1 %4526  ;;  %v3014_v44 = vadd.f32 %v9482_v51, %v2970_v26  ;;  %v4551_v59 = vadd.f32 %v8407_v25, %v4513_v38  ;;  %v2961_v2 = vadd.f32 %v9483_v61, %v2917_v45  ;;  %v2952_v20 = vadd.f32 %v9484_v40, %v2908_v60  ;;  %v9488_v26 = vld [vmem:[#allocation260_spill] sm:$0xff]  ;;  %v9490_v45 = vld [vmem:[#allocation269_spill] sm:$0xff]  ;;  %v9492_v11 = vld [vmem:[#allocation270_spill] sm:$0xff] }
 0x50f   : > { %v4453_v7 = vadd.f32 %v8378_v43, %v4413_v63  ;;  %v2979_v22 = vadd.f32 %v9485_v53, %v2943_v56  ;;  %v4505_v6 = vadd.f32 %v8409_v21, %v4462_v12  ;;  %v4521_v23 = vadd.f32 %v8438_v58, %v4484_v55  ;;  %v9487_v43 = vld [vmem:[#allocation267_spill] sm:$0xff]  ;;  %v9491_v27 = vld [vmem:[#allocation264_spill] sm:$0xff] }
 0x510   : > { %v3050_v33 = vadd.f32 %v9486_v13, %v3014_v44  ;;  %v4591_v32 = vadd.f32 %v4589_v1, %v4551_v59  ;;  %v3001_v25 = vadd.f32 %v9487_v43, %v2961_v2  ;;  %v2988_v28 = vadd.f32 %v9488_v26, %v2952_v20  ;;  %v9495_v43 = vld [vmem:[#allocation275_spill] sm:$0xff] }
 0x511   : > { %v4497_v9 = vadd.f32 %v8440_v48, %v4453_v7  ;;  %v3023_v39 = vadd.f32 %v9489_v5, %v2979_v22  ;;  %v3116_v50 = vmul.f32 %v3115_v10, %v7274_v62  ;;  %v4538_v21 = vadd.f32 %v4536_v0, %v4505_v6 }
 0x512   : > { %v4633_v47 = vpop.permute.xlu0 %4632  ;;  %v4580_v46 = vpop.permute.xlu1 %4579  ;;  %v4564_v58 = vadd.f32 %v4562_v15, %v4521_v23  ;;  %v3041_v1 = vadd.f32 %v9490_v45, %v3001_v25  ;;  %v3032_v60 = vadd.f32 %v9491_v27, %v2988_v28  ;;  %v3109_v51 = vmul.f32 %v3108_v37, %v7274_v62  ;;  %v9494_v62 = vld [vmem:[#allocation271_spill] sm:$0xff] }
 0x513   : > { %v4529_v18 = vadd.f32 %v4527_v41, %v4497_v9  ;;  %v4635_v48 = vadd.f32 %v4633_v47, %v4591_v32  ;;  %v3059_v56 = vadd.f32 %v9492_v11, %v3023_v39  ;;  %v3092_v10 = vadd.f32 %v3090_v52, %v3050_v33  ;;  %v9493_v41 = vld [vmem:[#allocation273_spill] sm:$0xff] }
 0x514   : > { %v4582_v44 = vadd.f32 %v4580_v46, %v4538_v21  ;;  %v3097_v15 = vrot.slane %v8418_v30, 7  ;;  %v3085_v47 = vadd.f32 %v9493_v41, %v3041_v1  ;;  %v3118_v55 = vrot.slane %v3116_v50, 3  ;;  %v9498_v21 = vld [vmem:[#allocation279_spill] sm:$0xff] }
 0x515   : > { %v3135_v7 = vmul.f32 %v3133_v31, %v7048_v19  ;;  %v3072_v37 = vadd.f32 %v9494_v62, %v3032_v60  ;;  %v4637_v2 = vrot.slane %v4635_v48, 1  ;;  %v3104_v52 = vrot.slane %v8430_v14, 7  ;;  %v9505_v62 = vld [vmem:[#allocation278_spill] sm:$0xff] }
 0x516   : > { %v4598_v63 = vpop.permute.xlu0 %4597  ;;  %v4571_v38 = vpop.permute.xlu1 %4570  ;;  %v3111_v46 = vrot.slane %v3109_v51, 3  ;;  %v3127_v30 = vrot.slane %v8412_v29, 3  ;;  %v3128_v20 = vrot.slane %v8421_v57, 3  ;;  %v3099_v53 = vadd.f32 %v3097_v15, %v3059_v56  ;;  %v9496_v57 = vld [vmem:[#allocation14_spill] sm:$0xff] }
 0x517   : > { %v4600_v0 = vadd.f32 %v4598_v63, %v4564_v58  ;;  %v4573_v12 = vadd.f32 %v4571_v38, %v4529_v18  ;;  %v3120_v22 = vadd.f32 %v3118_v55, %v3092_v10  ;;  %v1492_v13 = vstv %s8504_s17  ;;  %v9501_v10 = vld [vmem:[#allocation282_spill] sm:$0xff]  ;;  %v9503_v55 = vld [vmem:[#allocation276_spill] sm:$0xff]  ;;  %s5407_s17 = scalar_lea.vmem %s5406_s28, 1024 }
 0x518   : > { %v3113_v33 = vadd.f32 %v3111_v46, %v3085_v47  ;;  %v3138_v6 = vrot.slane %v8426_v4, 3  ;;  %v3139_v23 = vrot.slane %v3135_v7, 3  ;;  %v3106_v14 = vadd.f32 %v3104_v52, %v3072_v37  ;;  %v9497_v4 = vld [vmem:[#allocation71_spill] sm:$0xff]  ;;  %p5409_p10 = scmp.lt.s32.totalorder %s5407_s17, %s5401_s10 }
 0x519   : > { %v4641_v19 = vrot.slane %v4600_v0, 2  ;;  %v3158_v25 = vadd.f32 %v9495_v43, %v3120_v22  ;;  %v8542_v28 = vadd.f32 %v9496_v57, %v8358_v17  ;;  %v1480_v5 = vrot.slane %v8367_v34, 7  ;;  %v9499_v17 = vld [vmem:[#allocation272_spill] sm:$0xff]  ;;  %v9511_v43 = vld [vmem:[#allocation15_spill] sm:$0xff] }
 0x51a   : > { %v4607_v59 = vpop.permute.xlu0 %4606  ;;  %v4620_v61 = vpop.permute.xlu1 %4619  ;;  %v3129_v39 = vsel %vm897_vm8, %v3127_v30, %v3128_v20  ;;  %v4649_v50 = vstv %s8518_s9  ;;  %v1476_v63 = vmul.f32 %v8322_v24, %v9497_v4  ;;  %v8551_v48 = vmul.f32 %v1492_v13, %v6327_v54  ;;  %v9500_v24 = vld [vmem:[#allocation274_spill] sm:$0xff]  ;;  %v9507_v20 = vld [vmem:[#allocation280_spill] sm:$0xff]  ;;  %p5410_p2 = por %p5409_p10, %p5408_p9 }
 0x51b   : > { %v4609_v40 = vadd.f32 %v4607_v59, %v4573_v12  ;;  %v4622_v36 = vadd.f32 %v4620_v61, %v4582_v44  ;;  %v3131_v38 = vadd.f32 %v3129_v39, %v3099_v53  ;;  %v3196_v58 = vadd.f32 %v9498_v21, %v3158_v25  ;;  %v9504_v59 = vld [vmem:[#allocation277_spill] sm:$0xff]  ;;  %v9512_v39 = vld [vmem:[#allocation283_spill] sm:$0xff]  ;;  %v9514_v21 = vld [vmem:[#allocation288_spill] sm:$0xff] }
 0x51c   : > { %v1494_v45 = vmul.f32 %v1492_v13, %v6320_v8  ;;  %v3150_v1 = vadd.f32 %v9499_v17, %v3113_v33  ;;  %v3140_v27 = vsel %vm897_vm8, %v3138_v6, %v3139_v23  ;;  %v9502_v12 = vrot.slane %v8348_v49, 7  ;;  %v9509_v33 = vld [vmem:[#allocation284_spill] sm:$0xff]  ;;  %v9510_v23 = vld [vmem:[#allocation289_spill] sm:$0xff]  ;;  %p5411_p0 = pnand %p5410_p2, %p5404_p8 }
 0x51d   : > { %v4639_v31 = vadd.f32 %v4637_v2, %v4622_v36  ;;  %v4645_v29 = vrot.slane %v4609_v40, 3  ;;  %v3166_v56 = vadd.f32 %v9500_v24, %v3131_v38  ;;  %v3142_v51 = vadd.f32 %v3140_v27, %v3106_v14  ;;  %v9506_v2 = vld [vmem:[#allocation285_spill] sm:$0xff] }
 0x51e   : > { %v8535_v9 = vpop.permute.xlu0 %3427  ;;  %v8537_v32 = vpop.permute.xlu1 %3435  ;;  %v3236_v44 = vadd.f32 %v9501_v10, %v3196_v58  ;;  %v8567_v15 = vsel %vm823_vm7, %v1480_v5, %v9502_v12  ;;  %v1495_v41 = vmul.f32 %v1492_v13, %v9497_v4  ;;  %v1511_v47 = vstv %s8528_s22  ;;  %v9517_v10 = vld [vmem:[#allocation287_spill] sm:$0xff]  ;;  %v9520_v49 = vld [vmem:[#allocation297_spill] sm:$0xff] }
 0x51f   : > { %v4643_v26 = vadd.f32 %v4641_v19, %v4639_v31  ;;  %v3183_v7 = vadd.f32 %v9503_v55, %v3150_v1  ;;  %v3174_v61 = vadd.f32 %v9504_v59, %v3142_v51  ;;  %v3209_v37 = vadd.f32 %v9505_v62, %v3166_v56  ;;  %v9508_v31 = vld [vmem:[#allocation281_spill] sm:$0xff]  ;;  %v9521_v59 = vld [vmem:[#allocation18_spill] sm:$0xff] }
 0x520   : > { %v3280_v40 = vadd.f32 %v9506_v2, %v3236_v44  ;;  %v1499_v52 = vrot.slane %v8551_v48, 7  ;;  %v1483_v46 = vrot.slane %v1476_v63, 7  ;;  %v1500_v30 = vrot.slane %v1494_v45, 7  ;;  %v9513_v63 = vld [vmem:[#allocation286_spill] sm:$0xff] }
 0x521   : > { %v4647_v18 = vadd.f32 %v4645_v29, %v4643_v26  ;;  %v3227_v53 = vadd.f32 %v9507_v20, %v3183_v7  ;;  %v3218_v13 = vadd.f32 %v9508_v31, %v3174_v61  ;;  %v3245_v6 = vadd.f32 %v9509_v33, %v3209_v37  ;;  %v9524_v20 = vld [vmem:[#allocation296_spill] sm:$0xff] }
 0x522   : > { %v8558_v60 = vpop.permute.xlu0 %3443  ;;  %v3474_v11 = vpop.permute.xlu1 %3473  ;;  %v3316_v14 = vadd.f32 %v9510_v23, %v3280_v40  ;;  %v651_v25 = vadd.f32 %v9511_v43, %v8363_v16  ;;  %v1502_v29 = vrot.slane %v1495_v41, 7  ;;  %v1513_v26 = vmul.f32 %v1511_v47, %v6320_v8  ;;  %v9519_v41 = vld [vmem:[#allocation292_spill] sm:$0xff] }
 0x523   : > { %v4650_v0 = vadd.f32 %v4649_v50, %v4647_v18  ;;  %v1514_v57 = vmul.f32 %v1511_v47, %v9497_v4  ;;  %v3254_v50 = vadd.f32 %v9512_v39, %v3218_v13  ;;  %v3267_v38 = vadd.f32 %v9513_v63, %v3227_v53  ;;  %v9515_v18 = vld [vmem:[#allocation293_spill] sm:$0xff]  ;;  %v9528_v63 = vld [vmem:[#allocation19_spill] sm:$0xff] }
 0x524   : > { %v3289_v58 = vadd.f32 %v9514_v21, %v3245_v6  ;;  %v3360_v45 = vadd.f32 %v9515_v18, %v3316_v14  ;;  %v9516_v17 = vmov %v9502_v12  ;;  %v8598_v16 = vsel %vm823_vm7, %v1499_v52, %v1500_v30  ;;  %v9525_v14 = vld [vmem:[#allocation295_spill] sm:$0xff] }
 0x525   : > { %v5251_v36 = vmul.f32 -1.442695, %v4650_v0  ;;  %v8593_v1 = vsel %vm823_vm7, %v9516_v17, %v1483_v46  ;;  %v1512_v27 = vmul.f32 %v1511_v47, %v6327_v54  ;;  %v1528_v24 = vstv %s8554_s7  ;;  %v9518_v0 = vld [vmem:[#allocation290_spill] sm:$0xff]  ;;  %v9522_v47 = vld [vmem:[#allocation291_spill] sm:$0xff] }
 0x526   : > { %v3514_v22 = vpop.permute.xlu0 %3513  ;;  %v3461_v19 = vpop.permute.xlu1 %3460  ;;  %v3298_v44 = vadd.f32 %v9517_v10, %v3254_v50  ;;  %v3307_v12 = vadd.f32 %v9518_v0, %v3267_v38  ;;  %v3325_v55 = vadd.f32 %v9519_v41, %v3289_v58  ;;  %v3396_v7 = vadd.f32 %v9520_v49, %v3360_v45  ;;  %v9530_v45 = vld [vmem:[#allocation299_spill] sm:$0xff] }
 0x527   : > { %5338 = vpow2.f32 %v5251_v36  ;;  %v673_v61 = vadd.f32 %v9521_v59, %v8402_v3  ;;  %v8609_v62 = vsel %vm823_vm7, %v1500_v30, %v1502_v29  ;;  %v1519_v37 = vrot.slane %v1513_v26, 3  ;;  %v9523_v36 = vld [vmem:[#allocation294_spill] sm:$0xff] }
 0x528   : > { %v1521_v2 = vrot.slane %v1514_v57, 3  ;;  %v3338_v40 = vadd.f32 %v9522_v47, %v3298_v44  ;;  %v3351_v46 = vadd.f32 %v9523_v36, %v3307_v12  ;;  %v3369_v53 = vadd.f32 %v9524_v20, %v3325_v55  ;;  %v9526_v29 = vld [vmem:[#allocation298_spill] sm:$0xff]  ;;  %v9527_v57 = vld [vmem:[#allocation300_spill] sm:$0xff] }
 0x529   : > { %v3438_v31 = vadd.f32 %v8537_v32, %v3396_v7  ;;  %v1518_v13 = vrot.slane %v1512_v27, 3  ;;  %v1530_v33 = vmul.f32 %v1528_v24, %v6320_v8  ;;  %v8619_v3 = vmul.f32 %v1528_v24, %v9497_v4  ;;  %v9529_v32 = vld [vmem:[#allocation20_spill] sm:$0xff] }
 0x52a   : > { %v3487_v56 = vpop.permute.xlu0 %3486  ;;  %v3452_v51 = vpop.permute.xlu1 %3451  ;;  %v1529_v30 = vmul.f32 %v1528_v24, %v6327_v54  ;;  %v3378_v43 = vadd.f32 %v9525_v14, %v3338_v40  ;;  %v3387_v26 = vadd.f32 %v9526_v29, %v3351_v46  ;;  %v3409_v39 = vadd.f32 %v9527_v57, %v3369_v53  ;;  %v9535_v53 = vld [vmem:[#allocation25_spill] sm:$0xff]  ;;  %v9536_v29 = vld [vmem:[#allocation314_spill] sm:$0xff] }
 0x52b   : > { %v3476_v50 = vadd.f32 %v3474_v11, %v3438_v31  ;;  %v8626_v38 = vadd.f32 %v9528_v63, %v673_v61  ;;  %v8629_v21 = vadd.f32 %v9529_v32, %v651_v25  ;;  %v8632_v58 = vsel %vm897_vm8, %v1519_v37, %v1521_v2  ;;  %v9531_v2 = vld [vmem:[#allocation313_spill] sm:$0xff]  ;;  %v9538_v63 = vld [vmem:[#allocation319_spill] sm:$0xff]  ;;  %v9539_v32 = vld [vmem:[#allocation26_spill] sm:$0xff] }
 0x52c   : > { %v1547_v18 = vstv %s8584_s5  ;;  %v3422_v17 = vadd.f32 %v9530_v45, %v3378_v43  ;;  %v3430_v27 = vadd.f32 %v8535_v9, %v3387_v26  ;;  %v3446_v24 = vadd.f32 %v8558_v60, %v3409_v39  ;;  %v9532_v9 = vld [vmem:[#allocation21_spill] sm:$0xff]  ;;  %v9537_v26 = vld [vmem:[#allocation24_spill] sm:$0xff] }
 0x52d   : > { %v3516_v10 = vadd.f32 %v3514_v22, %v3476_v50  ;;  %v8639_v11 = vsel %vm897_vm8, %v1518_v13, %v1519_v37  ;;  %v1536_v44 = vrot.slane %v1530_v33, 3  ;;  %v1538_v0 = vrot.slane %v8619_v3, 3 }
 0x52e   : > { %v3558_v6 = vpop.permute.xlu0 %3557  ;;  %v3505_v23 = vpop.permute.xlu1 %3504  ;;  %v1535_v25 = vrot.slane %v1529_v30, 3  ;;  %v3463_v55 = vadd.f32 %v3461_v19, %v3430_v27  ;;  %v3489_v49 = vadd.f32 %v3487_v56, %v3446_v24  ;;  %v3454_v7 = vadd.f32 %v3452_v51, %v3422_v17  ;;  %v9533_v56 = vld [vmem:[#allocation315_spill] sm:$0xff]  ;;  %v9540_v17 = vld [vmem:[#allocation321_spill] sm:$0xff]  ;;  %v9541_v27 = vld [vmem:[#allocation32_spill] sm:$0xff] }
 0x52f   : > { %v3560_v59 = vadd.f32 %v3558_v6, %v3516_v10  ;;  %v530_v47 = vadd.f32 %v9532_v9, %v9531_v2  ;;  %v8645_v60 = vmul.f32 %v1547_v18, %v6320_v8  ;;  %v8648_v22 = vmul.f32 %v1547_v18, %v6327_v54  ;;  %v9534_v51 = vld [vmem:[#allocation23_spill] sm:$0xff]  ;;  %v9548_v2 = vld [vmem:[#allocation30_spill] sm:$0xff] }
 0x530   : > { %v1566_v37 = vstv %s8611_s6  ;;  %v3507_v36 = vadd.f32 %v3505_v23, %v3463_v55  ;;  %v554_v20 = vadd.f32 %v9534_v51, %v9533_v56  ;;  %v578_v31 = vadd.f32 %v9535_v53, %v8328_v42  ;;  %v9550_v56 = vld [vmem:[#allocation31_spill] sm:$0xff]  ;;  %v9551_v53 = vld [vmem:[#allocation34_spill] sm:$0xff] }
 0x531   : > { %v8660_v13 = vsel %vm897_vm8, %v1536_v44, %v1538_v0  ;;  %v8663_v33 = vsel %vm897_vm8, %v1535_v25, %v1536_v44  ;;  %v3562_v23 = vrot.slane %v3560_v59, 1  ;;  %v507_v57 = vadd.f32 %v9537_v26, %v9536_v29  ;;  %v9542_v25 = vld [vmem:[#allocation322_spill] sm:$0xff]  ;;  %v9555_v26 = vld [vmem:[#allocation37_spill] sm:$0xff] }
 0x532   : > { %v3523_v12 = vpop.permute.xlu0 %3522  ;;  %v3496_v41 = vpop.permute.xlu1 %3495  ;;  %v8668_v39 = vmul.f32 %v1547_v18, %v9497_v4  ;;  %v8671_v42 = vmul.f32 %v1566_v37, %v6320_v8  ;;  %v8674_v50 = vmul.f32 %v1566_v37, %v9497_v4  ;;  %v529_v45 = vadd.f32 %v9539_v32, %v9538_v63  ;;  %v9544_v18 = vld [vmem:[#allocation35_spill] sm:$0xff]  ;;  %v9545_v8 = vld [vmem:[#allocation16_spill] sm:$0xff]  ;;  %v9556_v63 = vld [vmem:[#allocation38_spill] sm:$0xff] }
 0x533   : > { %v3525_v46 = vadd.f32 %v3523_v12, %v3489_v49  ;;  %v3498_v19 = vadd.f32 %v3496_v41, %v3454_v7  ;;  %v603_v24 = vadd.f32 %v9541_v27, %v9540_v17  ;;  %v9543_v12 = vld [vmem:[#allocation28_spill] sm:$0xff]  ;;  %v698_v55 = vadd.f32 %v9544_v18, %v8542_v28  ;;  %v9546_v7 = vld [vmem:[#allocation27_spill] sm:$0xff]  ;;  %v9552_v28 = vld [vmem:[#allocation33_spill] sm:$0xff] }
 0x534   : > { %v5339_v61 = vpop.eup %5338  ;;  %v553_v41 = vadd.f32 %v9543_v12, %v9542_v25  ;;  %v671_v49 = vadd.f32 %v9545_v8, %v578_v31  ;;  %v8686_v4 = vmul.f32 %v1566_v37, %v6327_v54  ;;  %v604_v59 = vadd.f32 %v9546_v7, %v507_v57  ;;  %v9553_v31 = vld [vmem:[#allocation36_spill] sm:$0xff]  ;;  %v9554_v54 = vld [vmem:[#allocation17_spill] sm:$0xff]  ;;  %v9558_v27 = vld [vmem:[#allocation22_spill] sm:$0xff] }
 0x535   : > { %v4654_v40 = vadd.f32 1.0, %v5339_v61  ;;  %v3566_v10 = vrot.slane %v3525_v46, 2  ;;  %v9547_v61 = vld [vmem:[#allocation320_spill] sm:$0xff]  ;;  %v9549_v46 = vld [vmem:[#allocation29_spill] sm:$0xff]  ;;  %v696_v37 = vadd.f32 %v9554_v54, %v603_v24  ;;  %v9561_v12 = vld [vmem:[#allocation42_spill] sm:$0xff] }
 0x536   : > { %v3532_v30 = vpop.permute.xlu0 %3531  ;;  %v3545_v6 = vpop.permute.xlu1 %3544  ;;  %v579_v9 = vadd.f32 %v9548_v2, %v9547_v61  ;;  %v649_v51 = vadd.f32 %v9550_v56, %v553_v41  ;;  %v697_v32 = vadd.f32 %v9556_v63, %v604_v59  ;;  %v9560_v25 = vld [vmem:[#allocation41_spill] sm:$0xff]  ;;  %v9562_v8 = vld [vmem:[#allocation43_spill] sm:$0xff]  ;;  %v9563_v7 = vld [vmem:[#allocation44_spill] sm:$0xff] }
 0x537   : > { %5340 = vrcp.f32 %v4654_v40  ;;  %v3534_v14 = vadd.f32 %v3532_v30, %v3498_v19  ;;  %v3547_v43 = vadd.f32 %v3545_v6, %v3507_v36  ;;  %v625_v19 = vadd.f32 %v9549_v46, %v529_v45  ;;  %v9564_v61 = vld [vmem:[#allocation45_spill] sm:$0xff]  ;;  %v9566_v59 = vld [vmem:[#allocation47_spill] sm:$0xff]  ;;  %v9567_v46 = vld [vmem:[#allocation48_spill] sm:$0xff] }
 0x538   : > { %v626_v30 = vadd.f32 %v9551_v53, %v530_v47  ;;  %v3574_v6 = vstv %s8651_s20  ;;  %v795_v45 = vadd.f32 %v9558_v27, %v698_v55  ;;  %v768_v47 = vadd.f32 %v9560_v25, %v671_v49  ;;  %v9568_v56 = vld [vmem:[#allocation241_spill] sm:$0xff]  ;;  %v9575_v63 = vld [vmem:[#allocation55_spill] sm:$0xff] }
 0x539   : > { %v3564_v44 = vadd.f32 %v3562_v23, %v3547_v43  ;;  %v3570_v40 = vrot.slane %v3534_v14, 3  ;;  %v672_v23 = vadd.f32 %v9552_v28, %v579_v9  ;;  %v650_v43 = vadd.f32 %v9553_v31, %v554_v20  ;;  %v9557_v14 = vld [vmem:[#allocation40_spill] sm:$0xff]  ;;  %v9565_v9 = vld [vmem:[#allocation46_spill] sm:$0xff]  ;;  %v9569_v49 = vld [vmem:[#allocation49_spill] sm:$0xff] }
 0x53a   : > { %v720_v57 = vadd.f32 %v9555_v26, %v626_v30  ;;  %v719_v17 = vadd.f32 %v9557_v14, %v625_v19  ;;  %v743_v41 = vadd.f32 %v9561_v12, %v649_v51  ;;  %v794_v20 = vadd.f32 %v9562_v8, %v697_v32  ;;  %v9570_v30 = vld [vmem:[#allocation50_spill] sm:$0xff]  ;;  %v9571_v28 = vld [vmem:[#allocation51_spill] sm:$0xff]  ;;  %v9573_v54 = vld [vmem:[#allocation53_spill] sm:$0xff] }
 0x53b   : > { %v3568_v36 = vadd.f32 %v3566_v10, %v3564_v44  ;;  %v9559_v10 = vld [vmem:[#allocation39_spill] sm:$0xff]  ;;  %v769_v24 = vadd.f32 %v9563_v7, %v672_v23  ;;  %v8712_v53 = vsub.s32 0, %v9568_v56  ;;  %v838_v51 = vadd.f32 %v9569_v49, %v8629_v21  ;;  %v9572_v23 = vld [vmem:[#allocation52_spill] sm:$0xff]  ;;  %v9577_v27 = vld [vmem:[#allocation57_spill] sm:$0xff] }
 0x53c   : > { %v744_v44 = vadd.f32 %v9559_v10, %v650_v43  ;;  %v815_v2 = vadd.f32 %v9564_v61, %v719_v17  ;;  %v816_v19 = vadd.f32 %v9567_v46, %v720_v57  ;;  %v861_v43 = vadd.f32 %v9572_v23, %v768_v47  ;;  %v9576_v14 = vld [vmem:[#allocation56_spill] sm:$0xff]  ;;  %v9578_v10 = vld [vmem:[#allocation58_spill] sm:$0xff]  ;;  %v9579_v25 = vld [vmem:[#allocation59_spill] sm:$0xff] }
 0x53d   : > { %v3572_v29 = vadd.f32 %v3570_v40, %v3568_v36  ;;  %v793_v40 = vadd.f32 %v9565_v9, %v696_v37  ;;  %v836_v36 = vadd.f32 %v9566_v59, %v743_v41  ;;  %v862_v31 = vadd.f32 %v9571_v28, %v769_v24  ;;  %v9574_v37 = vld [vmem:[#allocation54_spill] sm:$0xff]  ;;  %v9580_v41 = vld [vmem:[#allocation60_spill] sm:$0xff]  ;;  %v9583_v61 = vld [vmem:[#allocation63_spill] sm:$0xff] }
 0x53e   : > { %v863_v26 = vadd.f32 %v9574_v37, %v8626_v38  ;;  %v888_v57 = vadd.f32 %v9575_v63, %v795_v45  ;;  %v887_v17 = vadd.f32 %v9576_v14, %v794_v20  ;;  %v910_v21 = vadd.f32 %v9577_v27, %v816_v19  ;;  %v9582_v7 = vld [vmem:[#allocation62_spill] sm:$0xff]  ;;  %v9584_v20 = vld [vmem:[#allocation64_spill] sm:$0xff]  ;;  %v9585_v59 = vld [vmem:[#allocation65_spill] sm:$0xff] }
 0x53f   : > { %v3575_v18 = vadd.f32 %v3574_v6, %v3572_v29  ;;  %v837_v6 = vadd.f32 %v9570_v30, %v744_v44  ;;  %v886_v29 = vadd.f32 %v9573_v54, %v793_v40  ;;  %v909_v44 = vadd.f32 %v9578_v10, %v815_v2  ;;  %v9586_v2 = vld [vmem:[#allocation66_spill] sm:$0xff]  ;;  %v9591_v54 = vld [vmem:[#allocation72_spill] sm:$0xff]  ;;  %v9592_v37 = vld [vmem:[#allocation73_spill] sm:$0xff] }
 0x540   : > { %v933_v47 = vadd.f32 %v9580_v41, %v836_v36  ;;  %v4723_v45 = vsub.s32 1, %v9568_v56  ;;  %v935_v24 = vadd.f32 %v9582_v7, %v838_v51  ;;  %v960_v9 = vadd.f32 %v9583_v61, %v863_v26  ;;  %v9588_v36 = vld [vmem:[#allocation68_spill] sm:$0xff]  ;;  %v9590_v23 = vld [vmem:[#allocation70_spill] sm:$0xff]  ;;  %v9594_v14 = vld [vmem:[#allocation75_spill] sm:$0xff] }
 0x541   : > { %v5151_v55 = vmul.f32 -1.442695, %v3575_v18  ;;  %v934_v12 = vadd.f32 %v9579_v25, %v837_v6  ;;  %v9581_v18 = vld [vmem:[#allocation61_spill] sm:$0xff]  ;;  %v959_v40 = vadd.f32 %v9584_v20, %v862_v31  ;;  %v984_v46 = vadd.f32 %v9585_v59, %v887_v17  ;;  %v9593_v63 = vld [vmem:[#allocation74_spill] sm:$0xff]  ;;  %v9595_v10 = vld [vmem:[#allocation76_spill] sm:$0xff] }
 0x542   : > { %v958_v8 = vadd.f32 %v9581_v18, %v861_v43  ;;  %v983_v19 = vadd.f32 %v9586_v2, %v886_v29  ;;  %v985_v30 = vadd.f32 %v9588_v36, %v888_v57  ;;  %v9589_v6 = vld [vmem:[#allocation69_spill] sm:$0xff]  ;;  %v999_v43 = vadd.f32 %v9590_v23, %v910_v21  ;;  %v9597_v41 = vld [vmem:[#allocation78_spill] sm:$0xff]  ;;  %v9598_v18 = vld [vmem:[#allocation79_spill] sm:$0xff] }
 0x543   : > { %5342 = vpow2.f32 %v5151_v55  ;;  %v9587_v55 = vld [vmem:[#allocation67_spill] sm:$0xff]  ;;  %v1017_v28 = vadd.f32 %v9589_v6, %v933_v47  ;;  %v1019_v51 = vadd.f32 %v9591_v54, %v935_v24  ;;  %v1018_v26 = vadd.f32 %v9592_v37, %v934_v12  ;;  %v9600_v24 = vld [vmem:[#allocation81_spill] sm:$0xff]  ;;  %v9601_v61 = vld [vmem:[#allocation82_spill] sm:$0xff] }
 0x544   : > { %v8723_v32 = vpop.eup %5340  ;;  %v998_v49 = vadd.f32 %v9587_v55, %v909_v44  ;;  %v1038_v31 = vadd.f32 %v9593_v63, %v959_v40  ;;  %v1037_v17 = vadd.f32 %v9594_v14, %v958_v8  ;;  %v4734_v27 = vsub.s32 2, %v9568_v56  ;;  %v9596_v44 = vld [vmem:[#allocation77_spill] sm:$0xff]  ;;  %v9603_v59 = vld [vmem:[#allocation84_spill] sm:$0xff]  ;;  %v9605_v55 = vld [vmem:[#allocation86_spill] sm:$0xff] }
 0x545   : > { %v4713_v38 = vrot.slane %v8723_v32, %v8712_v53  ;;  %v4724_v29 = vrot.slane %v8723_v32, %v4723_v45  ;;  %v1057_v57 = vadd.f32 %v9595_v10, %v983_v19  ;;  %v1039_v25 = vadd.f32 %v9596_v44, %v960_v9  ;;  %v9602_v45 = vld [vmem:[#allocation83_spill] sm:$0xff]  ;;  %v9604_v19 = vld [vmem:[#allocation85_spill] sm:$0xff]  ;;  %v9607_v6 = vld [vmem:[#allocation88_spill] sm:$0xff] }
 0x546   : > { %v1059_v47 = vadd.f32 %v9597_v41, %v985_v30  ;;  %v1058_v21 = vadd.f32 %v9598_v18, %v984_v46  ;;  %v1079_v12 = vadd.f32 %v9600_v24, %v998_v49  ;;  %v1104_v20 = vadd.f32 %v9601_v61, %v1018_v26  ;;  %v9606_v30 = vld [vmem:[#allocation87_spill] sm:$0xff]  ;;  %v9608_v54 = vld [vmem:[#allocation89_spill] sm:$0xff]  ;;  %v9609_v26 = vld [vmem:[#allocation90_spill] sm:$0xff] }
 0x547   : > { %4719 = vbcast.lane.b32.xlu0 %v4713_v38, 264  ;;  %4715 = vbcast.lane.b32.xlu1 %v4713_v38, 256  ;;  %v9599_v38 = vld [vmem:[#allocation80_spill] sm:$0xff]  ;;  %v1555_v8 = vrot.slane %v8645_v60, 3  ;;  %v1103_v40 = vadd.f32 %v9602_v45, %v1017_v28  ;;  %v1128_v2 = vadd.f32 %v9603_v59, %v1037_v17  ;;  %v1105_v9 = vadd.f32 %v9604_v19, %v1019_v51  ;;  %v9610_v63 = vld [vmem:[#allocation91_spill] sm:$0xff]  ;;  %v9613_v44 = vld [vmem:[#allocation94_spill] sm:$0xff] }
 0x548   : > { %v1080_v7 = vadd.f32 %v9599_v38, %v999_v43  ;;  %v1130_v36 = vadd.f32 %v9605_v55, %v1039_v25  ;;  %v1129_v46 = vadd.f32 %v9606_v30, %v1038_v31  ;;  %v1150_v23 = vadd.f32 %v9607_v6, %v1058_v21  ;;  %v9611_v17 = vld [vmem:[#allocation92_spill] sm:$0xff]  ;;  %v9614_v25 = vld [vmem:[#allocation95_spill] sm:$0xff]  ;;  %v9616_v38 = vld [vmem:[#allocation97_spill] sm:$0xff] }
 0x549   : > { %v4735_v49 = vrot.slane %v8723_v32, %v4734_v27  ;;  %v4745_v43 = vsub.s32 3, %v9568_v56  ;;  %v1149_v37 = vadd.f32 %v9608_v54, %v1057_v57  ;;  %v1171_v28 = vadd.f32 %v9609_v26, %v1079_v12  ;;  %v9615_v21 = vld [vmem:[#allocation96_spill] sm:$0xff]  ;;  %v9617_v12 = vld [vmem:[#allocation98_spill] sm:$0xff]  ;;  %v9618_v61 = vld [vmem:[#allocation99_spill] sm:$0xff] }
 0x54a   : > { %v1151_v14 = vadd.f32 %v9610_v63, %v1059_v47  ;;  %v1195_v51 = vadd.f32 %v9611_v17, %v1103_v40  ;;  %v1197_v31 = vadd.f32 %v9613_v44, %v1105_v9  ;;  %v1196_v41 = vadd.f32 %v9614_v25, %v1104_v20  ;;  %v9620_v20 = vld [vmem:[#allocation101_spill] sm:$0xff] }
 0x54b   : > { %4730 = vbcast.lane.b32.xlu0 %v4724_v29, 264  ;;  %4726 = vbcast.lane.b32.xlu1 %v4724_v29, 256  ;;  %v9612_v29 = vld [vmem:[#allocation93_spill] sm:$0xff]  ;;  %v1554_v27 = vrot.slane %v8648_v22, 3  ;;  %v1221_v57 = vadd.f32 %v9615_v21, %v1129_v46  ;;  %v1220_v24 = vadd.f32 %v9616_v38, %v1128_v2  ;;  %v1245_v47 = vadd.f32 %v9617_v12, %v1149_v37  ;;  %v9621_v2 = vld [vmem:[#allocation102_spill] sm:$0xff]  ;;  %v9623_v46 = vld [vmem:[#allocation104_spill] sm:$0xff] }
 0x54c   : > { %v1172_v10 = vadd.f32 %v9612_v29, %v1080_v7  ;;  %v1222_v45 = vadd.f32 %v9618_v61, %v1130_v36  ;;  %v9619_v7 = vld [vmem:[#allocation100_spill] sm:$0xff]  ;;  %v1246_v59 = vadd.f32 %v9620_v20, %v1150_v23  ;;  %v4746_v9 = vrot.slane %v8723_v32, %v4745_v43  ;;  %v9622_v36 = vld [vmem:[#allocation103_spill] sm:$0xff] }
 0x54d   : > { %v1247_v40 = vadd.f32 %v9619_v7, %v1151_v14  ;;  %v1267_v30 = vadd.f32 %v9622_v36, %v1171_v28  ;;  %v1292_v6 = vadd.f32 %v9623_v46, %v1196_v41 }
 0x54e   : > { %v1268_v55 = vadd.f32 %v9621_v2, %v1172_v10 }
 0x54f   : > { %4741 = vbcast.lane.b32.xlu0 %v4735_v49, 264  ;;  %4737 = vbcast.lane.b32.xlu1 %v4735_v49, 256 }
 0x550   : > { %v5343_v18 = vpop.eup %5342 }
 0x551   : > { %v3579_v19 = vadd.f32 1.0, %v5343_v18 }
 0x552   : > { %5414 = shalt.err (!%p5411_p0)
}
 0x553   : > { %s5415_s9 = scalar_lea.hbm %s8785_s8, 512  ;;  %s5419_s5 = scalar_lea.hbm %s9096_s3, 1024 }
 0x554   : > { %p5416_p3 = scmp.ne.s32.totalorder %s8785_s8, %s5415_s9  ;;  %p5420_p1 = scmp.lt.s32.totalorder %s8785_s8, %s9096_s3 }
 0x555   : > { %p5421_p6 = scmp.lt.s32.totalorder %s5419_s5, %s5415_s9 }
 0x556   : > { %p5417_p5 = pnand %p5416_p3, %p9624_p13 }
 0x557   : > { %p5422_p11 = por %p5421_p6, %p5420_p1 }
 0x558   : > { %p5418_p4 = pneg %p5417_p5 }
 0x55a   : > { %p5423_p12 = pnand %p5422_p11, %p5418_p4 }
 0x55c   : > { %5426 = shalt.err (!%p5423_p12)
}
 0x55d   : > { %s5514_s11 = smov 128   ;;  %s5515_s27 = smov 8   ;;  %v9625_v32 = vld [vmem:[#allocation105_spill] sm:$0xff]  ;;  %v9626_v49 = vld [vmem:[#allocation106_spill] sm:$0xff]  ;;  %v9627_v54 = vld [vmem:[#allocation107_spill] sm:$0xff]  ;;  %5344 = vrcp.f32 %v3579_v19  ;;  %4752 = vbcast.lane.b32.xlu0 %v4746_v9, 264  ;;  %v1556_v34 = vsel %vm897_vm8, %v1554_v27, %v1555_v8 }
 0x55e   : > { %5270 = dma.vmem_to_hbm [thread:$0]  (%p9624_p13), %s8787_s4, 512, %s8785_s8, %s4792_s26, %s5514_s11, %s5514_s11, %s5515_s27   ;;  %v1291_v23 = vadd.f32 %v9625_v32, %v1195_v51  ;;  %v1312_v43 = vadd.f32 %v9626_v49, %v1220_v24  ;;  %v1293_v37 = vadd.f32 %v9627_v54, %v1197_v31  ;;  %4748 = vbcast.lane.b32.xlu1 %v4746_v9, 256  ;;  %v9628_v26 = vld [vmem:[#allocation108_spill] sm:$0xff]  ;;  %v9629_v63 = vld [vmem:[#allocation109_spill] sm:$0xff]  ;;  %v9630_v17 = vld [vmem:[#allocation110_spill] sm:$0xff] }
 0x55f   : > { %v1314_v28 = vadd.f32 %v9628_v26, %v1222_v45  ;;  %v1313_v14 = vadd.f32 %v9629_v63, %v1221_v57  ;;  %v1338_v29 = vadd.f32 %v9630_v17, %v1246_v59  ;;  %v9631_v10 = vld [vmem:[#allocation111_spill] sm:$0xff]  ;;  %v9632_v25 = vld [vmem:[#allocation112_spill] sm:$0xff]  ;;  %v9633_v18 = vld [vmem:[#allocation113_spill] sm:$0xff]  ;;  %v5516_v24 = vmov 1966171168   ;;  %s5049_s4 = sld [smem:[#allocation2 + $0x62]] }
 0x560   : > { %v1337_v44 = vadd.f32 %v9631_v10, %v1245_v47  ;;  %v1359_v41 = vadd.f32 %v9632_v25, %v1267_v30  ;;  %v1339_v21 = vadd.f32 %v9633_v18, %v1247_v40  ;;  %v9634_v51 = vld [vmem:[#allocation114_spill] sm:$0xff]  ;;  %v4659_v12 = vunpack.c.l.s4 %v5516_v24  ;;  %v9635_v31 = vld [vmem:[#allocation115_spill] sm:$0xff]  ;;  %v9636_v7 = vld [vmem:[#allocation116_spill] sm:$0xff]  ;;  %s9765_s30 = sshll.u32 %s5654_s19, 6  ;;  %s5261_s26 = sshll.u32 %s5559_s16, 10 }
 0x561   : > { %v1383_v38 = vadd.f32 %v9634_v51, %v1291_v23  ;;  %v1360_v61 = vadd.f32 %v9635_v31, %v1268_v55  ;;  %v1385_v20 = vadd.f32 %v9636_v7, %v1293_v37  ;;  %v9637_v19 = vld [vmem:[#allocation117_spill] sm:$0xff]  ;;  %v9638_v9 = vld [vmem:[#allocation119_spill] sm:$0xff]  ;;  %v9639_v2 = vld [vmem:[#allocation118_spill] sm:$0xff]  ;;  %v1557_v37 = vrot.slane %v8668_v39, 3  ;;  %s9014_s8 = scalar_lea.vmem [#allocation7], %s9765_s30  ;;  %s9043_s17 = scalar_lea.hbm %s9095_s2, %s5261_s26 }
 0x562   : > { %v1384_v45 = vadd.f32 %v9637_v19, %v1292_v6  ;;  %v1408_v57 = vadd.f32 %v9638_v9, %v1312_v43  ;;  %v1409_v59 = vadd.f32 %v9639_v2, %v1313_v14  ;;  %v9640_v36 = vld [vmem:[#allocation120_spill] sm:$0xff]  ;;  %v9641_v46 = vld [vmem:[#allocation121_spill] sm:$0xff]  ;;  %v9642_v32 = vld [vmem:[#allocation123_spill] sm:$0xff]  ;;  %v1574_v6 = vrot.slane %v8671_v42, 3  ;;  %s4805_s10 = sshll.u32 %s9014_s8, 4  ;;  %s4787_s16 = scalar_lea.sflag [#allocation4], %s5654_s19  ;;  %s9045_s10 = int_to_ptr.vmem [resolvable:$true] %s4805_s10 }
 0x563   : > { %v1433_v47 = vadd.f32 %v9640_v36, %v1337_v44  ;;  %v1410_v30 = vadd.f32 %v9641_v46, %v1314_v28  ;;  %v1434_v40 = vadd.f32 %v9642_v32, %v1338_v29  ;;  %v9643_v49 = vld [vmem:[#allocation122_spill] sm:$0xff]  ;;  %v9644_v54 = vld [vmem:[#allocation124_spill] sm:$0xff]  ;;  %v9645_v63 = vld [vmem:[#allocation125_spill] sm:$0xff]  ;;  %v1576_v43 = vrot.slane %v8674_v50, 3  ;;  %s5427_s9 = scalar_lea.vmem %s9045_s10, 1024 }
 0x564   : > { %v1435_v23 = vadd.f32 %v9643_v49, %v1339_v21  ;;  %v1456_v26 = vadd.f32 %v9644_v54, %v1360_v61  ;;  %v1455_v55 = vadd.f32 %v9645_v63, %v1359_v41  ;;  %v1573_v14 = vrot.slane %v8686_v4, 3  ;;  %v9646_v10 = vld [vmem:[#allocation316_spill] sm:$0xff]  ;;  %v9648_v25 = vld [vmem:[#allocation317_spill] sm:$0xff]  ;;  %v9651_v31 = vld [vmem:[#allocation127_spill] sm:$0xff]  ;;  %p5428_p7 = scmp.ne.s32.totalorder %s9045_s10, %s5427_s9 }
 0x565   : > { %v4660_v17 = vunpack.c.0.s8 %v4659_v12  ;;  %v9647_v44 = vrot.slane %v9646_v10, 7  ;;  %v9649_v29 = vrot.slane %v9648_v25, 7  ;;  %v1470_v21 = vadd.f32 %v8385_v35, %v1384_v45  ;;  %v9652_v7 = vld [vmem:[#allocation128_spill] sm:$0xff]  ;;  %v9653_v19 = vld [vmem:[#allocation129_spill] sm:$0xff]  ;;  %v9654_v45 = vld [vmem:[#allocation130_spill] sm:$0xff] }
 0x566   : > { %v1488_v41 = vadd.f32 %v1480_v5, %v1408_v57  ;;  %v1489_v39 = vadd.f32 %v8567_v15, %v1409_v59  ;;  %v1507_v42 = vadd.f32 %v1499_v52, %v1433_v47  ;;  %v1490_v50 = vadd.f32 %v8593_v1, %v1410_v30  ;;  %v9655_v9 = vld [vmem:[#allocation131_spill] sm:$0xff]  ;;  %v9657_v59 = vld [vmem:[#allocation133_spill] sm:$0xff]  ;;  %v9658_v47 = vld [vmem:[#allocation134_spill] sm:$0xff]  ;;  %p5429_p8 = pnand %p5428_p7, %p9624_p13 }
 0x567   : > { %v1469_v28 = vadd.f32 %v9647_v44, %v1383_v38  ;;  %v1471_v18 = vadd.f32 %v9649_v29, %v1385_v20  ;;  %v1508_v4 = vadd.f32 %v8598_v16, %v1434_v40  ;;  %v1509_v51 = vadd.f32 %v8609_v62, %v1435_v23  ;;  %v9659_v30 = vld [vmem:[#allocation135_spill] sm:$0xff]  ;;  %v9660_v40 = vld [vmem:[#allocation136_spill] sm:$0xff]  ;;  %v9661_v23 = vld [vmem:[#allocation137_spill] sm:$0xff] }
 0x568   : > { %v1526_v38 = vadd.f32 %v8632_v58, %v1456_v26  ;;  %v1525_v24 = vadd.f32 %v8639_v11, %v1455_v55  ;;  %v1558_v35 = vsel %vm897_vm8, %v1555_v8, %v1557_v37  ;;  %v1577_v5 = vsel %vm897_vm8, %v1574_v6, %v1576_v43  ;;  %v9650_v8 = vld [vmem:[#allocation126_spill] sm:$0xff]  ;;  %v9665_v10 = vld [vmem:[#allocation141_spill] sm:$0xff]  ;;  %p5430_p9 = pneg %p5429_p8 }
 0x569   : > { %v1575_v48 = vsel %vm897_vm8, %v1573_v14, %v1574_v6  ;;  %v4663_v15 = vsub.s32 %v4660_v17, %v9568_v56  ;;  %v1544_v52 = vadd.f32 %v8660_v13, %v1470_v21  ;;  %v1543_v1 = vadd.f32 %v8663_v33, %v1469_v28  ;;  %v9662_v55 = vld [vmem:[#allocation138_spill] sm:$0xff]  ;;  %v9663_v6 = vld [vmem:[#allocation139_spill] sm:$0xff]  ;;  %v9664_v14 = vld [vmem:[#allocation140_spill] sm:$0xff] }
 0x56a   : > { %v1562_v16 = vadd.f32 %v1556_v34, %v1488_v41  ;;  %v1545_v62 = vadd.f32 %v1538_v0, %v1471_v18  ;;  %v1564_v58 = vadd.f32 %v1557_v37, %v1490_v50  ;;  %v1563_v11 = vadd.f32 %v1558_v35, %v1489_v39  ;;  %v5345_v27 = vpop.eup %5344  ;;  %v9656_v0 = vld [vmem:[#allocation132_spill] sm:$0xff]  ;;  %v9666_v28 = vld [vmem:[#allocation142_spill] sm:$0xff]  ;;  %v9667_v41 = vld [vmem:[#allocation143_spill] sm:$0xff] }
 0x56b   : > { %v1582_v22 = vadd.f32 %v1577_v5, %v1508_v4  ;;  %v1581_v60 = vadd.f32 %v1575_v48, %v1507_v42  ;;  %v1597_v12 = vadd.f32 %v9650_v8, %v1526_v38  ;;  %v1596_v61 = vadd.f32 %v9651_v31, %v1525_v24  ;;  %v9668_v42 = vld [vmem:[#allocation144_spill] sm:$0xff]  ;;  %v9669_v4 = vld [vmem:[#allocation150_spill] sm:$0xff]  ;;  %v9670_v38 = vld [vmem:[#allocation151_spill] sm:$0xff] }
 0x56c   : > { %v1616_v20 = vadd.f32 %v9652_v7, %v1544_v52  ;;  %v1583_v56 = vadd.f32 %v1576_v43, %v1509_v51  ;;  %v1615_v13 = vadd.f32 %v9653_v19, %v1543_v1  ;;  %v1635_v33 = vadd.f32 %v9654_v45, %v1562_v16  ;;  %v9671_v34 = vld [vmem:[#allocation145_spill] sm:$0xff]  ;;  %v9680_v19 = vld [vmem:[#allocation152_spill] sm:$0xff] }
 0x56d   : > { %v1617_v57 = vadd.f32 %v9655_v9, %v1545_v62  ;;  %v4664_v3 = vrot.slane %v5345_v27, %v4663_v15  ;;  %v1637_v2 = vadd.f32 %v9656_v0, %v1564_v58  ;;  %v1636_v36 = vadd.f32 %v9657_v59, %v1563_v11  ;;  %v9672_v5 = vld [vmem:[#allocation153_spill] sm:$0xff]  ;;  %v9674_v62 = vld [vmem:[#allocation160_spill] sm:$0xff]  ;;  %v9675_v11 = vld [vmem:[#allocation163_spill] sm:$0xff] }
 0x56e   : > { %v1656_v46 = vadd.f32 %v9658_v47, %v1582_v22  ;;  %v1655_v32 = vadd.f32 %v9659_v30, %v1581_v60  ;;  %v1677_v49 = vadd.f32 %v9660_v40, %v1596_v61  ;;  %v1657_v54 = vadd.f32 %v9661_v23, %v1583_v56  ;;  %v9676_v27 = vld [vmem:[#allocation147_spill] sm:$0xff]  ;;  %v9678_v61 = vld [vmem:[#allocation149_spill] sm:$0xff]  ;;  %v9681_v45 = vld [vmem:[#allocation172_spill] sm:$0xff] }
 0x56f   : > { %v4672_v26 = vrot.slane %v4664_v3, %v4663_v15  ;;  %v4665_v63 = vcombine.high %v4664_v3, %v4664_v3  ;;  %v1701_v37 = vadd.f32 %v9662_v55, %v1615_v13  ;;  %v1678_v43 = vadd.f32 %v9663_v6, %v1597_v12  ;;  %v9677_v12 = vld [vmem:[#allocation148_spill] sm:$0xff]  ;;  %v9682_v9 = vld [vmem:[#allocation173_spill] sm:$0xff]  ;;  %v9683_v0 = vld [vmem:[#allocation154_spill] sm:$0xff] }
 0x570   : > { %v1703_v17 = vadd.f32 %v9664_v14, %v1617_v57  ;;  %v1702_v44 = vadd.f32 %v9665_v10, %v1616_v20  ;;  %v1727_v25 = vadd.f32 %v9666_v28, %v1636_v36  ;;  %v1726_v39 = vadd.f32 %v9667_v41, %v1635_v33  ;;  %v9679_v20 = vld [vmem:[#allocation162_spill] sm:$0xff]  ;;  %v9684_v59 = vld [vmem:[#allocation155_spill] sm:$0xff]  ;;  %v9685_v47 = vld [vmem:[#allocation156_spill] sm:$0xff] }
 0x571   : > { %v8891_v29 = vrot.slane %v4672_v26, %v8712_v53  ;;  %v4679_v18 = vrot.slane %v4665_v63, %v4663_v15  ;;  %v4680_v21 = vcombine.high %v4672_v26, %v4672_v26  ;;  %v1747_v50 = vadd.f32 %v9668_v42, %v1655_v32  ;;  %v9673_v15 = vld [vmem:[#allocation146_spill] sm:$0xff]  ;;  %v9686_v30 = vld [vmem:[#allocation175_spill] sm:$0xff]  ;;  %v9687_v40 = vld [vmem:[#allocation157_spill] sm:$0xff] }
 0x572   : > { %v1794_v51 = vadd.f32 %v9669_v4, %v1702_v44  ;;  %v1793_v24 = vadd.f32 %v9670_v38, %v1701_v37  ;;  %v1728_v35 = vadd.f32 %v9671_v34, %v1637_v2  ;;  %v1795_v48 = vadd.f32 %v9672_v5, %v1703_v17  ;;  %v9688_v23 = vld [vmem:[#allocation158_spill] sm:$0xff]  ;;  %v9690_v55 = vld [vmem:[#allocation185_spill] sm:$0xff]  ;;  %v9691_v6 = vld [vmem:[#allocation159_spill] sm:$0xff] }
 0x573   : > { %v8900_v52 = vrot.slane %v4679_v18, %v8712_v53  ;;  %v8903_v1 = vrot.slane %v4680_v21, %v8712_v53  ;;  %v1749_v16 = vadd.f32 %v9673_v15, %v1657_v54  ;;  %v4681_v60 = vcombine.high %v4679_v18, %v4679_v18  ;;  %v9689_v26 = vld [vmem:[#allocation182_spill] sm:$0xff]  ;;  %v9693_v17 = vld [vmem:[#allocation164_spill] sm:$0xff] }
 0x574   : > { %v1889_v58 = vadd.f32 %v9674_v62, %v1793_v24  ;;  %v1890_v22 = vadd.f32 %v9675_v11, %v1794_v51  ;;  %v1748_v8 = vadd.f32 %v9676_v27, %v1656_v46  ;;  %v1770_v31 = vadd.f32 %v9677_v12, %v1678_v43  ;;  %v9694_v44 = vld [vmem:[#allocation184_spill] sm:$0xff]  ;;  %v9696_v21 = vld [vmem:[#allocation166_spill] sm:$0xff]  ;;  %v9699_v51 = vld [vmem:[#allocation167_spill] sm:$0xff] }
 0x575   : > { %v1769_v7 = vadd.f32 %v9678_v61, %v1677_v49  ;;  %v1891_v56 = vadd.f32 %v9679_v20, %v1795_v48  ;;  %v1818_v13 = vadd.f32 %v9680_v19, %v1726_v39  ;;  %v8916_v3 = vrot.slane %v4681_v60, %v8712_v53  ;;  %v9692_v53 = vld [vmem:[#allocation161_spill] sm:$0xff]  ;;  %v9697_v39 = vld [vmem:[#allocation194_spill] sm:$0xff]  ;;  %v9700_v24 = vld [vmem:[#allocation168_spill] sm:$0xff] }
 0x576   : > { %v1982_v33 = vadd.f32 %v9681_v45, %v1890_v22  ;;  %v1981_v57 = vadd.f32 %v9682_v9, %v1889_v58  ;;  %v1820_v2 = vadd.f32 %v9683_v0, %v1728_v35  ;;  %v1819_v36 = vadd.f32 %v9684_v59, %v1727_v25  ;;  %v9695_v25 = vld [vmem:[#allocation165_spill] sm:$0xff]  ;;  %v9704_v58 = vld [vmem:[#allocation171_spill] sm:$0xff]  ;;  %v9705_v22 = vld [vmem:[#allocation204_spill] sm:$0xff] }
 0x577   : > { %v1844_v46 = vadd.f32 %v9685_v47, %v1748_v8  ;;  %v1983_v32 = vadd.f32 %v9686_v30, %v1891_v56  ;;  %v1843_v49 = vadd.f32 %v9687_v40, %v1747_v50  ;;  %v1865_v54 = vadd.f32 %v9688_v23, %v1769_v7  ;;  %v9698_v50 = vld [vmem:[#allocation195_spill] sm:$0xff]  ;;  %v9701_v35 = vld [vmem:[#allocation169_spill] sm:$0xff]  ;;  %v9707_v12 = vld [vmem:[#allocation174_spill] sm:$0xff] }
 0x578   : > { %v2073_v63 = vadd.f32 %v9689_v26, %v1981_v57  ;;  %v2074_v37 = vadd.f32 %v9690_v55, %v1982_v33  ;;  %v1845_v43 = vadd.f32 %v9691_v6, %v1749_v16  ;;  %v1866_v14 = vadd.f32 %v9692_v53, %v1770_v31  ;;  %v9702_v48 = vld [vmem:[#allocation197_spill] sm:$0xff]  ;;  %v9703_v16 = vld [vmem:[#allocation170_spill] sm:$0xff]  ;;  %v9706_v27 = vld [vmem:[#allocation207_spill] sm:$0xff] }
 0x579   : > { %v1911_v10 = vadd.f32 %v9693_v17, %v1819_v36  ;;  %v2075_v28 = vadd.f32 %v9694_v44, %v1983_v32  ;;  %v1910_v18 = vadd.f32 %v9695_v25, %v1818_v13  ;;  %v1935_v41 = vadd.f32 %v9696_v21, %v1843_v49  ;;  %v9708_v61 = vld [vmem:[#allocation176_spill] sm:$0xff]  ;;  %v9709_v20 = vld [vmem:[#allocation177_spill] sm:$0xff]  ;;  %v9710_v19 = vld [vmem:[#allocation206_spill] sm:$0xff] }
 0x57a   : > { %v2170_v42 = vadd.f32 %v9697_v39, %v2074_v37  ;;  %v2169_v4 = vadd.f32 %v9698_v50, %v2073_v63  ;;  %v1912_v38 = vadd.f32 %v9699_v51, %v1820_v2  ;;  %v1937_v34 = vadd.f32 %v9700_v24, %v1845_v43  ;;  %v9711_v45 = vld [vmem:[#allocation178_spill] sm:$0xff]  ;;  %v9712_v9 = vld [vmem:[#allocation179_spill] sm:$0xff]  ;;  %v9713_v0 = vld [vmem:[#allocation216_spill] sm:$0xff] }
 0x57b   : > { %v1936_v5 = vadd.f32 %v9701_v35, %v1844_v46  ;;  %v2171_v15 = vadd.f32 %v9702_v48, %v2075_v28  ;;  %v1958_v62 = vadd.f32 %v9703_v16, %v1866_v14  ;;  %v1957_v11 = vadd.f32 %v9704_v58, %v1865_v54  ;;  %v9714_v59 = vld [vmem:[#allocation217_spill] sm:$0xff]  ;;  %v9715_v47 = vld [vmem:[#allocation180_spill] sm:$0xff]  ;;  %v9717_v40 = vld [vmem:[#allocation183_spill] sm:$0xff] }
 0x57c   : > { %v2253_v60 = vadd.f32 %v9705_v22, %v2169_v4  ;;  %v2254_v8 = vadd.f32 %v9706_v27, %v2170_v42  ;;  %v2006_v31 = vadd.f32 %v9707_v12, %v1910_v18  ;;  %v2008_v7 = vadd.f32 %v9708_v61, %v1912_v38  ;;  %v9716_v30 = vld [vmem:[#allocation181_spill] sm:$0xff]  ;;  %v9718_v23 = vld [vmem:[#allocation219_spill] sm:$0xff]  ;;  %v9719_v26 = vld [vmem:[#allocation186_spill] sm:$0xff] }
 0x57d   : > { %v2007_v56 = vadd.f32 %v9709_v20, %v1911_v10  ;;  %v2255_v13 = vadd.f32 %v9710_v19, %v2171_v15  ;;  %v2032_v33 = vadd.f32 %v9711_v45, %v1936_v5  ;;  %v2031_v57 = vadd.f32 %v9712_v9, %v1935_v41  ;;  %v9720_v55 = vld [vmem:[#allocation187_spill] sm:$0xff]  ;;  %v9721_v6 = vld [vmem:[#allocation226_spill] sm:$0xff]  ;;  %v9722_v53 = vld [vmem:[#allocation229_spill] sm:$0xff] }
 0x57e   : > { %v2340_v2 = vadd.f32 %v9713_v0, %v2254_v8  ;;  %v2339_v36 = vadd.f32 %v9714_v59, %v2253_v60  ;;  %v2053_v46 = vadd.f32 %v9715_v47, %v1957_v11  ;;  %v2033_v32 = vadd.f32 %v9716_v30, %v1937_v34  ;;  %v9723_v17 = vld [vmem:[#allocation188_spill] sm:$0xff]  ;;  %v9724_v44 = vld [vmem:[#allocation189_spill] sm:$0xff]  ;;  %v9725_v25 = vld [vmem:[#allocation191_spill] sm:$0xff] }
 0x57f   : > { %v2054_v49 = vadd.f32 %v9717_v40, %v1958_v62  ;;  %v2341_v54 = vadd.f32 %v9718_v23, %v2255_v13  ;;  %v2099_v63 = vadd.f32 %v9719_v26, %v2007_v56  ;;  %v2098_v37 = vadd.f32 %v9720_v55, %v2006_v31  ;;  %v9726_v21 = vld [vmem:[#allocation228_spill] sm:$0xff]  ;;  %v9728_v50 = vld [vmem:[#allocation199_spill] sm:$0xff]  ;;  %v9729_v51 = vld [vmem:[#allocation238_spill] sm:$0xff] }
 0x580   : > { %v2431_v43 = vadd.f32 %v9721_v6, %v2339_v36  ;;  %v2432_v14 = vadd.f32 %v9722_v53, %v2340_v2  ;;  %v2123_v10 = vadd.f32 %v9723_v17, %v2031_v57  ;;  %v2100_v28 = vadd.f32 %v9724_v44, %v2008_v7  ;;  %v9727_v39 = vld [vmem:[#allocation196_spill] sm:$0xff]  ;;  %v9730_v24 = vld [vmem:[#allocation239_spill] sm:$0xff]  ;;  %v9732_v48 = vld [vmem:[#allocation193_spill] sm:$0xff] }
 0x581   : > { %v2124_v18 = vadd.f32 %v9725_v25, %v2032_v33  ;;  %v2433_v41 = vadd.f32 %v9726_v21, %v2341_v54  ;;  %v2194_v42 = vadd.f32 %v9727_v39, %v2098_v37  ;;  %v2195_v4 = vadd.f32 %v9728_v50, %v2099_v63  ;;  %v9731_v35 = vld [vmem:[#allocation192_spill] sm:$0xff]  ;;  %v9733_v16 = vld [vmem:[#allocation198_spill] sm:$0xff]  ;;  %v9738_v61 = vld [vmem:[#allocation209_spill] sm:$0xff] }
 0x582   : > { %v2528_v38 = vadd.f32 %v9729_v51, %v2432_v14  ;;  %v2527_v34 = vadd.f32 %v9730_v24, %v2431_v43  ;;  %v2146_v5 = vadd.f32 %v9731_v35, %v2054_v49  ;;  %v2145_v15 = vadd.f32 %v9732_v48, %v2053_v46  ;;  %v9734_v58 = vld [vmem:[#allocation240_spill] sm:$0xff]  ;;  %v9735_v22 = vld [vmem:[#allocation190_spill] sm:$0xff]  ;;  %v9739_v20 = vld [vmem:[#allocation201_spill] sm:$0xff] }
 0x583   : > { %v2196_v62 = vadd.f32 %v9733_v16, %v2100_v28  ;;  %v2529_v11 = vadd.f32 %v9734_v58, %v2433_v41  ;;  %v2125_v60 = vadd.f32 %v9735_v22, %v2033_v32  ;;  %v9736_v27 = vld [vmem:[#allocation200_spill] sm:$0xff]  ;;  %v2273_v7 = vadd.f32 %v9738_v61, %v2194_v42  ;;  %v9740_v19 = vld [vmem:[#allocation202_spill] sm:$0xff]  ;;  %v9741_v45 = vld [vmem:[#allocation205_spill] sm:$0xff] }
 0x584   : > { %v2220_v8 = vadd.f32 %v9736_v27, %v2124_v18  ;;  %v9737_v12 = vld [vmem:[#allocation208_spill] sm:$0xff]  ;;  %v2219_v56 = vadd.f32 %v9739_v20, %v2123_v10  ;;  %v2234_v13 = vadd.f32 %v9740_v19, %v2145_v15  ;;  %v2235_v33 = vadd.f32 %v9741_v45, %v2146_v5  ;;  %v9742_v9 = vld [vmem:[#allocation211_spill] sm:$0xff]  ;;  %v9743_v0 = vld [vmem:[#allocation218_spill] sm:$0xff] }
 0x585   : > { %v2274_v31 = vadd.f32 %v9737_v12, %v2195_v4  ;;  %v2275_v57 = vadd.f32 %v9742_v9, %v2196_v62  ;;  %v2364_v2 = vadd.f32 %v9743_v0, %v2273_v7  ;;  %v9744_v59 = vld [vmem:[#allocation221_spill] sm:$0xff]  ;;  %v2534_v47 = vrot.slane %v2528_v38, 1  ;;  %v9745_v30 = vld [vmem:[#allocation203_spill] sm:$0xff]  ;;  %v9747_v23 = vld [vmem:[#allocation220_spill] sm:$0xff] }
 0x586   : > { %v2533_v46 = vrot.slane %v2527_v34, 1  ;;  %v2221_v32 = vadd.f32 %v9745_v30, %v2125_v60  ;;  %v9746_v40 = vld [vmem:[#allocation215_spill] sm:$0xff]  ;;  %v2536_v26 = vrot.slane %v2529_v11, 1  ;;  %v9748_v63 = vld [vmem:[#allocation213_spill] sm:$0xff]  ;;  %v9749_v37 = vld [vmem:[#allocation214_spill] sm:$0xff] }
 0x587   : > { %v2365_v36 = vadd.f32 %v9744_v59, %v2274_v31  ;;  %v2315_v49 = vadd.f32 %v9746_v40, %v2234_v13  ;;  %v2366_v54 = vadd.f32 %v9747_v23, %v2275_v57  ;;  %v2294_v55 = vadd.f32 %v9748_v63, %v2220_v8  ;;  %v9750_v43 = vld [vmem:[#allocation230_spill] sm:$0xff]  ;;  %v9751_v14 = vld [vmem:[#allocation231_spill] sm:$0xff]  ;;  %v9753_v28 = vld [vmem:[#allocation212_spill] sm:$0xff] }
 0x588   : > { %v2316_v6 = vadd.f32 %v9749_v37, %v2235_v33  ;;  %v2456_v17 = vadd.f32 %v9751_v14, %v2364_v2  ;;  %v9752_v10 = vld [vmem:[#allocation210_spill] sm:$0xff]  ;;  %v2295_v25 = vadd.f32 %v9753_v28, %v2221_v32  ;;  %v9754_v18 = vld [vmem:[#allocation224_spill] sm:$0xff]  ;;  %v9755_v41 = vld [vmem:[#allocation233_spill] sm:$0xff]  ;;  %v2535_v38 = vsel %vm517_vm4, %v2533_v46, %v2534_v47 }
 0x589   : > { %v2457_v53 = vadd.f32 %v9750_v43, %v2365_v36  ;;  %v2293_v44 = vadd.f32 %v9752_v10, %v2219_v56  ;;  %v2407_v21 = vadd.f32 %v9754_v18, %v2315_v49  ;;  %v2458_v39 = vadd.f32 %v9755_v41, %v2366_v54  ;;  %v9756_v42 = vld [vmem:[#allocation222_spill] sm:$0xff]  ;;  %v9757_v4 = vld [vmem:[#allocation227_spill] sm:$0xff]  ;;  %v9759_v35 = vld [vmem:[#allocation225_spill] sm:$0xff] }
 0x58a   : > { %v2386_v50 = vadd.f32 %v9756_v42, %v2294_v55  ;;  %v2408_v51 = vadd.f32 %v9757_v4, %v2316_v6  ;;  %v9758_v24 = vld [vmem:[#allocation223_spill] sm:$0xff]  ;;  %v2387_v5 = vadd.f32 %v9759_v35, %v2295_v25  ;;  %v9760_v48 = vld [vmem:[#allocation237_spill] sm:$0xff]  ;;  %v2537_v16 = vsel %vm517_vm4, %v2534_v47, %v2536_v26  ;;  %v9762_v60 = vld [vmem:[#allocation236_spill] sm:$0xff] }
 0x58b   : > { %v2385_v34 = vadd.f32 %v9758_v24, %v2293_v44  ;;  %v2503_v15 = vadd.f32 %v9760_v48, %v2407_v21  ;;  %v2546_v62 = vrot.slane %v2457_v53, 2  ;;  %v2545_v58 = vrot.slane %v2456_v17, 2  ;;  %v9761_v11 = vld [vmem:[#allocation235_spill] sm:$0xff]  ;;  %v9763_v12 = vld [vmem:[#allocation234_spill] sm:$0xff]  ;;  %v9764_v7 = vld [vmem:[#allocation232_spill] sm:$0xff] }
 0x58c   : > { %v2482_v22 = vadd.f32 %v9761_v11, %v2386_v50  ;;  %v2504_v27 = vadd.f32 %v9762_v60, %v2408_v51  ;;  %v2548_v8 = vrot.slane %v2458_v39, 2  ;;  %v2483_v31 = vadd.f32 %v9763_v12, %v2387_v5  ;;  %v5354_v39 = vld [vmem:[%s5660_s29 + $0x8] sm:$0xff]  ;;  %v5355_v50 = vld [vmem:[%s5660_s29] sm:$0xff]  ;;  %v5356_v48 = vld [vmem:[%s5660_s29 + $0x18] sm:$0xff] }
 0x58d   : > { %v2540_v61 = vadd.f32 %v2535_v38, %v2503_v15  ;;  %v2481_v20 = vadd.f32 %v9764_v7, %v2385_v34  ;;  %v2547_v19 = vsel %vm707_vm6, %v2545_v58, %v2546_v62  ;;  %v2567_v47 = vstv %s5049_s4  ;;  %v5359_v7 = vld [vmem:[%s5660_s29 + $0x20] sm:$0xff] }
 0x58e   : > { %v2541_v56 = vadd.f32 %v2537_v16, %v2504_v27  ;;  %v2558_v13 = vrot.slane %v2482_v22, 3  ;;  %v2549_v45 = vsel %vm707_vm6, %v2546_v62, %v2548_v8  ;;  %v2560_v33 = vrot.slane %v2483_v31, 3  ;;  %v5357_v16 = vld [vmem:[%s5660_s29 + $0x10] sm:$0xff]  ;;  %v5358_v31 = vld [vmem:[%s5660_s29 + $0x28] sm:$0xff] }
 0x58f   : > { %v2552_v9 = vadd.f32 %v2547_v19, %v2540_v61  ;;  %v2557_v57 = vrot.slane %v2481_v20, 3 }
 0x590   : > { %v2553_v0 = vadd.f32 %v2549_v45, %v2541_v56  ;;  %v2561_v59 = vsel %vm897_vm8, %v2558_v13, %v2560_v33  ;;  %v5360_v45 = vld [vmem:[%s5660_s29 + $0x38] sm:$0xff] }
 0x591   : > { %v2559_v2 = vsel %vm897_vm8, %v2557_v57, %v2558_v13 }
 0x592   : > { %v2564_v36 = vadd.f32 %v2559_v2, %v2552_v9  ;;  %v2565_v46 = vadd.f32 %v2561_v59, %v2553_v0  ;;  %v5361_v9 = vld [vmem:[%s5660_s29 + $0x30] sm:$0xff]  ;;  %s5517_s29 = smov [#allocation7]  }
 0x593   : > { %s5431_s22 = sshll.u32 %s5517_s29, 4  ;;  %s5432_s22 = int_to_ptr.vmem [resolvable:$false] %s5431_s22 }
 0x594   : > { %v2568_v30 = vadd.f32 %v2567_v47, %v2564_v36  ;;  %v2569_v32 = vadd.f32 %v2567_v47, %v2565_v46  ;;  %s5433_s7 = scalar_lea.vmem %s5432_s22, 2048  ;;  %p5434_p10 = scmp.lt.s32.totalorder %s9045_s10, %s5432_s22 }
 0x595   : > { %p5435_p2 = scmp.lt.s32.totalorder %s5433_s7, %s5427_s9 }
 0x596   : > { %v5050_v40 = vmul.f32 -1.442695, %v2568_v30  ;;  %v5051_v49 = vmul.f32 -1.442695, %v2569_v32 }
 0x597   : > { %p5436_p0 = por %p5435_p2, %p5434_p10 }
 0x598   : > { %5346 = vpow2.f32 %v5050_v40 }
 0x599   : > { %5348 = vpow2.f32 %v5051_v49  ;;  %p5437_p3 = pnand %p5436_p0, %p5430_p9 }
 0x5a5   : > { %v5347_v23 = vpop.eup %5346 }
 0x5a6   : > { %v5349_v54 = vpop.eup %5348  ;;  %v2576_v26 = vadd.f32 1.0, %v5347_v23 }
 0x5a7   : > { %v2577_v63 = vadd.f32 1.0, %v5349_v54 }
 0x5a8   : > { %5350 = vrcp.f32 %v2576_v26 }
 0x5a9   : > { %5352 = vrcp.f32 %v2577_v63 }
 0x5b5   : > { %v5351_v55 = vpop.eup %5350 }
 0x5b6   : > { %v5353_v37 = vpop.eup %5352  ;;  %v4702_v43 = vadd.f32 %v5351_v55, %v8891_v29  ;;  %v4704_v18 = vadd.f32 %v5351_v55, %v8900_v52  ;;  %v4706_v34 = vadd.f32 %v5351_v55, %v8903_v1  ;;  %v4708_v27 = vadd.f32 %v5351_v55, %v8916_v3 }
 0x5b7   : > { %v4703_v6 = vadd.f32 %v5353_v37, %v8891_v29  ;;  %v4705_v25 = vadd.f32 %v5353_v37, %v8900_v52  ;;  %v4707_v24 = vadd.f32 %v5353_v37, %v8903_v1  ;;  %v4709_v60 = vadd.f32 %v5353_v37, %v8916_v3 }
 0x5b9   : > { %v4720_v53 = vpop.permute.xlu0 %4719  ;;  %v4716_v14 = vpop.permute.xlu1 %4715 }
 0x5ba   : > { %v4755_v17 = vadd.f32 %v4720_v53, %v4703_v6  ;;  %v4754_v10 = vadd.f32 %v4716_v14, %v4702_v43 }
 0x5bc   : > { %v4763_v44 = vmul.f32 0.33333334, %v4755_v17  ;;  %v4762_v28 = vmul.f32 0.33333334, %v4754_v10 }
 0x5bd   : > { %v4731_v21 = vpop.permute.xlu0 %4730  ;;  %v4727_v41 = vpop.permute.xlu1 %4726 }
 0x5be   : > { %v4771_v42 = vmul.f32 %v5354_v39, %v4763_v44  ;;  %v4770_v4 = vmul.f32 %v5355_v50, %v4762_v28  ;;  %v4757_v29 = vadd.f32 %v4731_v21, %v4705_v25  ;;  %v4756_v51 = vadd.f32 %v4727_v41, %v4704_v18 }
 0x5c0   : > { %4779 = vst.msk [vmem:[%s9014_s8 + $0x8] sm:$0xff] %vm220_vm0, %v4771_v42  ;;  %4778 = vst.msk [vmem:[%s9014_s8] sm:$0xff] %vm220_vm0, %v4770_v4  ;;  %v4765_v52 = vmul.f32 0.33333334, %v4757_v29  ;;  %v4764_v38 = vmul.f32 0.33333334, %v4756_v51 }
 0x5c1   : > { %v4742_v35 = vpop.permute.xlu0 %4741  ;;  %v4738_v5 = vpop.permute.xlu1 %4737 }
 0x5c2   : > { %v4773_v15 = vmul.f32 %v5356_v48, %v4765_v52  ;;  %v4772_v62 = vmul.f32 %v5357_v16, %v4764_v38  ;;  %v4759_v58 = vadd.f32 %v4742_v35, %v4707_v24  ;;  %v4758_v11 = vadd.f32 %v4738_v5, %v4706_v34 }
 0x5c4   : > { %4781 = vst.msk [vmem:[%s9014_s8 + $0x18] sm:$0xff] %vm220_vm0, %v4773_v15  ;;  %4780 = vst.msk [vmem:[%s9014_s8 + $0x10] sm:$0xff] %vm220_vm0, %v4772_v62  ;;  %v4767_v22 = vmul.f32 0.33333334, %v4759_v58  ;;  %v4766_v1 = vmul.f32 0.33333334, %v4758_v11 }
 0x5c6   : > { %v4775_v61 = vmul.f32 %v5358_v31, %v4767_v22  ;;  %v4774_v20 = vmul.f32 %v5359_v7, %v4766_v1 }
 0x5c8   : > { %4783 = vst.msk [vmem:[%s9014_s8 + $0x28] sm:$0xff] %vm220_vm0, %v4775_v61  ;;  %4782 = vst.msk [vmem:[%s9014_s8 + $0x20] sm:$0xff] %vm220_vm0, %v4774_v20 }
 0x5cf   : > { %v4753_v8 = vpop.permute.xlu0 %4752 }
 0x5d0   : > { %v4749_v12 = vpop.permute.xlu1 %4748  ;;  %v4761_v56 = vadd.f32 %v4753_v8, %v4709_v60 }
 0x5d1   : > { %v4760_v19 = vadd.f32 %v4749_v12, %v4708_v27 }
 0x5d2   : > { %v4769_v3 = vmul.f32 0.33333334, %v4761_v56 }
 0x5d3   : > { %v4768_v13 = vmul.f32 0.33333334, %v4760_v19 }
 0x5d4   : > { %v4777_v33 = vmul.f32 %v5360_v45, %v4769_v3 }
 0x5d5   : > { %v4776_v57 = vmul.f32 %v5361_v9, %v4768_v13 }
 0x5d6   : > { %4785 = vst.msk [vmem:[%s9014_s8 + $0x38] sm:$0xff] %vm220_vm0, %v4777_v33 }
 0x5d7   : > { %4784 = vst.msk [vmem:[%s9014_s8 + $0x30] sm:$0xff] %vm220_vm0, %v4776_v57 }
 0x5d8   : > { %5440 = shalt.err (!%p5437_p3)
}
 0x5d9   : > { %s5441_s5 = scalar_lea.hbm %s9043_s17, 1024  ;;  %s5445_s20 = scalar_lea.hbm %s9095_s2, 2048 }
 0x5da   : > { %p5442_p5 = scmp.ne.s32.totalorder %s9043_s17, %s5441_s5  ;;  %p5446_p6 = scmp.lt.s32.totalorder %s9043_s17, %s9095_s2 }
 0x5db   : > { %p5447_p11 = scmp.lt.s32.totalorder %s5445_s20, %s5441_s5 }
 0x5dc   : > { %p5443_p4 = pnand %p5442_p5, %p9624_p13 }
 0x5dd   : > { %p5448_p12 = por %p5447_p11, %p5446_p6 }
 0x5de   : > { %p5444_p1 = pneg %p5443_p4 }
 0x5e0   : > { %p5449_p7 = pnand %p5448_p12, %p5444_p1 }
 0x5e2   : > { %5452 = shalt.err (!%p5449_p7)
}
 0x5e3   : > { %5269 = dma.vmem_to_hbm [thread:$0]  (%p9624_p13), %s9045_s10, 1024, %s9043_s17, %s4787_s16, %s5514_s11, %s5514_s11, %s5515_s27  }
 0x5e4 PF: > { %s4836_s8 = sand.u32 1, %s5487_s12   ;;  %p9766_p8 = scmp.ne.s32.totalorder %s9124_s25, 0 }
 0x5e5   : > { %p9767_p9 = scmp.ge.s32.totalorder %s5499_s15, 2  ;;  %s4837_s26 = scalar_lea.sflag [#allocation4], %s4836_s8 }
 0x5e7   : > { %p5282_p10 = pnand %p9767_p9, %p9766_p8 }
 0x5e9   : > { %p5283_p2 = pneg %p5282_p10 }
 0x5eb   : > { %5478 = dma.done.wait (%p5283_p2), %s4837_s26, 1024  }
 0x5ec   : > { %5480 = vsyncadd (%p5283_p2), %s4837_s26, 4294966272  ;;  %s4846_s23 = scalar_lea.sflag [#allocation9], %s4836_s8 }
 0x5ed   : > { %5482 = dma.done.wait (%p5283_p2), %s4846_s23, 512  }
 0x5ee   : > { %5484 = vsyncadd (%p5283_p2), %s4846_s23, 4294966784  ;;  %p21_p13 = scmp.ge.s32.totalorder %s5563_s18, 4   ;;  %s9768_s12 = smov %s5491_s13 }
 0x5ef   : > { %s9769_s13 = smov %s5495_s14  ;;  %s9770_s14 = smov %s5575_s21 }
 0x5f0   : > { %s9771_s15 = smov %s5563_s18  ;;  %23 = sbr.rel (!%p21_p13) target bundleno = 8 (0x8), region = 96 }
 0x5f5   :  { %4851 = vsyncpa [#allocation3], 1 }
 0x5f6   :  { %4853 = vsyncpa [#allocation3 + $0x1], 1 }
 0x5f7   :  { %4854 = vsyncpa [#allocation4], 1 }
 0x5f8   :  { %4856 = vsyncpa [#allocation4 + $0x1], 1 }
 0x5f9   :  { %4857 = vsyncpa [#allocation9], 1 }
 0x5fa   :  { %4859 = vsyncpa [#allocation9 + $0x1], 1 }
 0x5fb   :  { %4860 = vsyncpa [#allocation5], 1 }
 0x5fc   :  { %4862 = vsyncpa [#allocation5 + $0x1], 1 }

</bundles_post_ra>
